<compile_context>
chip_gen: v7x
topology: tpu7x:2x2x1
jax: 0.10.0
libtpu: 0.0.40
codegen_flags: <defaults>
</compile_context>

<pallas_src>
import functools
from math import sqrt

import jax
import jax.numpy as jnp
from jax.experimental import pallas as pl
from jax.experimental.pallas import tpu as pltpu

MATMUL_DTYPE = jnp.bfloat16   # MXU input dtype; accumulation stays f32
STORE_DTYPE = jnp.bfloat16    # intermediate activations written to HBM


def _round_up(x, m):
    return (x + m - 1) // m * m


def _default_tile_m():
    """v7x has 2 TensorCores -> keep grid >= 2; v5e/v6e are single-TC -> one
    big tile amortizes per-grid-step overhead."""
    try:
        kind = jax.devices()[0].device_kind.lower()
    except Exception:
        kind = ""
    return 256 if "v7" in kind else 512


# ----------------------------------------------------------------------------
# Pallas kernel: fused conv-as-matmul + bias (+ residual) (+ PReLU) (+ 1x1 proj)
# ----------------------------------------------------------------------------
def _fused_stage_kernel(*refs, has_residual, has_prelu, has_proj, has_extra):
    """o = [proj]( [PReLU]( x @ w + b [+ res] ) )
       proj(a) = a @ w2 + b2 [+ x2 @ w2b]          (fused 1x1 conv)

    All matmul operands are MATMUL_DTYPE (bf16); accumulation and the
    epilogue (bias / residual / PReLU) are f32.
    Ref order: x, w, b, [res], [alpha (SMEM)], [w2, b2], [x2, w2b], out.
    """
    o_ref = refs[-1]
    it = iter(refs[:-1])
    x_ref, w_ref, b_ref = next(it), next(it), next(it)

    acc = jnp.dot(x_ref[...], w_ref[...], preferred_element_type=jnp.float32)
    acc = acc + b_ref[...]
    if has_residual:
        acc = acc + next(it)[...].astype(jnp.float32)
    if has_prelu:
        alpha = next(it)[0]
        acc = jnp.where(acc >= 0.0, acc, alpha * acc)
    if has_proj:
        w2_ref, b2_ref = next(it), next(it)
        out = jnp.dot(acc.astype(MATMUL_DTYPE), w2_ref[...],
                      preferred_element_type=jnp.float32) + b2_ref[...]
        if has_extra:
            x2_ref, w2b_ref = next(it), next(it)
            out = out + jnp.dot(x2_ref[...], w2b_ref[...],
                                preferred_element_type=jnp.float32)
        acc = out
    o_ref[...] = acc.astype(o_ref.dtype)


# ----------------------------------------------------------------------------
# Wrapper: one fused stage (im2col patches already built by plain-JAX glue)
# ----------------------------------------------------------------------------
def _run_stage(patches, w2d, b, *, residual2d=None, alpha=None,
               proj=None, extra=None, out_dtype=STORE_DTYPE, tile_m=None):
    """patches (M,K) @ w2d (K,C1) + b  [+ residual2d (M,C1)]  [PReLU(alpha)]
    optionally followed by a fused 1x1 projection:
        proj  = (w2 (C1,C2), b2 (C2,))
        extra = (x2 (M,Ce),  w2b (Ce,C2))   # second term of the projection
    Returns (M, Cout) in out_dtype, Cout = C2 if proj else C1.
    """
    M, K = patches.shape
    C1 = w2d.shape[1]
    Kp = _round_up(K, 128)
    C1p = _round_up(C1, 128)
    TM = tile_m if tile_m is not None else _default_tile_m()
    TM = min(TM, _round_up(M, 8))
    Mp = _round_up(M, TM)

    def padm(a, rows, cols):
        return jnp.pad(a, ((0, rows - a.shape[0]), (0, cols - a.shape[1])))

    args = [padm(patches.astype(MATMUL_DTYPE), Mp, Kp),
            padm(w2d.astype(MATMUL_DTYPE), Kp, C1p),
            padm(b.reshape(1, C1).astype(jnp.float32), 1, C1p)]
    in_specs = [pl.BlockSpec((TM, Kp), lambda i: (i, 0)),
                pl.BlockSpec((Kp, C1p), lambda i: (0, 0)),
                pl.BlockSpec((1, C1p), lambda i: (0, 0))]

    if residual2d is not None:
        args.append(padm(residual2d.astype(STORE_DTYPE), Mp, C1p))
        in_specs.append(pl.BlockSpec((TM, C1p), lambda i: (i, 0)))
    if alpha is not None:
        args.append(jnp.reshape(alpha, (1,)).astype(jnp.float32))
        in_specs.append(pl.BlockSpec(memory_space=pltpu.MemorySpace.SMEM))

    Cout, Coutp = C1, C1p
    if proj is not None:
        w2, b2 = proj
        C2 = w2.shape[1]
        C2p = _round_up(C2, 128)
        args.append(padm(w2.astype(MATMUL_DTYPE), C1p, C2p))
        args.append(padm(b2.reshape(1, C2).astype(jnp.float32), 1, C2p))
        in_specs.append(pl.BlockSpec((C1p, C2p), lambda i: (0, 0)))
        in_specs.append(pl.BlockSpec((1, C2p), lambda i: (0, 0)))
        if extra is not None:
            x2, w2b = extra
            Cep = _round_up(x2.shape[1], 128)
            args.append(padm(x2.astype(MATMUL_DTYPE), Mp, Cep))
            args.append(padm(w2b.astype(MATMUL_DTYPE), Cep, C2p))
            in_specs.append(pl.BlockSpec((TM, Cep), lambda i: (i, 0)))
            in_specs.append(pl.BlockSpec((Cep, C2p), lambda i: (0, 0)))
        Cout, Coutp = C2, C2p

    kern = functools.partial(_fused_stage_kernel,
                             has_residual=residual2d is not None,
                             has_prelu=alpha is not None,
                             has_proj=proj is not None,
                             has_extra=extra is not None)
    out = pl.pallas_call(
        kern,
        out_shape=jax.ShapeDtypeStruct((Mp, Coutp), out_dtype),
        grid=(Mp // TM,),
        in_specs=in_specs,
        out_specs=pl.BlockSpec((TM, Coutp), lambda i: (i, 0)),
        compiler_params=pltpu.CompilerParams(
            dimension_semantics=("parallel",)),
    )(*args)
    return out[:M, :Cout]


# ----------------------------------------------------------------------------
# Plain-JAX glue: replication-padded im2col and weight reshaping
# ----------------------------------------------------------------------------
def _im2col(x_nhwc, k):
    N, H, W, Cin = x_nhwc.shape
    if k == 1:
        return x_nhwc.reshape(N * H * W, Cin)
    p = (k - 1) // 2
    xp = jnp.pad(x_nhwc, ((0, 0), (p, p), (p, p), (0, 0)), mode="edge")
    taps = [xp[:, i:i + H, j:j + W, :] for i in range(k) for j in range(k)]
    return jnp.concatenate(taps, axis=-1).reshape(N * H * W, k * k * Cin)


def _w_matrix(w_oihw):
    Cout, Cin, KH, KW = w_oihw.shape
    # (Cout, Cin, KH, KW) -> (KH, KW, Cin, Cout) -> (K, Cout): tap-major,
    # Cin-minor rows, matching _im2col's channel ordering.
    return jnp.transpose(w_oihw, (2, 3, 1, 0)).reshape(KH * KW * Cin, Cout)


# ----------------------------------------------------------------------------
# Parameters (deterministic, PyTorch-like uniform init; synthetic weights)
# ----------------------------------------------------------------------------
def _init_conv(key, cout, cin, k):
    kw_, kb_ = jax.random.split(key)
    bound = 1.0 / sqrt(cin * k * k)
    w = jax.random.uniform(kw_, (cout, cin, k, k), jnp.float32, -bound, bound)
    b = jax.random.uniform(kb_, (cout,), jnp.float32, -bound, bound)
    return {"w": w, "b": b}


def init_cannet_params(key, in_channel, out_channel):
    keys = jax.random.split(key, 9)
    return {
        "conv1": _init_conv(keys[0], 128, in_channel, 5),
        "conv_residual": _init_conv(keys[1], out_channel, in_channel, 7),
        "conv2": _init_conv(keys[2], 32, 128, 1),
        "resB1": {
            "conv1": _init_conv(keys[3], 32, 32, 3),
            "conv2": _init_conv(keys[4], 32, 32, 3),
            "alpha": jnp.float32(0.25),   # nn.PReLU() default; shared in block
        },
        "resB2": {
            "conv1": _init_conv(keys[5], 32, 32, 3),
            "conv2": _init_conv(keys[6], 32, 32, 3),
            "alpha": jnp.float32(0.25),
        },
        "conv5": _init_conv(keys[7], 128, 64, 1),
        "conv6": _init_conv(keys[8], out_channel, 128, 5),
    }


# ----------------------------------------------------------------------------
# Forward pass (6 fused Pallas stages)
# ----------------------------------------------------------------------------
def cannet_forward(params, x_nchw):
    p = params
    x = jnp.transpose(x_nchw, (0, 2, 3, 1)).astype(jnp.float32)   # -> NHWC
    N, H, W, _ = x.shape

    def nhwc(flat, c):
        return flat.reshape(N, H, W, c)

    # Stage 1: conv1 (5x5, Cin->128) fused with conv2 (1x1, 128->32).
    out2 = _run_stage(
        _im2col(x, 5), _w_matrix(p["conv1"]["w"]), p["conv1"]["b"],
        proj=(_w_matrix(p["conv2"]["w"]), p["conv2"]["b"]))            # (M,32)

    # Stages 2/3: residual block 1 (conv+PReLU, then conv+add+PReLU).
    rb1 = p["resB1"]
    o1 = _run_stage(_im2col(nhwc(out2, 32), 3), _w_matrix(rb1["conv1"]["w"]),
                    rb1["conv1"]["b"], alpha=rb1["alpha"])
    out3 = _run_stage(_im2col(nhwc(o1, 32), 3), _w_matrix(rb1["conv2"]["w"]),
                      rb1["conv2"]["b"], residual2d=out2, alpha=rb1["alpha"])

    # Stages 4/5: residual block 2; its second conv is fused with the concat
    # and conv5 (1x1, 64->128) by splitting W5 across the concat:
    #   out5 = prelu(out3 + conv(o1b)) @ W5[:32] + out2 @ W5[32:] + b5
    rb2 = p["resB2"]
    o1b = _run_stage(_im2col(nhwc(out3, 32), 3), _w_matrix(rb2["conv1"]["w"]),
                     rb2["conv1"]["b"], alpha=rb2["alpha"])
    w5 = _w_matrix(p["conv5"]["w"])                                    # (64,128)
    out5 = _run_stage(_im2col(nhwc(o1b, 32), 3), _w_matrix(rb2["conv2"]["w"]),
                      rb2["conv2"]["b"], residual2d=out3, alpha=rb2["alpha"],
                      proj=(w5[:32], p["conv5"]["b"]),
                      extra=(out2, w5[32:]))                           # (M,128)

    # Stage 6: conv6 (5x5, 128->Cout) + conv_residual (7x7, Cin->Cout) fused by
    # concatenating their im2col matrices along K; the add is one matmul.
    k6 = jnp.concatenate([_im2col(nhwc(out5, 128), 5).astype(MATMUL_DTYPE),
                          _im2col(x, 7).astype(MATMUL_DTYPE)], axis=-1)
    w6 = jnp.concatenate([_w_matrix(p["conv6"]["w"]),
                          _w_matrix(p["conv_residual"]["w"])], axis=0)
    out = _run_stage(k6, w6, p["conv6"]["b"] + p["conv_residual"]["b"],
                     out_dtype=jnp.float32)                            # (M,Cout)

    Cout = p["conv6"]["w"].shape[0]
    return jnp.transpose(out.reshape(N, H, W, Cout), (0, 3, 1, 2))     # -> NCHW


# ----------------------------------------------------------------------------
# Pure-JAX f32 reference (correctness check only)
# ----------------------------------------------------------------------------
def _ref_conv(p, t):
    k = p["w"].shape[-1]
    pad = (k - 1) // 2
    tp = jnp.pad(t, ((0, 0), (pad, pad), (pad, pad), (0, 0)), mode="edge")
    w = jnp.transpose(p["w"], (2, 3, 1, 0))  # HWIO
    y = jax.lax.conv_general_dilated(
        tp, w, (1, 1), "VALID", dimension_numbers=("NHWC", "HWIO", "NHWC"))
    return y + p["b"][None, None, None, :]


def cannet_forward_ref(params, x_nchw):
    x = jnp.transpose(x_nchw, (0, 2, 3, 1)).astype(jnp.float32)

    def prelu(t, a):
        return jnp.where(t >= 0, t, a * t)

    def resblock(p, t):
        o1 = prelu(_ref_conv(p["conv1"], t), p["alpha"])
        residual = _ref_conv(p["conv2"], o1)
        return prelu(t + residual, p["alpha"])

    out1 = _ref_conv(params["conv1"], x)
    out2 = _ref_conv(params["conv2"], out1)
    out3 = resblock(params["resB1"], out2)
    out4 = resblock(params["resB2"], out3)
    out4 = jnp.concatenate([out4, out2], axis=-1)
    out5 = _ref_conv(params["conv5"], out4)
    out6 = _ref_conv(params["conv6"], out5)
    residual = _ref_conv(params["conv_residual"], x)
    return jnp.transpose(out6 + residual, (0, 3, 1, 2))


# ----------------------------------------------------------------------------
if __name__ == "__main__":
    in_channel, out_channel = 4, 4
    N, H, W = 2, 16, 16

    key = jax.random.PRNGKey(0)
    k_params, k_x = jax.random.split(key)
    params = init_cannet_params(k_params, in_channel, out_channel)
    x = jax.random.normal(k_x, (N, in_channel, H, W), jnp.float32)  # NCHW

    out = jax.block_until_ready(jax.jit(cannet_forward)(params, x))
    ref = jax.block_until_ready(jax.jit(cannet_forward_ref)(params, x))

    assert out.shape == (N, out_channel, H, W), out.shape
    max_err = float(jnp.max(jnp.abs(out - ref)))
    # bf16 MXU inputs (f32 accumulation) -> slightly looser tolerance vs f32 ref.
    assert jnp.allclose(out, ref, atol=3e-2, rtol=3e-2), max_err

    print("KERNEL_OK")
</pallas_src>

<mosaic_0001>
module attributes {stable_mosaic.version = 11 : i64} {
  func.func @_fused_stage_kernel(%arg0: i32, %arg1: memref<512x128xbf16, #tpu.memory_space<vmem>>, %arg2: memref<128x128xbf16, #tpu.memory_space<vmem>>, %arg3: memref<1x128xf32, #tpu.memory_space<vmem>>, %arg4: memref<128x128xbf16, #tpu.memory_space<vmem>>, %arg5: memref<1x128xf32, #tpu.memory_space<vmem>>, %arg6: memref<512x128xbf16, #tpu.memory_space<vmem>>) attributes {dimension_semantics = [#tpu.dimension_semantics<parallel>], iteration_bounds = array<i64: 1>, scalar_prefetch = 0 : i64, scratch_operands = 0 : i64, tpu.core_type = #tpu.core_type<tc>, window_params = [{transform_indices = @transform_0, window_bounds = array<i64: 512, 128>}, {pipeline_mode = #tpu.pipeline_mode<synchronous>, transform_indices = @transform_1, window_bounds = array<i64: 128, 128>}, {pipeline_mode = #tpu.pipeline_mode<synchronous>, transform_indices = @transform_2, window_bounds = array<i64: 1, 128>}, {pipeline_mode = #tpu.pipeline_mode<synchronous>, transform_indices = @transform_3, window_bounds = array<i64: 128, 128>}, {pipeline_mode = #tpu.pipeline_mode<synchronous>, transform_indices = @transform_4, window_bounds = array<i64: 1, 128>}, {transform_indices = @transform_5, window_bounds = array<i64: 512, 128>}]} {
    %c0 = arith.constant 0 : index
    %c0_0 = arith.constant 0 : index
    %0 = vector.load %arg1[%c0, %c0_0] : memref<512x128xbf16, #tpu.memory_space<vmem>>, vector<512x128xbf16>
    %c0_1 = arith.constant 0 : index
    %c0_2 = arith.constant 0 : index
    %1 = vector.load %arg2[%c0_1, %c0_2] : memref<128x128xbf16, #tpu.memory_space<vmem>>, vector<128x128xbf16>
    %cst = arith.constant dense<0.000000e+00> : vector<512x128xf32>
    %2 = tpu.matmul %0, %1, %cst {dimension_numbers = #tpu.dot_dimension_numbers<[1], [0], [0], [1], [0, 0, 1, 1], [], []>} : vector<512x128xbf16>, vector<128x128xbf16>, vector<512x128xf32> -> vector<512x128xf32>
    %c0_3 = arith.constant 0 : index
    %c0_4 = arith.constant 0 : index
    %3 = vector.load %arg3[%c0_3, %c0_4] : memref<1x128xf32, #tpu.memory_space<vmem>>, vector<1x128xf32>
    %4 = vector.broadcast %3 : vector<1x128xf32> to vector<512x128xf32>
    %5 = arith.addf %2, %4 : vector<512x128xf32>
    %6 = arith.truncf %5 : vector<512x128xf32> to vector<512x128xbf16>
    %c0_5 = arith.constant 0 : index
    %c0_6 = arith.constant 0 : index
    %7 = vector.load %arg4[%c0_5, %c0_6] : memref<128x128xbf16, #tpu.memory_space<vmem>>, vector<128x128xbf16>
    %cst_7 = arith.constant dense<0.000000e+00> : vector<512x128xf32>
    %8 = tpu.matmul %6, %7, %cst_7 {dimension_numbers = #tpu.dot_dimension_numbers<[1], [0], [0], [1], [0, 0, 1, 1], [], []>} : vector<512x128xbf16>, vector<128x128xbf16>, vector<512x128xf32> -> vector<512x128xf32>
    %c0_8 = arith.constant 0 : index
    %c0_9 = arith.constant 0 : index
    %9 = vector.load %arg5[%c0_8, %c0_9] : memref<1x128xf32, #tpu.memory_space<vmem>>, vector<1x128xf32>
    %10 = vector.broadcast %9 : vector<1x128xf32> to vector<512x128xf32>
    %11 = arith.addf %8, %10 : vector<512x128xf32>
    %12 = arith.truncf %11 : vector<512x128xf32> to vector<512x128xbf16>
    %c0_10 = arith.constant 0 : index
    %c0_11 = arith.constant 0 : index
    %13 = vector.load %arg6[%c0_10, %c0_11] : memref<512x128xbf16, #tpu.memory_space<vmem>>, vector<512x128xbf16>
    tpu.vector_store %arg6[%c0_10, %c0_11], %12 {strides = array<i32>} : memref<512x128xbf16, #tpu.memory_space<vmem>>, vector<512x128xbf16>,
    return
  }
  func.func @transform_0(%arg0: i32) -> (i32, i32) {
    %c0_i32 = arith.constant 0 : i32
    %c0_i32_0 = arith.constant 0 : i32
    return %arg0, %c0_i32 : i32, i32
  }
  func.func @transform_1(%arg0: i32) -> (i32, i32) {
    %c0_i32 = arith.constant 0 : i32
    %c0_i32_0 = arith.constant 0 : i32
    %c0_i32_1 = arith.constant 0 : i32
    return %c0_i32, %c0_i32_0 : i32, i32
  }
  func.func @transform_2(%arg0: i32) -> (i32, i32) {
    %c0_i32 = arith.constant 0 : i32
    %c0_i32_0 = arith.constant 0 : i32
    %c0_i32_1 = arith.constant 0 : i32
    return %c0_i32, %c0_i32_0 : i32, i32
  }
  func.func @transform_3(%arg0: i32) -> (i32, i32) {
    %c0_i32 = arith.constant 0 : i32
    %c0_i32_0 = arith.constant 0 : i32
    %c0_i32_1 = arith.constant 0 : i32
    return %c0_i32, %c0_i32_0 : i32, i32
  }
  func.func @transform_4(%arg0: i32) -> (i32, i32) {
    %c0_i32 = arith.constant 0 : i32
    %c0_i32_0 = arith.constant 0 : i32
    %c0_i32_1 = arith.constant 0 : i32
    return %c0_i32, %c0_i32_0 : i32, i32
  }
  func.func @transform_5(%arg0: i32) -> (i32, i32) {
    %c0_i32 = arith.constant 0 : i32
    %c0_i32_0 = arith.constant 0 : i32
    return %arg0, %c0_i32 : i32, i32
  }
}

module attributes {stable_mosaic.version = 11 : i64} {
  func.func @_fused_stage_kernel(%arg0: i32, %arg1: memref<512x384xbf16, #tpu.memory_space<vmem>>, %arg2: memref<384x128xbf16, #tpu.memory_space<vmem>>, %arg3: memref<1x128xf32, #tpu.memory_space<vmem>>, %arg4: memref<1xf32, #tpu.memory_space<smem>>, %arg5: memref<512x128xbf16, #tpu.memory_space<vmem>>) attributes {dimension_semantics = [#tpu.dimension_semantics<parallel>], iteration_bounds = array<i64: 1>, scalar_prefetch = 0 : i64, scratch_operands = 0 : i64, tpu.core_type = #tpu.core_type<tc>, window_params = [{transform_indices = @transform_0, window_bounds = array<i64: 512, 384>}, {pipeline_mode = #tpu.pipeline_mode<synchronous>, transform_indices = @transform_1, window_bounds = array<i64: 384, 128>}, {pipeline_mode = #tpu.pipeline_mode<synchronous>, transform_indices = @transform_2, window_bounds = array<i64: 1, 128>}, {transform_indices = @transform_3, window_bounds = array<i64: 1>}, {transform_indices = @transform_4, window_bounds = array<i64: 512, 128>}]} {
    %c0 = arith.constant 0 : index
    %c0_0 = arith.constant 0 : index
    %0 = vector.load %arg1[%c0, %c0_0] : memref<512x384xbf16, #tpu.memory_space<vmem>>, vector<512x384xbf16>
    %c0_1 = arith.constant 0 : index
    %c0_2 = arith.constant 0 : index
    %1 = vector.load %arg2[%c0_1, %c0_2] : memref<384x128xbf16, #tpu.memory_space<vmem>>, vector<384x128xbf16>
    %cst = arith.constant dense<0.000000e+00> : vector<512x128xf32>
    %2 = tpu.matmul %0, %1, %cst {dimension_numbers = #tpu.dot_dimension_numbers<[1], [0], [0], [1], [0, 0, 1, 1], [], []>} : vector<512x384xbf16>, vector<384x128xbf16>, vector<512x128xf32> -> vector<512x128xf32>
    %c0_3 = arith.constant 0 : index
    %c0_4 = arith.constant 0 : index
    %3 = vector.load %arg3[%c0_3, %c0_4] : memref<1x128xf32, #tpu.memory_space<vmem>>, vector<1x128xf32>
    %4 = vector.broadcast %3 : vector<1x128xf32> to vector<512x128xf32>
    %5 = arith.addf %2, %4 : vector<512x128xf32>
    %c0_5 = arith.constant 0 : index
    %6 = memref.load %arg4[%c0_5] : memref<1xf32, #tpu.memory_space<smem>>
    %cst_6 = arith.constant 0.000000e+00 : f32
    %7 = vector.broadcast %cst_6 : f32 to vector<512x128xf32>
    %8 = arith.cmpf oge, %5, %7 : vector<512x128xf32>
    %9 = vector.broadcast %6 : f32 to vector<512x128xf32>
    %10 = arith.mulf %9, %5 : vector<512x128xf32>
    %11 = arith.select %8, %5, %10 : vector<512x128xi1>, vector<512x128xf32>
    %12 = arith.truncf %11 : vector<512x128xf32> to vector<512x128xbf16>
    %c0_7 = arith.constant 0 : index
    %c0_8 = arith.constant 0 : index
    %13 = vector.load %arg5[%c0_7, %c0_8] : memref<512x128xbf16, #tpu.memory_space<vmem>>, vector<512x128xbf16>
    tpu.vector_store %arg5[%c0_7, %c0_8], %12 {strides = array<i32>} : memref<512x128xbf16, #tpu.memory_space<vmem>>, vector<512x128xbf16>,
    return
  }
  func.func @transform_0(%arg0: i32) -> (i32, i32) {
    %c0_i32 = arith.constant 0 : i32
    %c0_i32_0 = arith.constant 0 : i32
    return %arg0, %c0_i32 : i32, i32
  }
  func.func @transform_1(%arg0: i32) -> (i32, i32) {
    %c0_i32 = arith.constant 0 : i32
    %c0_i32_0 = arith.constant 0 : i32
    %c0_i32_1 = arith.constant 0 : i32
    return %c0_i32, %c0_i32_0 : i32, i32
  }
  func.func @transform_2(%arg0: i32) -> (i32, i32) {
    %c0_i32 = arith.constant 0 : i32
    %c0_i32_0 = arith.constant 0 : i32
    %c0_i32_1 = arith.constant 0 : i32
    return %c0_i32, %c0_i32_0 : i32, i32
  }
  func.func @transform_3(%arg0: i32) -> i32 {
    %c0_i32 = arith.constant 0 : i32
    %c0_i32_0 = arith.constant 0 : i32
    return %c0_i32 : i32
  }
  func.func @transform_4(%arg0: i32) -> (i32, i32) {
    %c0_i32 = arith.constant 0 : i32
    %c0_i32_0 = arith.constant 0 : i32
    return %arg0, %c0_i32 : i32, i32
  }
}

module attributes {stable_mosaic.version = 11 : i64} {
  func.func @_fused_stage_kernel(%arg0: i32, %arg1: memref<512x384xbf16, #tpu.memory_space<vmem>>, %arg2: memref<384x128xbf16, #tpu.memory_space<vmem>>, %arg3: memref<1x128xf32, #tpu.memory_space<vmem>>, %arg4: memref<512x128xbf16, #tpu.memory_space<vmem>>, %arg5: memref<1xf32, #tpu.memory_space<smem>>, %arg6: memref<512x128xbf16, #tpu.memory_space<vmem>>) attributes {dimension_semantics = [#tpu.dimension_semantics<parallel>], iteration_bounds = array<i64: 1>, scalar_prefetch = 0 : i64, scratch_operands = 0 : i64, tpu.core_type = #tpu.core_type<tc>, window_params = [{transform_indices = @transform_0, window_bounds = array<i64: 512, 384>}, {pipeline_mode = #tpu.pipeline_mode<synchronous>, transform_indices = @transform_1, window_bounds = array<i64: 384, 128>}, {pipeline_mode = #tpu.pipeline_mode<synchronous>, transform_indices = @transform_2, window_bounds = array<i64: 1, 128>}, {transform_indices = @transform_3, window_bounds = array<i64: 512, 128>}, {transform_indices = @transform_4, window_bounds = array<i64: 1>}, {transform_indices = @transform_5, window_bounds = array<i64: 512, 128>}]} {
    %c0 = arith.constant 0 : index
    %c0_0 = arith.constant 0 : index
    %0 = vector.load %arg1[%c0, %c0_0] : memref<512x384xbf16, #tpu.memory_space<vmem>>, vector<512x384xbf16>
    %c0_1 = arith.constant 0 : index
    %c0_2 = arith.constant 0 : index
    %1 = vector.load %arg2[%c0_1, %c0_2] : memref<384x128xbf16, #tpu.memory_space<vmem>>, vector<384x128xbf16>
    %cst = arith.constant dense<0.000000e+00> : vector<512x128xf32>
    %2 = tpu.matmul %0, %1, %cst {dimension_numbers = #tpu.dot_dimension_numbers<[1], [0], [0], [1], [0, 0, 1, 1], [], []>} : vector<512x384xbf16>, vector<384x128xbf16>, vector<512x128xf32> -> vector<512x128xf32>
    %c0_3 = arith.constant 0 : index
    %c0_4 = arith.constant 0 : index
    %3 = vector.load %arg3[%c0_3, %c0_4] : memref<1x128xf32, #tpu.memory_space<vmem>>, vector<1x128xf32>
    %4 = vector.broadcast %3 : vector<1x128xf32> to vector<512x128xf32>
    %5 = arith.addf %2, %4 : vector<512x128xf32>
    %c0_5 = arith.constant 0 : index
    %c0_6 = arith.constant 0 : index
    %6 = vector.load %arg4[%c0_5, %c0_6] : memref<512x128xbf16, #tpu.memory_space<vmem>>, vector<512x128xbf16>
    %7 = arith.extf %6 : vector<512x128xbf16> to vector<512x128xf32>
    %8 = arith.addf %5, %7 : vector<512x128xf32>
    %c0_7 = arith.constant 0 : index
    %9 = memref.load %arg5[%c0_7] : memref<1xf32, #tpu.memory_space<smem>>
    %cst_8 = arith.constant 0.000000e+00 : f32
    %10 = vector.broadcast %cst_8 : f32 to vector<512x128xf32>
    %11 = arith.cmpf oge, %8, %10 : vector<512x128xf32>
    %12 = vector.broadcast %9 : f32 to vector<512x128xf32>
    %13 = arith.mulf %12, %8 : vector<512x128xf32>
    %14 = arith.select %11, %8, %13 : vector<512x128xi1>, vector<512x128xf32>
    %15 = arith.truncf %14 : vector<512x128xf32> to vector<512x128xbf16>
    %c0_9 = arith.constant 0 : index
    %c0_10 = arith.constant 0 : index
    %16 = vector.load %arg6[%c0_9, %c0_10] : memref<512x128xbf16, #tpu.memory_space<vmem>>, vector<512x128xbf16>
    tpu.vector_store %arg6[%c0_9, %c0_10], %15 {strides = array<i32>} : memref<512x128xbf16, #tpu.memory_space<vmem>>, vector<512x128xbf16>,
    return
  }
  func.func @transform_0(%arg0: i32) -> (i32, i32) {
    %c0_i32 = arith.constant 0 : i32
    %c0_i32_0 = arith.constant 0 : i32
    return %arg0, %c0_i32 : i32, i32
  }
  func.func @transform_1(%arg0: i32) -> (i32, i32) {
    %c0_i32 = arith.constant 0 : i32
    %c0_i32_0 = arith.constant 0 : i32
    %c0_i32_1 = arith.constant 0 : i32
    return %c0_i32, %c0_i32_0 : i32, i32
  }
  func.func @transform_2(%arg0: i32) -> (i32, i32) {
    %c0_i32 = arith.constant 0 : i32
    %c0_i32_0 = arith.constant 0 : i32
    %c0_i32_1 = arith.constant 0 : i32
    return %c0_i32, %c0_i32_0 : i32, i32
  }
  func.func @transform_3(%arg0: i32) -> (i32, i32) {
    %c0_i32 = arith.constant 0 : i32
    %c0_i32_0 = arith.constant 0 : i32
    return %arg0, %c0_i32 : i32, i32
  }
  func.func @transform_4(%arg0: i32) -> i32 {
    %c0_i32 = arith.constant 0 : i32
    %c0_i32_0 = arith.constant 0 : i32
    return %c0_i32 : i32
  }
  func.func @transform_5(%arg0: i32) -> (i32, i32) {
    %c0_i32 = arith.constant 0 : i32
    %c0_i32_0 = arith.constant 0 : i32
    return %arg0, %c0_i32 : i32, i32
  }
}

module attributes {stable_mosaic.version = 11 : i64} {
  func.func @_fused_stage_kernel(%arg0: i32, %arg1: memref<512x384xbf16, #tpu.memory_space<vmem>>, %arg2: memref<384x128xbf16, #tpu.memory_space<vmem>>, %arg3: memref<1x128xf32, #tpu.memory_space<vmem>>, %arg4: memref<512x128xbf16, #tpu.memory_space<vmem>>, %arg5: memref<1xf32, #tpu.memory_space<smem>>, %arg6: memref<128x128xbf16, #tpu.memory_space<vmem>>, %arg7: memref<1x128xf32, #tpu.memory_space<vmem>>, %arg8: memref<512x128xbf16, #tpu.memory_space<vmem>>, %arg9: memref<128x128xbf16, #tpu.memory_space<vmem>>, %arg10: memref<512x128xbf16, #tpu.memory_space<vmem>>) attributes {dimension_semantics = [#tpu.dimension_semantics<parallel>], iteration_bounds = array<i64: 1>, scalar_prefetch = 0 : i64, scratch_operands = 0 : i64, tpu.core_type = #tpu.core_type<tc>, window_params = [{transform_indices = @transform_0, window_bounds = array<i64: 512, 384>}, {pipeline_mode = #tpu.pipeline_mode<synchronous>, transform_indices = @transform_1, window_bounds = array<i64: 384, 128>}, {pipeline_mode = #tpu.pipeline_mode<synchronous>, transform_indices = @transform_2, window_bounds = array<i64: 1, 128>}, {transform_indices = @transform_3, window_bounds = array<i64: 512, 128>}, {transform_indices = @transform_4, window_bounds = array<i64: 1>}, {pipeline_mode = #tpu.pipeline_mode<synchronous>, transform_indices = @transform_5, window_bounds = array<i64: 128, 128>}, {pipeline_mode = #tpu.pipeline_mode<synchronous>, transform_indices = @transform_6, window_bounds = array<i64: 1, 128>}, {transform_indices = @transform_7, window_bounds = array<i64: 512, 128>}, {pipeline_mode = #tpu.pipeline_mode<synchronous>, transform_indices = @transform_8, window_bounds = array<i64: 128, 128>}, {transform_indices = @transform_9, window_bounds = array<i64: 512, 128>}]} {
    %c0 = arith.constant 0 : index
    %c0_0 = arith.constant 0 : index
    %0 = vector.load %arg1[%c0, %c0_0] : memref<512x384xbf16, #tpu.memory_space<vmem>>, vector<512x384xbf16>
    %c0_1 = arith.constant 0 : index
    %c0_2 = arith.constant 0 : index
    %1 = vector.load %arg2[%c0_1, %c0_2] : memref<384x128xbf16, #tpu.memory_space<vmem>>, vector<384x128xbf16>
    %cst = arith.constant dense<0.000000e+00> : vector<512x128xf32>
    %2 = tpu.matmul %0, %1, %cst {dimension_numbers = #tpu.dot_dimension_numbers<[1], [0], [0], [1], [0, 0, 1, 1], [], []>} : vector<512x384xbf16>, vector<384x128xbf16>, vector<512x128xf32> -> vector<512x128xf32>
    %c0_3 = arith.constant 0 : index
    %c0_4 = arith.constant 0 : index
    %3 = vector.load %arg3[%c0_3, %c0_4] : memref<1x128xf32, #tpu.memory_space<vmem>>, vector<1x128xf32>
    %4 = vector.broadcast %3 : vector<1x128xf32> to vector<512x128xf32>
    %5 = arith.addf %2, %4 : vector<512x128xf32>
    %c0_5 = arith.constant 0 : index
    %c0_6 = arith.constant 0 : index
    %6 = vector.load %arg4[%c0_5, %c0_6] : memref<512x128xbf16, #tpu.memory_space<vmem>>, vector<512x128xbf16>
    %7 = arith.extf %6 : vector<512x128xbf16> to vector<512x128xf32>
    %8 = arith.addf %5, %7 : vector<512x128xf32>
    %c0_7 = arith.constant 0 : index
    %9 = memref.load %arg5[%c0_7] : memref<1xf32, #tpu.memory_space<smem>>
    %cst_8 = arith.constant 0.000000e+00 : f32
    %10 = vector.broadcast %cst_8 : f32 to vector<512x128xf32>
    %11 = arith.cmpf oge, %8, %10 : vector<512x128xf32>
    %12 = vector.broadcast %9 : f32 to vector<512x128xf32>
    %13 = arith.mulf %12, %8 : vector<512x128xf32>
    %14 = arith.select %11, %8, %13 : vector<512x128xi1>, vector<512x128xf32>
    %15 = arith.truncf %14 : vector<512x128xf32> to vector<512x128xbf16>
    %c0_9 = arith.constant 0 : index
    %c0_10 = arith.constant 0 : index
    %16 = vector.load %arg6[%c0_9, %c0_10] : memref<128x128xbf16, #tpu.memory_space<vmem>>, vector<128x128xbf16>
    %cst_11 = arith.constant dense<0.000000e+00> : vector<512x128xf32>
    %17 = tpu.matmul %15, %16, %cst_11 {dimension_numbers = #tpu.dot_dimension_numbers<[1], [0], [0], [1], [0, 0, 1, 1], [], []>} : vector<512x128xbf16>, vector<128x128xbf16>, vector<512x128xf32> -> vector<512x128xf32>
    %c0_12 = arith.constant 0 : index
    %c0_13 = arith.constant 0 : index
    %18 = vector.load %arg7[%c0_12, %c0_13] : memref<1x128xf32, #tpu.memory_space<vmem>>, vector<1x128xf32>
    %19 = vector.broadcast %18 : vector<1x128xf32> to vector<512x128xf32>
    %20 = arith.addf %17, %19 : vector<512x128xf32>
    %c0_14 = arith.constant 0 : index
    %c0_15 = arith.constant 0 : index
    %21 = vector.load %arg8[%c0_14, %c0_15] : memref<512x128xbf16, #tpu.memory_space<vmem>>, vector<512x128xbf16>
    %c0_16 = arith.constant 0 : index
    %c0_17 = arith.constant 0 : index
    %22 = vector.load %arg9[%c0_16, %c0_17] : memref<128x128xbf16, #tpu.memory_space<vmem>>, vector<128x128xbf16>
    %cst_18 = arith.constant dense<0.000000e+00> : vector<512x128xf32>
    %23 = tpu.matmul %21, %22, %cst_18 {dimension_numbers = #tpu.dot_dimension_numbers<[1], [0], [0], [1], [0, 0, 1, 1], [], []>} : vector<512x128xbf16>, vector<128x128xbf16>, vector<512x128xf32> -> vector<512x128xf32>
    %24 = arith.addf %20, %23 : vector<512x128xf32>
    %25 = arith.truncf %24 : vector<512x128xf32> to vector<512x128xbf16>
    %c0_19 = arith.constant 0 : index
    %c0_20 = arith.constant 0 : index
    %26 = vector.load %arg10[%c0_19, %c0_20] : memref<512x128xbf16, #tpu.memory_space<vmem>>, vector<512x128xbf16>
    tpu.vector_store %arg10[%c0_19, %c0_20], %25 {strides = array<i32>} : memref<512x128xbf16, #tpu.memory_space<vmem>>, vector<512x128xbf16>,
    return
  }
  func.func @transform_0(%arg0: i32) -> (i32, i32) {
    %c0_i32 = arith.constant 0 : i32
    %c0_i32_0 = arith.constant 0 : i32
    return %arg0, %c0_i32 : i32, i32
  }
  func.func @transform_1(%arg0: i32) -> (i32, i32) {
    %c0_i32 = arith.constant 0 : i32
    %c0_i32_0 = arith.constant 0 : i32
    %c0_i32_1 = arith.constant 0 : i32
    return %c0_i32, %c0_i32_0 : i32, i32
  }
  func.func @transform_2(%arg0: i32) -> (i32, i32) {
    %c0_i32 = arith.constant 0 : i32
    %c0_i32_0 = arith.constant 0 : i32
    %c0_i32_1 = arith.constant 0 : i32
    return %c0_i32, %c0_i32_0 : i32, i32
  }
  func.func @transform_3(%arg0: i32) -> (i32, i32) {
    %c0_i32 = arith.constant 0 : i32
    %c0_i32_0 = arith.constant 0 : i32
    return %arg0, %c0_i32 : i32, i32
  }
  func.func @transform_4(%arg0: i32) -> i32 {
    %c0_i32 = arith.constant 0 : i32
    %c0_i32_0 = arith.constant 0 : i32
    return %c0_i32 : i32
  }
  func.func @transform_5(%arg0: i32) -> (i32, i32) {
    %c0_i32 = arith.constant 0 : i32
    %c0_i32_0 = arith.constant 0 : i32
    %c0_i32_1 = arith.constant 0 : i32
    return %c0_i32, %c0_i32_0 : i32, i32
  }
  func.func @transform_6(%arg0: i32) -> (i32, i32) {
    %c0_i32 = arith.constant 0 : i32
    %c0_i32_0 = arith.constant 0 : i32
    %c0_i32_1 = arith.constant 0 : i32
    return %c0_i32, %c0_i32_0 : i32, i32
  }
  func.func @transform_7(%arg0: i32) -> (i32, i32) {
    %c0_i32 = arith.constant 0 : i32
    %c0_i32_0 = arith.constant 0 : i32
    return %arg0, %c0_i32 : i32, i32
  }
  func.func @transform_8(%arg0: i32) -> (i32, i32) {
    %c0_i32 = arith.constant 0 : i32
    %c0_i32_0 = arith.constant 0 : i32
    %c0_i32_1 = arith.constant 0 : i32
    return %c0_i32, %c0_i32_0 : i32, i32
  }
  func.func @transform_9(%arg0: i32) -> (i32, i32) {
    %c0_i32 = arith.constant 0 : i32
    %c0_i32_0 = arith.constant 0 : i32
    return %arg0, %c0_i32 : i32, i32
  }
}

module attributes {stable_mosaic.version = 11 : i64} {
  func.func @_fused_stage_kernel(%arg0: i32, %arg1: memref<512x3456xbf16, #tpu.memory_space<vmem>>, %arg2: memref<3456x128xbf16, #tpu.memory_space<vmem>>, %arg3: memref<1x128xf32, #tpu.memory_space<vmem>>, %arg4: memref<512x128xf32, #tpu.memory_space<vmem>>) attributes {dimension_semantics = [#tpu.dimension_semantics<parallel>], iteration_bounds = array<i64: 1>, scalar_prefetch = 0 : i64, scratch_operands = 0 : i64, tpu.core_type = #tpu.core_type<tc>, window_params = [{transform_indices = @transform_0, window_bounds = array<i64: 512, 3456>}, {pipeline_mode = #tpu.pipeline_mode<synchronous>, transform_indices = @transform_1, window_bounds = array<i64: 3456, 128>}, {pipeline_mode = #tpu.pipeline_mode<synchronous>, transform_indices = @transform_2, window_bounds = array<i64: 1, 128>}, {transform_indices = @transform_3, window_bounds = array<i64: 512, 128>}]} {
    %c0 = arith.constant 0 : index
    %c0_0 = arith.constant 0 : index
    %0 = vector.load %arg1[%c0, %c0_0] : memref<512x3456xbf16, #tpu.memory_space<vmem>>, vector<512x3456xbf16>
    %c0_1 = arith.constant 0 : index
    %c0_2 = arith.constant 0 : index
    %1 = vector.load %arg2[%c0_1, %c0_2] : memref<3456x128xbf16, #tpu.memory_space<vmem>>, vector<3456x128xbf16>
    %cst = arith.constant dense<0.000000e+00> : vector<512x128xf32>
    %2 = tpu.matmul %0, %1, %cst {dimension_numbers = #tpu.dot_dimension_numbers<[1], [0], [0], [1], [0, 0, 1, 1], [], []>} : vector<512x3456xbf16>, vector<3456x128xbf16>, vector<512x128xf32> -> vector<512x128xf32>
    %c0_3 = arith.constant 0 : index
    %c0_4 = arith.constant 0 : index
    %3 = vector.load %arg3[%c0_3, %c0_4] : memref<1x128xf32, #tpu.memory_space<vmem>>, vector<1x128xf32>
    %4 = vector.broadcast %3 : vector<1x128xf32> to vector<512x128xf32>
    %5 = arith.addf %2, %4 : vector<512x128xf32>
    %c0_5 = arith.constant 0 : index
    %c0_6 = arith.constant 0 : index
    %6 = vector.load %arg4[%c0_5, %c0_6] : memref<512x128xf32, #tpu.memory_space<vmem>>, vector<512x128xf32>
    tpu.vector_store %arg4[%c0_5, %c0_6], %5 {strides = array<i32>} : memref<512x128xf32, #tpu.memory_space<vmem>>, vector<512x128xf32>,
    return
  }
  func.func @transform_0(%arg0: i32) -> (i32, i32) {
    %c0_i32 = arith.constant 0 : i32
    %c0_i32_0 = arith.constant 0 : i32
    return %arg0, %c0_i32 : i32, i32
  }
  func.func @transform_1(%arg0: i32) -> (i32, i32) {
    %c0_i32 = arith.constant 0 : i32
    %c0_i32_0 = arith.constant 0 : i32
    %c0_i32_1 = arith.constant 0 : i32
    return %c0_i32, %c0_i32_0 : i32, i32
  }
  func.func @transform_2(%arg0: i32) -> (i32, i32) {
    %c0_i32 = arith.constant 0 : i32
    %c0_i32_0 = arith.constant 0 : i32
    %c0_i32_1 = arith.constant 0 : i32
    return %c0_i32, %c0_i32_0 : i32, i32
  }
  func.func @transform_3(%arg0: i32) -> (i32, i32) {
    %c0_i32 = arith.constant 0 : i32
    %c0_i32_0 = arith.constant 0 : i32
    return %arg0, %c0_i32 : i32, i32
  }
}

</mosaic_0001>

<bundles_post_ra>
// kernel: cannet_forward.6
= control target key start
LH: loop header
LB: loop body
LE: loop exit
PB: predicated region body
PF: predicated region fallthrough
CT: control target
= control target key end

     0   :  { %s2418_s1 = inlined_call_operand.vmem [shape: bf16[128,128], index: 1, kind: input, shape index: {}]   ;;  %s2419_s0 = inlined_call_operand.vmem [shape: bf16[512,128], index: 0, kind: input, shape index: {}]   ;;  %s2420_s3 = inlined_call_operand.vmem [shape: bf16[128,128], index: 3, kind: input, shape index: {}]   ;;  %s2421_s2 = inlined_call_operand.vmem [shape: f32[1,128], index: 2, kind: input, shape index: {}]   ;;  %s2422_s4 = inlined_call_operand.vmem [shape: f32[1,128], index: 4, kind: input, shape index: {}]   ;;  %s2423_s5 = inlined_call_operand.vmem [shape: bf16[512,128], index: 5, kind: output, shape index: {}]  }
   0x1   :  { %v1962_v0 = vld [vmem:[%s2418_s1] sm:$0xff]   ;;  %v1963_v1 = vld [vmem:[%s2418_s1 + $0x8] sm:$0xff]   ;;  %v1964_v2 = vld [vmem:[%s2418_s1 + $0x10] sm:$0xff]  }
   0x2   :  { %1802 = vmatprep.subr.bf16.mxu0 %v1962_v0  ;;  %v1965_v3 = vld [vmem:[%s2418_s1 + $0x18] sm:$0xff]   ;;  %v1970_v4 = vld [vmem:[%s2419_s0] sm:$0xff]   ;;  %v1967_v6 = vld [vmem:[%s2418_s1 + $0x28] sm:$0xff]  }
   0x3   :  { %1803 = vmatpush3.bf16.msra.mxu0 %v1962_v0  ;;  %1818 = vmatprep.mubr.bf16.mxu0 %v1970_v4  ;;  %v1966_v5 = vld [vmem:[%s2418_s1 + $0x20] sm:$0xff]   ;;  %v1968_v7 = vld [vmem:[%s2418_s1 + $0x30] sm:$0xff]   ;;  %v1969_v8 = vld [vmem:[%s2418_s1 + $0x38] sm:$0xff]  }
   0x4   :  { %1804 = vmatprep.subr.bf16.mxu0 %v1963_v1  ;;  %v1971_v9 = vld [vmem:[%s2419_s0 + $0x8] sm:$0xff]   ;;  %v1972_v10 = vld [vmem:[%s2419_s0 + $0x10] sm:$0xff]   ;;  %v1973_v11 = vld [vmem:[%s2419_s0 + $0x18] sm:$0xff]  }
   0x5   :  { %v1974_v12 = vld [vmem:[%s2419_s0 + $0x20] sm:$0xff]   ;;  %v2003_v14 = vld [vmem:[%s2420_s3 + $0x8] sm:$0xff]   ;;  %v2004_v15 = vld [vmem:[%s2420_s3 + $0x10] sm:$0xff]  }
   0x6   :  { %v2002_v13 = vld [vmem:[%s2420_s3] sm:$0xff]   ;;  %v1975_v16 = vld [vmem:[%s2419_s0 + $0x28] sm:$0xff]   ;;  %v1976_v17 = vld [vmem:[%s2419_s0 + $0x30] sm:$0xff]  }
   0x7   :  { %1805 = vmatpush3.bf16.msra.mxu0 %v1963_v1  ;;  %1882 = vmatprep.subr.bf16.mxu1 %v2002_v13  ;;  %v2005_v18 = vld [vmem:[%s2420_s3 + $0x18] sm:$0xff]   ;;  %v2006_v19 = vld [vmem:[%s2420_s3 + $0x20] sm:$0xff]   ;;  %v2007_v22 = vld [vmem:[%s2420_s3 + $0x28] sm:$0xff]  }
   0x8   :  { %1806 = vmatprep.subr.bf16.mxu0 %v1964_v2  ;;  %1883 = vmatpush3.bf16.msra.mxu1 %v2002_v13  ;;  %v1977_v20 = vld [vmem:[%s2419_s0 + $0x38] sm:$0xff]   ;;  %v1978_v21 = vld [vmem:[%s2419_s0 + $0x40] sm:$0xff]   ;;  %v1979_v23 = vld [vmem:[%s2419_s0 + $0x48] sm:$0xff]  }
   0x9   :  { %1884 = vmatprep.subr.bf16.mxu1 %v2003_v14  ;;  %v1980_v24 = vld [vmem:[%s2419_s0 + $0x50] sm:$0xff]   ;;  %v1981_v25 = vld [vmem:[%s2419_s0 + $0x58] sm:$0xff]   ;;  %v1982_v26 = vld [vmem:[%s2419_s0 + $0x60] sm:$0xff]  }
   0xa   :  { %v1983_v27 = vld [vmem:[%s2419_s0 + $0x68] sm:$0xff]   ;;  %v1984_v28 = vld [vmem:[%s2419_s0 + $0x70] sm:$0xff]   ;;  %v1985_v29 = vld [vmem:[%s2419_s0 + $0x78] sm:$0xff]  }
   0xb   :  { %1807 = vmatpush3.bf16.msra.mxu0 %v1964_v2  ;;  %v1986_v30 = vld [vmem:[%s2419_s0 + $0x80] sm:$0xff]   ;;  %v1987_v31 = vld [vmem:[%s2419_s0 + $0x88] sm:$0xff]   ;;  %v1988_v32 = vld [vmem:[%s2419_s0 + $0x90] sm:$0xff]  }
   0xc   :  { %1808 = vmatprep.subr.bf16.mxu0 %v1965_v3  ;;  %1885 = vmatpush3.bf16.msra.mxu1 %v2003_v14  ;;  %v1989_v33 = vld [vmem:[%s2419_s0 + $0x98] sm:$0xff]   ;;  %v1990_v34 = vld [vmem:[%s2419_s0 + $0xa0] sm:$0xff]   ;;  %v1991_v35 = vld [vmem:[%s2419_s0 + $0xa8] sm:$0xff]  }
   0xd   :  { %1886 = vmatprep.subr.bf16.mxu1 %v2004_v15  ;;  %v1992_v36 = vld [vmem:[%s2419_s0 + $0xb0] sm:$0xff]   ;;  %v1993_v38 = vld [vmem:[%s2419_s0 + $0xb8] sm:$0xff]   ;;  %v1994_v39 = vld [vmem:[%s2419_s0 + $0xc0] sm:$0xff]  }
   0xe   :  { %v2008_v37 = vld [vmem:[%s2420_s3 + $0x30] sm:$0xff]   ;;  %v2009_v40 = vld [vmem:[%s2420_s3 + $0x38] sm:$0xff]   ;;  %v1995_v41 = vld [vmem:[%s2419_s0 + $0xc8] sm:$0xff]  }
   0xf   :  { %1809 = vmatpush3.bf16.msra.mxu0 %v1965_v3  ;;  %v1996_v42 = vld [vmem:[%s2419_s0 + $0xd0] sm:$0xff]   ;;  %v1997_v43 = vld [vmem:[%s2419_s0 + $0xd8] sm:$0xff]   ;;  %v1998_v44 = vld [vmem:[%s2419_s0 + $0xe0] sm:$0xff]  }
  0x10   :  { %1810 = vmatprep.subr.bf16.mxu0 %v1966_v5  ;;  %1887 = vmatpush3.bf16.msra.mxu1 %v2004_v15  ;;  %v1999_v45 = vld [vmem:[%s2419_s0 + $0xe8] sm:$0xff]   ;;  %v2000_v46 = vld [vmem:[%s2419_s0 + $0xf0] sm:$0xff]   ;;  %v2001_v47 = vld [vmem:[%s2419_s0 + $0xf8] sm:$0xff]  }
  0x11   :  { %1888 = vmatprep.subr.bf16.mxu1 %v2005_v18  ;;  %v2187_v49 = vld [vmem:[%s2421_s2] ss:$0 sm:$0xff] }
  0x13   :  { %1811 = vmatpush3.bf16.msra.mxu0 %v1966_v5 }
  0x14   :  { %1812 = vmatprep.subr.bf16.mxu0 %v1967_v6  ;;  %1889 = vmatpush3.bf16.msra.mxu1 %v2005_v18 }
  0x15   :  { %1890 = vmatprep.subr.bf16.mxu1 %v2006_v19 }
  0x17   :  { %1813 = vmatpush3.bf16.msra.mxu0 %v1967_v6 }
  0x18   :  { %1814 = vmatprep.subr.bf16.mxu0 %v1968_v7  ;;  %1891 = vmatpush3.bf16.msra.mxu1 %v2006_v19 }
  0x19   :  { %1892 = vmatprep.subr.bf16.mxu1 %v2007_v22 }
  0x1b   :  { %1815 = vmatpush3.bf16.msra.mxu0 %v1968_v7 }
  0x1c   :  { %1816 = vmatprep.subr.bf16.mxu0 %v1969_v8  ;;  %1893 = vmatpush3.bf16.msra.mxu1 %v2007_v22 }
  0x1d   :  { %1894 = vmatprep.subr.bf16.mxu1 %v2008_v37 }
  0x1f   :  { %1817 = vmatpush3.bf16.msra.mxu0 %v1969_v8 }
  0x20   :  { %1895 = vmatpush3.bf16.msra.mxu1 %v2008_v37 }
  0x21   :  { %1896 = vmatprep.subr.bf16.mxu1 %v2009_v40 }
  0x22   :  { %1819 = vmatmul.mubr.bf16.vlgmr.msra.gmra.mrb[0].mxu0 %v1971_v9 }
  0x23   :  { %1822 = vmatprep.mubr.bf16.mxu0 %v1972_v10 }
  0x24   :  { %1897 = vmatpush3.bf16.msra.mxu1 %v2009_v40 }
  0x2a   :  { %1823 = vmatmul.mubr.bf16.gmra.mrb[4].mxu0 %v1973_v11 }
  0x2b   :  { %1826 = vmatprep.mubr.bf16.mxu0 %v1974_v12 }
  0x32   :  { %1827 = vmatmul.mubr.bf16.gmra.mrb[8].mxu0 %v1975_v16 }
  0x33   :  { %1830 = vmatprep.mubr.bf16.mxu0 %v1976_v17 }
  0x3a   :  { %1831 = vmatmul.mubr.bf16.gmra.mrb[12].mxu0 %v1977_v20 }
  0x3b   :  { %1834 = vmatprep.mubr.bf16.mxu0 %v1978_v21 }
  0x42   :  { %1835 = vmatmul.mubr.bf16.gmra.mrb[16].mxu0 %v1979_v23 }
  0x43   :  { %1838 = vmatprep.mubr.bf16.mxu0 %v1980_v24 }
  0x4a   :  { %1839 = vmatmul.mubr.bf16.gmra.mrb[20].mxu0 %v1981_v25 }
  0x4b   :  { %1842 = vmatprep.mubr.bf16.mxu0 %v1982_v26 }
  0x52   :  { %1843 = vmatmul.mubr.bf16.gmra.mrb[24].mxu0 %v1983_v27 }
  0x53   :  { %1846 = vmatprep.mubr.bf16.mxu0 %v1984_v28 }
  0x5a   :  { %1847 = vmatmul.mubr.bf16.gmra.mrb[28].mxu0 %v1985_v29 }
  0x5b   :  { %1850 = vmatprep.mubr.bf16.mxu0 %v1986_v30 }
  0x62   :  { %1851 = vmatmul.mubr.bf16.gmra.mrb[32].mxu0 %v1987_v31 }
  0x63   :  { %1854 = vmatprep.mubr.bf16.mxu0 %v1988_v32 }
  0x6a   :  { %1855 = vmatmul.mubr.bf16.gmra.mrb[36].mxu0 %v1989_v33 }
  0x6b   :  { %1858 = vmatprep.mubr.bf16.mxu0 %v1990_v34 }
  0x72   :  { %1859 = vmatmul.mubr.bf16.gmra.mrb[40].mxu0 %v1991_v35 }
  0x73   :  { %1862 = vmatprep.mubr.bf16.mxu0 %v1992_v36 }
  0x7a   :  { %1863 = vmatmul.mubr.bf16.gmra.mrb[44].mxu0 %v1993_v38 }
  0x7b   :  { %1866 = vmatprep.mubr.bf16.mxu0 %v1994_v39 }
  0x82   :  { %1867 = vmatmul.mubr.bf16.gmra.mrb[48].mxu0 %v1995_v41 }
  0x83   :  { %1870 = vmatprep.mubr.bf16.mxu0 %v1996_v42 }
  0x8a   :  { %1871 = vmatmul.mubr.bf16.gmra.mrb[52].mxu0 %v1997_v43 }
  0x8b   :  { %1874 = vmatprep.mubr.bf16.mxu0 %v1998_v44 }
  0x92   :  { %1875 = vmatmul.mubr.bf16.gmra.mrb[56].mxu0 %v1999_v45 }
  0x93   :  { %1878 = vmatprep.mubr.bf16.mxu0 %v2000_v46 }
  0x9a   :  { %1879 = vmatmul.mubr.bf16.gmra.mrb[60].mxu0 %v2001_v47 }
  0xf5   :  { %v1820_v48 = vpop.f32.mrb[0].mxu0 }
  0xf6   :  { %v382_v50 = vpop.f32.mrb[1].mxu0  ;;  %v391_v52 = vadd.f32 %v1820_v48, %v2187_v49 }
  0xf7   :  { %v1821_v51 = vpop.f32.mrb[2].mxu0  ;;  %v383_v55 = vadd.f32 %v2187_v49, %v382_v50 }
  0xf8   :  { %v394_v53 = vadd.f32 %v1821_v51, %v2187_v49  ;;  %v385_v54 = vpop.f32.mrb[3].mxu0 }
  0xf9   :  { %v386_v56 = vadd.f32 %v2187_v49, %v385_v54 }
  0xfa   :  { %v638_v57 = vpack.c.bf16 %v394_v53, %v391_v52 }
  0xfb   :  { %v637_v58 = vpack.c.bf16 %v386_v56, %v383_v55 }
  0xfd   :  { %v1824_v59 = vpop.f32.mrb[4].mxu0  ;;  %1898 = vmatprep.mubr.bf16.mxu1 %v637_v58 }
  0xfe   :  { %v398_v60 = vpop.f32.mrb[5].mxu0  ;;  %1899 = vmatmul.mubr.bf16.vlgmr.msra.gmra.mrb[0].mxu1 %v638_v57  ;;  %v407_v62 = vadd.f32 %v1824_v59, %v2187_v49 }
  0xff   :  { %v1825_v61 = vpop.f32.mrb[6].mxu0  ;;  %v399_v1 = vadd.f32 %v2187_v49, %v398_v60 }
 0x100   :  { %v410_v63 = vadd.f32 %v1825_v61, %v2187_v49  ;;  %v401_v0 = vpop.f32.mrb[7].mxu0 }
 0x101   :  { %v402_v2 = vadd.f32 %v2187_v49, %v401_v0 }
 0x102   :  { %v640_v3 = vpack.c.bf16 %v410_v63, %v407_v62 }
 0x103   :  { %v639_v4 = vpack.c.bf16 %v402_v2, %v399_v1 }
 0x105   :  { %v1828_v5 = vpop.f32.mrb[8].mxu0  ;;  %1902 = vmatprep.mubr.bf16.mxu1 %v639_v4 }
 0x106   :  { %v414_v6 = vpop.f32.mrb[9].mxu0  ;;  %1903 = vmatmul.mubr.bf16.gmra.mrb[4].mxu1 %v640_v3  ;;  %v423_v8 = vadd.f32 %v1828_v5, %v2187_v49 }
 0x107   :  { %v1829_v7 = vpop.f32.mrb[10].mxu0  ;;  %v415_v11 = vadd.f32 %v2187_v49, %v414_v6 }
 0x108   :  { %v426_v9 = vadd.f32 %v1829_v7, %v2187_v49  ;;  %v417_v10 = vpop.f32.mrb[11].mxu0 }
 0x109   :  { %v418_v12 = vadd.f32 %v2187_v49, %v417_v10 }
 0x10a   :  { %v642_v13 = vpack.c.bf16 %v426_v9, %v423_v8 }
 0x10b   :  { %v641_v14 = vpack.c.bf16 %v418_v12, %v415_v11 }
 0x10d   :  { %v1832_v15 = vpop.f32.mrb[12].mxu0  ;;  %1906 = vmatprep.mubr.bf16.mxu1 %v641_v14 }
 0x10e   :  { %v430_v16 = vpop.f32.mrb[13].mxu0  ;;  %1907 = vmatmul.mubr.bf16.gmra.mrb[8].mxu1 %v642_v13  ;;  %v439_v18 = vadd.f32 %v1832_v15, %v2187_v49 }
 0x10f   :  { %v1833_v17 = vpop.f32.mrb[14].mxu0  ;;  %v431_v21 = vadd.f32 %v2187_v49, %v430_v16 }
 0x110   :  { %v442_v19 = vadd.f32 %v1833_v17, %v2187_v49  ;;  %v433_v20 = vpop.f32.mrb[15].mxu0 }
 0x111   :  { %v434_v22 = vadd.f32 %v2187_v49, %v433_v20 }
 0x112   :  { %v644_v23 = vpack.c.bf16 %v442_v19, %v439_v18 }
 0x113   :  { %v643_v24 = vpack.c.bf16 %v434_v22, %v431_v21 }
 0x115   :  { %v1836_v25 = vpop.f32.mrb[16].mxu0  ;;  %1910 = vmatprep.mubr.bf16.mxu1 %v643_v24 }
 0x116   :  { %v446_v26 = vpop.f32.mrb[17].mxu0  ;;  %1911 = vmatmul.mubr.bf16.gmra.mrb[12].mxu1 %v644_v23  ;;  %v455_v28 = vadd.f32 %v1836_v25, %v2187_v49 }
 0x117   :  { %v1837_v27 = vpop.f32.mrb[18].mxu0  ;;  %v447_v31 = vadd.f32 %v2187_v49, %v446_v26 }
 0x118   :  { %v458_v29 = vadd.f32 %v1837_v27, %v2187_v49  ;;  %v449_v30 = vpop.f32.mrb[19].mxu0 }
 0x119   :  { %v450_v32 = vadd.f32 %v2187_v49, %v449_v30 }
 0x11a   :  { %v646_v33 = vpack.c.bf16 %v458_v29, %v455_v28 }
 0x11b   :  { %v645_v34 = vpack.c.bf16 %v450_v32, %v447_v31 }
 0x11d   :  { %v1840_v35 = vpop.f32.mrb[20].mxu0  ;;  %1914 = vmatprep.mubr.bf16.mxu1 %v645_v34 }
 0x11e   :  { %v462_v36 = vpop.f32.mrb[21].mxu0  ;;  %1915 = vmatmul.mubr.bf16.gmra.mrb[16].mxu1 %v646_v33  ;;  %v471_v38 = vadd.f32 %v1840_v35, %v2187_v49 }
 0x11f   :  { %v1841_v37 = vpop.f32.mrb[22].mxu0  ;;  %v463_v41 = vadd.f32 %v2187_v49, %v462_v36 }
 0x120   :  { %v474_v39 = vadd.f32 %v1841_v37, %v2187_v49  ;;  %v465_v40 = vpop.f32.mrb[23].mxu0 }
 0x121   :  { %v466_v42 = vadd.f32 %v2187_v49, %v465_v40 }
 0x122   :  { %v648_v43 = vpack.c.bf16 %v474_v39, %v471_v38 }
 0x123   :  { %v647_v44 = vpack.c.bf16 %v466_v42, %v463_v41 }
 0x125   :  { %v1844_v45 = vpop.f32.mrb[24].mxu0  ;;  %1918 = vmatprep.mubr.bf16.mxu1 %v647_v44 }
 0x126   :  { %v478_v46 = vpop.f32.mrb[25].mxu0  ;;  %1919 = vmatmul.mubr.bf16.gmra.mrb[20].mxu1 %v648_v43  ;;  %v487_v48 = vadd.f32 %v1844_v45, %v2187_v49 }
 0x127   :  { %v1845_v47 = vpop.f32.mrb[26].mxu0  ;;  %v479_v52 = vadd.f32 %v2187_v49, %v478_v46 }
 0x128   :  { %v490_v50 = vadd.f32 %v1845_v47, %v2187_v49  ;;  %v481_v51 = vpop.f32.mrb[27].mxu0 }
 0x129   :  { %v482_v53 = vadd.f32 %v2187_v49, %v481_v51 }
 0x12a   :  { %v650_v54 = vpack.c.bf16 %v490_v50, %v487_v48 }
 0x12b   :  { %v649_v55 = vpack.c.bf16 %v482_v53, %v479_v52 }
 0x12d   :  { %v1848_v56 = vpop.f32.mrb[28].mxu0  ;;  %1922 = vmatprep.mubr.bf16.mxu1 %v649_v55 }
 0x12e   :  { %v494_v57 = vpop.f32.mrb[29].mxu0  ;;  %1923 = vmatmul.mubr.bf16.gmra.mrb[24].mxu1 %v650_v54  ;;  %v503_v59 = vadd.f32 %v1848_v56, %v2187_v49 }
 0x12f   :  { %v1849_v58 = vpop.f32.mrb[30].mxu0  ;;  %v495_v62 = vadd.f32 %v2187_v49, %v494_v57 }
 0x130   :  { %v506_v60 = vadd.f32 %v1849_v58, %v2187_v49  ;;  %v497_v61 = vpop.f32.mrb[31].mxu0 }
 0x131   :  { %v498_v63 = vadd.f32 %v2187_v49, %v497_v61 }
 0x132   :  { %v652_v0 = vpack.c.bf16 %v506_v60, %v503_v59 }
 0x133   :  { %v651_v1 = vpack.c.bf16 %v498_v63, %v495_v62 }
 0x135   :  { %v1852_v2 = vpop.f32.mrb[32].mxu0  ;;  %1926 = vmatprep.mubr.bf16.mxu1 %v651_v1 }
 0x136   :  { %v510_v3 = vpop.f32.mrb[33].mxu0  ;;  %1927 = vmatmul.mubr.bf16.gmra.mrb[28].mxu1 %v652_v0  ;;  %v519_v5 = vadd.f32 %v1852_v2, %v2187_v49 }
 0x137   :  { %v1853_v4 = vpop.f32.mrb[34].mxu0  ;;  %v511_v8 = vadd.f32 %v2187_v49, %v510_v3 }
 0x138   :  { %v522_v6 = vadd.f32 %v1853_v4, %v2187_v49  ;;  %v513_v7 = vpop.f32.mrb[35].mxu0 }
 0x139   :  { %v514_v9 = vadd.f32 %v2187_v49, %v513_v7 }
 0x13a   :  { %v654_v10 = vpack.c.bf16 %v522_v6, %v519_v5 }
 0x13b   :  { %v653_v11 = vpack.c.bf16 %v514_v9, %v511_v8 }
 0x13d   :  { %v1856_v12 = vpop.f32.mrb[36].mxu0  ;;  %1930 = vmatprep.mubr.bf16.mxu1 %v653_v11 }
 0x13e   :  { %v526_v13 = vpop.f32.mrb[37].mxu0  ;;  %1931 = vmatmul.mubr.bf16.gmra.mrb[32].mxu1 %v654_v10  ;;  %v535_v15 = vadd.f32 %v1856_v12, %v2187_v49 }
 0x13f   :  { %v1857_v14 = vpop.f32.mrb[38].mxu0  ;;  %v527_v18 = vadd.f32 %v2187_v49, %v526_v13 }
 0x140   :  { %v538_v16 = vadd.f32 %v1857_v14, %v2187_v49  ;;  %v529_v17 = vpop.f32.mrb[39].mxu0 }
 0x141   :  { %v530_v19 = vadd.f32 %v2187_v49, %v529_v17 }
 0x142   :  { %v656_v20 = vpack.c.bf16 %v538_v16, %v535_v15 }
 0x143   :  { %v655_v21 = vpack.c.bf16 %v530_v19, %v527_v18 }
 0x145   :  { %v1860_v22 = vpop.f32.mrb[40].mxu0  ;;  %1934 = vmatprep.mubr.bf16.mxu1 %v655_v21 }
 0x146   :  { %v542_v23 = vpop.f32.mrb[41].mxu0  ;;  %1935 = vmatmul.mubr.bf16.gmra.mrb[36].mxu1 %v656_v20  ;;  %v551_v25 = vadd.f32 %v1860_v22, %v2187_v49  ;;  %v2256_v20 = vld [vmem:[%s2422_s4] ss:$0 sm:$0xff] }
 0x147   :  { %v1861_v24 = vpop.f32.mrb[42].mxu0  ;;  %v543_v28 = vadd.f32 %v2187_v49, %v542_v23 }
 0x148   :  { %v554_v26 = vadd.f32 %v1861_v24, %v2187_v49  ;;  %v545_v27 = vpop.f32.mrb[43].mxu0 }
 0x149   :  { %v546_v29 = vadd.f32 %v2187_v49, %v545_v27 }
 0x14a   :  { %v658_v30 = vpack.c.bf16 %v554_v26, %v551_v25 }
 0x14b   :  { %v657_v31 = vpack.c.bf16 %v546_v29, %v543_v28 }
 0x14d   :  { %v1864_v32 = vpop.f32.mrb[44].mxu0  ;;  %1938 = vmatprep.mubr.bf16.mxu1 %v657_v31 }
 0x14e   :  { %v558_v33 = vpop.f32.mrb[45].mxu0  ;;  %1939 = vmatmul.mubr.bf16.gmra.mrb[40].mxu1 %v658_v30  ;;  %v567_v35 = vadd.f32 %v1864_v32, %v2187_v49 }
 0x14f   :  { %v1865_v34 = vpop.f32.mrb[46].mxu0  ;;  %v559_v38 = vadd.f32 %v2187_v49, %v558_v33 }
 0x150   :  { %v570_v36 = vadd.f32 %v1865_v34, %v2187_v49  ;;  %v561_v37 = vpop.f32.mrb[47].mxu0 }
 0x151   :  { %v562_v39 = vadd.f32 %v2187_v49, %v561_v37 }
 0x152   :  { %v660_v40 = vpack.c.bf16 %v570_v36, %v567_v35 }
 0x153   :  { %v659_v41 = vpack.c.bf16 %v562_v39, %v559_v38 }
 0x155   :  { %v1868_v42 = vpop.f32.mrb[48].mxu0  ;;  %1942 = vmatprep.mubr.bf16.mxu1 %v659_v41 }
 0x156   :  { %v574_v43 = vpop.f32.mrb[49].mxu0  ;;  %1943 = vmatmul.mubr.bf16.gmra.mrb[44].mxu1 %v660_v40  ;;  %v583_v45 = vadd.f32 %v1868_v42, %v2187_v49 }
 0x157   :  { %v1869_v44 = vpop.f32.mrb[50].mxu0  ;;  %v575_v48 = vadd.f32 %v2187_v49, %v574_v43 }
 0x158   :  { %v586_v46 = vadd.f32 %v1869_v44, %v2187_v49  ;;  %v577_v47 = vpop.f32.mrb[51].mxu0 }
 0x159   :  { %v578_v50 = vadd.f32 %v2187_v49, %v577_v47 }
 0x15a   :  { %v662_v51 = vpack.c.bf16 %v586_v46, %v583_v45 }
 0x15b   :  { %v661_v52 = vpack.c.bf16 %v578_v50, %v575_v48 }
 0x15d   :  { %v1872_v53 = vpop.f32.mrb[52].mxu0  ;;  %1946 = vmatprep.mubr.bf16.mxu1 %v661_v52 }
 0x15e   :  { %v590_v54 = vpop.f32.mrb[53].mxu0  ;;  %1947 = vmatmul.mubr.bf16.gmra.mrb[48].mxu1 %v662_v51  ;;  %v599_v56 = vadd.f32 %v1872_v53, %v2187_v49 }
 0x15f   :  { %v1873_v55 = vpop.f32.mrb[54].mxu0  ;;  %v591_v59 = vadd.f32 %v2187_v49, %v590_v54 }
 0x160   :  { %v602_v57 = vadd.f32 %v1873_v55, %v2187_v49  ;;  %v593_v58 = vpop.f32.mrb[55].mxu0 }
 0x161   :  { %v594_v60 = vadd.f32 %v2187_v49, %v593_v58 }
 0x162   :  { %v664_v61 = vpack.c.bf16 %v602_v57, %v599_v56 }
 0x163   :  { %v663_v62 = vpack.c.bf16 %v594_v60, %v591_v59 }
 0x165   :  { %v1876_v63 = vpop.f32.mrb[56].mxu0  ;;  %1950 = vmatprep.mubr.bf16.mxu1 %v663_v62 }
 0x166   :  { %v606_v0 = vpop.f32.mrb[57].mxu0  ;;  %1951 = vmatmul.mubr.bf16.gmra.mrb[52].mxu1 %v664_v61  ;;  %v615_v2 = vadd.f32 %v1876_v63, %v2187_v49 }
 0x167   :  { %v1877_v1 = vpop.f32.mrb[58].mxu0  ;;  %v607_v5 = vadd.f32 %v2187_v49, %v606_v0 }
 0x168   :  { %v618_v3 = vadd.f32 %v1877_v1, %v2187_v49  ;;  %v609_v4 = vpop.f32.mrb[59].mxu0 }
 0x169   :  { %v610_v6 = vadd.f32 %v2187_v49, %v609_v4 }
 0x16a   :  { %v666_v7 = vpack.c.bf16 %v618_v3, %v615_v2 }
 0x16b   :  { %v665_v8 = vpack.c.bf16 %v610_v6, %v607_v5 }
 0x16d   :  { %v1880_v9 = vpop.f32.mrb[60].mxu0  ;;  %1954 = vmatprep.mubr.bf16.mxu1 %v665_v8 }
 0x16e   :  { %v622_v10 = vpop.f32.mrb[61].mxu0  ;;  %1955 = vmatmul.mubr.bf16.gmra.mrb[56].mxu1 %v666_v7  ;;  %v631_v12 = vadd.f32 %v1880_v9, %v2187_v49 }
 0x16f   :  { %v1881_v11 = vpop.f32.mrb[62].mxu0  ;;  %v623_v15 = vadd.f32 %v2187_v49, %v622_v10 }
 0x170   :  { %v634_v13 = vadd.f32 %v1881_v11, %v2187_v49  ;;  %v625_v14 = vpop.f32.mrb[63].mxu0 }
 0x171   :  { %v626_v16 = vadd.f32 %v2187_v49, %v625_v14 }
 0x172   :  { %v668_v17 = vpack.c.bf16 %v634_v13, %v631_v12 }
 0x173   :  { %v667_v18 = vpack.c.bf16 %v626_v16, %v623_v15 }
 0x175   :  { %1958 = vmatprep.mubr.bf16.mxu1 %v667_v18 }
 0x176   :  { %1959 = vmatmul.mubr.bf16.gmra.mrb[60].mxu1 %v668_v17 }
 0x1d1   :  { %v1900_v19 = vpop.f32.mrb[0].mxu1 }
 0x1d2   :  { %v774_v21 = vpop.f32.mrb[1].mxu1  ;;  %v783_v23 = vadd.f32 %v1900_v19, %v2256_v20 }
 0x1d3   :  { %v1901_v22 = vpop.f32.mrb[2].mxu1  ;;  %v775_v26 = vadd.f32 %v2256_v20, %v774_v21 }
 0x1d4   :  { %v786_v24 = vadd.f32 %v1901_v22, %v2256_v20  ;;  %v777_v25 = vpop.f32.mrb[3].mxu1 }
 0x1d5   :  { %v778_v49 = vadd.f32 %v2256_v20, %v777_v25 }
 0x1d6   :  { %v1539_v27 = vpack.c.bf16 %v786_v24, %v783_v23 }
 0x1d7   :  { %v1534_v28 = vpack.c.bf16 %v778_v49, %v775_v26 }
 0x1d8   :  { %1691 = vst [vmem:[%s2423_s5 + $0x8] sm:$0xff] %v1539_v27  }
 0x1d9   :  { %1535 = vst [vmem:[%s2423_s5] sm:$0xff] %v1534_v28   ;;  %v1904_v29 = vpop.f32.mrb[4].mxu1 }
 0x1da   :  { %v790_v30 = vpop.f32.mrb[5].mxu1  ;;  %v799_v32 = vadd.f32 %v1904_v29, %v2256_v20 }
 0x1db   :  { %v1905_v31 = vpop.f32.mrb[6].mxu1  ;;  %v791_v35 = vadd.f32 %v2256_v20, %v790_v30 }
 0x1dc   :  { %v802_v33 = vadd.f32 %v1905_v31, %v2256_v20  ;;  %v793_v34 = vpop.f32.mrb[7].mxu1 }
 0x1dd   :  { %v794_v36 = vadd.f32 %v2256_v20, %v793_v34 }
 0x1de   :  { %v1549_v37 = vpack.c.bf16 %v802_v33, %v799_v32 }
 0x1df   :  { %v1544_v38 = vpack.c.bf16 %v794_v36, %v791_v35 }
 0x1e0   :  { %1693 = vst [vmem:[%s2423_s5 + $0x18] sm:$0xff] %v1549_v37  }
 0x1e1   :  { %1692 = vst [vmem:[%s2423_s5 + $0x10] sm:$0xff] %v1544_v38   ;;  %v1908_v39 = vpop.f32.mrb[8].mxu1 }
 0x1e2   :  { %v806_v40 = vpop.f32.mrb[9].mxu1  ;;  %v815_v42 = vadd.f32 %v1908_v39, %v2256_v20 }
 0x1e3   :  { %v1909_v41 = vpop.f32.mrb[10].mxu1  ;;  %v807_v45 = vadd.f32 %v2256_v20, %v806_v40 }
 0x1e4   :  { %v818_v43 = vadd.f32 %v1909_v41, %v2256_v20  ;;  %v809_v44 = vpop.f32.mrb[11].mxu1 }
 0x1e5   :  { %v810_v46 = vadd.f32 %v2256_v20, %v809_v44 }
 0x1e6   :  { %v1559_v47 = vpack.c.bf16 %v818_v43, %v815_v42 }
 0x1e7   :  { %v1554_v48 = vpack.c.bf16 %v810_v46, %v807_v45 }
 0x1e8   :  { %1695 = vst [vmem:[%s2423_s5 + $0x28] sm:$0xff] %v1559_v47  }
 0x1e9   :  { %1694 = vst [vmem:[%s2423_s5 + $0x20] sm:$0xff] %v1554_v48   ;;  %v1912_v50 = vpop.f32.mrb[12].mxu1 }
 0x1ea   :  { %v822_v51 = vpop.f32.mrb[13].mxu1  ;;  %v831_v53 = vadd.f32 %v1912_v50, %v2256_v20 }
 0x1eb   :  { %v1913_v52 = vpop.f32.mrb[14].mxu1  ;;  %v823_v56 = vadd.f32 %v2256_v20, %v822_v51 }
 0x1ec   :  { %v834_v54 = vadd.f32 %v1913_v52, %v2256_v20  ;;  %v825_v55 = vpop.f32.mrb[15].mxu1 }
 0x1ed   :  { %v826_v57 = vadd.f32 %v2256_v20, %v825_v55 }
 0x1ee   :  { %v1569_v58 = vpack.c.bf16 %v834_v54, %v831_v53 }
 0x1ef   :  { %v1564_v59 = vpack.c.bf16 %v826_v57, %v823_v56 }
 0x1f0   :  { %1697 = vst [vmem:[%s2423_s5 + $0x38] sm:$0xff] %v1569_v58  }
 0x1f1   :  { %1696 = vst [vmem:[%s2423_s5 + $0x30] sm:$0xff] %v1564_v59   ;;  %v1916_v60 = vpop.f32.mrb[16].mxu1 }
 0x1f2   :  { %v838_v61 = vpop.f32.mrb[17].mxu1  ;;  %v847_v63 = vadd.f32 %v1916_v60, %v2256_v20 }
 0x1f3   :  { %v1917_v62 = vpop.f32.mrb[18].mxu1  ;;  %v839_v2 = vadd.f32 %v2256_v20, %v838_v61 }
 0x1f4   :  { %v850_v0 = vadd.f32 %v1917_v62, %v2256_v20  ;;  %v841_v1 = vpop.f32.mrb[19].mxu1 }
 0x1f5   :  { %v842_v3 = vadd.f32 %v2256_v20, %v841_v1 }
 0x1f6   :  { %v1579_v4 = vpack.c.bf16 %v850_v0, %v847_v63 }
 0x1f7   :  { %v1574_v5 = vpack.c.bf16 %v842_v3, %v839_v2 }
 0x1f8   :  { %1699 = vst [vmem:[%s2423_s5 + $0x48] sm:$0xff] %v1579_v4  }
 0x1f9   :  { %1698 = vst [vmem:[%s2423_s5 + $0x40] sm:$0xff] %v1574_v5   ;;  %v1920_v6 = vpop.f32.mrb[20].mxu1 }
 0x1fa   :  { %v854_v7 = vpop.f32.mrb[21].mxu1  ;;  %v863_v9 = vadd.f32 %v1920_v6, %v2256_v20 }
 0x1fb   :  { %v1921_v8 = vpop.f32.mrb[22].mxu1  ;;  %v855_v12 = vadd.f32 %v2256_v20, %v854_v7 }
 0x1fc   :  { %v866_v10 = vadd.f32 %v1921_v8, %v2256_v20  ;;  %v857_v11 = vpop.f32.mrb[23].mxu1 }
 0x1fd   :  { %v858_v13 = vadd.f32 %v2256_v20, %v857_v11 }
 0x1fe   :  { %v1589_v14 = vpack.c.bf16 %v866_v10, %v863_v9 }
 0x1ff   :  { %v1584_v15 = vpack.c.bf16 %v858_v13, %v855_v12 }
 0x200   :  { %1701 = vst [vmem:[%s2423_s5 + $0x58] sm:$0xff] %v1589_v14  }
 0x201   :  { %1700 = vst [vmem:[%s2423_s5 + $0x50] sm:$0xff] %v1584_v15   ;;  %v1924_v16 = vpop.f32.mrb[24].mxu1 }
 0x202   :  { %v870_v17 = vpop.f32.mrb[25].mxu1  ;;  %v879_v19 = vadd.f32 %v1924_v16, %v2256_v20 }
 0x203   :  { %v1925_v18 = vpop.f32.mrb[26].mxu1  ;;  %v871_v23 = vadd.f32 %v2256_v20, %v870_v17 }
 0x204   :  { %v882_v21 = vadd.f32 %v1925_v18, %v2256_v20  ;;  %v873_v22 = vpop.f32.mrb[27].mxu1 }
 0x205   :  { %v874_v24 = vadd.f32 %v2256_v20, %v873_v22 }
 0x206   :  { %v1599_v25 = vpack.c.bf16 %v882_v21, %v879_v19 }
 0x207   :  { %v1594_v26 = vpack.c.bf16 %v874_v24, %v871_v23 }
 0x208   :  { %1703 = vst [vmem:[%s2423_s5 + $0x68] sm:$0xff] %v1599_v25  }
 0x209   :  { %1702 = vst [vmem:[%s2423_s5 + $0x60] sm:$0xff] %v1594_v26   ;;  %v1928_v49 = vpop.f32.mrb[28].mxu1 }
 0x20a   :  { %v886_v27 = vpop.f32.mrb[29].mxu1  ;;  %v895_v29 = vadd.f32 %v1928_v49, %v2256_v20 }
 0x20b   :  { %v1929_v28 = vpop.f32.mrb[30].mxu1  ;;  %v887_v32 = vadd.f32 %v2256_v20, %v886_v27 }
 0x20c   :  { %v898_v30 = vadd.f32 %v1929_v28, %v2256_v20  ;;  %v889_v31 = vpop.f32.mrb[31].mxu1 }
 0x20d   :  { %v890_v33 = vadd.f32 %v2256_v20, %v889_v31 }
 0x20e   :  { %v1609_v34 = vpack.c.bf16 %v898_v30, %v895_v29 }
 0x20f   :  { %v1604_v35 = vpack.c.bf16 %v890_v33, %v887_v32 }
 0x210   :  { %1705 = vst [vmem:[%s2423_s5 + $0x78] sm:$0xff] %v1609_v34  }
 0x211   :  { %1704 = vst [vmem:[%s2423_s5 + $0x70] sm:$0xff] %v1604_v35   ;;  %v1932_v36 = vpop.f32.mrb[32].mxu1 }
 0x212   :  { %v902_v37 = vpop.f32.mrb[33].mxu1  ;;  %v911_v39 = vadd.f32 %v1932_v36, %v2256_v20 }
 0x213   :  { %v1933_v38 = vpop.f32.mrb[34].mxu1  ;;  %v903_v42 = vadd.f32 %v2256_v20, %v902_v37 }
 0x214   :  { %v914_v40 = vadd.f32 %v1933_v38, %v2256_v20  ;;  %v905_v41 = vpop.f32.mrb[35].mxu1 }
 0x215   :  { %v906_v43 = vadd.f32 %v2256_v20, %v905_v41 }
 0x216   :  { %v1619_v44 = vpack.c.bf16 %v914_v40, %v911_v39 }
 0x217   :  { %v1614_v45 = vpack.c.bf16 %v906_v43, %v903_v42 }
 0x218   :  { %1707 = vst [vmem:[%s2423_s5 + $0x88] sm:$0xff] %v1619_v44  }
 0x219   :  { %1706 = vst [vmem:[%s2423_s5 + $0x80] sm:$0xff] %v1614_v45   ;;  %v1936_v46 = vpop.f32.mrb[36].mxu1 }
 0x21a   :  { %v918_v47 = vpop.f32.mrb[37].mxu1  ;;  %v927_v50 = vadd.f32 %v1936_v46, %v2256_v20 }
 0x21b   :  { %v1937_v48 = vpop.f32.mrb[38].mxu1  ;;  %v919_v53 = vadd.f32 %v2256_v20, %v918_v47 }
 0x21c   :  { %v930_v51 = vadd.f32 %v1937_v48, %v2256_v20  ;;  %v921_v52 = vpop.f32.mrb[39].mxu1 }
 0x21d   :  { %v922_v54 = vadd.f32 %v2256_v20, %v921_v52 }
 0x21e   :  { %v1629_v55 = vpack.c.bf16 %v930_v51, %v927_v50 }
 0x21f   :  { %v1624_v56 = vpack.c.bf16 %v922_v54, %v919_v53 }
 0x220   :  { %1709 = vst [vmem:[%s2423_s5 + $0x98] sm:$0xff] %v1629_v55  }
 0x221   :  { %1708 = vst [vmem:[%s2423_s5 + $0x90] sm:$0xff] %v1624_v56   ;;  %v1940_v57 = vpop.f32.mrb[40].mxu1 }
 0x222   :  { %v934_v58 = vpop.f32.mrb[41].mxu1  ;;  %v943_v60 = vadd.f32 %v1940_v57, %v2256_v20 }
 0x223   :  { %v1941_v59 = vpop.f32.mrb[42].mxu1  ;;  %v935_v63 = vadd.f32 %v2256_v20, %v934_v58 }
 0x224   :  { %v946_v61 = vadd.f32 %v1941_v59, %v2256_v20  ;;  %v937_v62 = vpop.f32.mrb[43].mxu1 }
 0x225   :  { %v938_v0 = vadd.f32 %v2256_v20, %v937_v62 }
 0x226   :  { %v1639_v1 = vpack.c.bf16 %v946_v61, %v943_v60 }
 0x227   :  { %v1634_v2 = vpack.c.bf16 %v938_v0, %v935_v63 }
 0x228   :  { %1711 = vst [vmem:[%s2423_s5 + $0xa8] sm:$0xff] %v1639_v1  }
 0x229   :  { %1710 = vst [vmem:[%s2423_s5 + $0xa0] sm:$0xff] %v1634_v2   ;;  %v1944_v3 = vpop.f32.mrb[44].mxu1 }
 0x22a   :  { %v950_v4 = vpop.f32.mrb[45].mxu1  ;;  %v959_v6 = vadd.f32 %v1944_v3, %v2256_v20 }
 0x22b   :  { %v1945_v5 = vpop.f32.mrb[46].mxu1  ;;  %v951_v9 = vadd.f32 %v2256_v20, %v950_v4 }
 0x22c   :  { %v962_v7 = vadd.f32 %v1945_v5, %v2256_v20  ;;  %v953_v8 = vpop.f32.mrb[47].mxu1 }
 0x22d   :  { %v954_v10 = vadd.f32 %v2256_v20, %v953_v8 }
 0x22e   :  { %v1649_v11 = vpack.c.bf16 %v962_v7, %v959_v6 }
 0x22f   :  { %v1644_v12 = vpack.c.bf16 %v954_v10, %v951_v9 }
 0x230   :  { %1713 = vst [vmem:[%s2423_s5 + $0xb8] sm:$0xff] %v1649_v11  }
 0x231   :  { %1712 = vst [vmem:[%s2423_s5 + $0xb0] sm:$0xff] %v1644_v12   ;;  %v1948_v13 = vpop.f32.mrb[48].mxu1 }
 0x232   :  { %v966_v14 = vpop.f32.mrb[49].mxu1  ;;  %v975_v16 = vadd.f32 %v1948_v13, %v2256_v20 }
 0x233   :  { %v1949_v15 = vpop.f32.mrb[50].mxu1  ;;  %v967_v19 = vadd.f32 %v2256_v20, %v966_v14 }
 0x234   :  { %v978_v17 = vadd.f32 %v1949_v15, %v2256_v20  ;;  %v969_v18 = vpop.f32.mrb[51].mxu1 }
 0x235   :  { %v970_v21 = vadd.f32 %v2256_v20, %v969_v18 }
 0x236   :  { %v1659_v22 = vpack.c.bf16 %v978_v17, %v975_v16 }
 0x237   :  { %v1654_v23 = vpack.c.bf16 %v970_v21, %v967_v19 }
 0x238   :  { %1715 = vst [vmem:[%s2423_s5 + $0xc8] sm:$0xff] %v1659_v22  }
 0x239   :  { %1714 = vst [vmem:[%s2423_s5 + $0xc0] sm:$0xff] %v1654_v23   ;;  %v1952_v24 = vpop.f32.mrb[52].mxu1 }
 0x23a   :  { %v982_v25 = vpop.f32.mrb[53].mxu1  ;;  %v991_v49 = vadd.f32 %v1952_v24, %v2256_v20 }
 0x23b   :  { %v1953_v26 = vpop.f32.mrb[54].mxu1  ;;  %v983_v29 = vadd.f32 %v2256_v20, %v982_v25 }
 0x23c   :  { %v994_v27 = vadd.f32 %v1953_v26, %v2256_v20  ;;  %v985_v28 = vpop.f32.mrb[55].mxu1 }
 0x23d   :  { %v986_v30 = vadd.f32 %v2256_v20, %v985_v28 }
 0x23e   :  { %v1669_v31 = vpack.c.bf16 %v994_v27, %v991_v49 }
 0x23f   :  { %v1664_v32 = vpack.c.bf16 %v986_v30, %v983_v29 }
 0x240   :  { %1717 = vst [vmem:[%s2423_s5 + $0xd8] sm:$0xff] %v1669_v31  }
 0x241   :  { %1716 = vst [vmem:[%s2423_s5 + $0xd0] sm:$0xff] %v1664_v32   ;;  %v1956_v33 = vpop.f32.mrb[56].mxu1 }
 0x242   :  { %v998_v34 = vpop.f32.mrb[57].mxu1  ;;  %v1007_v36 = vadd.f32 %v1956_v33, %v2256_v20 }
 0x243   :  { %v1957_v35 = vpop.f32.mrb[58].mxu1  ;;  %v999_v39 = vadd.f32 %v2256_v20, %v998_v34 }
 0x244   :  { %v1010_v37 = vadd.f32 %v1957_v35, %v2256_v20  ;;  %v1001_v38 = vpop.f32.mrb[59].mxu1 }
 0x245   :  { %v1002_v40 = vadd.f32 %v2256_v20, %v1001_v38 }
 0x246   :  { %v1679_v41 = vpack.c.bf16 %v1010_v37, %v1007_v36 }
 0x247   :  { %v1674_v42 = vpack.c.bf16 %v1002_v40, %v999_v39 }
 0x248   :  { %1719 = vst [vmem:[%s2423_s5 + $0xe8] sm:$0xff] %v1679_v41  }
 0x249   :  { %1718 = vst [vmem:[%s2423_s5 + $0xe0] sm:$0xff] %v1674_v42   ;;  %v1960_v43 = vpop.f32.mrb[60].mxu1 }
 0x24a   :  { %v1014_v44 = vpop.f32.mrb[61].mxu1  ;;  %v1023_v46 = vadd.f32 %v1960_v43, %v2256_v20 }
 0x24b   :  { %v1961_v45 = vpop.f32.mrb[62].mxu1  ;;  %v1015_v50 = vadd.f32 %v2256_v20, %v1014_v44 }
 0x24c   :  { %v1026_v47 = vadd.f32 %v1961_v45, %v2256_v20  ;;  %v1017_v48 = vpop.f32.mrb[63].mxu1 }
 0x24d   :  { %v1018_v51 = vadd.f32 %v2256_v20, %v1017_v48 }
 0x24e   :  { %v1689_v52 = vpack.c.bf16 %v1026_v47, %v1023_v46 }
 0x24f   :  { %v1684_v53 = vpack.c.bf16 %v1018_v51, %v1015_v50 }
 0x250   :  { %1721 = vst [vmem:[%s2423_s5 + $0xf8] sm:$0xff] %v1689_v52  }
 0x251   :  { %1720 = vst [vmem:[%s2423_s5 + $0xf0] sm:$0xff] %v1684_v53  }

// kernel: cannet_forward.7
= control target key start
LH: loop header
LB: loop body
LE: loop exit
PB: predicated region body
PF: predicated region fallthrough
CT: control target
= control target key end

     0   :  { %v2699_v0 = vmov 0   ;;  %s3479_s1 = inlined_call_operand.vmem [shape: bf16[384,128], index: 1, kind: input, shape index: {}]   ;;  %s3480_s0 = inlined_call_operand.vmem [shape: bf16[512,384], index: 0, kind: input, shape index: {}]   ;;  %s3481_s2 = inlined_call_operand.vmem [shape: f32[1,128], index: 2, kind: input, shape index: {}]   ;;  %s3482_s3 = inlined_call_operand.<no memory space> [shape: f32[1], index: 3, kind: input, shape index: {}]   ;;  %s3483_s4 = inlined_call_operand.vmem [shape: bf16[512,128], index: 4, kind: output, shape index: {}]  }
   0x1   :  { %858 = vmatprep.subr.bf16.mxu0 %v2699_v0  ;;  %2514 = vmatprep.subr.bf16.mxu1 %v2699_v0  ;;  %v2547_v1 = vld [vmem:[%s3479_s1] sm:$0xff]   ;;  %v2548_v2 = vld [vmem:[%s3479_s1 + $0x8] sm:$0xff]   ;;  %v2549_v3 = vld [vmem:[%s3479_s1 + $0x10] sm:$0xff]  }
   0x2   :  { %859 = vmatpush1.bf16.msra.mxu0 %v2547_v1  ;;  %2530 = vmatpush1.bf16.msra.mxu1 %v2547_v1  ;;  %v2550_v4 = vld [vmem:[%s3479_s1 + $0x18] sm:$0xff]   ;;  %v2551_v5 = vld [vmem:[%s3479_s1 + $0x20] sm:$0xff]   ;;  %v2552_v7 = vld [vmem:[%s3479_s1 + $0x28] sm:$0xff]  }
   0x3   :  { %860 = vmatprep.subr.bf16.mxu0 %v2699_v0  ;;  %2515 = vmatprep.subr.bf16.mxu1 %v2699_v0  ;;  %v2565_v6 = vld [vmem:[%s3480_s0 + $0x4] ss:$12 sps:$4 sm:$0xff]   ;;  %v2554_v10 = vld [vmem:[%s3479_s1 + $0x38] sm:$0xff]   ;;  %v2556_v12 = vld [vmem:[%s3479_s1 + $0x48] sm:$0xff]  }
   0x4   :  { %v2568_v8 = vld [vmem:[%s3480_s0 + $0x244] ss:$12 sps:$4 sm:$0xff]   ;;  %890 = vmatprep.mubr.bf16.mxu0 %v2565_v6  ;;  %v2558_v14 = vld [vmem:[%s3479_s1 + $0x58] sm:$0xff]   ;;  %v2560_v16 = vld [vmem:[%s3479_s1 + $0x68] sm:$0xff]  }
   0x5   :  { %1082 = vmatprep.mubr.bf16.mxu1 %v2568_v8  ;;  %v2553_v9 = vld [vmem:[%s3479_s1 + $0x30] sm:$0xff]   ;;  %v2555_v11 = vld [vmem:[%s3479_s1 + $0x40] sm:$0xff]   ;;  %v2562_v18 = vld [vmem:[%s3479_s1 + $0x78] sm:$0xff]  }
   0x6   :  { %861 = vmatpush1.bf16.msra.mxu0 %v2548_v2  ;;  %2531 = vmatpush1.bf16.msra.mxu1 %v2548_v2  ;;  %v2557_v13 = vld [vmem:[%s3479_s1 + $0x50] sm:$0xff]   ;;  %v2559_v15 = vld [vmem:[%s3479_s1 + $0x60] sm:$0xff]   ;;  %v2570_v22 = vld [vmem:[%s3480_s0 + $0x1c] ss:$12 sps:$4 sm:$0xff]  }
   0x7   :  { %862 = vmatprep.subr.bf16.mxu0 %v2699_v0  ;;  %2516 = vmatprep.subr.bf16.mxu1 %v2699_v0  ;;  %v2561_v17 = vld [vmem:[%s3479_s1 + $0x70] sm:$0xff]   ;;  %v2569_v19 = vld [vmem:[%s3479_s1 + $0x80] sm:$0xff]   ;;  %v2572_v23 = vld [vmem:[%s3480_s0 + $0x25c] ss:$12 sps:$4 sm:$0xff]  }
   0x8   :  { %v2563_v20 = vld [vmem:[%s3480_s0] ss:$12 sps:$4 sm:$0xff]   ;;  %v2583_v25 = vld [vmem:[%s3479_s1 + $0x90] sm:$0xff]   ;;  %v2574_v26 = vld [vmem:[%s3480_s0 + $0x18] ss:$12 sps:$4 sm:$0xff]  }
   0x9   :  { %v2566_v21 = vld [vmem:[%s3480_s0 + $0x240] ss:$12 sps:$4 sm:$0xff]   ;;  %v2575_v27 = vld [vmem:[%s3480_s0 + $0x258] ss:$12 sps:$4 sm:$0xff]   ;;  %v2581_v31 = vld [vmem:[%s3480_s0 + $0x30] ss:$12 sps:$4 sm:$0xff]  }
   0xa   :  { %863 = vmatpush1.bf16.msra.mxu0 %v2549_v3  ;;  %2532 = vmatpush1.bf16.msra.mxu1 %v2549_v3  ;;  %v2576_v24 = vld [vmem:[%s3479_s1 + $0x88] sm:$0xff]   ;;  %v2577_v28 = vld [vmem:[%s3480_s0 + $0x34] ss:$12 sps:$4 sm:$0xff]   ;;  %v2590_v30 = vld [vmem:[%s3479_s1 + $0x98] sm:$0xff]  }
   0xb   :  { %864 = vmatprep.subr.bf16.mxu0 %v2699_v0  ;;  %2517 = vmatprep.subr.bf16.mxu1 %v2699_v0  ;;  %v2579_v29 = vld [vmem:[%s3480_s0 + $0x274] ss:$12 sps:$4 sm:$0xff]   ;;  %v2582_v33 = vld [vmem:[%s3480_s0 + $0x270] ss:$12 sps:$4 sm:$0xff]   ;;  %v2584_v34 = vld [vmem:[%s3480_s0 + $0x4c] ss:$12 sps:$4 sm:$0xff]  }
   0xc   :  { %v2597_v32 = vld [vmem:[%s3479_s1 + $0xa0] sm:$0xff]   ;;  %v2586_v35 = vld [vmem:[%s3480_s0 + $0x28c] ss:$12 sps:$4 sm:$0xff]   ;;  %v2588_v37 = vld [vmem:[%s3480_s0 + $0x48] ss:$12 sps:$4 sm:$0xff]  }
   0xd   :  { %v2604_v36 = vld [vmem:[%s3479_s1 + $0xa8] sm:$0xff]   ;;  %v2591_v39 = vld [vmem:[%s3480_s0 + $0x64] ss:$12 sps:$4 sm:$0xff]   ;;  %v2618_v42 = vld [vmem:[%s3479_s1 + $0xb8] sm:$0xff]  }
   0xe   :  { %865 = vmatpush1.bf16.msra.mxu0 %v2550_v4  ;;  %2533 = vmatpush1.bf16.msra.mxu1 %v2550_v4  ;;  %v2589_v38 = vld [vmem:[%s3480_s0 + $0x288] ss:$12 sps:$4 sm:$0xff]   ;;  %v2593_v40 = vld [vmem:[%s3480_s0 + $0x2a4] ss:$12 sps:$4 sm:$0xff]   ;;  %v2595_v43 = vld [vmem:[%s3480_s0 + $0x60] ss:$12 sps:$4 sm:$0xff]  }
   0xf   :  { %866 = vmatprep.subr.bf16.mxu0 %v2699_v0  ;;  %2518 = vmatprep.subr.bf16.mxu1 %v2699_v0  ;;  %v2611_v41 = vld [vmem:[%s3479_s1 + $0xb0] sm:$0xff]   ;;  %v2596_v44 = vld [vmem:[%s3480_s0 + $0x2a0] ss:$12 sps:$4 sm:$0xff]   ;;  %v2598_v45 = vld [vmem:[%s3480_s0 + $0x7c] ss:$12 sps:$4 sm:$0xff]  }
  0x10   :  { %v2600_v46 = vld [vmem:[%s3480_s0 + $0x2bc] ss:$12 sps:$4 sm:$0xff]   ;;  %v2602_v47 = vld [vmem:[%s3480_s0 + $0x78] ss:$12 sps:$4 sm:$0xff]   ;;  %v2605_v49 = vld [vmem:[%s3480_s0 + $0x94] ss:$12 sps:$4 sm:$0xff]  }
  0x11   :  { %v2603_v48 = vld [vmem:[%s3480_s0 + $0x2b8] ss:$12 sps:$4 sm:$0xff]   ;;  %v2607_v50 = vld [vmem:[%s3480_s0 + $0x2d4] ss:$12 sps:$4 sm:$0xff]   ;;  %v2609_v51 = vld [vmem:[%s3480_s0 + $0x90] ss:$12 sps:$4 sm:$0xff]  }
  0x12   :  { %867 = vmatpush1.bf16.msra.mxu0 %v2551_v5  ;;  %2534 = vmatpush1.bf16.msra.mxu1 %v2551_v5  ;;  %v2610_v52 = vld [vmem:[%s3480_s0 + $0x2d0] ss:$12 sps:$4 sm:$0xff]   ;;  %v2612_v53 = vld [vmem:[%s3480_s0 + $0xac] ss:$12 sps:$4 sm:$0xff]   ;;  %v2616_v55 = vld [vmem:[%s3480_s0 + $0xa8] ss:$12 sps:$4 sm:$0xff]  }
  0x13   :  { %868 = vmatprep.subr.bf16.mxu0 %v2699_v0  ;;  %2519 = vmatprep.subr.bf16.mxu1 %v2699_v0  ;;  %v2614_v54 = vld [vmem:[%s3480_s0 + $0x2ec] ss:$12 sps:$4 sm:$0xff]   ;;  %v2617_v56 = vld [vmem:[%s3480_s0 + $0x2e8] ss:$12 sps:$4 sm:$0xff]   ;;  %v2619_v57 = vld [vmem:[%s3480_s0 + $0xc4] ss:$12 sps:$4 sm:$0xff]  }
  0x14   :  { %v2621_v58 = vld [vmem:[%s3480_s0 + $0x8] ss:$12 sps:$4 sm:$0xff]   ;;  %v2622_v59 = vld [vmem:[%s3480_s0 + $0xc0] ss:$12 sps:$4 sm:$0xff]   ;;  %v2626_v62 = vld [vmem:[%s3480_s0 + $0x38] ss:$12 sps:$4 sm:$0xff]  }
  0x15   :  { %v2623_v60 = vld [vmem:[%s3480_s0 + $0x20] ss:$12 sps:$4 sm:$0xff]   ;;  %v2624_v61 = vld [vmem:[%s3480_s0 + $0xdc] ss:$12 sps:$4 sm:$0xff]   ;;  %v2627_v63 = vld [vmem:[%s3480_s0 + $0xd8] ss:$12 sps:$4 sm:$0xff]  }
  0x16   :  { %869 = vmatpush1.bf16.msra.mxu0 %v2552_v7  ;;  %2535 = vmatpush1.bf16.msra.mxu1 %v2552_v7  ;;  %v2629_v1 = vld [vmem:[%s3480_s0 + $0xf4] ss:$12 sps:$4 sm:$0xff]   ;;  %v2632_v3 = vld [vmem:[%s3480_s0 + $0xf0] ss:$12 sps:$4 sm:$0xff]   ;;  %v2634_v5 = vld [vmem:[%s3480_s0 + $0x10c] ss:$12 sps:$4 sm:$0xff]  }
  0x17   :  { %870 = vmatprep.subr.bf16.mxu0 %v2699_v0  ;;  %2520 = vmatprep.subr.bf16.mxu1 %v2699_v0  ;;  %v2631_v2 = vld [vmem:[%s3480_s0 + $0x68] ss:$12 sps:$4 sm:$0xff]   ;;  %v2633_v4 = vld [vmem:[%s3480_s0 + $0x80] ss:$12 sps:$4 sm:$0xff]   ;;  %v2636_v6 = vld [vmem:[%s3480_s0 + $0x98] ss:$12 sps:$4 sm:$0xff]  }
  0x18   :  { %v2637_v7 = vld [vmem:[%s3480_s0 + $0x108] ss:$12 sps:$4 sm:$0xff]   ;;  %v2638_v8 = vld [vmem:[%s3480_s0 + $0xb0] ss:$12 sps:$4 sm:$0xff]  }
  0x1a   :  { %871 = vmatpush1.bf16.msra.mxu0 %v2553_v9  ;;  %2536 = vmatpush1.bf16.msra.mxu1 %v2553_v9  ;;  %v2639_v9 = vld [vmem:[%s3480_s0 + $0x124] ss:$12 sps:$4 sm:$0xff]  }
  0x1b   :  { %872 = vmatprep.subr.bf16.mxu0 %v2699_v0  ;;  %2521 = vmatprep.subr.bf16.mxu1 %v2699_v0 }
  0x1e   :  { %873 = vmatpush1.bf16.msra.mxu0 %v2554_v10  ;;  %2537 = vmatpush1.bf16.msra.mxu1 %v2554_v10  ;;  %v2641_v10 = vld [vmem:[%s3480_s0 + $0xc8] ss:$12 sps:$4 sm:$0xff]  }
  0x1f   :  { %874 = vmatprep.subr.bf16.mxu0 %v2699_v0  ;;  %2522 = vmatprep.subr.bf16.mxu1 %v2699_v0 }
  0x22   :  { %875 = vmatpush1.bf16.msra.mxu0 %v2555_v11  ;;  %2538 = vmatpush1.bf16.msra.mxu1 %v2555_v11  ;;  %v2642_v11 = vld [vmem:[%s3480_s0 + $0x120] ss:$12 sps:$4 sm:$0xff]  }
  0x23   :  { %876 = vmatprep.subr.bf16.mxu0 %v2699_v0  ;;  %2523 = vmatprep.subr.bf16.mxu1 %v2699_v0 }
  0x26   :  { %877 = vmatpush1.bf16.msra.mxu0 %v2556_v12  ;;  %2539 = vmatpush1.bf16.msra.mxu1 %v2556_v12  ;;  %v2643_v12 = vld [vmem:[%s3480_s0 + $0xe0] ss:$12 sps:$4 sm:$0xff]  }
  0x27   :  { %878 = vmatprep.subr.bf16.mxu0 %v2699_v0  ;;  %2524 = vmatprep.subr.bf16.mxu1 %v2699_v0 }
  0x2a   :  { %879 = vmatpush1.bf16.msra.mxu0 %v2557_v13  ;;  %2540 = vmatpush1.bf16.msra.mxu1 %v2557_v13  ;;  %v2644_v13 = vld [vmem:[%s3480_s0 + $0x13c] ss:$12 sps:$4 sm:$0xff]  }
  0x2b   :  { %880 = vmatprep.subr.bf16.mxu0 %v2699_v0  ;;  %2525 = vmatprep.subr.bf16.mxu1 %v2699_v0 }
  0x2e   :  { %881 = vmatpush1.bf16.msra.mxu0 %v2558_v14  ;;  %2541 = vmatpush1.bf16.msra.mxu1 %v2558_v14  ;;  %v2646_v14 = vld [vmem:[%s3480_s0 + $0xf8] ss:$12 sps:$4 sm:$0xff]  }
  0x2f   :  { %882 = vmatprep.subr.bf16.mxu0 %v2699_v0  ;;  %2526 = vmatprep.subr.bf16.mxu1 %v2699_v0 }
  0x32   :  { %883 = vmatpush1.bf16.msra.mxu0 %v2559_v15  ;;  %2542 = vmatpush1.bf16.msra.mxu1 %v2559_v15  ;;  %v2647_v15 = vld [vmem:[%s3480_s0 + $0x138] ss:$12 sps:$4 sm:$0xff]  }
  0x33   :  { %884 = vmatprep.subr.bf16.mxu0 %v2699_v0  ;;  %2527 = vmatprep.subr.bf16.mxu1 %v2699_v0 }
  0x36   :  { %885 = vmatpush1.bf16.msra.mxu0 %v2560_v16  ;;  %2543 = vmatpush1.bf16.msra.mxu1 %v2560_v16  ;;  %v2648_v16 = vld [vmem:[%s3480_s0 + $0x110] ss:$12 sps:$4 sm:$0xff]  }
  0x37   :  { %886 = vmatprep.subr.bf16.mxu0 %v2699_v0  ;;  %2528 = vmatprep.subr.bf16.mxu1 %v2699_v0 }
  0x3a   :  { %887 = vmatpush1.bf16.msra.mxu0 %v2561_v17  ;;  %2544 = vmatpush1.bf16.msra.mxu1 %v2561_v17  ;;  %v2649_v17 = vld [vmem:[%s3480_s0 + $0x154] ss:$12 sps:$4 sm:$0xff]  }
  0x3b   :  { %888 = vmatprep.subr.bf16.mxu0 %v2699_v0  ;;  %2529 = vmatprep.subr.bf16.mxu1 %v2699_v0  ;;  %v2628_v0 = vld [vmem:[%s3480_s0 + $0x50] ss:$12 sps:$4 sm:$0xff]  }
  0x3e   :  { %889 = vmatpush1.bf16.msra.mxu0 %v2562_v18  ;;  %2545 = vmatpush1.bf16.msra.mxu1 %v2562_v18  ;;  %v2651_v18 = vld [vmem:[%s3480_s0 + $0x128] ss:$12 sps:$4 sm:$0xff]  }
  0x3f   :  { %2434 = vmatprep.subr.bf16.mxu1 %v2569_v19 }
  0x41   :  { %891 = vmatmul.mubr.bf16.vlgmr.msra.gmra.mrb[0].mxu0 %v2563_v20  ;;  %1083 = vmatmul.mubr.bf16.vlgmr.msra.gmra.mrb[0].mxu1 %v2566_v21  ;;  %v2653_v20 = vld [vmem:[%s3480_s0 + $0x140] ss:$12 sps:$4 sm:$0xff]  }
  0x42   :  { %2435 = vmatpush3.bf16.msra.mxu1 %v2569_v19  ;;  %898 = vmatprep.mubr.bf16.mxu0 %v2570_v22  ;;  %v2652_v19 = vld [vmem:[%s3480_s0 + $0x150] ss:$12 sps:$4 sm:$0xff]   ;;  %v2654_v21 = vld [vmem:[%s3480_s0 + $0x16c] ss:$12 sps:$4 sm:$0xff]  }
  0x43   :  { %1090 = vmatprep.mubr.bf16.mxu1 %v2572_v23  ;;  %2436 = vmatprep.subr.bf16.mxu1 %v2576_v24  ;;  %v2656_v22 = vld [vmem:[%s3480_s0 + $0x158] ss:$12 sps:$4 sm:$0xff]   ;;  %v2657_v23 = vld [vmem:[%s3480_s0 + $0x168] ss:$12 sps:$4 sm:$0xff]  }
  0x46   :  { %2437 = vmatpush3.bf16.msra.mxu1 %v2576_v24  ;;  %v2658_v24 = vld [vmem:[%s3480_s0 + $0x170] ss:$12 sps:$4 sm:$0xff]  }
  0x47   :  { %2438 = vmatprep.subr.bf16.mxu1 %v2583_v25 }
  0x49   :  { %899 = vmatmul.mubr.bf16.gmra.mrb[4].mxu0 %v2574_v26  ;;  %1091 = vmatmul.mubr.bf16.gmra.mrb[4].mxu1 %v2575_v27  ;;  %v2661_v26 = vld [vmem:[%s3480_s0 + $0x188] ss:$12 sps:$4 sm:$0xff]   ;;  %v2662_v27 = vld [vmem:[%s3480_s0 + $0x180] ss:$12 sps:$4 sm:$0xff]  }
  0x4a   :  { %906 = vmatprep.mubr.bf16.mxu0 %v2577_v28  ;;  %1098 = vmatprep.mubr.bf16.mxu1 %v2579_v29  ;;  %v2663_v28 = vld [vmem:[%s3480_s0 + $0x1a0] ss:$12 sps:$4 sm:$0xff]   ;;  %v2664_v29 = vld [vmem:[%s3480_s0 + $0x19c] ss:$12 sps:$4 sm:$0xff]  }
  0x4b   :  { %2439 = vmatpush3.bf16.msra.mxu1 %v2583_v25  ;;  %v2659_v25 = vld [vmem:[%s3480_s0 + $0x184] ss:$12 sps:$4 sm:$0xff]  }
  0x4c   :  { %2440 = vmatprep.subr.bf16.mxu1 %v2590_v30 }
  0x4f   :  { %2441 = vmatpush3.bf16.msra.mxu1 %v2590_v30  ;;  %v2666_v30 = vld [vmem:[%s3480_s0 + $0x1b8] ss:$12 sps:$4 sm:$0xff]  }
  0x50   :  { %2442 = vmatprep.subr.bf16.mxu1 %v2597_v32 }
  0x51   :  { %907 = vmatmul.mubr.bf16.gmra.mrb[8].mxu0 %v2581_v31  ;;  %1099 = vmatmul.mubr.bf16.gmra.mrb[8].mxu1 %v2582_v33  ;;  %v2667_v31 = vld [vmem:[%s3480_s0 + $0x198] ss:$12 sps:$4 sm:$0xff]   ;;  %v2669_v33 = vld [vmem:[%s3480_s0 + $0x1b4] ss:$12 sps:$4 sm:$0xff]  }
  0x52   :  { %914 = vmatprep.mubr.bf16.mxu0 %v2584_v34  ;;  %1106 = vmatprep.mubr.bf16.mxu1 %v2586_v35  ;;  %v2671_v34 = vld [vmem:[%s3480_s0 + $0x1e8] ss:$12 sps:$4 sm:$0xff]   ;;  %v2672_v35 = vld [vmem:[%s3480_s0 + $0x1b0] ss:$12 sps:$4 sm:$0xff]  }
  0x53   :  { %2443 = vmatpush3.bf16.msra.mxu1 %v2597_v32  ;;  %v2668_v32 = vld [vmem:[%s3480_s0 + $0x1d0] ss:$12 sps:$4 sm:$0xff]  }
  0x54   :  { %2444 = vmatprep.subr.bf16.mxu1 %v2604_v36 }
  0x57   :  { %2445 = vmatpush3.bf16.msra.mxu1 %v2604_v36  ;;  %v2673_v36 = vld [vmem:[%s3480_s0 + $0x200] ss:$12 sps:$4 sm:$0xff]  }
  0x58   :  { %2446 = vmatprep.subr.bf16.mxu1 %v2611_v41 }
  0x59   :  { %915 = vmatmul.mubr.bf16.gmra.mrb[12].mxu0 %v2588_v37  ;;  %1107 = vmatmul.mubr.bf16.gmra.mrb[12].mxu1 %v2589_v38  ;;  %v2674_v37 = vld [vmem:[%s3480_s0 + $0x1cc] ss:$12 sps:$4 sm:$0xff]  }
  0x5a   :  { %922 = vmatprep.mubr.bf16.mxu0 %v2591_v39  ;;  %1114 = vmatprep.mubr.bf16.mxu1 %v2593_v40  ;;  %v2676_v38 = vld [vmem:[%s3480_s0 + $0x218] ss:$12 sps:$4 sm:$0xff]   ;;  %v2677_v39 = vld [vmem:[%s3480_s0 + $0x1c8] ss:$12 sps:$4 sm:$0xff]   ;;  %v2678_v40 = vld [vmem:[%s3480_s0 + $0x230] ss:$12 sps:$4 sm:$0xff]  }
  0x5b   :  { %2447 = vmatpush3.bf16.msra.mxu1 %v2611_v41  ;;  %v2679_v41 = vld [vmem:[%s3480_s0 + $0x1e4] ss:$12 sps:$4 sm:$0xff]  }
  0x5c   :  { %2448 = vmatprep.subr.bf16.mxu1 %v2618_v42 }
  0x5f   :  { %2449 = vmatpush3.bf16.msra.mxu1 %v2618_v42  ;;  %v2681_v42 = vld [vmem:[%s3480_s0 + $0x248] ss:$12 sps:$4 sm:$0xff]  }
  0x61   :  { %923 = vmatmul.mubr.bf16.gmra.mrb[16].mxu0 %v2595_v43  ;;  %1115 = vmatmul.mubr.bf16.gmra.mrb[16].mxu1 %v2596_v44  ;;  %v2682_v43 = vld [vmem:[%s3480_s0 + $0x1e0] ss:$12 sps:$4 sm:$0xff]  }
  0x62   :  { %930 = vmatprep.mubr.bf16.mxu0 %v2598_v45  ;;  %1122 = vmatprep.mubr.bf16.mxu1 %v2600_v46  ;;  %v2683_v44 = vld [vmem:[%s3480_s0 + $0x260] ss:$12 sps:$4 sm:$0xff]   ;;  %v2684_v45 = vld [vmem:[%s3480_s0 + $0x1fc] ss:$12 sps:$4 sm:$0xff]   ;;  %v2686_v46 = vld [vmem:[%s3480_s0 + $0x278] ss:$12 sps:$4 sm:$0xff]  }
  0x69   :  { %931 = vmatmul.mubr.bf16.gmra.mrb[20].mxu0 %v2602_v47  ;;  %1123 = vmatmul.mubr.bf16.gmra.mrb[20].mxu1 %v2603_v48  ;;  %v2687_v47 = vld [vmem:[%s3480_s0 + $0x1f8] ss:$12 sps:$4 sm:$0xff]   ;;  %v2688_v48 = vld [vmem:[%s3480_s0 + $0x290] ss:$12 sps:$4 sm:$0xff]  }
  0x6a   :  { %938 = vmatprep.mubr.bf16.mxu0 %v2605_v49  ;;  %1130 = vmatprep.mubr.bf16.mxu1 %v2607_v50  ;;  %v2689_v49 = vld [vmem:[%s3480_s0 + $0x214] ss:$12 sps:$4 sm:$0xff]  }
  0x6b   :  { %v2691_v50 = vld [vmem:[%s3480_s0 + $0x2a8] ss:$12 sps:$4 sm:$0xff]  }
  0x71   :  { %939 = vmatmul.mubr.bf16.gmra.mrb[24].mxu0 %v2609_v51  ;;  %1131 = vmatmul.mubr.bf16.gmra.mrb[24].mxu1 %v2610_v52  ;;  %v2692_v51 = vld [vmem:[%s3480_s0 + $0x210] ss:$12 sps:$4 sm:$0xff]   ;;  %v2693_v52 = vld [vmem:[%s3480_s0 + $0x2c0] ss:$12 sps:$4 sm:$0xff]  }
  0x72   :  { %946 = vmatprep.mubr.bf16.mxu0 %v2612_v53  ;;  %1138 = vmatprep.mubr.bf16.mxu1 %v2614_v54  ;;  %v2694_v53 = vld [vmem:[%s3480_s0 + $0x22c] ss:$12 sps:$4 sm:$0xff]  }
  0x73   :  { %v2696_v54 = vld [vmem:[%s3480_s0 + $0x2d8] ss:$12 sps:$4 sm:$0xff]  }
  0x79   :  { %947 = vmatmul.mubr.bf16.gmra.mrb[28].mxu0 %v2616_v55  ;;  %1139 = vmatmul.mubr.bf16.gmra.mrb[28].mxu1 %v2617_v56  ;;  %v2697_v55 = vld [vmem:[%s3480_s0 + $0x228] ss:$12 sps:$4 sm:$0xff]   ;;  %v2698_v56 = vld [vmem:[%s3480_s0 + $0x2f0] ss:$12 sps:$4 sm:$0xff]  }
  0x7a   :  { %954 = vmatprep.mubr.bf16.mxu0 %v2619_v57  ;;  %2450 = vmatprep.mubr.bf16.mxu1 %v2621_v58 }
  0x81   :  { %955 = vmatmul.mubr.bf16.gmra.mrb[32].mxu0 %v2622_v59  ;;  %2451 = vmatmul.mubr.bf16.vlgmr.msra.gmra.mrb[32].mxu1 %v2623_v60 }
  0x82   :  { %962 = vmatprep.mubr.bf16.mxu0 %v2624_v61  ;;  %2454 = vmatprep.mubr.bf16.mxu1 %v2626_v62 }
  0x89   :  { %963 = vmatmul.mubr.bf16.gmra.mrb[36].mxu0 %v2627_v63  ;;  %2455 = vmatmul.mubr.bf16.gmra.mrb[36].mxu1 %v2628_v0 }
  0x8a   :  { %970 = vmatprep.mubr.bf16.mxu0 %v2629_v1  ;;  %2458 = vmatprep.mubr.bf16.mxu1 %v2631_v2 }
  0x91   :  { %971 = vmatmul.mubr.bf16.gmra.mrb[40].mxu0 %v2632_v3  ;;  %2459 = vmatmul.mubr.bf16.gmra.mrb[40].mxu1 %v2633_v4 }
  0x92   :  { %978 = vmatprep.mubr.bf16.mxu0 %v2634_v5  ;;  %2462 = vmatprep.mubr.bf16.mxu1 %v2636_v6 }
  0x99   :  { %979 = vmatmul.mubr.bf16.gmra.mrb[44].mxu0 %v2637_v7  ;;  %2463 = vmatmul.mubr.bf16.gmra.mrb[44].mxu1 %v2638_v8 }
  0x9a   :  { %986 = vmatprep.mubr.bf16.mxu0 %v2639_v9  ;;  %2466 = vmatprep.mubr.bf16.mxu1 %v2641_v10 }
  0xa1   :  { %987 = vmatmul.mubr.bf16.gmra.mrb[48].mxu0 %v2642_v11  ;;  %2467 = vmatmul.mubr.bf16.gmra.mrb[48].mxu1 %v2643_v12 }
  0xa2   :  { %994 = vmatprep.mubr.bf16.mxu0 %v2644_v13  ;;  %2470 = vmatprep.mubr.bf16.mxu1 %v2646_v14 }
  0xa9   :  { %995 = vmatmul.mubr.bf16.gmra.mrb[52].mxu0 %v2647_v15  ;;  %2471 = vmatmul.mubr.bf16.gmra.mrb[52].mxu1 %v2648_v16 }
  0xaa   :  { %1002 = vmatprep.mubr.bf16.mxu0 %v2649_v17  ;;  %2474 = vmatprep.mubr.bf16.mxu1 %v2651_v18 }
  0xb1   :  { %1003 = vmatmul.mubr.bf16.gmra.mrb[56].mxu0 %v2652_v19  ;;  %2475 = vmatmul.mubr.bf16.gmra.mrb[56].mxu1 %v2653_v20 }
  0xb2   :  { %1010 = vmatprep.mubr.bf16.mxu0 %v2654_v21  ;;  %2478 = vmatprep.mubr.bf16.mxu1 %v2656_v22 }
  0xb9   :  { %1011 = vmatmul.mubr.bf16.gmra.mrb[60].mxu0 %v2657_v23  ;;  %2479 = vmatmul.mubr.bf16.gmra.mrb[60].mxu1 %v2658_v24 }
  0xba   :  { %1018 = vmatprep.mubr.bf16.mxu0 %v2659_v25  ;;  %2482 = vmatprep.mubr.bf16.mxu1 %v2661_v26 }
  0xc1   :  { %1019 = vmatmul.mubr.bf16.gmra.mrb[64].mxu0 %v2662_v27  ;;  %2483 = vmatmul.mubr.bf16.gmra.mrb[64].mxu1 %v2663_v28 }
  0xc2   :  { %1026 = vmatprep.mubr.bf16.mxu0 %v2664_v29  ;;  %2486 = vmatprep.mubr.bf16.mxu1 %v2666_v30 }
  0xc9   :  { %1027 = vmatmul.mubr.bf16.gmra.mrb[68].mxu0 %v2667_v31  ;;  %2487 = vmatmul.mubr.bf16.gmra.mrb[68].mxu1 %v2668_v32 }
  0xca   :  { %1034 = vmatprep.mubr.bf16.mxu0 %v2669_v33  ;;  %2490 = vmatprep.mubr.bf16.mxu1 %v2671_v34 }
  0xd1   :  { %1035 = vmatmul.mubr.bf16.gmra.mrb[72].mxu0 %v2672_v35  ;;  %2491 = vmatmul.mubr.bf16.gmra.mrb[72].mxu1 %v2673_v36 }
  0xd2   :  { %1042 = vmatprep.mubr.bf16.mxu0 %v2674_v37  ;;  %2494 = vmatprep.mubr.bf16.mxu1 %v2676_v38 }
  0xd9   :  { %1043 = vmatmul.mubr.bf16.gmra.mrb[76].mxu0 %v2677_v39  ;;  %2495 = vmatmul.mubr.bf16.gmra.mrb[76].mxu1 %v2678_v40 }
  0xda   :  { %1050 = vmatprep.mubr.bf16.mxu0 %v2679_v41  ;;  %2498 = vmatprep.mubr.bf16.mxu1 %v2681_v42 }
  0xe1   :  { %1051 = vmatmul.mubr.bf16.gmra.mrb[80].mxu0 %v2682_v43  ;;  %2499 = vmatmul.mubr.bf16.gmra.mrb[80].mxu1 %v2683_v44 }
  0xe2   :  { %1058 = vmatprep.mubr.bf16.mxu0 %v2684_v45  ;;  %2502 = vmatprep.mubr.bf16.mxu1 %v2686_v46 }
  0xe9   :  { %1059 = vmatmul.mubr.bf16.gmra.mrb[84].mxu0 %v2687_v47  ;;  %2503 = vmatmul.mubr.bf16.gmra.mrb[84].mxu1 %v2688_v48 }
  0xea   :  { %1066 = vmatprep.mubr.bf16.mxu0 %v2689_v49  ;;  %2506 = vmatprep.mubr.bf16.mxu1 %v2691_v50 }
  0xf1   :  { %1067 = vmatmul.mubr.bf16.gmra.mrb[88].mxu0 %v2692_v51  ;;  %2507 = vmatmul.mubr.bf16.gmra.mrb[88].mxu1 %v2693_v52 }
  0xf2   :  { %1074 = vmatprep.mubr.bf16.mxu0 %v2694_v53  ;;  %2510 = vmatprep.mubr.bf16.mxu1 %v2696_v54 }
  0xf9   :  { %1075 = vmatmul.mubr.bf16.gmra.mrb[92].mxu0 %v2697_v55  ;;  %2511 = vmatmul.mubr.bf16.gmra.mrb[92].mxu1 %v2698_v56 }
 0x114   :  { %v3117_v57 = vpop.f32.mrb[0].mxu0  ;;  %v3119_v58 = vpop.f32.mrb[0].mxu1 }
 0x115   :  { %v894_v59 = vpop.f32.mrb[1].mxu0  ;;  %v1086_v60 = vpop.f32.mrb[1].mxu1 }
 0x116   :  { %v3121_v61 = vpop.f32.mrb[2].mxu0  ;;  %v3123_v62 = vpop.f32.mrb[2].mxu1  ;;  %v3180_v59 = vld [vmem:[%s3481_s2] ss:$0 sm:$0xff] }
 0x117   :  { %v897_v63 = vpop.f32.mrb[3].mxu0  ;;  %v1089_v0 = vpop.f32.mrb[3].mxu1 }
 0x118   :  { %v893_v63 = vadd.f32 %v3180_v59, %v3117_v57 }
 0x11c   :  { %v900_v1 = vpop.f32.mrb[4].mxu0  ;;  %v3125_v2 = vpop.f32.mrb[4].mxu1 }
 0x11d   :  { %v902_v3 = vpop.f32.mrb[5].mxu0  ;;  %v1094_v4 = vpop.f32.mrb[5].mxu1  ;;  %v901_v60 = vadd.f32 %v3180_v59, %v900_v1 }
 0x11e   :  { %v903_v5 = vpop.f32.mrb[6].mxu0  ;;  %v3127_v6 = vpop.f32.mrb[6].mxu1  ;;  %v3190_v4 = vstv %s3482_s3 }
 0x11f   :  { %v905_v7 = vpop.f32.mrb[7].mxu0  ;;  %v1097_v8 = vpop.f32.mrb[7].mxu1 }
 0x120   :  { %v904_v7 = vadd.f32 %v3180_v59, %v903_v5 }
 0x124   :  { %v3129_v9 = vpop.f32.mrb[8].mxu0  ;;  %v3131_v10 = vpop.f32.mrb[8].mxu1 }
 0x125   :  { %v910_v11 = vpop.f32.mrb[9].mxu0  ;;  %v1102_v12 = vpop.f32.mrb[9].mxu1 }
 0x126   :  { %v3133_v13 = vpop.f32.mrb[10].mxu0  ;;  %v3135_v14 = vpop.f32.mrb[10].mxu1 }
 0x127   :  { %v913_v15 = vpop.f32.mrb[11].mxu0  ;;  %v1105_v16 = vpop.f32.mrb[11].mxu1 }
 0x128   :  { %v896_v15 = vadd.f32 %v3180_v59, %v3121_v61 }
 0x12c   :  { %v3137_v17 = vpop.f32.mrb[12].mxu0  ;;  %v3139_v18 = vpop.f32.mrb[12].mxu1 }
 0x12d   :  { %v918_v19 = vpop.f32.mrb[13].mxu0  ;;  %v1110_v20 = vpop.f32.mrb[13].mxu1 }
 0x12e   :  { %v3141_v21 = vpop.f32.mrb[14].mxu0  ;;  %v3143_v22 = vpop.f32.mrb[14].mxu1 }
 0x12f   :  { %v921_v23 = vpop.f32.mrb[15].mxu0  ;;  %v1113_v24 = vpop.f32.mrb[15].mxu1 }
 0x134   :  { %v3145_v25 = vpop.f32.mrb[16].mxu0  ;;  %v3147_v26 = vpop.f32.mrb[16].mxu1 }
 0x135   :  { %v926_v27 = vpop.f32.mrb[17].mxu0  ;;  %v1118_v28 = vpop.f32.mrb[17].mxu1 }
 0x136   :  { %v3149_v29 = vpop.f32.mrb[18].mxu0  ;;  %v3151_v30 = vpop.f32.mrb[18].mxu1 }
 0x137   :  { %v929_v31 = vpop.f32.mrb[19].mxu0  ;;  %v1121_v32 = vpop.f32.mrb[19].mxu1 }
 0x138   :  { %v917_v31 = vadd.f32 %v3180_v59, %v3137_v17  ;;  %v912_v17 = vadd.f32 %v3180_v59, %v3133_v13 }
 0x13c   :  { %v3153_v33 = vpop.f32.mrb[20].mxu0  ;;  %v3155_v34 = vpop.f32.mrb[20].mxu1 }
 0x13d   :  { %v934_v35 = vpop.f32.mrb[21].mxu0  ;;  %v1126_v36 = vpop.f32.mrb[21].mxu1 }
 0x13e   :  { %v3157_v37 = vpop.f32.mrb[22].mxu0  ;;  %v3159_v38 = vpop.f32.mrb[22].mxu1  ;;  %v909_v36 = vadd.f32 %v3180_v59, %v3129_v9 }
 0x13f   :  { %v937_v39 = vpop.f32.mrb[23].mxu0  ;;  %v1129_v40 = vpop.f32.mrb[23].mxu1 }
 0x144   :  { %v3161_v41 = vpop.f32.mrb[24].mxu0  ;;  %v3163_v42 = vpop.f32.mrb[24].mxu1 }
 0x145   :  { %v942_v43 = vpop.f32.mrb[25].mxu0  ;;  %v1134_v44 = vpop.f32.mrb[25].mxu1 }
 0x146   :  { %v3165_v45 = vpop.f32.mrb[26].mxu0  ;;  %v3167_v46 = vpop.f32.mrb[26].mxu1 }
 0x147   :  { %v945_v47 = vpop.f32.mrb[27].mxu0  ;;  %v1137_v48 = vpop.f32.mrb[27].mxu1 }
 0x148   :  { %v920_v48 = vadd.f32 %v3180_v59, %v3141_v21 }
 0x14c   :  { %v3169_v49 = vpop.f32.mrb[28].mxu0  ;;  %v3171_v50 = vpop.f32.mrb[28].mxu1 }
 0x14d   :  { %v950_v51 = vpop.f32.mrb[29].mxu0  ;;  %v1142_v52 = vpop.f32.mrb[29].mxu1 }
 0x14e   :  { %v3173_v53 = vpop.f32.mrb[30].mxu0  ;;  %v3175_v54 = vpop.f32.mrb[30].mxu1 }
 0x14f   :  { %v953_v55 = vpop.f32.mrb[31].mxu0  ;;  %v1145_v56 = vpop.f32.mrb[31].mxu1 }
 0x154   :  { %v3185_v0 = vpop.f32.mrb[32].mxu0  ;;  %v2452_v3 = vpop.f32.mrb[32].mxu1 }
 0x155   :  { %v1190_v8 = vadd.f32 %v2452_v3, %v901_v60  ;;  %v958_v11 = vpop.f32.mrb[33].mxu0  ;;  %v1181_v12 = vpop.f32.mrb[33].mxu1 }
 0x156   :  { %v1182_v1 = vadd.f32 %v1181_v12, %v893_v63  ;;  %v3195_v16 = vpop.f32.mrb[34].mxu0  ;;  %v2453_v57 = vpop.f32.mrb[34].mxu1 }
 0x157   :  { %v1504_v19 = vmul.f32 %v3190_v4, %v1190_v8  ;;  %v1193_v20 = vadd.f32 %v2453_v57, %v904_v7  ;;  %v961_v23 = vpop.f32.mrb[35].mxu0  ;;  %v1184_v24 = vpop.f32.mrb[35].mxu1  ;;  %vm1439_vm0 = vcmp.ge.f32.partialorder %v1190_v8, 0.0 }
 0x158   :  { %v1502_v27 = vmul.f32 %v3190_v4, %v1182_v1  ;;  %v1185_v28 = vadd.f32 %v1184_v24, %v896_v15  ;;  %vm1437_vm1 = vcmp.ge.f32.partialorder %v1182_v1, 0.0 }
 0x159   :  { %vm1440_vm2 = vcmp.ge.f32.partialorder %v1193_v20, 0.0  ;;  %v1505_v5 = vmul.f32 %v3190_v4, %v1193_v20  ;;  %v1568_v32 = vsel %vm1439_vm0, %v1190_v8, %v1504_v19 }
 0x15a   :  { %vm1438_vm3 = vcmp.ge.f32.partialorder %v1185_v28, 0.0  ;;  %v1503_v61 = vmul.f32 %v3190_v4, %v1185_v28  ;;  %v1566_v39 = vsel %vm1437_vm1, %v1182_v1, %v1502_v27  ;;  %v933_v1 = vadd.f32 %v3180_v59, %v3153_v33 }
 0x15b   :  { %v1569_v35 = vsel %vm1440_vm2, %v1193_v20, %v1505_v5  ;;  %v925_v20 = vadd.f32 %v3180_v59, %v3145_v25  ;;  %v928_v33 = vadd.f32 %v3180_v59, %v3149_v29 }
 0x15c   :  { %v2211_v40 = vpack.c.bf16 %v1569_v35, %v1568_v32  ;;  %v1567_v43 = vsel %vm1438_vm3, %v1185_v28, %v1503_v61  ;;  %v3205_v44 = vpop.f32.mrb[36].mxu0  ;;  %v2456_v47 = vpop.f32.mrb[36].mxu1  ;;  %v936_v61 = vadd.f32 %v3180_v59, %v3157_v37 }
 0x15d   :  { %v2206_v51 = vpack.c.bf16 %v1567_v43, %v1566_v39  ;;  %v1206_v52 = vadd.f32 %v2456_v47, %v917_v31  ;;  %v966_v55 = vpop.f32.mrb[37].mxu0  ;;  %v1197_v56 = vpop.f32.mrb[37].mxu1 }
 0x15e   :  { %2363 = vst [vmem:[%s3483_s4 + $0x8] sm:$0xff] %v2211_v40   ;;  %v1198_v9 = vadd.f32 %v1197_v56, %v909_v36  ;;  %v3214_v60 = vpop.f32.mrb[38].mxu0  ;;  %v2457_v63 = vpop.f32.mrb[38].mxu1  ;;  %v949_v56 = vadd.f32 %v3180_v59, %v3169_v49  ;;  %v944_v49 = vadd.f32 %v3180_v59, %v3165_v45 }
 0x15f   :  { %2207 = vst [vmem:[%s3483_s4] sm:$0xff] %v2206_v51   ;;  %v1508_v21 = vmul.f32 %v3190_v4, %v1206_v52  ;;  %v1209_v3 = vadd.f32 %v2457_v63, %v920_v48  ;;  %v969_v7 = vpop.f32.mrb[39].mxu0  ;;  %v1200_v8 = vpop.f32.mrb[39].mxu1  ;;  %vm1443_vm4 = vcmp.ge.f32.partialorder %v1206_v52, 0.0  ;;  %v941_v63 = vadd.f32 %v3180_v59, %v3161_v41 }
 0x160   :  { %v1506_v13 = vmul.f32 %v3190_v4, %v1198_v9  ;;  %v1201_v11 = vadd.f32 %v1200_v8, %v912_v17  ;;  %vm1441_vm5 = vcmp.ge.f32.partialorder %v1198_v9, 0.0 }
 0x161   :  { %vm1444_vm6 = vcmp.ge.f32.partialorder %v1209_v3, 0.0  ;;  %v1509_v12 = vmul.f32 %v3190_v4, %v1209_v3  ;;  %v1572_v57 = vsel %vm1443_vm4, %v1206_v52, %v1508_v21 }
 0x162   :  { %vm1442_vm7 = vcmp.ge.f32.partialorder %v1201_v11, 0.0  ;;  %v1507_v15 = vmul.f32 %v3190_v4, %v1201_v11  ;;  %v1570_v23 = vsel %vm1441_vm5, %v1198_v9, %v1506_v13 }
 0x163   :  { %v1573_v19 = vsel %vm1444_vm6, %v1209_v3, %v1509_v12 }
 0x164   :  { %v2221_v24 = vpack.c.bf16 %v1573_v19, %v1572_v57  ;;  %v1571_v27 = vsel %vm1442_vm7, %v1201_v11, %v1507_v15  ;;  %v3227_v28 = vpop.f32.mrb[40].mxu0  ;;  %v2460_v5 = vpop.f32.mrb[40].mxu1  ;;  %v952_v11 = vadd.f32 %v3180_v59, %v3173_v53 }
 0x165   :  { %v2216_v31 = vpack.c.bf16 %v1571_v27, %v1570_v23  ;;  %v1222_v32 = vadd.f32 %v2460_v5, %v933_v1  ;;  %v974_v35 = vpop.f32.mrb[41].mxu0  ;;  %v1213_v36 = vpop.f32.mrb[41].mxu1 }
 0x166   :  { %2365 = vst [vmem:[%s3483_s4 + $0x18] sm:$0xff] %v2221_v24   ;;  %v1214_v25 = vadd.f32 %v1213_v36, %v925_v20  ;;  %v3236_v39 = vpop.f32.mrb[42].mxu0  ;;  %v2461_v40 = vpop.f32.mrb[42].mxu1 }
 0x167   :  { %2364 = vst [vmem:[%s3483_s4 + $0x10] sm:$0xff] %v2216_v31   ;;  %v1512_v37 = vmul.f32 %v3190_v4, %v1222_v32  ;;  %v1225_v43 = vadd.f32 %v2461_v40, %v936_v61  ;;  %v977_v47 = vpop.f32.mrb[43].mxu0  ;;  %v1216_v48 = vpop.f32.mrb[43].mxu1  ;;  %vm1447_vm8 = vcmp.ge.f32.partialorder %v1222_v32, 0.0 }
 0x168   :  { %v1510_v29 = vmul.f32 %v3190_v4, %v1214_v25  ;;  %v1217_v51 = vadd.f32 %v1216_v48, %v928_v33  ;;  %vm1445_vm9 = vcmp.ge.f32.partialorder %v1214_v25, 0.0  ;;  %v957_v33 = vadd.f32 %v3180_v59, %v3185_v0 }
 0x169   :  { %vm1448_vm10 = vcmp.ge.f32.partialorder %v1225_v43, 0.0  ;;  %v1513_v52 = vmul.f32 %v3190_v4, %v1225_v43  ;;  %v1576_v17 = vsel %vm1447_vm8, %v1222_v32, %v1512_v37  ;;  %v965_v32 = vadd.f32 %v3180_v59, %v3205_v44 }
 0x16a   :  { %vm1446_vm11 = vcmp.ge.f32.partialorder %v1217_v51, 0.0  ;;  %v1511_v55 = vmul.f32 %v3190_v4, %v1217_v51  ;;  %v1574_v21 = vsel %vm1445_vm9, %v1214_v25, %v1510_v29  ;;  %v968_v48 = vadd.f32 %v3180_v59, %v3214_v60 }
 0x16b   :  { %v1577_v9 = vsel %vm1448_vm10, %v1225_v43, %v1513_v52  ;;  %v960_v44 = vadd.f32 %v3180_v59, %v3195_v16 }
 0x16c   :  { %v2231_v3 = vpack.c.bf16 %v1577_v9, %v1576_v17  ;;  %v1575_v7 = vsel %vm1446_vm11, %v1217_v51, %v1511_v55  ;;  %v980_v8 = vpop.f32.mrb[44].mxu0  ;;  %v2464_v13 = vpop.f32.mrb[44].mxu1 }
 0x16d   :  { %v2226_v12 = vpack.c.bf16 %v1575_v7, %v1574_v21  ;;  %v1238_v15 = vadd.f32 %v2464_v13, %v949_v56  ;;  %v982_v1 = vpop.f32.mrb[45].mxu0  ;;  %v1229_v57 = vpop.f32.mrb[45].mxu1 }
 0x16e   :  { %2367 = vst [vmem:[%s3483_s4 + $0x28] sm:$0xff] %v2231_v3   ;;  %v1230_v41 = vadd.f32 %v1229_v57, %v941_v63  ;;  %v983_v19 = vpop.f32.mrb[46].mxu0  ;;  %v2465_v20 = vpop.f32.mrb[46].mxu1  ;;  %v973_v1 = vadd.f32 %v3180_v59, %v3227_v28 }
 0x16f   :  { %2366 = vst [vmem:[%s3483_s4 + $0x20] sm:$0xff] %v2226_v12   ;;  %v1516_v53 = vmul.f32 %v3190_v4, %v1238_v15  ;;  %v1241_v23 = vadd.f32 %v2465_v20, %v952_v11  ;;  %v985_v24 = vpop.f32.mrb[47].mxu0  ;;  %v1232_v27 = vpop.f32.mrb[47].mxu1  ;;  %vm1451_vm12 = vcmp.ge.f32.partialorder %v1238_v15, 0.0  ;;  %v981_v11 = vadd.f32 %v3180_v59, %v980_v8 }
 0x170   :  { %v1514_v5 = vmul.f32 %v3190_v4, %v1230_v41  ;;  %v1233_v45 = vadd.f32 %v1232_v27, %v944_v49  ;;  %vm1449_vm13 = vcmp.ge.f32.partialorder %v1230_v41, 0.0 }
 0x171   :  { %vm1452_vm14 = vcmp.ge.f32.partialorder %v1241_v23, 0.0  ;;  %v1517_v61 = vmul.f32 %v3190_v4, %v1241_v23  ;;  %v1580_v35 = vsel %vm1451_vm12, %v1238_v15, %v1516_v53 }
 0x172   :  { %vm1450_vm15 = vcmp.ge.f32.partialorder %v1233_v45, 0.0  ;;  %v1515_v31 = vmul.f32 %v3190_v4, %v1233_v45  ;;  %v1578_v25 = vsel %vm1449_vm13, %v1230_v41, %v1514_v5 }
 0x173   :  { %v1581_v36 = vsel %vm1452_vm14, %v1241_v23, %v1517_v61  ;;  %v984_v23 = vadd.f32 %v3180_v59, %v983_v19  ;;  %v976_v61 = vadd.f32 %v3180_v59, %v3236_v39 }
 0x174   :  { %v2241_v40 = vpack.c.bf16 %v1581_v36, %v1580_v35  ;;  %v1579_v37 = vsel %vm1450_vm15, %v1233_v45, %v1515_v31  ;;  %v988_v43 = vpop.f32.mrb[48].mxu0  ;;  %v2468_v47 = vpop.f32.mrb[48].mxu1 }
 0x175   :  { %v2236_v29 = vpack.c.bf16 %v1579_v37, %v1578_v25  ;;  %v1254_v51 = vadd.f32 %v2468_v47, %v965_v32  ;;  %v990_v52 = vpop.f32.mrb[49].mxu0  ;;  %v1245_v55 = vpop.f32.mrb[49].mxu1 }
 0x176   :  { %2369 = vst [vmem:[%s3483_s4 + $0x38] sm:$0xff] %v2241_v40   ;;  %v1246_v0 = vadd.f32 %v1245_v55, %v957_v33  ;;  %v991_v56 = vpop.f32.mrb[50].mxu0  ;;  %v2469_v17 = vpop.f32.mrb[50].mxu1 }
 0x177   :  { %2368 = vst [vmem:[%s3483_s4 + $0x30] sm:$0xff] %v2236_v29   ;;  %v1520_v60 = vmul.f32 %v3190_v4, %v1254_v51  ;;  %v1257_v9 = vadd.f32 %v2469_v17, %v968_v48  ;;  %v993_v63 = vpop.f32.mrb[51].mxu0  ;;  %v1248_v21 = vpop.f32.mrb[51].mxu1  ;;  %vm1455_vm0 = vcmp.ge.f32.partialorder %v1254_v51, 0.0  ;;  %v989_v29 = vadd.f32 %v3180_v59, %v988_v43 }
 0x178   :  { %v1518_v3 = vmul.f32 %v3190_v4, %v1246_v0  ;;  %v1249_v16 = vadd.f32 %v1248_v21, %v960_v44  ;;  %vm1453_vm1 = vcmp.ge.f32.partialorder %v1246_v0, 0.0 }
 0x179   :  { %vm1456_vm2 = vcmp.ge.f32.partialorder %v1257_v9, 0.0  ;;  %v1521_v7 = vmul.f32 %v3190_v4, %v1257_v9  ;;  %v1584_v12 = vsel %vm1455_vm0, %v1254_v51, %v1520_v60 }
 0x17a   :  { %vm1454_vm3 = vcmp.ge.f32.partialorder %v1249_v16, 0.0  ;;  %v1519_v13 = vmul.f32 %v3190_v4, %v1249_v16  ;;  %v1582_v57 = vsel %vm1453_vm1, %v1246_v0, %v1518_v3  ;;  %v992_v3 = vadd.f32 %v3180_v59, %v991_v56 }
 0x17b   :  { %v1585_v15 = vsel %vm1456_vm2, %v1257_v9, %v1521_v7 }
 0x17c   :  { %v2251_v49 = vpack.c.bf16 %v1585_v15, %v1584_v12  ;;  %v1583_v41 = vsel %vm1454_vm3, %v1249_v16, %v1519_v13  ;;  %v996_v20 = vpop.f32.mrb[52].mxu0  ;;  %v2472_v53 = vpop.f32.mrb[52].mxu1 }
 0x17d   :  { %v2246_v24 = vpack.c.bf16 %v1583_v41, %v1582_v57  ;;  %v1270_v27 = vadd.f32 %v2472_v53, %v981_v11  ;;  %v998_v5 = vpop.f32.mrb[53].mxu0  ;;  %v1261_v45 = vpop.f32.mrb[53].mxu1  ;;  %v997_v37 = vadd.f32 %v3180_v59, %v996_v20 }
 0x17e   :  { %2371 = vst [vmem:[%s3483_s4 + $0x48] sm:$0xff] %v2251_v49   ;;  %v1262_v8 = vadd.f32 %v1261_v45, %v973_v1  ;;  %v999_v28 = vpop.f32.mrb[54].mxu0  ;;  %v2473_v31 = vpop.f32.mrb[54].mxu1 }
 0x17f   :  { %2370 = vst [vmem:[%s3483_s4 + $0x40] sm:$0xff] %v2246_v24   ;;  %v1524_v19 = vmul.f32 %v3190_v4, %v1270_v27  ;;  %v1273_v32 = vadd.f32 %v2473_v31, %v984_v23  ;;  %v1001_v35 = vpop.f32.mrb[55].mxu0  ;;  %v1264_v36 = vpop.f32.mrb[55].mxu1  ;;  %vm1459_vm4 = vcmp.ge.f32.partialorder %v1270_v27, 0.0  ;;  %v1000_v17 = vadd.f32 %v3180_v59, %v999_v28 }
 0x180   :  { %v1522_v33 = vmul.f32 %v3190_v4, %v1262_v8  ;;  %v1265_v39 = vadd.f32 %v1264_v36, %v976_v61  ;;  %vm1457_vm5 = vcmp.ge.f32.partialorder %v1262_v8, 0.0 }
 0x181   :  { %vm1460_vm6 = vcmp.ge.f32.partialorder %v1273_v32, 0.0  ;;  %v1525_v25 = vmul.f32 %v3190_v4, %v1273_v32  ;;  %v1588_v47 = vsel %vm1459_vm4, %v1270_v27, %v1524_v19 }
 0x182   :  { %vm1458_vm7 = vcmp.ge.f32.partialorder %v1265_v39, 0.0  ;;  %v1523_v40 = vmul.f32 %v3190_v4, %v1265_v39  ;;  %v1586_v51 = vsel %vm1457_vm5, %v1262_v8, %v1522_v33 }
 0x183   :  { %v1589_v48 = vsel %vm1460_vm6, %v1273_v32, %v1525_v25 }
 0x184   :  { %v2261_v52 = vpack.c.bf16 %v1589_v48, %v1588_v47  ;;  %v1587_v55 = vsel %vm1458_vm7, %v1265_v39, %v1523_v40  ;;  %v1004_v44 = vpop.f32.mrb[56].mxu0  ;;  %v2476_v0 = vpop.f32.mrb[56].mxu1 }
 0x185   :  { %v2256_v60 = vpack.c.bf16 %v1587_v55, %v1586_v51  ;;  %v1286_v9 = vadd.f32 %v2476_v0, %v997_v37  ;;  %v1006_v63 = vpop.f32.mrb[57].mxu0  ;;  %v1277_v21 = vpop.f32.mrb[57].mxu1  ;;  %v1005_v53 = vadd.f32 %v3180_v59, %v1004_v44 }
 0x186   :  { %2373 = vst [vmem:[%s3483_s4 + $0x58] sm:$0xff] %v2261_v52   ;;  %v1278_v16 = vadd.f32 %v1277_v21, %v989_v29  ;;  %v1007_v7 = vpop.f32.mrb[58].mxu0  ;;  %v2477_v43 = vpop.f32.mrb[58].mxu1 }
 0x187   :  { %2372 = vst [vmem:[%s3483_s4 + $0x50] sm:$0xff] %v2256_v60   ;;  %v1528_v13 = vmul.f32 %v3190_v4, %v1286_v9  ;;  %v1289_v11 = vadd.f32 %v2477_v43, %v1000_v17  ;;  %v1009_v12 = vpop.f32.mrb[59].mxu0  ;;  %v1280_v15 = vpop.f32.mrb[59].mxu1  ;;  %vm1463_vm8 = vcmp.ge.f32.partialorder %v1286_v9, 0.0  ;;  %v1008_v19 = vadd.f32 %v3180_v59, %v1007_v7 }
 0x188   :  { %v1526_v1 = vmul.f32 %v3190_v4, %v1278_v16  ;;  %v1281_v56 = vadd.f32 %v1280_v15, %v992_v3  ;;  %vm1461_vm9 = vcmp.ge.f32.partialorder %v1278_v16, 0.0 }
 0x189   :  { %vm1464_vm10 = vcmp.ge.f32.partialorder %v1289_v11, 0.0  ;;  %v1529_v57 = vmul.f32 %v3190_v4, %v1289_v11  ;;  %v1592_v41 = vsel %vm1463_vm8, %v1286_v9, %v1528_v13 }
 0x18a   :  { %vm1462_vm11 = vcmp.ge.f32.partialorder %v1281_v56, 0.0  ;;  %v1527_v49 = vmul.f32 %v3190_v4, %v1281_v56  ;;  %v1590_v23 = vsel %vm1461_vm9, %v1278_v16, %v1526_v1 }
 0x18b   :  { %v1593_v20 = vsel %vm1464_vm10, %v1289_v11, %v1529_v57 }
 0x18c   :  { %v2271_v24 = vpack.c.bf16 %v1593_v20, %v1592_v41  ;;  %v1591_v27 = vsel %vm1462_vm11, %v1281_v56, %v1527_v49  ;;  %v1012_v5 = vpop.f32.mrb[60].mxu0  ;;  %v2480_v45 = vpop.f32.mrb[60].mxu1 }
 0x18d   :  { %v2266_v61 = vpack.c.bf16 %v1591_v27, %v1590_v23  ;;  %v1013_v8 = vadd.f32 %v3180_v59, %v1012_v5  ;;  %v1014_v28 = vpop.f32.mrb[61].mxu0  ;;  %v1293_v31 = vpop.f32.mrb[61].mxu1 }
 0x18e   :  { %2375 = vst [vmem:[%s3483_s4 + $0x68] sm:$0xff] %v2271_v24   ;;  %v1294_v32 = vadd.f32 %v1293_v31, %v1005_v53  ;;  %v1015_v35 = vpop.f32.mrb[62].mxu0  ;;  %v2481_v36 = vpop.f32.mrb[62].mxu1 }
 0x18f   :  { %2374 = vst [vmem:[%s3483_s4 + $0x60] sm:$0xff] %v2266_v61   ;;  %v1302_v33 = vadd.f32 %v2480_v45, %v1013_v8  ;;  %v1016_v39 = vadd.f32 %v3180_v59, %v1015_v35  ;;  %v1017_v25 = vpop.f32.mrb[63].mxu0  ;;  %v1296_v40 = vpop.f32.mrb[63].mxu1 }
 0x190   :  { %v1530_v37 = vmul.f32 %v3190_v4, %v1294_v32  ;;  %v1297_v47 = vadd.f32 %v1296_v40, %v1008_v19  ;;  %vm1465_vm12 = vcmp.ge.f32.partialorder %v1294_v32, 0.0 }
 0x191   :  { %v1532_v48 = vmul.f32 %v3190_v4, %v1302_v33  ;;  %v1305_v29 = vadd.f32 %v2481_v36, %v1016_v39  ;;  %vm1467_vm13 = vcmp.ge.f32.partialorder %v1302_v33, 0.0 }
 0x192   :  { %vm1466_vm14 = vcmp.ge.f32.partialorder %v1297_v47, 0.0  ;;  %v1531_v51 = vmul.f32 %v3190_v4, %v1297_v47  ;;  %v1594_v55 = vsel %vm1465_vm12, %v1294_v32, %v1530_v37 }
 0x193   :  { %vm1468_vm15 = vcmp.ge.f32.partialorder %v1305_v29, 0.0  ;;  %v1533_v52 = vmul.f32 %v3190_v4, %v1305_v29  ;;  %v1596_v60 = vsel %vm1467_vm13, %v1302_v33, %v1532_v48 }
 0x194   :  { %v1595_v44 = vsel %vm1466_vm14, %v1297_v47, %v1531_v51  ;;  %v1020_v0 = vpop.f32.mrb[64].mxu0  ;;  %v2484_v17 = vpop.f32.mrb[64].mxu1 }
 0x195   :  { %v1597_v9 = vsel %vm1468_vm15, %v1305_v29, %v1533_v52  ;;  %v2276_v63 = vpack.c.bf16 %v1595_v44, %v1594_v55  ;;  %v1021_v21 = vadd.f32 %v3180_v59, %v1020_v0  ;;  %v1022_v3 = vpop.f32.mrb[65].mxu0  ;;  %v1309_v16 = vpop.f32.mrb[65].mxu1 }
 0x196   :  { %v2281_v7 = vpack.c.bf16 %v1597_v9, %v1596_v60  ;;  %v1023_v43 = vpop.f32.mrb[66].mxu0  ;;  %v2485_v13 = vpop.f32.mrb[66].mxu1 }
 0x197   :  { %2376 = vst [vmem:[%s3483_s4 + $0x70] sm:$0xff] %v2276_v63   ;;  %v1310_v11 = vadd.f32 %v1309_v16, %v1021_v21  ;;  %v1024_v12 = vadd.f32 %v3180_v59, %v1023_v43  ;;  %v1025_v15 = vpop.f32.mrb[67].mxu0  ;;  %v1312_v1 = vpop.f32.mrb[67].mxu1 }
 0x198   :  { %2377 = vst [vmem:[%s3483_s4 + $0x78] sm:$0xff] %v2281_v7  }
 0x199   :  { %v1534_v56 = vmul.f32 %v3190_v4, %v1310_v11  ;;  %v1313_v57 = vadd.f32 %v1312_v1, %v1024_v12  ;;  %vm1469_vm0 = vcmp.ge.f32.partialorder %v1310_v11, 0.0 }
 0x19b   :  { %vm1470_vm1 = vcmp.ge.f32.partialorder %v1313_v57, 0.0  ;;  %v1535_v49 = vmul.f32 %v3190_v4, %v1313_v57  ;;  %v1598_v53 = vsel %vm1469_vm0, %v1310_v11, %v1534_v56 }
 0x19c   :  { %v1028_v41 = vpop.f32.mrb[68].mxu0  ;;  %v2488_v20 = vpop.f32.mrb[68].mxu1 }
 0x19d   :  { %v1599_v23 = vsel %vm1470_vm1, %v1313_v57, %v1535_v49  ;;  %v1029_v24 = vadd.f32 %v3180_v59, %v1028_v41  ;;  %v1030_v27 = vpop.f32.mrb[69].mxu0  ;;  %v1325_v5 = vpop.f32.mrb[69].mxu1 }
 0x19e   :  { %v2286_v45 = vpack.c.bf16 %v1599_v23, %v1598_v53  ;;  %v1031_v61 = vpop.f32.mrb[70].mxu0  ;;  %v2489_v8 = vpop.f32.mrb[70].mxu1  ;;  %v1093_v27 = vadd.f32 %v3180_v59, %v3125_v2  ;;  %v1096_v2 = vadd.f32 %v3180_v59, %v3127_v6 }
 0x19f   :  { %v1318_v28 = vadd.f32 %v2484_v17, %v1029_v24  ;;  %v1032_v31 = vadd.f32 %v3180_v59, %v1031_v61  ;;  %v1033_v19 = vpop.f32.mrb[71].mxu0  ;;  %v1328_v32 = vpop.f32.mrb[71].mxu1 }
 0x1a0   :  { %2378 = vst [vmem:[%s3483_s4 + $0x80] sm:$0xff] %v2286_v45   ;;  %v1088_v45 = vadd.f32 %v3180_v59, %v3123_v62  ;;  %v1104_v62 = vadd.f32 %v3180_v59, %v3135_v14 }
 0x1a1   :  { %v1536_v35 = vmul.f32 %v3190_v4, %v1318_v28  ;;  %v1321_v36 = vadd.f32 %v2485_v13, %v1032_v31  ;;  %vm1471_vm2 = vcmp.ge.f32.partialorder %v1318_v28, 0.0 }
 0x1a3   :  { %vm1472_vm3 = vcmp.ge.f32.partialorder %v1321_v36, 0.0  ;;  %v1537_v33 = vmul.f32 %v3190_v4, %v1321_v36  ;;  %v1600_v40 = vsel %vm1471_vm2, %v1318_v28, %v1536_v35 }
 0x1a4   :  { %v1036_v39 = vpop.f32.mrb[72].mxu0  ;;  %v3342_v25 = vpop.f32.mrb[72].mxu1 }
 0x1a5   :  { %v1601_v37 = vsel %vm1472_vm3, %v1321_v36, %v1537_v33  ;;  %v1037_v47 = vadd.f32 %v3180_v59, %v1036_v39  ;;  %v1038_v48 = vpop.f32.mrb[73].mxu0  ;;  %v1341_v29 = vpop.f32.mrb[73].mxu1  ;;  %v1101_v33 = vadd.f32 %v3180_v59, %v3131_v10 }
 0x1a6   :  { %v2291_v51 = vpack.c.bf16 %v1601_v37, %v1600_v40  ;;  %v1039_v52 = vpop.f32.mrb[74].mxu0  ;;  %v3345_v55 = vpop.f32.mrb[74].mxu1 }
 0x1a7   :  { %v1326_v44 = vadd.f32 %v1325_v5, %v1037_v47  ;;  %v1040_v0 = vadd.f32 %v3180_v59, %v1039_v52  ;;  %v1041_v17 = vpop.f32.mrb[75].mxu0  ;;  %v1344_v60 = vpop.f32.mrb[75].mxu1 }
 0x1a8   :  { %2379 = vst [vmem:[%s3483_s4 + $0x88] sm:$0xff] %v2291_v51  }
 0x1a9   :  { %v1538_v9 = vmul.f32 %v3190_v4, %v1326_v44  ;;  %v1329_v63 = vadd.f32 %v1328_v32, %v1040_v0  ;;  %vm1473_vm4 = vcmp.ge.f32.partialorder %v1326_v44, 0.0 }
 0x1ab   :  { %vm1474_vm5 = vcmp.ge.f32.partialorder %v1329_v63, 0.0  ;;  %v1539_v21 = vmul.f32 %v3190_v4, %v1329_v63  ;;  %v1602_v7 = vsel %vm1473_vm4, %v1326_v44, %v1538_v9 }
 0x1ac   :  { %v1044_v3 = vpop.f32.mrb[76].mxu0  ;;  %v3353_v16 = vpop.f32.mrb[76].mxu1 }
 0x1ad   :  { %v1603_v43 = vsel %vm1474_vm5, %v1329_v63, %v1539_v21  ;;  %v1045_v13 = vadd.f32 %v3180_v59, %v1044_v3  ;;  %v1046_v11 = vpop.f32.mrb[77].mxu0  ;;  %v3356_v12 = vpop.f32.mrb[77].mxu1  ;;  %v1112_v63 = vadd.f32 %v3180_v59, %v3143_v22 }
 0x1ae   :  { %v2296_v15 = vpack.c.bf16 %v1603_v43, %v1602_v7  ;;  %v1047_v1 = vpop.f32.mrb[78].mxu0  ;;  %v3358_v56 = vpop.f32.mrb[78].mxu1 }
 0x1af   :  { %v1334_v57 = vadd.f32 %v2488_v20, %v1045_v13  ;;  %v1048_v49 = vadd.f32 %v3180_v59, %v1047_v1  ;;  %v1049_v41 = vpop.f32.mrb[79].mxu0  ;;  %v3361_v53 = vpop.f32.mrb[79].mxu1  ;;  %v1085_v20 = vadd.f32 %v3180_v59, %v3119_v58 }
 0x1b0   :  { %2380 = vst [vmem:[%s3483_s4 + $0x90] sm:$0xff] %v2296_v15  }
 0x1b1   :  { %v1540_v23 = vmul.f32 %v3190_v4, %v1334_v57  ;;  %v1337_v24 = vadd.f32 %v2489_v8, %v1048_v49  ;;  %vm1475_vm6 = vcmp.ge.f32.partialorder %v1334_v57, 0.0 }
 0x1b3   :  { %vm1476_vm7 = vcmp.ge.f32.partialorder %v1337_v24, 0.0  ;;  %v1541_v5 = vmul.f32 %v3190_v4, %v1337_v24  ;;  %v1604_v31 = vsel %vm1475_vm6, %v1334_v57, %v1540_v23 }
 0x1b4   :  { %v1052_v61 = vpop.f32.mrb[80].mxu0  ;;  %v2500_v28 = vpop.f32.mrb[80].mxu1 }
 0x1b5   :  { %v1605_v19 = vsel %vm1476_vm7, %v1337_v24, %v1541_v5  ;;  %v1053_v32 = vadd.f32 %v3180_v59, %v1052_v61  ;;  %v1382_v8 = vadd.f32 %v2500_v28, %v1093_v27  ;;  %v1054_v35 = vpop.f32.mrb[81].mxu0  ;;  %v1373_v36 = vpop.f32.mrb[81].mxu1  ;;  %v1117_v61 = vadd.f32 %v3180_v59, %v3147_v26 }
 0x1b6   :  { %v2301_v39 = vpack.c.bf16 %v1605_v19, %v1604_v31  ;;  %v1374_v58 = vadd.f32 %v1373_v36, %v1085_v20  ;;  %v1055_v40 = vpop.f32.mrb[82].mxu0  ;;  %v2501_v37 = vpop.f32.mrb[82].mxu1  ;;  %v1120_v35 = vadd.f32 %v3180_v59, %v3151_v30  ;;  %v1125_v36 = vadd.f32 %v3180_v59, %v3155_v34 }
 0x1b7   :  { %v1342_v47 = vadd.f32 %v1341_v29, %v1053_v32  ;;  %vm1487_vm8 = vcmp.ge.f32.partialorder %v1382_v8, 0.0  ;;  %v1056_v48 = vadd.f32 %v3180_v59, %v1055_v40  ;;  %v1057_v51 = vpop.f32.mrb[83].mxu0  ;;  %v1376_v52 = vpop.f32.mrb[83].mxu1  ;;  %v1552_v6 = vmul.f32 %v3190_v4, %v1382_v8 }
 0x1b8   :  { %2381 = vst [vmem:[%s3483_s4 + $0x98] sm:$0xff] %v2301_v39   ;;  %v1550_v10 = vmul.f32 %v3190_v4, %v1374_v58  ;;  %v1385_v44 = vadd.f32 %v2501_v37, %v1096_v2  ;;  %v1377_v0 = vadd.f32 %v1376_v52, %v1088_v45  ;;  %vm1485_vm10 = vcmp.ge.f32.partialorder %v1374_v58, 0.0 }
 0x1b9   :  { %vm1477_vm9 = vcmp.ge.f32.partialorder %v1342_v47, 0.0  ;;  %v1542_v17 = vmul.f32 %v3190_v4, %v1342_v47  ;;  %v1345_v14 = vadd.f32 %v1344_v60, %v1056_v48  ;;  %v1109_v29 = vadd.f32 %v3180_v59, %v3139_v18 }
 0x1ba   :  { %vm1488_vm11 = vcmp.ge.f32.partialorder %v1385_v44, 0.0  ;;  %v1553_v9 = vmul.f32 %v3190_v4, %v1385_v44  ;;  %vm1486_vm12 = vcmp.ge.f32.partialorder %v1377_v0, 0.0  ;;  %v1551_v3 = vmul.f32 %v3190_v4, %v1377_v0 }
 0x1bb   :  { %vm1478_vm13 = vcmp.ge.f32.partialorder %v1345_v14, 0.0  ;;  %v1543_v21 = vmul.f32 %v3190_v4, %v1345_v14  ;;  %v1606_v7 = vsel %vm1477_vm9, %v1342_v47, %v1542_v17  ;;  %v1616_v43 = vsel %vm1487_vm8, %v1382_v8, %v1552_v6 }
 0x1bc   :  { %v1614_v13 = vsel %vm1485_vm10, %v1374_v58, %v1550_v10  ;;  %v1617_v60 = vsel %vm1488_vm11, %v1385_v44, %v1553_v9  ;;  %v1060_v11 = vpop.f32.mrb[84].mxu0  ;;  %v2504_v15 = vpop.f32.mrb[84].mxu1  ;;  %v1615_v57 = vsel %vm1486_vm12, %v1377_v0, %v1551_v3  ;;  %v1128_v30 = vadd.f32 %v3180_v59, %v3159_v38 }
 0x1bd   :  { %v1607_v18 = vsel %vm1478_vm13, %v1345_v14, %v1543_v21  ;;  %v2331_v1 = vpack.c.bf16 %v1617_v60, %v1616_v43  ;;  %v1061_v49 = vadd.f32 %v3180_v59, %v1060_v11  ;;  %v1062_v41 = vpop.f32.mrb[85].mxu0  ;;  %v1389_v23 = vpop.f32.mrb[85].mxu1  ;;  %v2326_v24 = vpack.c.bf16 %v1615_v57, %v1614_v13 }
 0x1be   :  { %v2306_v22 = vpack.c.bf16 %v1607_v18, %v1606_v7  ;;  %v1398_v27 = vadd.f32 %v2504_v15, %v1109_v29  ;;  %v1390_v5 = vadd.f32 %v1389_v23, %v1101_v33  ;;  %v1063_v20 = vpop.f32.mrb[86].mxu0  ;;  %v2505_v45 = vpop.f32.mrb[86].mxu1  ;;  %v1133_v21 = vadd.f32 %v3180_v59, %v3163_v42 }
 0x1bf   :  { %2387 = vst [vmem:[%s3483_s4 + $0xc8] sm:$0xff] %v2331_v1   ;;  %v1350_v28 = vadd.f32 %v3342_v25, %v1061_v49  ;;  %v1064_v31 = vadd.f32 %v3180_v59, %v1063_v20  ;;  %v1401_v19 = vadd.f32 %v2505_v45, %v1112_v63  ;;  %v1065_v32 = vpop.f32.mrb[87].mxu0  ;;  %v1392_v8 = vpop.f32.mrb[87].mxu1  ;;  %2386 = vst [vmem:[%s3483_s4 + $0xc0] sm:$0xff] %v2326_v24  }
 0x1c0   :  { %2382 = vst [vmem:[%s3483_s4 + $0xa0] sm:$0xff] %v2306_v22   ;;  %vm1491_vm14 = vcmp.ge.f32.partialorder %v1398_v27, 0.0  ;;  %v1556_v26 = vmul.f32 %v3190_v4, %v1398_v27  ;;  %v1554_v34 = vmul.f32 %v3190_v4, %v1390_v5  ;;  %v1393_v39 = vadd.f32 %v1392_v8, %v1104_v62 }
 0x1c1   :  { %vm1479_vm15 = vcmp.ge.f32.partialorder %v1350_v28, 0.0  ;;  %v1544_v25 = vmul.f32 %v3190_v4, %v1350_v28  ;;  %v1353_v2 = vadd.f32 %v3345_v55, %v1064_v31  ;;  %vm1492_vm0 = vcmp.ge.f32.partialorder %v1401_v19, 0.0 }
 0x1c2   :  { %v1557_v33 = vmul.f32 %v3190_v4, %v1401_v19  ;;  %v1620_v58 = vsel %vm1491_vm14, %v1398_v27, %v1556_v26  ;;  %vm1489_vm1 = vcmp.ge.f32.partialorder %v1390_v5, 0.0  ;;  %vm1490_vm3 = vcmp.ge.f32.partialorder %v1393_v39, 0.0 }
 0x1c3   :  { %vm1480_vm2 = vcmp.ge.f32.partialorder %v1353_v2, 0.0  ;;  %v1545_v40 = vmul.f32 %v3190_v4, %v1353_v2  ;;  %v1608_v37 = vsel %vm1479_vm15, %v1350_v28, %v1544_v25  ;;  %v1555_v48 = vmul.f32 %v3190_v4, %v1393_v39 }
 0x1c4   :  { %v1621_v47 = vsel %vm1492_vm0, %v1401_v19, %v1557_v33  ;;  %v1068_v55 = vpop.f32.mrb[88].mxu0  ;;  %v2508_v51 = vpop.f32.mrb[88].mxu1  ;;  %v1618_v62 = vsel %vm1489_vm1, %v1390_v5, %v1554_v34  ;;  %v1141_v18 = vadd.f32 %v3180_v59, %v3171_v50  ;;  %v1136_v25 = vadd.f32 %v3180_v59, %v3167_v46 }
 0x1c5   :  { %v1609_v52 = vsel %vm1480_vm2, %v1353_v2, %v1545_v40  ;;  %v2341_v6 = vpack.c.bf16 %v1621_v47, %v1620_v58  ;;  %v1069_v38 = vadd.f32 %v3180_v59, %v1068_v55  ;;  %v1414_v10 = vadd.f32 %v2508_v51, %v1125_v36  ;;  %v1070_v44 = vpop.f32.mrb[89].mxu0  ;;  %v1405_v0 = vpop.f32.mrb[89].mxu1 }
 0x1c6   :  { %v2311_v17 = vpack.c.bf16 %v1609_v52, %v1608_v37  ;;  %v1619_v14 = vsel %vm1490_vm3, %v1393_v39, %v1555_v48  ;;  %v1406_v29 = vadd.f32 %v1405_v0, %v1117_v61  ;;  %v1071_v9 = vpop.f32.mrb[90].mxu0  ;;  %v2509_v63 = vpop.f32.mrb[90].mxu1 }
 0x1c7   :  { %2389 = vst [vmem:[%s3483_s4 + $0xd8] sm:$0xff] %v2341_v6   ;;  %v2336_v3 = vpack.c.bf16 %v1619_v14, %v1618_v62  ;;  %v1358_v7 = vadd.f32 %v3356_v12, %v1069_v38  ;;  %v1560_v43 = vmul.f32 %v3190_v4, %v1414_v10  ;;  %v1073_v13 = vpop.f32.mrb[91].mxu0  ;;  %v1408_v60 = vpop.f32.mrb[91].mxu1  ;;  %vm1495_vm4 = vcmp.ge.f32.partialorder %v1414_v10, 0.0 }
 0x1c8   :  { %2383 = vst [vmem:[%s3483_s4 + $0xa8] sm:$0xff] %v2311_v17   ;;  %v1558_v11 = vmul.f32 %v3190_v4, %v1406_v29  ;;  %v1072_v42 = vadd.f32 %v3180_v59, %v1071_v9  ;;  %v1417_v15 = vadd.f32 %v2509_v63, %v1128_v30  ;;  %v1144_v12 = vadd.f32 %v3180_v59, %v3175_v54 }
 0x1c9   :  { %2388 = vst [vmem:[%s3483_s4 + $0xd0] sm:$0xff] %v2336_v3   ;;  %vm1493_vm5 = vcmp.ge.f32.partialorder %v1406_v29, 0.0  ;;  %v1409_v1 = vadd.f32 %v1408_v60, %v1120_v35  ;;  %v1546_v57 = vmul.f32 %v3190_v4, %v1358_v7  ;;  %vm1481_vm7 = vcmp.ge.f32.partialorder %v1358_v7, 0.0 }
 0x1ca   :  { %v1361_v49 = vadd.f32 %v3361_v53, %v1072_v42  ;;  %vm1496_vm6 = vcmp.ge.f32.partialorder %v1417_v15, 0.0  ;;  %v1561_v41 = vmul.f32 %v3190_v4, %v1417_v15  ;;  %v1624_v23 = vsel %vm1495_vm4, %v1414_v10, %v1560_v43 }
 0x1cb   :  { %vm1494_vm8 = vcmp.ge.f32.partialorder %v1409_v1, 0.0  ;;  %v1559_v50 = vmul.f32 %v3190_v4, %v1409_v1  ;;  %v1622_v22 = vsel %vm1493_vm5, %v1406_v29, %v1558_v11  ;;  %v1610_v19 = vsel %vm1481_vm7, %v1358_v7, %v1546_v57 }
 0x1cc   :  { %vm1482_vm9 = vcmp.ge.f32.partialorder %v1361_v49, 0.0  ;;  %v1547_v54 = vmul.f32 %v3190_v4, %v1361_v49  ;;  %v1625_v24 = vsel %vm1496_vm6, %v1417_v15, %v1561_v41  ;;  %v1076_v27 = vpop.f32.mrb[92].mxu0  ;;  %v2512_v5 = vpop.f32.mrb[92].mxu1 }
 0x1cd   :  { %v2351_v20 = vpack.c.bf16 %v1625_v24, %v1624_v23  ;;  %v1623_v45 = vsel %vm1494_vm8, %v1409_v1, %v1559_v50  ;;  %v1077_v61 = vadd.f32 %v3180_v59, %v1076_v27  ;;  %v1430_v53 = vadd.f32 %v2512_v5, %v1141_v18  ;;  %v1078_v28 = vpop.f32.mrb[93].mxu0  ;;  %v1421_v31 = vpop.f32.mrb[93].mxu1 }
 0x1ce   :  { %v1611_v32 = vsel %vm1482_vm9, %v1361_v49, %v1547_v54  ;;  %v2346_v8 = vpack.c.bf16 %v1623_v45, %v1622_v22  ;;  %v1422_v35 = vadd.f32 %v1421_v31, %v1133_v21  ;;  %v1079_v36 = vpop.f32.mrb[94].mxu0  ;;  %v2513_v26 = vpop.f32.mrb[94].mxu1 }
 0x1cf   :  { %v2316_v2 = vpack.c.bf16 %v1611_v32, %v1610_v19  ;;  %2391 = vst [vmem:[%s3483_s4 + $0xe8] sm:$0xff] %v2351_v20   ;;  %v1366_v30 = vadd.f32 %v3353_v16, %v1077_v61  ;;  %v1081_v34 = vpop.f32.mrb[95].mxu0  ;;  %v1424_v33 = vpop.f32.mrb[95].mxu1  ;;  %v1564_v39 = vmul.f32 %v3190_v4, %v1430_v53  ;;  %v1080_v58 = vadd.f32 %v3180_v59, %v1079_v36 }
 0x1d0   :  { %2390 = vst [vmem:[%s3483_s4 + $0xe0] sm:$0xff] %v2346_v8   ;;  %v1433_v40 = vadd.f32 %v2513_v26, %v1144_v12  ;;  %vm1499_vm10 = vcmp.ge.f32.partialorder %v1430_v53, 0.0  ;;  %vm1497_vm11 = vcmp.ge.f32.partialorder %v1422_v35, 0.0  ;;  %v1562_v46 = vmul.f32 %v3190_v4, %v1422_v35 }
 0x1d1   :  { %2384 = vst [vmem:[%s3483_s4 + $0xb0] sm:$0xff] %v2316_v2   ;;  %v1425_v16 = vadd.f32 %v1424_v33, %v1136_v25  ;;  %v1548_v37 = vmul.f32 %v3190_v4, %v1366_v30  ;;  %v1369_v47 = vadd.f32 %v3358_v56, %v1080_v58  ;;  %vm1483_vm13 = vcmp.ge.f32.partialorder %v1366_v30, 0.0 }
 0x1d2   :  { %vm1500_vm12 = vcmp.ge.f32.partialorder %v1433_v40, 0.0  ;;  %v1565_v48 = vmul.f32 %v3190_v4, %v1433_v40  ;;  %v1628_v55 = vsel %vm1499_vm10, %v1430_v53, %v1564_v39  ;;  %v1626_v6 = vsel %vm1497_vm11, %v1422_v35, %v1562_v46 }
 0x1d3   :  { %vm1498_vm14 = vcmp.ge.f32.partialorder %v1425_v16, 0.0  ;;  %v1563_v59 = vmul.f32 %v3190_v4, %v1425_v16  ;;  %vm1484_vm15 = vcmp.ge.f32.partialorder %v1369_v47, 0.0  ;;  %v1549_v51 = vmul.f32 %v3190_v4, %v1369_v47 }
 0x1d4   :  { %v1629_v52 = vsel %vm1500_vm12, %v1433_v40, %v1565_v48  ;;  %v1612_v44 = vsel %vm1483_vm13, %v1366_v30, %v1548_v37 }
 0x1d5   :  { %v2361_v38 = vpack.c.bf16 %v1629_v52, %v1628_v55  ;;  %v1627_v10 = vsel %vm1498_vm14, %v1425_v16, %v1563_v59  ;;  %v1613_v0 = vsel %vm1484_vm15, %v1369_v47, %v1549_v51 }
 0x1d6   :  { %v2356_v62 = vpack.c.bf16 %v1627_v10, %v1626_v6  ;;  %v2321_v17 = vpack.c.bf16 %v1613_v0, %v1612_v44 }
 0x1d7   :  { %2393 = vst [vmem:[%s3483_s4 + $0xf8] sm:$0xff] %v2361_v38  }
 0x1d8   :  { %2392 = vst [vmem:[%s3483_s4 + $0xf0] sm:$0xff] %v2356_v62   ;;  %2385 = vst [vmem:[%s3483_s4 + $0xb8] sm:$0xff] %v2321_v17  }

// kernel: cannet_forward.8
= control target key start
LH: loop header
LB: loop body
LE: loop exit
PB: predicated region body
PF: predicated region fallthrough
CT: control target
= control target key end

     0   :  { %v3054_v0 = vmov 0   ;;  %s4117_s1 = inlined_call_operand.vmem [shape: bf16[384,128], index: 1, kind: input, shape index: {}]   ;;  %s4118_s0 = inlined_call_operand.vmem [shape: bf16[512,384], index: 0, kind: input, shape index: {}]   ;;  %s4119_s3 = inlined_call_operand.vmem [shape: bf16[512,128], index: 3, kind: input, shape index: {}]   ;;  %s4120_s2 = inlined_call_operand.vmem [shape: f32[1,128], index: 2, kind: input, shape index: {}]   ;;  %s4121_s4 = inlined_call_operand.<no memory space> [shape: f32[1], index: 4, kind: input, shape index: {}]   ;;  %s4122_s5 = inlined_call_operand.vmem [shape: bf16[512,128], index: 5, kind: output, shape index: {}]  }
   0x1   :  { %861 = vmatprep.subr.bf16.mxu0 %v3054_v0  ;;  %2868 = vmatprep.subr.bf16.mxu1 %v3054_v0  ;;  %v2901_v1 = vld [vmem:[%s4117_s1] sm:$0xff]   ;;  %v2902_v2 = vld [vmem:[%s4117_s1 + $0x8] sm:$0xff]   ;;  %v2903_v3 = vld [vmem:[%s4117_s1 + $0x10] sm:$0xff]  }
   0x2   :  { %862 = vmatpush1.bf16.msra.mxu0 %v2901_v1  ;;  %2884 = vmatpush1.bf16.msra.mxu1 %v2901_v1  ;;  %v2904_v4 = vld [vmem:[%s4117_s1 + $0x18] sm:$0xff]   ;;  %v2905_v5 = vld [vmem:[%s4117_s1 + $0x20] sm:$0xff]   ;;  %v2906_v7 = vld [vmem:[%s4117_s1 + $0x28] sm:$0xff]  }
   0x3   :  { %863 = vmatprep.subr.bf16.mxu0 %v3054_v0  ;;  %2869 = vmatprep.subr.bf16.mxu1 %v3054_v0  ;;  %v2919_v6 = vld [vmem:[%s4118_s0 + $0x4] ss:$12 sps:$4 sm:$0xff]   ;;  %v2908_v10 = vld [vmem:[%s4117_s1 + $0x38] sm:$0xff]   ;;  %v2910_v12 = vld [vmem:[%s4117_s1 + $0x48] sm:$0xff]  }
   0x4   :  { %v2922_v8 = vld [vmem:[%s4118_s0 + $0x244] ss:$12 sps:$4 sm:$0xff]   ;;  %893 = vmatprep.mubr.bf16.mxu0 %v2919_v6  ;;  %v2912_v14 = vld [vmem:[%s4117_s1 + $0x58] sm:$0xff]   ;;  %v2914_v16 = vld [vmem:[%s4117_s1 + $0x68] sm:$0xff]  }
   0x5   :  { %1085 = vmatprep.mubr.bf16.mxu1 %v2922_v8  ;;  %v2907_v9 = vld [vmem:[%s4117_s1 + $0x30] sm:$0xff]   ;;  %v2909_v11 = vld [vmem:[%s4117_s1 + $0x40] sm:$0xff]   ;;  %v2916_v18 = vld [vmem:[%s4117_s1 + $0x78] sm:$0xff]  }
   0x6   :  { %864 = vmatpush1.bf16.msra.mxu0 %v2902_v2  ;;  %2885 = vmatpush1.bf16.msra.mxu1 %v2902_v2  ;;  %v2911_v13 = vld [vmem:[%s4117_s1 + $0x50] sm:$0xff]   ;;  %v2913_v15 = vld [vmem:[%s4117_s1 + $0x60] sm:$0xff]   ;;  %v2924_v22 = vld [vmem:[%s4118_s0 + $0x1c] ss:$12 sps:$4 sm:$0xff]  }
   0x7   :  { %865 = vmatprep.subr.bf16.mxu0 %v3054_v0  ;;  %2870 = vmatprep.subr.bf16.mxu1 %v3054_v0  ;;  %v2915_v17 = vld [vmem:[%s4117_s1 + $0x70] sm:$0xff]   ;;  %v2923_v19 = vld [vmem:[%s4117_s1 + $0x80] sm:$0xff]   ;;  %v2926_v23 = vld [vmem:[%s4118_s0 + $0x25c] ss:$12 sps:$4 sm:$0xff]  }
   0x8   :  { %v2917_v20 = vld [vmem:[%s4118_s0] ss:$12 sps:$4 sm:$0xff]   ;;  %v2937_v25 = vld [vmem:[%s4117_s1 + $0x90] sm:$0xff]   ;;  %v2928_v26 = vld [vmem:[%s4118_s0 + $0x18] ss:$12 sps:$4 sm:$0xff]  }
   0x9   :  { %v2920_v21 = vld [vmem:[%s4118_s0 + $0x240] ss:$12 sps:$4 sm:$0xff]   ;;  %v2929_v27 = vld [vmem:[%s4118_s0 + $0x258] ss:$12 sps:$4 sm:$0xff]   ;;  %v2935_v31 = vld [vmem:[%s4118_s0 + $0x30] ss:$12 sps:$4 sm:$0xff]  }
   0xa   :  { %866 = vmatpush1.bf16.msra.mxu0 %v2903_v3  ;;  %2886 = vmatpush1.bf16.msra.mxu1 %v2903_v3  ;;  %v2930_v24 = vld [vmem:[%s4117_s1 + $0x88] sm:$0xff]   ;;  %v2931_v28 = vld [vmem:[%s4118_s0 + $0x34] ss:$12 sps:$4 sm:$0xff]   ;;  %v2944_v30 = vld [vmem:[%s4117_s1 + $0x98] sm:$0xff]  }
   0xb   :  { %867 = vmatprep.subr.bf16.mxu0 %v3054_v0  ;;  %2871 = vmatprep.subr.bf16.mxu1 %v3054_v0  ;;  %v2933_v29 = vld [vmem:[%s4118_s0 + $0x274] ss:$12 sps:$4 sm:$0xff]   ;;  %v2936_v33 = vld [vmem:[%s4118_s0 + $0x270] ss:$12 sps:$4 sm:$0xff]   ;;  %v2938_v34 = vld [vmem:[%s4118_s0 + $0x4c] ss:$12 sps:$4 sm:$0xff]  }
   0xc   :  { %v2951_v32 = vld [vmem:[%s4117_s1 + $0xa0] sm:$0xff]   ;;  %v2940_v35 = vld [vmem:[%s4118_s0 + $0x28c] ss:$12 sps:$4 sm:$0xff]   ;;  %v2942_v37 = vld [vmem:[%s4118_s0 + $0x48] ss:$12 sps:$4 sm:$0xff]  }
   0xd   :  { %v2958_v36 = vld [vmem:[%s4117_s1 + $0xa8] sm:$0xff]   ;;  %v2945_v39 = vld [vmem:[%s4118_s0 + $0x64] ss:$12 sps:$4 sm:$0xff]   ;;  %v2972_v42 = vld [vmem:[%s4117_s1 + $0xb8] sm:$0xff]  }
   0xe   :  { %868 = vmatpush1.bf16.msra.mxu0 %v2904_v4  ;;  %2887 = vmatpush1.bf16.msra.mxu1 %v2904_v4  ;;  %v2943_v38 = vld [vmem:[%s4118_s0 + $0x288] ss:$12 sps:$4 sm:$0xff]   ;;  %v2947_v40 = vld [vmem:[%s4118_s0 + $0x2a4] ss:$12 sps:$4 sm:$0xff]   ;;  %v2949_v43 = vld [vmem:[%s4118_s0 + $0x60] ss:$12 sps:$4 sm:$0xff]  }
   0xf   :  { %869 = vmatprep.subr.bf16.mxu0 %v3054_v0  ;;  %2872 = vmatprep.subr.bf16.mxu1 %v3054_v0  ;;  %v2965_v41 = vld [vmem:[%s4117_s1 + $0xb0] sm:$0xff]   ;;  %v2950_v44 = vld [vmem:[%s4118_s0 + $0x2a0] ss:$12 sps:$4 sm:$0xff]   ;;  %v2952_v45 = vld [vmem:[%s4118_s0 + $0x7c] ss:$12 sps:$4 sm:$0xff]  }
  0x10   :  { %v2954_v46 = vld [vmem:[%s4118_s0 + $0x2bc] ss:$12 sps:$4 sm:$0xff]   ;;  %v2956_v47 = vld [vmem:[%s4118_s0 + $0x78] ss:$12 sps:$4 sm:$0xff]   ;;  %v2959_v49 = vld [vmem:[%s4118_s0 + $0x94] ss:$12 sps:$4 sm:$0xff]  }
  0x11   :  { %v2957_v48 = vld [vmem:[%s4118_s0 + $0x2b8] ss:$12 sps:$4 sm:$0xff]   ;;  %v2961_v50 = vld [vmem:[%s4118_s0 + $0x2d4] ss:$12 sps:$4 sm:$0xff]   ;;  %v2963_v51 = vld [vmem:[%s4118_s0 + $0x90] ss:$12 sps:$4 sm:$0xff]  }
  0x12   :  { %870 = vmatpush1.bf16.msra.mxu0 %v2905_v5  ;;  %2888 = vmatpush1.bf16.msra.mxu1 %v2905_v5  ;;  %v2964_v52 = vld [vmem:[%s4118_s0 + $0x2d0] ss:$12 sps:$4 sm:$0xff]   ;;  %v2966_v53 = vld [vmem:[%s4118_s0 + $0xac] ss:$12 sps:$4 sm:$0xff]   ;;  %v2970_v55 = vld [vmem:[%s4118_s0 + $0xa8] ss:$12 sps:$4 sm:$0xff]  }
  0x13   :  { %871 = vmatprep.subr.bf16.mxu0 %v3054_v0  ;;  %2873 = vmatprep.subr.bf16.mxu1 %v3054_v0  ;;  %v2968_v54 = vld [vmem:[%s4118_s0 + $0x2ec] ss:$12 sps:$4 sm:$0xff]   ;;  %v2971_v56 = vld [vmem:[%s4118_s0 + $0x2e8] ss:$12 sps:$4 sm:$0xff]   ;;  %v2973_v57 = vld [vmem:[%s4118_s0 + $0xc4] ss:$12 sps:$4 sm:$0xff]  }
  0x14   :  { %v2975_v58 = vld [vmem:[%s4118_s0 + $0x8] ss:$12 sps:$4 sm:$0xff]   ;;  %v2976_v59 = vld [vmem:[%s4118_s0 + $0xc0] ss:$12 sps:$4 sm:$0xff]   ;;  %v2980_v62 = vld [vmem:[%s4118_s0 + $0x38] ss:$12 sps:$4 sm:$0xff]  }
  0x15   :  { %v2977_v60 = vld [vmem:[%s4118_s0 + $0x20] ss:$12 sps:$4 sm:$0xff]   ;;  %v2978_v61 = vld [vmem:[%s4118_s0 + $0xdc] ss:$12 sps:$4 sm:$0xff]   ;;  %v2981_v63 = vld [vmem:[%s4118_s0 + $0xd8] ss:$12 sps:$4 sm:$0xff]  }
  0x16   :  { %872 = vmatpush1.bf16.msra.mxu0 %v2906_v7  ;;  %2889 = vmatpush1.bf16.msra.mxu1 %v2906_v7  ;;  %v2983_v1 = vld [vmem:[%s4118_s0 + $0xf4] ss:$12 sps:$4 sm:$0xff]   ;;  %v2986_v3 = vld [vmem:[%s4118_s0 + $0xf0] ss:$12 sps:$4 sm:$0xff]   ;;  %v2988_v5 = vld [vmem:[%s4118_s0 + $0x10c] ss:$12 sps:$4 sm:$0xff]  }
  0x17   :  { %873 = vmatprep.subr.bf16.mxu0 %v3054_v0  ;;  %2874 = vmatprep.subr.bf16.mxu1 %v3054_v0  ;;  %v2985_v2 = vld [vmem:[%s4118_s0 + $0x68] ss:$12 sps:$4 sm:$0xff]   ;;  %v2987_v4 = vld [vmem:[%s4118_s0 + $0x80] ss:$12 sps:$4 sm:$0xff]   ;;  %v2990_v6 = vld [vmem:[%s4118_s0 + $0x98] ss:$12 sps:$4 sm:$0xff]  }
  0x18   :  { %v2991_v7 = vld [vmem:[%s4118_s0 + $0x108] ss:$12 sps:$4 sm:$0xff]   ;;  %v2992_v8 = vld [vmem:[%s4118_s0 + $0xb0] ss:$12 sps:$4 sm:$0xff]  }
  0x1a   :  { %874 = vmatpush1.bf16.msra.mxu0 %v2907_v9  ;;  %2890 = vmatpush1.bf16.msra.mxu1 %v2907_v9  ;;  %v2993_v9 = vld [vmem:[%s4118_s0 + $0x124] ss:$12 sps:$4 sm:$0xff]  }
  0x1b   :  { %875 = vmatprep.subr.bf16.mxu0 %v3054_v0  ;;  %2875 = vmatprep.subr.bf16.mxu1 %v3054_v0 }
  0x1e   :  { %876 = vmatpush1.bf16.msra.mxu0 %v2908_v10  ;;  %2891 = vmatpush1.bf16.msra.mxu1 %v2908_v10  ;;  %v2995_v10 = vld [vmem:[%s4118_s0 + $0xc8] ss:$12 sps:$4 sm:$0xff]  }
  0x1f   :  { %877 = vmatprep.subr.bf16.mxu0 %v3054_v0  ;;  %2876 = vmatprep.subr.bf16.mxu1 %v3054_v0 }
  0x22   :  { %878 = vmatpush1.bf16.msra.mxu0 %v2909_v11  ;;  %2892 = vmatpush1.bf16.msra.mxu1 %v2909_v11  ;;  %v2996_v11 = vld [vmem:[%s4118_s0 + $0x120] ss:$12 sps:$4 sm:$0xff]  }
  0x23   :  { %879 = vmatprep.subr.bf16.mxu0 %v3054_v0  ;;  %2877 = vmatprep.subr.bf16.mxu1 %v3054_v0 }
  0x26   :  { %880 = vmatpush1.bf16.msra.mxu0 %v2910_v12  ;;  %2893 = vmatpush1.bf16.msra.mxu1 %v2910_v12  ;;  %v2997_v12 = vld [vmem:[%s4118_s0 + $0xe0] ss:$12 sps:$4 sm:$0xff]  }
  0x27   :  { %881 = vmatprep.subr.bf16.mxu0 %v3054_v0  ;;  %2878 = vmatprep.subr.bf16.mxu1 %v3054_v0 }
  0x2a   :  { %882 = vmatpush1.bf16.msra.mxu0 %v2911_v13  ;;  %2894 = vmatpush1.bf16.msra.mxu1 %v2911_v13  ;;  %v2998_v13 = vld [vmem:[%s4118_s0 + $0x13c] ss:$12 sps:$4 sm:$0xff]  }
  0x2b   :  { %883 = vmatprep.subr.bf16.mxu0 %v3054_v0  ;;  %2879 = vmatprep.subr.bf16.mxu1 %v3054_v0 }
  0x2e   :  { %884 = vmatpush1.bf16.msra.mxu0 %v2912_v14  ;;  %2895 = vmatpush1.bf16.msra.mxu1 %v2912_v14  ;;  %v3000_v14 = vld [vmem:[%s4118_s0 + $0xf8] ss:$12 sps:$4 sm:$0xff]  }
  0x2f   :  { %885 = vmatprep.subr.bf16.mxu0 %v3054_v0  ;;  %2880 = vmatprep.subr.bf16.mxu1 %v3054_v0 }
  0x32   :  { %886 = vmatpush1.bf16.msra.mxu0 %v2913_v15  ;;  %2896 = vmatpush1.bf16.msra.mxu1 %v2913_v15  ;;  %v3001_v15 = vld [vmem:[%s4118_s0 + $0x138] ss:$12 sps:$4 sm:$0xff]  }
  0x33   :  { %887 = vmatprep.subr.bf16.mxu0 %v3054_v0  ;;  %2881 = vmatprep.subr.bf16.mxu1 %v3054_v0 }
  0x36   :  { %888 = vmatpush1.bf16.msra.mxu0 %v2914_v16  ;;  %2897 = vmatpush1.bf16.msra.mxu1 %v2914_v16  ;;  %v3002_v16 = vld [vmem:[%s4118_s0 + $0x110] ss:$12 sps:$4 sm:$0xff]  }
  0x37   :  { %889 = vmatprep.subr.bf16.mxu0 %v3054_v0  ;;  %2882 = vmatprep.subr.bf16.mxu1 %v3054_v0 }
  0x3a   :  { %890 = vmatpush1.bf16.msra.mxu0 %v2915_v17  ;;  %2898 = vmatpush1.bf16.msra.mxu1 %v2915_v17  ;;  %v3003_v17 = vld [vmem:[%s4118_s0 + $0x154] ss:$12 sps:$4 sm:$0xff]  }
  0x3b   :  { %891 = vmatprep.subr.bf16.mxu0 %v3054_v0  ;;  %2883 = vmatprep.subr.bf16.mxu1 %v3054_v0  ;;  %v2982_v0 = vld [vmem:[%s4118_s0 + $0x50] ss:$12 sps:$4 sm:$0xff]  }
  0x3e   :  { %892 = vmatpush1.bf16.msra.mxu0 %v2916_v18  ;;  %2899 = vmatpush1.bf16.msra.mxu1 %v2916_v18  ;;  %v3005_v18 = vld [vmem:[%s4118_s0 + $0x128] ss:$12 sps:$4 sm:$0xff]  }
  0x3f   :  { %2788 = vmatprep.subr.bf16.mxu1 %v2923_v19 }
  0x41   :  { %894 = vmatmul.mubr.bf16.vlgmr.msra.gmra.mrb[0].mxu0 %v2917_v20  ;;  %1086 = vmatmul.mubr.bf16.vlgmr.msra.gmra.mrb[0].mxu1 %v2920_v21  ;;  %v3007_v20 = vld [vmem:[%s4118_s0 + $0x140] ss:$12 sps:$4 sm:$0xff]  }
  0x42   :  { %2789 = vmatpush3.bf16.msra.mxu1 %v2923_v19  ;;  %901 = vmatprep.mubr.bf16.mxu0 %v2924_v22  ;;  %v3006_v19 = vld [vmem:[%s4118_s0 + $0x150] ss:$12 sps:$4 sm:$0xff]   ;;  %v3008_v21 = vld [vmem:[%s4118_s0 + $0x16c] ss:$12 sps:$4 sm:$0xff]  }
  0x43   :  { %1093 = vmatprep.mubr.bf16.mxu1 %v2926_v23  ;;  %2790 = vmatprep.subr.bf16.mxu1 %v2930_v24  ;;  %v3010_v22 = vld [vmem:[%s4118_s0 + $0x158] ss:$12 sps:$4 sm:$0xff]   ;;  %v3011_v23 = vld [vmem:[%s4118_s0 + $0x168] ss:$12 sps:$4 sm:$0xff]  }
  0x46   :  { %2791 = vmatpush3.bf16.msra.mxu1 %v2930_v24  ;;  %v3012_v24 = vld [vmem:[%s4118_s0 + $0x170] ss:$12 sps:$4 sm:$0xff]  }
  0x47   :  { %2792 = vmatprep.subr.bf16.mxu1 %v2937_v25 }
  0x49   :  { %902 = vmatmul.mubr.bf16.gmra.mrb[4].mxu0 %v2928_v26  ;;  %1094 = vmatmul.mubr.bf16.gmra.mrb[4].mxu1 %v2929_v27  ;;  %v3015_v26 = vld [vmem:[%s4118_s0 + $0x188] ss:$12 sps:$4 sm:$0xff]   ;;  %v3016_v27 = vld [vmem:[%s4118_s0 + $0x180] ss:$12 sps:$4 sm:$0xff]  }
  0x4a   :  { %909 = vmatprep.mubr.bf16.mxu0 %v2931_v28  ;;  %1101 = vmatprep.mubr.bf16.mxu1 %v2933_v29  ;;  %v3017_v28 = vld [vmem:[%s4118_s0 + $0x1a0] ss:$12 sps:$4 sm:$0xff]   ;;  %v3018_v29 = vld [vmem:[%s4118_s0 + $0x19c] ss:$12 sps:$4 sm:$0xff]  }
  0x4b   :  { %2793 = vmatpush3.bf16.msra.mxu1 %v2937_v25  ;;  %v3013_v25 = vld [vmem:[%s4118_s0 + $0x184] ss:$12 sps:$4 sm:$0xff]  }
  0x4c   :  { %2794 = vmatprep.subr.bf16.mxu1 %v2944_v30 }
  0x4f   :  { %2795 = vmatpush3.bf16.msra.mxu1 %v2944_v30  ;;  %v3020_v30 = vld [vmem:[%s4118_s0 + $0x1b8] ss:$12 sps:$4 sm:$0xff]  }
  0x50   :  { %2796 = vmatprep.subr.bf16.mxu1 %v2951_v32 }
  0x51   :  { %910 = vmatmul.mubr.bf16.gmra.mrb[8].mxu0 %v2935_v31  ;;  %1102 = vmatmul.mubr.bf16.gmra.mrb[8].mxu1 %v2936_v33  ;;  %v3021_v31 = vld [vmem:[%s4118_s0 + $0x198] ss:$12 sps:$4 sm:$0xff]   ;;  %v3023_v33 = vld [vmem:[%s4118_s0 + $0x1b4] ss:$12 sps:$4 sm:$0xff]  }
  0x52   :  { %917 = vmatprep.mubr.bf16.mxu0 %v2938_v34  ;;  %1109 = vmatprep.mubr.bf16.mxu1 %v2940_v35  ;;  %v3025_v34 = vld [vmem:[%s4118_s0 + $0x1e8] ss:$12 sps:$4 sm:$0xff]   ;;  %v3026_v35 = vld [vmem:[%s4118_s0 + $0x1b0] ss:$12 sps:$4 sm:$0xff]  }
  0x53   :  { %2797 = vmatpush3.bf16.msra.mxu1 %v2951_v32  ;;  %v3022_v32 = vld [vmem:[%s4118_s0 + $0x1d0] ss:$12 sps:$4 sm:$0xff]  }
  0x54   :  { %2798 = vmatprep.subr.bf16.mxu1 %v2958_v36 }
  0x57   :  { %2799 = vmatpush3.bf16.msra.mxu1 %v2958_v36  ;;  %v3027_v36 = vld [vmem:[%s4118_s0 + $0x200] ss:$12 sps:$4 sm:$0xff]  }
  0x58   :  { %2800 = vmatprep.subr.bf16.mxu1 %v2965_v41 }
  0x59   :  { %918 = vmatmul.mubr.bf16.gmra.mrb[12].mxu0 %v2942_v37  ;;  %1110 = vmatmul.mubr.bf16.gmra.mrb[12].mxu1 %v2943_v38  ;;  %v3028_v37 = vld [vmem:[%s4118_s0 + $0x1cc] ss:$12 sps:$4 sm:$0xff]  }
  0x5a   :  { %925 = vmatprep.mubr.bf16.mxu0 %v2945_v39  ;;  %1117 = vmatprep.mubr.bf16.mxu1 %v2947_v40  ;;  %v3030_v38 = vld [vmem:[%s4118_s0 + $0x218] ss:$12 sps:$4 sm:$0xff]   ;;  %v3031_v39 = vld [vmem:[%s4118_s0 + $0x1c8] ss:$12 sps:$4 sm:$0xff]   ;;  %v3032_v40 = vld [vmem:[%s4118_s0 + $0x230] ss:$12 sps:$4 sm:$0xff]  }
  0x5b   :  { %2801 = vmatpush3.bf16.msra.mxu1 %v2965_v41  ;;  %v3033_v41 = vld [vmem:[%s4118_s0 + $0x1e4] ss:$12 sps:$4 sm:$0xff]  }
  0x5c   :  { %2802 = vmatprep.subr.bf16.mxu1 %v2972_v42 }
  0x5f   :  { %2803 = vmatpush3.bf16.msra.mxu1 %v2972_v42  ;;  %v3035_v42 = vld [vmem:[%s4118_s0 + $0x248] ss:$12 sps:$4 sm:$0xff]  }
  0x61   :  { %926 = vmatmul.mubr.bf16.gmra.mrb[16].mxu0 %v2949_v43  ;;  %1118 = vmatmul.mubr.bf16.gmra.mrb[16].mxu1 %v2950_v44  ;;  %v3036_v43 = vld [vmem:[%s4118_s0 + $0x1e0] ss:$12 sps:$4 sm:$0xff]  }
  0x62   :  { %933 = vmatprep.mubr.bf16.mxu0 %v2952_v45  ;;  %1125 = vmatprep.mubr.bf16.mxu1 %v2954_v46  ;;  %v3037_v44 = vld [vmem:[%s4118_s0 + $0x260] ss:$12 sps:$4 sm:$0xff]   ;;  %v3038_v45 = vld [vmem:[%s4118_s0 + $0x1fc] ss:$12 sps:$4 sm:$0xff]   ;;  %v3040_v46 = vld [vmem:[%s4118_s0 + $0x278] ss:$12 sps:$4 sm:$0xff]  }
  0x69   :  { %934 = vmatmul.mubr.bf16.gmra.mrb[20].mxu0 %v2956_v47  ;;  %1126 = vmatmul.mubr.bf16.gmra.mrb[20].mxu1 %v2957_v48  ;;  %v3041_v47 = vld [vmem:[%s4118_s0 + $0x1f8] ss:$12 sps:$4 sm:$0xff]   ;;  %v3042_v48 = vld [vmem:[%s4118_s0 + $0x290] ss:$12 sps:$4 sm:$0xff]  }
  0x6a   :  { %941 = vmatprep.mubr.bf16.mxu0 %v2959_v49  ;;  %1133 = vmatprep.mubr.bf16.mxu1 %v2961_v50  ;;  %v3043_v49 = vld [vmem:[%s4118_s0 + $0x214] ss:$12 sps:$4 sm:$0xff]  }
  0x6b   :  { %v3045_v50 = vld [vmem:[%s4118_s0 + $0x2a8] ss:$12 sps:$4 sm:$0xff]  }
  0x71   :  { %942 = vmatmul.mubr.bf16.gmra.mrb[24].mxu0 %v2963_v51  ;;  %1134 = vmatmul.mubr.bf16.gmra.mrb[24].mxu1 %v2964_v52  ;;  %v3046_v51 = vld [vmem:[%s4118_s0 + $0x210] ss:$12 sps:$4 sm:$0xff]   ;;  %v3047_v52 = vld [vmem:[%s4118_s0 + $0x2c0] ss:$12 sps:$4 sm:$0xff]  }
  0x72   :  { %949 = vmatprep.mubr.bf16.mxu0 %v2966_v53  ;;  %1141 = vmatprep.mubr.bf16.mxu1 %v2968_v54  ;;  %v3048_v53 = vld [vmem:[%s4118_s0 + $0x22c] ss:$12 sps:$4 sm:$0xff]  }
  0x73   :  { %v3050_v54 = vld [vmem:[%s4118_s0 + $0x2d8] ss:$12 sps:$4 sm:$0xff]  }
  0x79   :  { %950 = vmatmul.mubr.bf16.gmra.mrb[28].mxu0 %v2970_v55  ;;  %1142 = vmatmul.mubr.bf16.gmra.mrb[28].mxu1 %v2971_v56  ;;  %v3051_v55 = vld [vmem:[%s4118_s0 + $0x228] ss:$12 sps:$4 sm:$0xff]   ;;  %v3052_v56 = vld [vmem:[%s4118_s0 + $0x2f0] ss:$12 sps:$4 sm:$0xff]  }
  0x7a   :  { %957 = vmatprep.mubr.bf16.mxu0 %v2973_v57  ;;  %2804 = vmatprep.mubr.bf16.mxu1 %v2975_v58 }
  0x81   :  { %958 = vmatmul.mubr.bf16.gmra.mrb[32].mxu0 %v2976_v59  ;;  %2805 = vmatmul.mubr.bf16.vlgmr.msra.gmra.mrb[32].mxu1 %v2977_v60 }
  0x82   :  { %965 = vmatprep.mubr.bf16.mxu0 %v2978_v61  ;;  %2808 = vmatprep.mubr.bf16.mxu1 %v2980_v62 }
  0x89   :  { %966 = vmatmul.mubr.bf16.gmra.mrb[36].mxu0 %v2981_v63  ;;  %2809 = vmatmul.mubr.bf16.gmra.mrb[36].mxu1 %v2982_v0 }
  0x8a   :  { %973 = vmatprep.mubr.bf16.mxu0 %v2983_v1  ;;  %2812 = vmatprep.mubr.bf16.mxu1 %v2985_v2 }
  0x91   :  { %974 = vmatmul.mubr.bf16.gmra.mrb[40].mxu0 %v2986_v3  ;;  %2813 = vmatmul.mubr.bf16.gmra.mrb[40].mxu1 %v2987_v4 }
  0x92   :  { %981 = vmatprep.mubr.bf16.mxu0 %v2988_v5  ;;  %2816 = vmatprep.mubr.bf16.mxu1 %v2990_v6 }
  0x99   :  { %982 = vmatmul.mubr.bf16.gmra.mrb[44].mxu0 %v2991_v7  ;;  %2817 = vmatmul.mubr.bf16.gmra.mrb[44].mxu1 %v2992_v8 }
  0x9a   :  { %989 = vmatprep.mubr.bf16.mxu0 %v2993_v9  ;;  %2820 = vmatprep.mubr.bf16.mxu1 %v2995_v10 }
  0xa1   :  { %990 = vmatmul.mubr.bf16.gmra.mrb[48].mxu0 %v2996_v11  ;;  %2821 = vmatmul.mubr.bf16.gmra.mrb[48].mxu1 %v2997_v12 }
  0xa2   :  { %997 = vmatprep.mubr.bf16.mxu0 %v2998_v13  ;;  %2824 = vmatprep.mubr.bf16.mxu1 %v3000_v14 }
  0xa9   :  { %998 = vmatmul.mubr.bf16.gmra.mrb[52].mxu0 %v3001_v15  ;;  %2825 = vmatmul.mubr.bf16.gmra.mrb[52].mxu1 %v3002_v16 }
  0xaa   :  { %1005 = vmatprep.mubr.bf16.mxu0 %v3003_v17  ;;  %2828 = vmatprep.mubr.bf16.mxu1 %v3005_v18 }
  0xb1   :  { %1006 = vmatmul.mubr.bf16.gmra.mrb[56].mxu0 %v3006_v19  ;;  %2829 = vmatmul.mubr.bf16.gmra.mrb[56].mxu1 %v3007_v20 }
  0xb2   :  { %1013 = vmatprep.mubr.bf16.mxu0 %v3008_v21  ;;  %2832 = vmatprep.mubr.bf16.mxu1 %v3010_v22 }
  0xb9   :  { %1014 = vmatmul.mubr.bf16.gmra.mrb[60].mxu0 %v3011_v23  ;;  %2833 = vmatmul.mubr.bf16.gmra.mrb[60].mxu1 %v3012_v24 }
  0xba   :  { %1021 = vmatprep.mubr.bf16.mxu0 %v3013_v25  ;;  %2836 = vmatprep.mubr.bf16.mxu1 %v3015_v26 }
  0xc1   :  { %1022 = vmatmul.mubr.bf16.gmra.mrb[64].mxu0 %v3016_v27  ;;  %2837 = vmatmul.mubr.bf16.gmra.mrb[64].mxu1 %v3017_v28 }
  0xc2   :  { %1029 = vmatprep.mubr.bf16.mxu0 %v3018_v29  ;;  %2840 = vmatprep.mubr.bf16.mxu1 %v3020_v30 }
  0xc9   :  { %1030 = vmatmul.mubr.bf16.gmra.mrb[68].mxu0 %v3021_v31  ;;  %2841 = vmatmul.mubr.bf16.gmra.mrb[68].mxu1 %v3022_v32 }
  0xca   :  { %1037 = vmatprep.mubr.bf16.mxu0 %v3023_v33  ;;  %2844 = vmatprep.mubr.bf16.mxu1 %v3025_v34 }
  0xd1   :  { %1038 = vmatmul.mubr.bf16.gmra.mrb[72].mxu0 %v3026_v35  ;;  %2845 = vmatmul.mubr.bf16.gmra.mrb[72].mxu1 %v3027_v36 }
  0xd2   :  { %1045 = vmatprep.mubr.bf16.mxu0 %v3028_v37  ;;  %2848 = vmatprep.mubr.bf16.mxu1 %v3030_v38 }
  0xd9   :  { %1046 = vmatmul.mubr.bf16.gmra.mrb[76].mxu0 %v3031_v39  ;;  %2849 = vmatmul.mubr.bf16.gmra.mrb[76].mxu1 %v3032_v40 }
  0xda   :  { %1053 = vmatprep.mubr.bf16.mxu0 %v3033_v41  ;;  %2852 = vmatprep.mubr.bf16.mxu1 %v3035_v42 }
  0xe1   :  { %1054 = vmatmul.mubr.bf16.gmra.mrb[80].mxu0 %v3036_v43  ;;  %2853 = vmatmul.mubr.bf16.gmra.mrb[80].mxu1 %v3037_v44 }
  0xe2   :  { %1061 = vmatprep.mubr.bf16.mxu0 %v3038_v45  ;;  %2856 = vmatprep.mubr.bf16.mxu1 %v3040_v46 }
  0xe9   :  { %1062 = vmatmul.mubr.bf16.gmra.mrb[84].mxu0 %v3041_v47  ;;  %2857 = vmatmul.mubr.bf16.gmra.mrb[84].mxu1 %v3042_v48 }
  0xea   :  { %1069 = vmatprep.mubr.bf16.mxu0 %v3043_v49  ;;  %2860 = vmatprep.mubr.bf16.mxu1 %v3045_v50 }
  0xf1   :  { %1070 = vmatmul.mubr.bf16.gmra.mrb[88].mxu0 %v3046_v51  ;;  %2861 = vmatmul.mubr.bf16.gmra.mrb[88].mxu1 %v3047_v52 }
  0xf2   :  { %1077 = vmatprep.mubr.bf16.mxu0 %v3048_v53  ;;  %2864 = vmatprep.mubr.bf16.mxu1 %v3050_v54 }
  0xf9   :  { %1078 = vmatmul.mubr.bf16.gmra.mrb[92].mxu0 %v3051_v55  ;;  %2865 = vmatmul.mubr.bf16.gmra.mrb[92].mxu1 %v3052_v56 }
 0x114   :  { %v3477_v57 = vpop.f32.mrb[0].mxu0  ;;  %v3479_v58 = vpop.f32.mrb[0].mxu1 }
 0x115   :  { %v897_v59 = vpop.f32.mrb[1].mxu0  ;;  %v1089_v60 = vpop.f32.mrb[1].mxu1 }
 0x116   :  { %v3481_v61 = vpop.f32.mrb[2].mxu0  ;;  %v3483_v62 = vpop.f32.mrb[2].mxu1  ;;  %v2686_v59 = vld [vmem:[%s4119_s3 + $0x8] sm:$0xff]   ;;  %v3545_v60 = vld [vmem:[%s4120_s2] ss:$0 sm:$0xff] }
 0x117   :  { %v900_v63 = vpop.f32.mrb[3].mxu0  ;;  %v1092_v0 = vpop.f32.mrb[3].mxu1 }
 0x118   :  { %v2399_v63 = vld [vmem:[%s4119_s3] sm:$0xff]  }
 0x11c   :  { %v903_v1 = vpop.f32.mrb[4].mxu0  ;;  %v3485_v2 = vpop.f32.mrb[4].mxu1 }
 0x11d   :  { %v905_v3 = vpop.f32.mrb[5].mxu0  ;;  %v1097_v4 = vpop.f32.mrb[5].mxu1  ;;  %v904_v0 = vadd.f32 %v3545_v60, %v903_v1  ;;  %v899_v1 = vadd.f32 %v3545_v60, %v3481_v61 }
 0x11e   :  { %v3487_v5 = vpop.f32.mrb[6].mxu0  ;;  %v3489_v6 = vpop.f32.mrb[6].mxu1  ;;  %v2404_v3 = vunpack.c.l.bf16 %v2686_v59  ;;  %v896_v4 = vadd.f32 %v3545_v60, %v3477_v57  ;;  %v3565_v57 = vstv %s4121_s4 }
 0x11f   :  { %v908_v7 = vpop.f32.mrb[7].mxu0  ;;  %v1100_v8 = vpop.f32.mrb[7].mxu1 }
 0x124   :  { %v3491_v9 = vpop.f32.mrb[8].mxu0  ;;  %v3493_v10 = vpop.f32.mrb[8].mxu1 }
 0x125   :  { %v913_v11 = vpop.f32.mrb[9].mxu0  ;;  %v1105_v12 = vpop.f32.mrb[9].mxu1 }
 0x126   :  { %v3495_v13 = vpop.f32.mrb[10].mxu0  ;;  %v3497_v14 = vpop.f32.mrb[10].mxu1  ;;  %v2400_v11 = vunpack.c.l.bf16 %v2399_v63  ;;  %v907_v12 = vadd.f32 %v3545_v60, %v3487_v5 }
 0x127   :  { %v916_v15 = vpop.f32.mrb[11].mxu0  ;;  %v1108_v16 = vpop.f32.mrb[11].mxu1 }
 0x12c   :  { %v3499_v17 = vpop.f32.mrb[12].mxu0  ;;  %v3501_v18 = vpop.f32.mrb[12].mxu1 }
 0x12d   :  { %v921_v19 = vpop.f32.mrb[13].mxu0  ;;  %v1113_v20 = vpop.f32.mrb[13].mxu1 }
 0x12e   :  { %v3503_v21 = vpop.f32.mrb[14].mxu0  ;;  %v3505_v22 = vpop.f32.mrb[14].mxu1  ;;  %v2405_v20 = vunpack.c.h.bf16 %v2686_v59  ;;  %v920_v59 = vadd.f32 %v3545_v60, %v3499_v17 }
 0x12f   :  { %v924_v23 = vpop.f32.mrb[15].mxu0  ;;  %v1116_v24 = vpop.f32.mrb[15].mxu1 }
 0x130   :  { %v2688_v23 = vld [vmem:[%s4119_s3 + $0x18] sm:$0xff]  }
 0x134   :  { %v3507_v25 = vpop.f32.mrb[16].mxu0  ;;  %v3509_v26 = vpop.f32.mrb[16].mxu1 }
 0x135   :  { %v929_v27 = vpop.f32.mrb[17].mxu0  ;;  %v1121_v28 = vpop.f32.mrb[17].mxu1 }
 0x136   :  { %v3511_v29 = vpop.f32.mrb[18].mxu0  ;;  %v3513_v30 = vpop.f32.mrb[18].mxu1  ;;  %v2401_v28 = vunpack.c.h.bf16 %v2399_v63 }
 0x137   :  { %v932_v31 = vpop.f32.mrb[19].mxu0  ;;  %v1124_v32 = vpop.f32.mrb[19].mxu1 }
 0x138   :  { %v2687_v31 = vld [vmem:[%s4119_s3 + $0x10] sm:$0xff]  }
 0x13c   :  { %v3515_v33 = vpop.f32.mrb[20].mxu0  ;;  %v3517_v34 = vpop.f32.mrb[20].mxu1 }
 0x13d   :  { %v937_v35 = vpop.f32.mrb[21].mxu0  ;;  %v1129_v36 = vpop.f32.mrb[21].mxu1 }
 0x13e   :  { %v3519_v37 = vpop.f32.mrb[22].mxu0  ;;  %v3521_v38 = vpop.f32.mrb[22].mxu1 }
 0x13f   :  { %v940_v39 = vpop.f32.mrb[23].mxu0  ;;  %v1132_v40 = vpop.f32.mrb[23].mxu1 }
 0x144   :  { %v3523_v41 = vpop.f32.mrb[24].mxu0  ;;  %v3525_v42 = vpop.f32.mrb[24].mxu1 }
 0x145   :  { %v945_v43 = vpop.f32.mrb[25].mxu0  ;;  %v1137_v44 = vpop.f32.mrb[25].mxu1 }
 0x146   :  { %v3527_v45 = vpop.f32.mrb[26].mxu0  ;;  %v3529_v46 = vpop.f32.mrb[26].mxu1  ;;  %v2412_v43 = vunpack.c.l.bf16 %v2688_v23 }
 0x147   :  { %v948_v47 = vpop.f32.mrb[27].mxu0  ;;  %v1140_v48 = vpop.f32.mrb[27].mxu1 }
 0x148   :  { %v2408_v48 = vunpack.c.l.bf16 %v2687_v31 }
 0x14c   :  { %v3531_v49 = vpop.f32.mrb[28].mxu0  ;;  %v3533_v50 = vpop.f32.mrb[28].mxu1 }
 0x14d   :  { %v953_v51 = vpop.f32.mrb[29].mxu0  ;;  %v1145_v52 = vpop.f32.mrb[29].mxu1 }
 0x14e   :  { %v3535_v53 = vpop.f32.mrb[30].mxu0  ;;  %v3537_v54 = vpop.f32.mrb[30].mxu1  ;;  %v2413_v51 = vunpack.c.h.bf16 %v2688_v23 }
 0x14f   :  { %v956_v55 = vpop.f32.mrb[31].mxu0  ;;  %v1148_v56 = vpop.f32.mrb[31].mxu1 }
 0x150   :  { %v2409_v56 = vunpack.c.h.bf16 %v2687_v31 }
 0x154   :  { %v3553_v7 = vpop.f32.mrb[32].mxu0  ;;  %v2806_v8 = vpop.f32.mrb[32].mxu1 }
 0x155   :  { %v1193_v15 = vadd.f32 %v2806_v8, %v904_v0  ;;  %v961_v16 = vpop.f32.mrb[33].mxu0  ;;  %v1184_v19 = vpop.f32.mrb[33].mxu1  ;;  %v912_v0 = vadd.f32 %v3545_v60, %v3491_v9  ;;  %v2690_v9 = vld [vmem:[%s4119_s3 + $0x28] sm:$0xff]  }
 0x156   :  { %v1185_v24 = vadd.f32 %v1184_v19, %v896_v4  ;;  %v3567_v27 = vpop.f32.mrb[34].mxu0  ;;  %v2807_v5 = vpop.f32.mrb[34].mxu1 }
 0x157   :  { %v1569_v32 = vadd.f32 %v2404_v3, %v1193_v15  ;;  %v1196_v35 = vadd.f32 %v2807_v5, %v907_v12  ;;  %v964_v36 = vpop.f32.mrb[35].mxu0  ;;  %v1187_v39 = vpop.f32.mrb[35].mxu1  ;;  %v915_v3 = vadd.f32 %v3545_v60, %v3495_v13  ;;  %v923_v12 = vadd.f32 %v3545_v60, %v3503_v21  ;;  %v2689_v21 = vld [vmem:[%s4119_s3 + $0x20] sm:$0xff]  }
 0x158   :  { %v1567_v40 = vadd.f32 %v2400_v11, %v1185_v24  ;;  %v1188_v61 = vadd.f32 %v1187_v39, %v899_v1 }
 0x159   :  { %v1699_v44 = vmul.f32 %v3565_v57, %v1569_v32  ;;  %v1570_v47 = vadd.f32 %v2405_v20, %v1196_v35  ;;  %vm1634_vm0 = vcmp.ge.f32.partialorder %v1569_v32, 0.0 }
 0x15a   :  { %v1697_v52 = vmul.f32 %v3565_v57, %v1567_v40  ;;  %v1568_v55 = vadd.f32 %v2401_v28, %v1188_v61  ;;  %vm1632_vm1 = vcmp.ge.f32.partialorder %v1567_v40, 0.0 }
 0x15b   :  { %vm1635_vm2 = vcmp.ge.f32.partialorder %v1570_v47, 0.0  ;;  %v1700_v63 = vmul.f32 %v3565_v57, %v1570_v47  ;;  %v1763_v17 = vsel %vm1634_vm0, %v1569_v32, %v1699_v44  ;;  %v2420_v44 = vunpack.c.l.bf16 %v2690_v9 }
 0x15c   :  { %vm1633_vm3 = vcmp.ge.f32.partialorder %v1568_v55, 0.0  ;;  %v1698_v4 = vmul.f32 %v3565_v57, %v1568_v55  ;;  %v3582_v8 = vpop.f32.mrb[36].mxu0  ;;  %v2810_v11 = vpop.f32.mrb[36].mxu1  ;;  %v1761_v13 = vsel %vm1632_vm1, %v1567_v40, %v1697_v52 }
 0x15d   :  { %v1764_v15 = vsel %vm1635_vm2, %v1570_v47, %v1700_v63  ;;  %v1209_v16 = vadd.f32 %v2810_v11, %v920_v59  ;;  %v969_v19 = vpop.f32.mrb[37].mxu0  ;;  %v1200_v20 = vpop.f32.mrb[37].mxu1  ;;  %v2421_v59 = vunpack.c.h.bf16 %v2690_v9 }
 0x15e   :  { %v2534_v23 = vpack.c.bf16 %v1764_v15, %v1763_v17  ;;  %v1762_v1 = vsel %vm1633_vm3, %v1568_v55, %v1698_v4  ;;  %v1201_v24 = vadd.f32 %v1200_v20, %v912_v0  ;;  %v3590_v5 = vpop.f32.mrb[38].mxu0  ;;  %v2811_v28 = vpop.f32.mrb[38].mxu1  ;;  %v2416_v55 = vunpack.c.l.bf16 %v2689_v21 }
 0x15f   :  { %v2529_v31 = vpack.c.bf16 %v1762_v1, %v1761_v13  ;;  %v1573_v32 = vadd.f32 %v2412_v43, %v1209_v16  ;;  %v1212_v35 = vadd.f32 %v2811_v28, %v923_v12  ;;  %v972_v36 = vpop.f32.mrb[39].mxu0  ;;  %v1203_v39 = vpop.f32.mrb[39].mxu1  ;;  %v2417_v0 = vunpack.c.h.bf16 %v2689_v21 }
 0x160   :  { %2717 = vst [vmem:[%s4122_s5 + $0x8] sm:$0xff] %v2534_v23   ;;  %v1571_v40 = vadd.f32 %v2408_v48, %v1201_v24  ;;  %v1204_v61 = vadd.f32 %v1203_v39, %v915_v3  ;;  %v936_v4 = vadd.f32 %v3545_v60, %v3515_v33  ;;  %v928_v3 = vadd.f32 %v3545_v60, %v3507_v25  ;;  %v2692_v25 = vld [vmem:[%s4119_s3 + $0x38] sm:$0xff]  }
 0x161   :  { %2530 = vst [vmem:[%s4122_s5] sm:$0xff] %v2529_v31   ;;  %v1703_v47 = vmul.f32 %v3565_v57, %v1573_v32  ;;  %v1574_v52 = vadd.f32 %v2413_v51, %v1212_v35  ;;  %vm1638_vm4 = vcmp.ge.f32.partialorder %v1573_v32, 0.0  ;;  %v931_v51 = vadd.f32 %v3545_v60, %v3511_v29 }
 0x162   :  { %v1701_v43 = vmul.f32 %v3565_v57, %v1571_v40  ;;  %v1572_v63 = vadd.f32 %v2409_v56, %v1204_v61  ;;  %vm1636_vm5 = vcmp.ge.f32.partialorder %v1571_v40, 0.0  ;;  %v939_v17 = vadd.f32 %v3545_v60, %v3519_v37  ;;  %v2691_v37 = vld [vmem:[%s4119_s3 + $0x30] sm:$0xff]  }
 0x163   :  { %vm1639_vm6 = vcmp.ge.f32.partialorder %v1574_v52, 0.0  ;;  %v1704_v48 = vmul.f32 %v3565_v57, %v1574_v52  ;;  %v1767_v33 = vsel %vm1638_vm4, %v1573_v32, %v1703_v47 }
 0x164   :  { %vm1637_vm7 = vcmp.ge.f32.partialorder %v1572_v63, 0.0  ;;  %v1702_v11 = vmul.f32 %v3565_v57, %v1572_v63  ;;  %v3611_v12 = vpop.f32.mrb[40].mxu0  ;;  %v2814_v56 = vpop.f32.mrb[40].mxu1  ;;  %v1765_v29 = vsel %vm1636_vm5, %v1571_v40, %v1701_v43  ;;  %v2428_v40 = vunpack.c.l.bf16 %v2692_v25 }
 0x165   :  { %v1768_v15 = vsel %vm1639_vm6, %v1574_v52, %v1704_v48  ;;  %v1225_v16 = vadd.f32 %v2814_v56, %v936_v4  ;;  %v977_v19 = vpop.f32.mrb[41].mxu0  ;;  %v1216_v20 = vpop.f32.mrb[41].mxu1  ;;  %v2424_v52 = vunpack.c.l.bf16 %v2691_v37  ;;  %v2429_v43 = vunpack.c.h.bf16 %v2692_v25 }
 0x166   :  { %v2544_v9 = vpack.c.bf16 %v1768_v15, %v1767_v33  ;;  %v1766_v13 = vsel %vm1637_vm7, %v1572_v63, %v1702_v11  ;;  %v1217_v23 = vadd.f32 %v1216_v20, %v928_v3  ;;  %v3619_v1 = vpop.f32.mrb[42].mxu0  ;;  %v2815_v24 = vpop.f32.mrb[42].mxu1  ;;  %v2425_v4 = vunpack.c.h.bf16 %v2691_v37 }
 0x167   :  { %v2539_v28 = vpack.c.bf16 %v1766_v13, %v1765_v29  ;;  %v1577_v21 = vadd.f32 %v2420_v44, %v1225_v16  ;;  %v1228_v31 = vadd.f32 %v2815_v24, %v939_v17  ;;  %v980_v32 = vpop.f32.mrb[43].mxu0  ;;  %v1219_v35 = vpop.f32.mrb[43].mxu1  ;;  %v952_v48 = vadd.f32 %v3545_v60, %v3531_v49 }
 0x168   :  { %2719 = vst [vmem:[%s4122_s5 + $0x18] sm:$0xff] %v2544_v9   ;;  %v1575_v36 = vadd.f32 %v2416_v55, %v1217_v23  ;;  %v1220_v39 = vadd.f32 %v1219_v35, %v931_v51  ;;  %v944_v3 = vadd.f32 %v3545_v60, %v3523_v41  ;;  %v955_v56 = vadd.f32 %v3545_v60, %v3535_v53  ;;  %v2694_v41 = vld [vmem:[%s4119_s3 + $0x48] sm:$0xff]   ;;  %v2693_v53 = vld [vmem:[%s4119_s3 + $0x40] sm:$0xff]  }
 0x169   :  { %2718 = vst [vmem:[%s4122_s5 + $0x10] sm:$0xff] %v2539_v28   ;;  %v1707_v61 = vmul.f32 %v3565_v57, %v1577_v21  ;;  %v1578_v47 = vadd.f32 %v2421_v59, %v1228_v31  ;;  %vm1642_vm8 = vcmp.ge.f32.partialorder %v1577_v21, 0.0  ;;  %v947_v59 = vadd.f32 %v3545_v60, %v3527_v45 }
 0x16a   :  { %v1705_v44 = vmul.f32 %v3565_v57, %v1575_v36  ;;  %v1576_v63 = vadd.f32 %v2417_v0, %v1220_v39  ;;  %vm1640_vm9 = vcmp.ge.f32.partialorder %v1575_v36, 0.0  ;;  %v2436_v32 = vunpack.c.l.bf16 %v2694_v41 }
 0x16b   :  { %vm1643_vm10 = vcmp.ge.f32.partialorder %v1578_v47, 0.0  ;;  %v1708_v55 = vmul.f32 %v3565_v57, %v1578_v47  ;;  %v1771_v49 = vsel %vm1642_vm8, %v1577_v21, %v1707_v61  ;;  %v2432_v39 = vunpack.c.l.bf16 %v2693_v53 }
 0x16c   :  { %vm1641_vm11 = vcmp.ge.f32.partialorder %v1576_v63, 0.0  ;;  %v1706_v51 = vmul.f32 %v3565_v57, %v1576_v63  ;;  %v3640_v11 = vpop.f32.mrb[44].mxu0  ;;  %v2818_v0 = vpop.f32.mrb[44].mxu1  ;;  %v1769_v45 = vsel %vm1640_vm9, %v1575_v36, %v1705_v44  ;;  %v2437_v61 = vunpack.c.h.bf16 %v2694_v41 }
 0x16d   :  { %v1772_v17 = vsel %vm1643_vm10, %v1578_v47, %v1708_v55  ;;  %v1241_v33 = vadd.f32 %v2818_v0, %v952_v48  ;;  %v985_v15 = vpop.f32.mrb[45].mxu0  ;;  %v1232_v16 = vpop.f32.mrb[45].mxu1  ;;  %v2433_v44 = vunpack.c.h.bf16 %v2693_v53  ;;  %v960_v48 = vadd.f32 %v3545_v60, %v3553_v7  ;;  %v2696_v7 = vld [vmem:[%s4119_s3 + $0x58] sm:$0xff]  }
 0x16e   :  { %v2554_v19 = vpack.c.bf16 %v1772_v17, %v1771_v49  ;;  %v1770_v20 = vsel %vm1641_vm11, %v1576_v63, %v1706_v51  ;;  %v1233_v25 = vadd.f32 %v1232_v16, %v944_v3  ;;  %v3648_v29 = vpop.f32.mrb[46].mxu0  ;;  %v2819_v9 = vpop.f32.mrb[46].mxu1  ;;  %v968_v63 = vadd.f32 %v3545_v60, %v3582_v8 }
 0x16f   :  { %v2549_v13 = vpack.c.bf16 %v1770_v20, %v1769_v45  ;;  %v1581_v23 = vadd.f32 %v2428_v40, %v1241_v33  ;;  %v1244_v24 = vadd.f32 %v2819_v9, %v955_v56  ;;  %v988_v37 = vpop.f32.mrb[47].mxu0  ;;  %v1235_v28 = vpop.f32.mrb[47].mxu1 }
 0x170   :  { %2721 = vst [vmem:[%s4122_s5 + $0x28] sm:$0xff] %v2554_v19   ;;  %v1579_v21 = vadd.f32 %v2424_v52, %v1233_v25  ;;  %v1236_v31 = vadd.f32 %v1235_v28, %v947_v59  ;;  %v971_v59 = vadd.f32 %v3545_v60, %v3590_v5  ;;  %v2695_v5 = vld [vmem:[%s4119_s3 + $0x50] sm:$0xff]  }
 0x171   :  { %2720 = vst [vmem:[%s4122_s5 + $0x20] sm:$0xff] %v2549_v13   ;;  %v1711_v35 = vmul.f32 %v3565_v57, %v1581_v23  ;;  %v1582_v36 = vadd.f32 %v2429_v43, %v1244_v24  ;;  %vm1646_vm12 = vcmp.ge.f32.partialorder %v1581_v23, 0.0  ;;  %v963_v43 = vadd.f32 %v3545_v60, %v3567_v27 }
 0x172   :  { %v1709_v40 = vmul.f32 %v3565_v57, %v1579_v21  ;;  %v1580_v47 = vadd.f32 %v2425_v4, %v1236_v31  ;;  %vm1644_vm13 = vcmp.ge.f32.partialorder %v1579_v21, 0.0  ;;  %v2440_v28 = vunpack.c.l.bf16 %v2695_v5 }
 0x173   :  { %vm1647_vm14 = vcmp.ge.f32.partialorder %v1582_v36, 0.0  ;;  %v1712_v52 = vmul.f32 %v3565_v57, %v1582_v36  ;;  %v1775_v8 = vsel %vm1646_vm12, %v1581_v23, %v1711_v35  ;;  %v2444_v23 = vunpack.c.l.bf16 %v2696_v7 }
 0x174   :  { %vm1645_vm15 = vcmp.ge.f32.partialorder %v1580_v47, 0.0  ;;  %v1710_v55 = vmul.f32 %v3565_v57, %v1580_v47  ;;  %v3669_v3 = vpop.f32.mrb[48].mxu0  ;;  %v2822_v4 = vpop.f32.mrb[48].mxu1  ;;  %v1773_v27 = vsel %vm1644_vm13, %v1579_v21, %v1709_v40  ;;  %v2445_v21 = vunpack.c.h.bf16 %v2696_v7 }
 0x175   :  { %v1776_v51 = vsel %vm1647_vm14, %v1582_v36, %v1712_v52  ;;  %v1257_v0 = vadd.f32 %v2822_v4, %v968_v63  ;;  %v993_v56 = vpop.f32.mrb[49].mxu0  ;;  %v1248_v49 = vpop.f32.mrb[49].mxu1  ;;  %v2441_v35 = vunpack.c.h.bf16 %v2695_v5  ;;  %v984_v36 = vadd.f32 %v3545_v60, %v3640_v11 }
 0x176   :  { %v2564_v17 = vpack.c.bf16 %v1776_v51, %v1775_v8  ;;  %v1774_v33 = vsel %vm1645_vm15, %v1580_v47, %v1710_v55  ;;  %v1249_v15 = vadd.f32 %v1248_v49, %v960_v48  ;;  %v3677_v16 = vpop.f32.mrb[50].mxu0  ;;  %v2823_v41 = vpop.f32.mrb[50].mxu1  ;;  %v976_v40 = vadd.f32 %v3545_v60, %v3611_v12  ;;  %v2698_v12 = vld [vmem:[%s4119_s3 + $0x68] sm:$0xff]  }
 0x177   :  { %v2559_v45 = vpack.c.bf16 %v1774_v33, %v1773_v27  ;;  %v1585_v19 = vadd.f32 %v2436_v32, %v1257_v0  ;;  %v1260_v20 = vadd.f32 %v2823_v41, %v971_v59  ;;  %v996_v25 = vpop.f32.mrb[51].mxu0  ;;  %v1251_v9 = vpop.f32.mrb[51].mxu1  ;;  %v2452_v5 = vunpack.c.l.bf16 %v2698_v12 }
 0x178   :  { %2723 = vst [vmem:[%s4122_s5 + $0x38] sm:$0xff] %v2564_v17   ;;  %v1583_v53 = vadd.f32 %v2432_v39, %v1249_v15  ;;  %v1252_v13 = vadd.f32 %v1251_v9, %v963_v43  ;;  %v2453_v25 = vunpack.c.h.bf16 %v2698_v12 }
 0x179   :  { %2722 = vst [vmem:[%s4122_s5 + $0x30] sm:$0xff] %v2559_v45   ;;  %v1715_v24 = vmul.f32 %v3565_v57, %v1585_v19  ;;  %v1586_v37 = vadd.f32 %v2437_v61, %v1260_v20  ;;  %vm1650_vm0 = vcmp.ge.f32.partialorder %v1585_v19, 0.0  ;;  %v979_v61 = vadd.f32 %v3545_v60, %v3619_v1 }
 0x17a   :  { %v1713_v31 = vmul.f32 %v3565_v57, %v1583_v53  ;;  %v1584_v32 = vadd.f32 %v2433_v44, %v1252_v13  ;;  %vm1648_vm1 = vcmp.ge.f32.partialorder %v1583_v53, 0.0  ;;  %v987_v44 = vadd.f32 %v3545_v60, %v3648_v29  ;;  %v2697_v29 = vld [vmem:[%s4119_s3 + $0x60] sm:$0xff]  }
 0x17b   :  { %vm1651_vm2 = vcmp.ge.f32.partialorder %v1586_v37, 0.0  ;;  %v1716_v39 = vmul.f32 %v3565_v57, %v1586_v37  ;;  %v1779_v48 = vsel %vm1650_vm0, %v1585_v19, %v1715_v24  ;;  %v2448_v20 = vunpack.c.l.bf16 %v2697_v29 }
 0x17c   :  { %vm1649_vm3 = vcmp.ge.f32.partialorder %v1584_v32, 0.0  ;;  %v1714_v47 = vmul.f32 %v3565_v57, %v1584_v32  ;;  %v999_v63 = vpop.f32.mrb[52].mxu0  ;;  %v2826_v52 = vpop.f32.mrb[52].mxu1  ;;  %v1777_v59 = vsel %vm1648_vm1, %v1583_v53, %v1713_v31  ;;  %v2449_v13 = vunpack.c.h.bf16 %v2697_v29 }
 0x17d   :  { %v1780_v11 = vsel %vm1651_vm2, %v1586_v37, %v1716_v39  ;;  %v1273_v43 = vadd.f32 %v2826_v52, %v984_v36  ;;  %v1001_v55 = vpop.f32.mrb[53].mxu0  ;;  %v1264_v4 = vpop.f32.mrb[53].mxu1  ;;  %v992_v37 = vadd.f32 %v3545_v60, %v3669_v3 }
 0x17e   :  { %v2574_v1 = vpack.c.bf16 %v1780_v11, %v1779_v48  ;;  %v1778_v8 = vsel %vm1649_vm3, %v1584_v32, %v1714_v47  ;;  %v1265_v51 = vadd.f32 %v1264_v4, %v976_v40  ;;  %v1002_v0 = vpop.f32.mrb[54].mxu0  ;;  %v2827_v56 = vpop.f32.mrb[54].mxu1 }
 0x17f   :  { %v2569_v49 = vpack.c.bf16 %v1778_v8, %v1777_v59  ;;  %v1589_v7 = vadd.f32 %v2444_v23, %v1273_v43  ;;  %v1276_v27 = vadd.f32 %v2827_v56, %v987_v44  ;;  %v1004_v17 = vpop.f32.mrb[55].mxu0  ;;  %v1267_v33 = vpop.f32.mrb[55].mxu1  ;;  %v1000_v23 = vadd.f32 %v3545_v60, %v999_v63  ;;  %v2699_v59 = vld [vmem:[%s4119_s3 + $0x70] sm:$0xff]  }
 0x180   :  { %2725 = vst [vmem:[%s4122_s5 + $0x48] sm:$0xff] %v2574_v1   ;;  %v1587_v15 = vadd.f32 %v2440_v28, %v1265_v51  ;;  %v1268_v41 = vadd.f32 %v1267_v33, %v979_v61  ;;  %v995_v28 = vadd.f32 %v3545_v60, %v3677_v16  ;;  %v2700_v51 = vld [vmem:[%s4119_s3 + $0x78] sm:$0xff]  }
 0x181   :  { %2724 = vst [vmem:[%s4122_s5 + $0x40] sm:$0xff] %v2569_v49   ;;  %v1719_v45 = vmul.f32 %v3565_v57, %v1589_v7  ;;  %v1590_v19 = vadd.f32 %v2445_v21, %v1276_v27  ;;  %vm1654_vm4 = vcmp.ge.f32.partialorder %v1589_v7, 0.0  ;;  %v2460_v17 = vunpack.c.l.bf16 %v2700_v51 }
 0x182   :  { %v1717_v9 = vmul.f32 %v3565_v57, %v1587_v15  ;;  %v1588_v53 = vadd.f32 %v2441_v35, %v1268_v41  ;;  %vm1652_vm5 = vcmp.ge.f32.partialorder %v1587_v15, 0.0  ;;  %v1003_v35 = vadd.f32 %v3545_v60, %v1002_v0 }
 0x183   :  { %vm1655_vm6 = vcmp.ge.f32.partialorder %v1590_v19, 0.0  ;;  %v1720_v24 = vmul.f32 %v3565_v57, %v1590_v19  ;;  %v1783_v36 = vsel %vm1654_vm4, %v1589_v7, %v1719_v45  ;;  %v2456_v7 = vunpack.c.l.bf16 %v2699_v59 }
 0x184   :  { %vm1653_vm7 = vcmp.ge.f32.partialorder %v1588_v53, 0.0  ;;  %v1718_v21 = vmul.f32 %v3565_v57, %v1588_v53  ;;  %v1007_v31 = vpop.f32.mrb[56].mxu0  ;;  %v2830_v32 = vpop.f32.mrb[56].mxu1  ;;  %v1781_v63 = vsel %vm1652_vm5, %v1587_v15, %v1717_v9  ;;  %v2457_v45 = vunpack.c.h.bf16 %v2699_v59 }
 0x185   :  { %v1784_v39 = vsel %vm1655_vm6, %v1590_v19, %v1720_v24  ;;  %v1289_v40 = vadd.f32 %v2830_v32, %v1000_v23  ;;  %v1009_v61 = vpop.f32.mrb[57].mxu0  ;;  %v1280_v47 = vpop.f32.mrb[57].mxu1  ;;  %v1008_v33 = vadd.f32 %v3545_v60, %v1007_v31 }
 0x186   :  { %v2584_v52 = vpack.c.bf16 %v1784_v39, %v1783_v36  ;;  %v1782_v44 = vsel %vm1653_vm7, %v1588_v53, %v1718_v21  ;;  %v1281_v48 = vadd.f32 %v1280_v47, %v992_v37  ;;  %v1010_v3 = vpop.f32.mrb[58].mxu0  ;;  %v2831_v11 = vpop.f32.mrb[58].mxu1  ;;  %v2461_v39 = vunpack.c.h.bf16 %v2700_v51 }
 0x187   :  { %v2579_v43 = vpack.c.bf16 %v1782_v44, %v1781_v63  ;;  %v1593_v16 = vadd.f32 %v2452_v5, %v1289_v40  ;;  %v1292_v55 = vadd.f32 %v2831_v11, %v1003_v35  ;;  %v1012_v4 = vpop.f32.mrb[59].mxu0  ;;  %v1283_v12 = vpop.f32.mrb[59].mxu1  ;;  %v2701_v11 = vld [vmem:[%s4119_s3 + $0x80] sm:$0xff]  }
 0x188   :  { %2727 = vst [vmem:[%s4122_s5 + $0x58] sm:$0xff] %v2584_v52   ;;  %v1591_v1 = vadd.f32 %v2448_v20, %v1281_v48  ;;  %v1284_v8 = vadd.f32 %v1283_v12, %v995_v28  ;;  %v1011_v20 = vadd.f32 %v3545_v60, %v1010_v3 }
 0x189   :  { %2726 = vst [vmem:[%s4122_s5 + $0x50] sm:$0xff] %v2579_v43   ;;  %v1723_v0 = vmul.f32 %v3565_v57, %v1593_v16  ;;  %v1594_v56 = vadd.f32 %v2453_v25, %v1292_v55  ;;  %vm1658_vm8 = vcmp.ge.f32.partialorder %v1593_v16, 0.0 }
 0x18a   :  { %v1721_v29 = vmul.f32 %v3565_v57, %v1591_v1  ;;  %v1592_v49 = vadd.f32 %v2449_v13, %v1284_v8  ;;  %vm1656_vm9 = vcmp.ge.f32.partialorder %v1591_v1, 0.0 }
 0x18b   :  { %vm1659_vm10 = vcmp.ge.f32.partialorder %v1594_v56, 0.0  ;;  %v1724_v27 = vmul.f32 %v3565_v57, %v1594_v56  ;;  %v1787_v19 = vsel %vm1658_vm8, %v1593_v16, %v1723_v0  ;;  %v2464_v0 = vunpack.c.l.bf16 %v2701_v11 }
 0x18c   :  { %vm1657_vm11 = vcmp.ge.f32.partialorder %v1592_v49, 0.0  ;;  %v1722_v15 = vmul.f32 %v3565_v57, %v1592_v49  ;;  %v1015_v41 = vpop.f32.mrb[60].mxu0  ;;  %v2834_v5 = vpop.f32.mrb[60].mxu1  ;;  %v1785_v23 = vsel %vm1656_vm9, %v1591_v1, %v1721_v29 }
 0x18d   :  { %v1788_v25 = vsel %vm1659_vm10, %v1594_v56, %v1724_v27  ;;  %v1016_v9 = vadd.f32 %v3545_v60, %v1015_v41  ;;  %v1017_v53 = vpop.f32.mrb[61].mxu0  ;;  %v1296_v13 = vpop.f32.mrb[61].mxu1 }
 0x18e   :  { %v2594_v24 = vpack.c.bf16 %v1788_v25, %v1787_v19  ;;  %v1786_v37 = vsel %vm1657_vm11, %v1592_v49, %v1722_v15  ;;  %v1297_v28 = vadd.f32 %v1296_v13, %v1008_v33  ;;  %v1018_v21 = vpop.f32.mrb[62].mxu0  ;;  %v2835_v31 = vpop.f32.mrb[62].mxu1  ;;  %v2702_v53 = vld [vmem:[%s4119_s3 + $0x88] sm:$0xff]  }
 0x18f   :  { %v2589_v32 = vpack.c.bf16 %v1786_v37, %v1785_v23  ;;  %v1305_v36 = vadd.f32 %v2834_v5, %v1016_v9  ;;  %v1019_v35 = vadd.f32 %v3545_v60, %v1018_v21  ;;  %v1020_v40 = vpop.f32.mrb[63].mxu0  ;;  %v1299_v61 = vpop.f32.mrb[63].mxu1 }
 0x190   :  { %2729 = vst [vmem:[%s4122_s5 + $0x68] sm:$0xff] %v2594_v24   ;;  %v1595_v47 = vadd.f32 %v2456_v7, %v1297_v28  ;;  %v1300_v63 = vadd.f32 %v1299_v61, %v1011_v20 }
 0x191   :  { %2728 = vst [vmem:[%s4122_s5 + $0x60] sm:$0xff] %v2589_v32   ;;  %v1597_v52 = vadd.f32 %v2460_v17, %v1305_v36  ;;  %v1308_v44 = vadd.f32 %v2835_v31, %v1019_v35  ;;  %v2465_v17 = vunpack.c.h.bf16 %v2701_v11  ;;  %v2468_v31 = vunpack.c.l.bf16 %v2702_v53 }
 0x192   :  { %v1725_v48 = vmul.f32 %v3565_v57, %v1595_v47  ;;  %v1596_v3 = vadd.f32 %v2457_v45, %v1300_v63  ;;  %vm1660_vm13 = vcmp.ge.f32.partialorder %v1595_v47, 0.0 }
 0x193   :  { %vm1662_vm12 = vcmp.ge.f32.partialorder %v1597_v52, 0.0  ;;  %v1727_v43 = vmul.f32 %v3565_v57, %v1597_v52  ;;  %v1598_v16 = vadd.f32 %v2461_v39, %v1308_v44  ;;  %v2469_v39 = vunpack.c.h.bf16 %v2702_v53 }
 0x194   :  { %vm1661_vm14 = vcmp.ge.f32.partialorder %v1596_v3, 0.0  ;;  %v1726_v55 = vmul.f32 %v3565_v57, %v1596_v3  ;;  %v1023_v4 = vpop.f32.mrb[64].mxu0  ;;  %v2838_v12 = vpop.f32.mrb[64].mxu1  ;;  %v1789_v29 = vsel %vm1660_vm13, %v1595_v47, %v1725_v48 }
 0x195   :  { %vm1663_vm15 = vcmp.ge.f32.partialorder %v1598_v16, 0.0  ;;  %v1728_v59 = vmul.f32 %v3565_v57, %v1598_v16  ;;  %v1024_v1 = vadd.f32 %v3545_v60, %v1023_v4  ;;  %v1025_v8 = vpop.f32.mrb[65].mxu0  ;;  %v1312_v51 = vpop.f32.mrb[65].mxu1  ;;  %v1791_v56 = vsel %vm1662_vm12, %v1597_v52, %v1727_v43 }
 0x196   :  { %v1790_v49 = vsel %vm1661_vm14, %v1596_v3, %v1726_v55  ;;  %v1026_v7 = vpop.f32.mrb[66].mxu0  ;;  %v2839_v27 = vpop.f32.mrb[66].mxu1 }
 0x197   :  { %v1792_v33 = vsel %vm1663_vm15, %v1598_v16, %v1728_v59  ;;  %v2599_v15 = vpack.c.bf16 %v1790_v49, %v1789_v29  ;;  %v1313_v41 = vadd.f32 %v1312_v51, %v1024_v1  ;;  %v1027_v5 = vadd.f32 %v3545_v60, %v1026_v7  ;;  %v1028_v45 = vpop.f32.mrb[67].mxu0  ;;  %v1315_v19 = vpop.f32.mrb[67].mxu1  ;;  %v2703_v16 = vld [vmem:[%s4119_s3 + $0x90] sm:$0xff]  }
 0x198   :  { %v2604_v20 = vpack.c.bf16 %v1792_v33, %v1791_v56  ;;  %v2472_v51 = vunpack.c.l.bf16 %v2703_v16  ;;  %v3791_v29 = vadd.f32 %v3545_v60, %v3479_v58  ;;  %v3795_v49 = vadd.f32 %v3545_v60, %v3483_v62  ;;  %v3809_v62 = vld [vmem:[%s4119_s3 + $0x98] sm:$0xff]  }
 0x199   :  { %2730 = vst [vmem:[%s4122_s5 + $0x70] sm:$0xff] %v2599_v15   ;;  %v1599_v25 = vadd.f32 %v2464_v0, %v1313_v41  ;;  %v1316_v9 = vadd.f32 %v1315_v19, %v1027_v5  ;;  %v3799_v7 = vadd.f32 %v3545_v60, %v3485_v2  ;;  %v3814_v2 = vld [vmem:[%s4119_s3 + $0xc8] sm:$0xff]  }
 0x19a   :  { %2731 = vst [vmem:[%s4122_s5 + $0x78] sm:$0xff] %v2604_v20   ;;  %v3818_v20 = vadd.f32 %v3545_v60, %v3489_v6  ;;  %v3839_v6 = vadd.f32 %v3545_v60, %v3505_v22  ;;  %v2477_v22 = vunpack.c.h.bf16 %v3809_v62 }
 0x19b   :  { %v1729_v13 = vmul.f32 %v3565_v57, %v1599_v25  ;;  %v1600_v23 = vadd.f32 %v2465_v17, %v1316_v9  ;;  %vm1664_vm0 = vcmp.ge.f32.partialorder %v1599_v25, 0.0  ;;  %v2473_v17 = vunpack.c.h.bf16 %v2703_v16  ;;  %v3885_v16 = vld [vmem:[%s4119_s3 + $0xa8] sm:$0xff]  }
 0x19c   :  { %v1031_v24 = vpop.f32.mrb[68].mxu0  ;;  %v3769_v37 = vpop.f32.mrb[68].mxu1  ;;  %v3826_v9 = vadd.f32 %v3545_v60, %v3497_v14  ;;  %v3844_v14 = vld [vmem:[%s4119_s3 + $0xc0] sm:$0xff]  }
 0x19d   :  { %vm1665_vm1 = vcmp.ge.f32.partialorder %v1600_v23, 0.0  ;;  %v1730_v28 = vmul.f32 %v3565_v57, %v1600_v23  ;;  %v1032_v21 = vadd.f32 %v3545_v60, %v1031_v24  ;;  %v1033_v32 = vpop.f32.mrb[69].mxu0  ;;  %v1328_v36 = vpop.f32.mrb[69].mxu1  ;;  %v1793_v61 = vsel %vm1664_vm0, %v1599_v25, %v1729_v13  ;;  %v3831_v13 = vld [vmem:[%s4119_s3 + $0xa0] sm:$0xff]  }
 0x19e   :  { %v1034_v35 = vpop.f32.mrb[70].mxu0  ;;  %v3773_v40 = vpop.f32.mrb[70].mxu1  ;;  %v3822_v25 = vadd.f32 %v3545_v60, %v3493_v10 }
 0x19f   :  { %v1794_v47 = vsel %vm1665_vm1, %v1600_v23, %v1730_v28  ;;  %v1321_v63 = vadd.f32 %v2838_v12, %v1032_v21  ;;  %v1035_v52 = vadd.f32 %v3545_v60, %v1034_v35  ;;  %v1036_v44 = vpop.f32.mrb[71].mxu0  ;;  %v1331_v48 = vpop.f32.mrb[71].mxu1  ;;  %v3835_v23 = vadd.f32 %v3545_v60, %v3501_v18  ;;  %v3865_v35 = vld [vmem:[%s4119_s3 + $0xd8] sm:$0xff]  }
 0x1a0   :  { %v2609_v3 = vpack.c.bf16 %v1794_v47, %v1793_v61  ;;  %v3848_v28 = vadd.f32 %v3545_v60, %v3509_v26  ;;  %v2476_v18 = vunpack.c.l.bf16 %v3809_v62  ;;  %v2500_v21 = vunpack.c.l.bf16 %v3814_v2 }
 0x1a1   :  { %v1601_v11 = vadd.f32 %v2468_v31, %v1321_v63  ;;  %v1324_v43 = vadd.f32 %v2839_v27, %v1035_v52  ;;  %v3858_v31 = vadd.f32 %v3545_v60, %v3513_v30  ;;  %v2480_v26 = vunpack.c.l.bf16 %v3831_v13 }
 0x1a2   :  { %2732 = vst [vmem:[%s4122_s5 + $0x80] sm:$0xff] %v2609_v3   ;;  %v2496_v30 = vunpack.c.l.bf16 %v3844_v14  ;;  %v2501_v63 = vunpack.c.h.bf16 %v3814_v2  ;;  %v2497_v52 = vunpack.c.h.bf16 %v3844_v14 }
 0x1a3   :  { %v1731_v55 = vmul.f32 %v3565_v57, %v1601_v11  ;;  %v1602_v4 = vadd.f32 %v2469_v39, %v1324_v43  ;;  %vm1666_vm2 = vcmp.ge.f32.partialorder %v1601_v11, 0.0  ;;  %v3870_v39 = vld [vmem:[%s4119_s3 + $0xd0] sm:$0xff]   ;;  %v2481_v43 = vunpack.c.h.bf16 %v3831_v13 }
 0x1a4   :  { %v1039_v12 = vpop.f32.mrb[72].mxu0  ;;  %v3783_v59 = vpop.f32.mrb[72].mxu1 }
 0x1a5   :  { %vm1667_vm3 = vcmp.ge.f32.partialorder %v1602_v4, 0.0  ;;  %v1732_v1 = vmul.f32 %v3565_v57, %v1602_v4  ;;  %v1040_v8 = vadd.f32 %v3545_v60, %v1039_v12  ;;  %v1041_v0 = vpop.f32.mrb[73].mxu0  ;;  %v3787_v56 = vpop.f32.mrb[73].mxu1  ;;  %v1795_v15 = vsel %vm1666_vm2, %v1601_v11, %v1731_v55 }
 0x1a6   :  { %v1042_v27 = vpop.f32.mrb[74].mxu0  ;;  %v3801_v33 = vpop.f32.mrb[74].mxu1  ;;  %v3889_v55 = vadd.f32 %v3545_v60, %v3517_v34 }
 0x1a7   :  { %v1796_v41 = vsel %vm1667_vm3, %v1602_v4, %v1732_v1  ;;  %v1329_v5 = vadd.f32 %v1328_v36, %v1040_v8  ;;  %v1043_v45 = vadd.f32 %v3545_v60, %v1042_v27  ;;  %v1044_v19 = vpop.f32.mrb[75].mxu0  ;;  %v3804_v58 = vpop.f32.mrb[75].mxu1  ;;  %v3893_v4 = vadd.f32 %v3545_v60, %v3521_v38  ;;  %v3907_v38 = vld [vmem:[%s4119_s3 + $0xb0] sm:$0xff]  }
 0x1a8   :  { %v2614_v53 = vpack.c.bf16 %v1796_v41, %v1795_v15  ;;  %v2508_v8 = vunpack.c.l.bf16 %v3865_v35  ;;  %v2484_v19 = vunpack.c.l.bf16 %v3885_v16 }
 0x1a9   :  { %v1603_v10 = vadd.f32 %v2472_v51, %v1329_v5  ;;  %v1332_v24 = vadd.f32 %v1331_v48, %v1043_v45  ;;  %v2504_v51 = vunpack.c.l.bf16 %v3870_v39  ;;  %v3912_v5 = vld [vmem:[%s4119_s3 + $0xe8] sm:$0xff]   ;;  %v3917_v45 = vld [vmem:[%s4119_s3 + $0xe0] sm:$0xff]  }
 0x1aa   :  { %2733 = vst [vmem:[%s4122_s5 + $0x88] sm:$0xff] %v2614_v53  }
 0x1ab   :  { %v1733_v32 = vmul.f32 %v3565_v57, %v1603_v10  ;;  %v1604_v36 = vadd.f32 %v2473_v17, %v1332_v24  ;;  %vm1668_vm4 = vcmp.ge.f32.partialorder %v1603_v10, 0.0 }
 0x1ac   :  { %v1047_v61 = vpop.f32.mrb[76].mxu0  ;;  %v3872_v47 = vpop.f32.mrb[76].mxu1 }
 0x1ad   :  { %vm1669_vm5 = vcmp.ge.f32.partialorder %v1604_v36, 0.0  ;;  %v1734_v44 = vmul.f32 %v3565_v57, %v1604_v36  ;;  %v1048_v48 = vadd.f32 %v3545_v60, %v1047_v61  ;;  %v1049_v3 = vpop.f32.mrb[77].mxu0  ;;  %v3879_v11 = vpop.f32.mrb[77].mxu1  ;;  %v1797_v0 = vsel %vm1668_vm4, %v1603_v10, %v1733_v32 }
 0x1ae   :  { %v1050_v12 = vpop.f32.mrb[78].mxu0  ;;  %v3895_v1 = vpop.f32.mrb[78].mxu1  ;;  %v3924_v10 = vadd.f32 %v3545_v60, %v3525_v42  ;;  %v3930_v61 = vadd.f32 %v3545_v60, %v3529_v46 }
 0x1af   :  { %v1798_v27 = vsel %vm1669_vm5, %v1604_v36, %v1734_v44  ;;  %v1337_v17 = vadd.f32 %v3769_v37, %v1048_v48  ;;  %v1051_v15 = vadd.f32 %v3545_v60, %v1050_v12  ;;  %v1052_v34 = vpop.f32.mrb[79].mxu0  ;;  %v3902_v41 = vpop.f32.mrb[79].mxu1  ;;  %v3948_v12 = vld [vmem:[%s4119_s3 + $0xf0] sm:$0xff]  }
 0x1b0   :  { %v2619_v37 = vpack.c.bf16 %v1798_v27, %v1797_v0  ;;  %v3952_v0 = vadd.f32 %v3545_v60, %v3533_v50  ;;  %v3956_v27 = vadd.f32 %v3545_v60, %v3537_v54  ;;  %v2520_v34 = vunpack.c.l.bf16 %v3948_v12 }
 0x1b1   :  { %v1605_v24 = vadd.f32 %v2476_v18, %v1337_v17  ;;  %v1340_v32 = vadd.f32 %v3773_v40, %v1051_v15  ;;  %v3941_v40 = vld [vmem:[%s4119_s3 + $0xf8] sm:$0xff]  }
 0x1b2   :  { %2734 = vst [vmem:[%s4122_s5 + $0x90] sm:$0xff] %v2619_v37  }
 0x1b3   :  { %vm1670_vm6 = vcmp.ge.f32.partialorder %v1605_v24, 0.0  ;;  %v1735_v18 = vmul.f32 %v3565_v57, %v1605_v24  ;;  %v1606_v46 = vadd.f32 %v2477_v22, %v1340_v32  ;;  %v3969_v22 = vld [vmem:[%s4119_s3 + $0xb8] sm:$0xff]  }
 0x1b4   :  { %v1055_v17 = vpop.f32.mrb[80].mxu0  ;;  %v2854_v15 = vpop.f32.mrb[80].mxu1 }
 0x1b5   :  { %vm1671_vm7 = vcmp.ge.f32.partialorder %v1606_v46, 0.0  ;;  %v1736_v37 = vmul.f32 %v3565_v57, %v1606_v46  ;;  %v1056_v32 = vadd.f32 %v3545_v60, %v1055_v17  ;;  %v1057_v3 = vpop.f32.mrb[81].mxu0  ;;  %v1376_v42 = vpop.f32.mrb[81].mxu1  ;;  %v1799_v44 = vsel %vm1670_vm6, %v1605_v24, %v1735_v18 }
 0x1b6   :  { %v1385_v54 = vadd.f32 %v2854_v15, %v3799_v7  ;;  %v1377_v48 = vadd.f32 %v1376_v42, %v3791_v29  ;;  %v1058_v36 = vpop.f32.mrb[82].mxu0  ;;  %v2855_v53 = vpop.f32.mrb[82].mxu1 }
 0x1b7   :  { %v1800_v17 = vsel %vm1671_vm7, %v1606_v46, %v1736_v37  ;;  %v1345_v3 = vadd.f32 %v3787_v56, %v1056_v32  ;;  %v1059_v50 = vadd.f32 %v3545_v60, %v1058_v36  ;;  %v1388_v24 = vadd.f32 %v2855_v53, %v3818_v20  ;;  %v1060_v18 = vpop.f32.mrb[83].mxu0  ;;  %v1379_v7 = vpop.f32.mrb[83].mxu1  ;;  %v4001_v32 = vld [vmem:[%s4120_s2] ss:$0 sm:$0xff] }
 0x1b8   :  { %v2624_v15 = vpack.c.bf16 %v1800_v17, %v1799_v44  ;;  %v1617_v29 = vadd.f32 %v2500_v21, %v1385_v54  ;;  %v1615_v42 = vadd.f32 %v2496_v30, %v1377_v48  ;;  %v1380_v62 = vadd.f32 %v1379_v7, %v3795_v49 }
 0x1b9   :  { %v1607_v46 = vadd.f32 %v2480_v26, %v1345_v3  ;;  %v1348_v56 = vadd.f32 %v3804_v58, %v1059_v50  ;;  %v1618_v60 = vadd.f32 %v2501_v63, %v1388_v24  ;;  %v2492_v20 = vunpack.c.l.bf16 %v3969_v22 }
 0x1ba   :  { %2735 = vst [vmem:[%s4122_s5 + $0x98] sm:$0xff] %v2624_v15   ;;  %vm1682_vm8 = vcmp.ge.f32.partialorder %v1617_v29, 0.0  ;;  %v1747_v21 = vmul.f32 %v3565_v57, %v1617_v29  ;;  %vm1680_vm9 = vcmp.ge.f32.partialorder %v1615_v42, 0.0  ;;  %v1745_v49 = vmul.f32 %v3565_v57, %v1615_v42 }
 0x1bb   :  { %vm1672_vm10 = vcmp.ge.f32.partialorder %v1607_v46, 0.0  ;;  %v1737_v26 = vmul.f32 %v3565_v57, %v1607_v46  ;;  %v1608_v58 = vadd.f32 %v2481_v43, %v1348_v56  ;;  %vm1683_vm11 = vcmp.ge.f32.partialorder %v1618_v60, 0.0 }
 0x1bc   :  { %v1811_v2 = vsel %vm1682_vm8, %v1617_v29, %v1747_v21  ;;  %v1809_v30 = vsel %vm1680_vm9, %v1615_v42, %v1745_v49  ;;  %v1748_v63 = vmul.f32 %v3565_v57, %v1618_v60  ;;  %v1616_v53 = vadd.f32 %v2497_v52, %v1380_v62  ;;  %v1063_v36 = vpop.f32.mrb[84].mxu0  ;;  %v2858_v44 = vpop.f32.mrb[84].mxu1 }
 0x1bd   :  { %v1801_v48 = vsel %vm1672_vm10, %v1607_v46, %v1737_v26  ;;  %vm1673_vm12 = vcmp.ge.f32.partialorder %v1608_v58, 0.0  ;;  %v1738_v37 = vmul.f32 %v3565_v57, %v1608_v58  ;;  %v1064_v13 = vadd.f32 %v4001_v32, %v1063_v36  ;;  %v1065_v43 = vpop.f32.mrb[85].mxu0  ;;  %v1392_v50 = vpop.f32.mrb[85].mxu1 }
 0x1be   :  { %v1812_v54 = vsel %vm1683_vm11, %v1618_v60, %v1748_v63  ;;  %vm1681_vm13 = vcmp.ge.f32.partialorder %v1616_v53, 0.0  ;;  %v1746_v14 = vmul.f32 %v3565_v57, %v1616_v53  ;;  %v1401_v52 = vadd.f32 %v2858_v44, %v3835_v23  ;;  %v1066_v62 = vpop.f32.mrb[86].mxu0  ;;  %v2859_v17 = vpop.f32.mrb[86].mxu1 }
 0x1bf   :  { %v1802_v3 = vsel %vm1673_vm12, %v1608_v58, %v1738_v37  ;;  %v2654_v24 = vpack.c.bf16 %v1812_v54, %v1811_v2  ;;  %v1353_v18 = vadd.f32 %v3783_v59, %v1064_v13  ;;  %v1393_v7 = vadd.f32 %v1392_v50, %v3822_v25  ;;  %v1068_v15 = vpop.f32.mrb[87].mxu0  ;;  %v1395_v29 = vpop.f32.mrb[87].mxu1 }
 0x1c0   :  { %v2629_v42 = vpack.c.bf16 %v1802_v3, %v1801_v48  ;;  %v1810_v46 = vsel %vm1681_vm13, %v1616_v53, %v1746_v14  ;;  %v1621_v56 = vadd.f32 %v2508_v8, %v1401_v52  ;;  %v1067_v60 = vadd.f32 %v4001_v32, %v1066_v62 }
 0x1c1   :  { %2741 = vst [vmem:[%s4122_s5 + $0xc8] sm:$0xff] %v2654_v24   ;;  %v2649_v23 = vpack.c.bf16 %v1810_v46, %v1809_v30  ;;  %v1609_v21 = vadd.f32 %v2484_v19, %v1353_v18  ;;  %v1619_v59 = vadd.f32 %v2504_v51, %v1393_v7  ;;  %v1404_v25 = vadd.f32 %v2859_v17, %v3839_v6 }
 0x1c2   :  { %2736 = vst [vmem:[%s4122_s5 + $0xa0] sm:$0xff] %v2629_v42   ;;  %vm1686_vm14 = vcmp.ge.f32.partialorder %v1621_v56, 0.0  ;;  %v1751_v8 = vmul.f32 %v3565_v57, %v1621_v56  ;;  %v1356_v49 = vadd.f32 %v3801_v33, %v1067_v60  ;;  %v1396_v26 = vadd.f32 %v1395_v29, %v3826_v9 }
 0x1c3   :  { %2740 = vst [vmem:[%s4122_s5 + $0xc0] sm:$0xff] %v2649_v23   ;;  %vm1674_vm15 = vcmp.ge.f32.partialorder %v1609_v21, 0.0  ;;  %v1739_v51 = vmul.f32 %v3565_v57, %v1609_v21  ;;  %vm1684_vm0 = vcmp.ge.f32.partialorder %v1619_v59, 0.0  ;;  %v1749_v6 = vmul.f32 %v3565_v57, %v1619_v59 }
 0x1c4   :  { %v1815_v19 = vsel %vm1686_vm14, %v1621_v56, %v1751_v8  ;;  %v4123_v58 = vunpack.c.h.bf16 %v3885_v16  ;;  %v4124_v30 = vunpack.c.h.bf16 %v3865_v35  ;;  %v4125_v33 = vunpack.c.h.bf16 %v3870_v39  ;;  %v1071_v53 = vpop.f32.mrb[88].mxu0  ;;  %v2862_v36 = vpop.f32.mrb[88].mxu1 }
 0x1c5   :  { %v1803_v44 = vsel %vm1674_vm15, %v1609_v21, %v1739_v51  ;;  %v1813_v48 = vsel %vm1684_vm0, %v1619_v59, %v1749_v6  ;;  %v1072_v37 = vadd.f32 %v4001_v32, %v1071_v53  ;;  %v1417_v13 = vadd.f32 %v2862_v36, %v3889_v55  ;;  %v1073_v43 = vpop.f32.mrb[89].mxu0  ;;  %v1408_v50 = vpop.f32.mrb[89].mxu1 }
 0x1c6   :  { %v1610_v2 = vadd.f32 %v4123_v58, %v1356_v49  ;;  %v1622_v63 = vadd.f32 %v4124_v30, %v1404_v25  ;;  %v1620_v9 = vadd.f32 %v4125_v33, %v1396_v26  ;;  %v1074_v54 = vpop.f32.mrb[90].mxu0  ;;  %v2863_v14 = vpop.f32.mrb[90].mxu1  ;;  %v4126_v62 = vunpack.c.l.bf16 %v3912_v5 }
 0x1c7   :  { %v1361_v52 = vadd.f32 %v3879_v11, %v1072_v37  ;;  %v1076_v3 = vpop.f32.mrb[91].mxu0  ;;  %v1411_v55 = vpop.f32.mrb[91].mxu1  ;;  %v1409_v7 = vadd.f32 %v1408_v50, %v3848_v28  ;;  %v1075_v15 = vadd.f32 %v4001_v32, %v1074_v54  ;;  %v4127_v56 = vunpack.c.l.bf16 %v3907_v38 }
 0x1c8   :  { %vm1675_vm1 = vcmp.ge.f32.partialorder %v1610_v2, 0.0  ;;  %v1740_v16 = vmul.f32 %v3565_v57, %v1610_v2  ;;  %vm1687_vm2 = vcmp.ge.f32.partialorder %v1622_v63, 0.0  ;;  %v1752_v35 = vmul.f32 %v3565_v57, %v1622_v63 }
 0x1c9   :  { %vm1685_vm3 = vcmp.ge.f32.partialorder %v1620_v9, 0.0  ;;  %v1750_v39 = vmul.f32 %v3565_v57, %v1620_v9  ;;  %v1625_v17 = vadd.f32 %v4126_v62, %v1417_v13  ;;  %v1611_v60 = vadd.f32 %v4127_v56, %v1361_v52 }
 0x1ca   :  { %v1804_v24 = vsel %vm1675_vm1, %v1610_v2, %v1740_v16  ;;  %v1816_v18 = vsel %vm1687_vm2, %v1622_v63, %v1752_v35  ;;  %v4128_v21 = vunpack.c.l.bf16 %v3917_v45  ;;  %v1364_v25 = vadd.f32 %v3902_v41, %v1075_v15 }
 0x1cb   :  { %v2634_v29 = vpack.c.bf16 %v1804_v24, %v1803_v44  ;;  %v2664_v42 = vpack.c.bf16 %v1816_v18, %v1815_v19  ;;  %v1814_v46 = vsel %vm1685_vm3, %v1620_v9, %v1750_v39  ;;  %vm1690_vm4 = vcmp.ge.f32.partialorder %v1625_v17, 0.0 }
 0x1cc   :  { %v2659_v23 = vpack.c.bf16 %v1814_v46, %v1813_v48  ;;  %v1755_v11 = vmul.f32 %v3565_v57, %v1625_v17  ;;  %v1623_v59 = vadd.f32 %v4128_v21, %v1409_v7  ;;  %vm1676_vm5 = vcmp.ge.f32.partialorder %v1611_v60, 0.0  ;;  %v1079_v6 = vpop.f32.mrb[92].mxu0  ;;  %v2866_v19 = vpop.f32.mrb[92].mxu1 }
 0x1cd   :  { %2737 = vst [vmem:[%s4122_s5 + $0xa8] sm:$0xff] %v2634_v29   ;;  %2743 = vst [vmem:[%s4122_s5 + $0xd8] sm:$0xff] %v2664_v42   ;;  %v1741_v28 = vmul.f32 %v3565_v57, %v1611_v60  ;;  %v1420_v8 = vadd.f32 %v2863_v14, %v3893_v4  ;;  %v1412_v51 = vadd.f32 %v1411_v55, %v3858_v31  ;;  %v2493_v58 = vunpack.c.h.bf16 %v3969_v22  ;;  %v1081_v33 = vpop.f32.mrb[93].mxu0  ;;  %v1424_v9 = vpop.f32.mrb[93].mxu1 }
 0x1ce   :  { %2742 = vst [vmem:[%s4122_s5 + $0xd0] sm:$0xff] %v2659_v23   ;;  %v1819_v49 = vsel %vm1690_vm4, %v1625_v17, %v1755_v11  ;;  %v1753_v26 = vmul.f32 %v3565_v57, %v1623_v59  ;;  %vm1688_vm6 = vcmp.ge.f32.partialorder %v1623_v59, 0.0  ;;  %v4129_v2 = vunpack.c.h.bf16 %v3907_v38  ;;  %v1082_v37 = vpop.f32.mrb[94].mxu0  ;;  %v2867_v13 = vpop.f32.mrb[94].mxu1 }
 0x1cf   :  { %v4130_v41 = vunpack.c.h.bf16 %v3912_v5  ;;  %v1080_v63 = vadd.f32 %v4001_v32, %v1079_v6  ;;  %v1805_v53 = vsel %vm1676_vm5, %v1611_v60, %v1741_v28  ;;  %v4131_v36 = vunpack.c.h.bf16 %v3917_v45  ;;  %v1084_v43 = vpop.f32.mrb[95].mxu0  ;;  %v1427_v50 = vpop.f32.mrb[95].mxu1 }
 0x1d0   :  { %v1612_v30 = vadd.f32 %v4129_v2, %v1364_v25  ;;  %v1433_v44 = vadd.f32 %v2866_v19, %v3952_v0  ;;  %v1425_v48 = vadd.f32 %v1424_v9, %v3924_v10  ;;  %v1817_v16 = vsel %vm1688_vm6, %v1623_v59, %v1753_v26 }
 0x1d1   :  { %v1626_v4 = vadd.f32 %v4130_v41, %v1420_v8  ;;  %v1624_v31 = vadd.f32 %v4131_v36, %v1412_v51  ;;  %v1369_v35 = vadd.f32 %v3872_v47, %v1080_v63  ;;  %v4132_v10 = vunpack.c.l.bf16 %v3941_v40 }
 0x1d2   :  { %vm1677_vm7 = vcmp.ge.f32.partialorder %v1612_v30, 0.0  ;;  %v1742_v38 = vmul.f32 %v3565_v57, %v1612_v30  ;;  %v1083_v39 = vadd.f32 %v4001_v32, %v1082_v37  ;;  %v1627_v24 = vadd.f32 %v2520_v34, %v1425_v48 }
 0x1d3   :  { %vm1691_vm8 = vcmp.ge.f32.partialorder %v1626_v4, 0.0  ;;  %v1756_v5 = vmul.f32 %v3565_v57, %v1626_v4  ;;  %vm1689_vm9 = vcmp.ge.f32.partialorder %v1624_v31, 0.0  ;;  %v1754_v45 = vmul.f32 %v3565_v57, %v1624_v31 }
 0x1d4   :  { %v1806_v0 = vsel %vm1677_vm7, %v1612_v30, %v1742_v38  ;;  %v1629_v14 = vadd.f32 %v4132_v10, %v1433_v44  ;;  %v1613_v3 = vadd.f32 %v2492_v20, %v1369_v35  ;;  %v2525_v18 = vunpack.c.h.bf16 %v3941_v40 }
 0x1d5   :  { %v1820_v54 = vsel %vm1691_vm8, %v1626_v4, %v1756_v5  ;;  %v2639_v52 = vpack.c.bf16 %v1806_v0, %v1805_v53  ;;  %v1818_v17 = vsel %vm1689_vm9, %v1624_v31, %v1754_v45  ;;  %v2521_v47 = vunpack.c.h.bf16 %v3948_v12 }
 0x1d6   :  { %v2674_v62 = vpack.c.bf16 %v1820_v54, %v1819_v49  ;;  %v2669_v55 = vpack.c.bf16 %v1818_v17, %v1817_v16  ;;  %v1372_v32 = vadd.f32 %v3895_v1, %v1083_v39  ;;  %v1436_v34 = vadd.f32 %v2867_v13, %v3956_v27 }
 0x1d7   :  { %2738 = vst [vmem:[%s4122_s5 + $0xb0] sm:$0xff] %v2639_v52   ;;  %v1428_v40 = vadd.f32 %v1427_v50, %v3930_v61  ;;  %v1743_v12 = vmul.f32 %v3565_v57, %v1613_v3  ;;  %vm1694_vm10 = vcmp.ge.f32.partialorder %v1629_v14, 0.0  ;;  %v1759_v22 = vmul.f32 %v3565_v57, %v1629_v14 }
 0x1d8   :  { %2745 = vst [vmem:[%s4122_s5 + $0xe8] sm:$0xff] %v2674_v62   ;;  %2744 = vst [vmem:[%s4122_s5 + $0xe0] sm:$0xff] %v2669_v55   ;;  %v1614_v20 = vadd.f32 %v2493_v58, %v1372_v32  ;;  %vm1678_vm11 = vcmp.ge.f32.partialorder %v1613_v3, 0.0  ;;  %v1757_v7 = vmul.f32 %v3565_v57, %v1627_v24  ;;  %v1630_v15 = vadd.f32 %v2525_v18, %v1436_v34 }
 0x1d9   :  { %v1628_v29 = vadd.f32 %v2521_v47, %v1428_v40  ;;  %vm1692_vm12 = vcmp.ge.f32.partialorder %v1627_v24, 0.0  ;;  %v1807_v42 = vsel %vm1678_vm11, %v1613_v3, %v1743_v12  ;;  %v1823_v46 = vsel %vm1694_vm10, %v1629_v14, %v1759_v22 }
 0x1da   :  { %vm1679_vm13 = vcmp.ge.f32.partialorder %v1614_v20, 0.0  ;;  %v1744_v1 = vmul.f32 %v3565_v57, %v1614_v20  ;;  %vm1695_vm14 = vcmp.ge.f32.partialorder %v1630_v15, 0.0  ;;  %v1760_v27 = vmul.f32 %v3565_v57, %v1630_v15 }
 0x1db   :  { %vm1693_vm15 = vcmp.ge.f32.partialorder %v1628_v29, 0.0  ;;  %v1758_v61 = vmul.f32 %v3565_v57, %v1628_v29  ;;  %v1821_v60 = vsel %vm1692_vm12, %v1627_v24, %v1757_v7 }
 0x1dc   :  { %v1808_v56 = vsel %vm1679_vm13, %v1614_v20, %v1744_v1  ;;  %v1824_v11 = vsel %vm1695_vm14, %v1630_v15, %v1760_v27 }
 0x1dd   :  { %v2644_v23 = vpack.c.bf16 %v1808_v56, %v1807_v42  ;;  %v1822_v21 = vsel %vm1693_vm15, %v1628_v29, %v1758_v61  ;;  %v2684_v59 = vpack.c.bf16 %v1824_v11, %v1823_v46 }
 0x1de   :  { %v2679_v28 = vpack.c.bf16 %v1822_v21, %v1821_v60 }
 0x1df   :  { %2739 = vst [vmem:[%s4122_s5 + $0xb8] sm:$0xff] %v2644_v23   ;;  %2747 = vst [vmem:[%s4122_s5 + $0xf8] sm:$0xff] %v2684_v59  }
 0x1e0   :  { %2746 = vst [vmem:[%s4122_s5 + $0xf0] sm:$0xff] %v2679_v28  }

// kernel: cannet_forward.10
= control target key start
LH: loop header
LB: loop body
LE: loop exit
PB: predicated region body
PF: predicated region fallthrough
CT: control target
= control target key end

     0   :  { %v4580_v0 = vmov 0   ;;  %s5989_s1 = inlined_call_operand.vmem [shape: bf16[384,128], index: 1, kind: input, shape index: {}]   ;;  %s5990_s0 = inlined_call_operand.vmem [shape: bf16[512,384], index: 0, kind: input, shape index: {}]   ;;  %s5991_s5 = inlined_call_operand.vmem [shape: bf16[128,128], index: 5, kind: input, shape index: {}]   ;;  %s5992_s3 = inlined_call_operand.vmem [shape: bf16[512,128], index: 3, kind: input, shape index: {}]   ;;  %s5993_s2 = inlined_call_operand.vmem [shape: f32[1,128], index: 2, kind: input, shape index: {}]   ;;  %s5994_s4 = inlined_call_operand.<no memory space> [shape: f32[1], index: 4, kind: input, shape index: {}]   ;;  %s5995_s8 = inlined_call_operand.vmem [shape: bf16[128,128], index: 8, kind: input, shape index: {}]   ;;  %s5996_s7 = inlined_call_operand.vmem [shape: bf16[512,128], index: 7, kind: input, shape index: {}]   ;;  %s5997_s6 = inlined_call_operand.vmem [shape: f32[1,128], index: 6, kind: input, shape index: {}]   ;;  %s5998_s9 = inlined_call_operand.vmem [shape: bf16[512,128], index: 9, kind: output, shape index: {}]  }
   0x1   :  { %873 = vmatprep.subr.bf16.mxu0 %v4580_v0  ;;  %v4379_v1 = vld [vmem:[%s5989_s1] sm:$0xff]   ;;  %v4380_v2 = vld [vmem:[%s5989_s1 + $0x8] sm:$0xff]   ;;  %v4381_v3 = vld [vmem:[%s5989_s1 + $0x10] sm:$0xff]  }
   0x2   :  { %874 = vmatpush1.bf16.msra.mxu0 %v4379_v1  ;;  %v4382_v4 = vld [vmem:[%s5989_s1 + $0x18] sm:$0xff]   ;;  %v4383_v5 = vld [vmem:[%s5989_s1 + $0x20] sm:$0xff]   ;;  %v4384_v6 = vld [vmem:[%s5989_s1 + $0x28] sm:$0xff]  }
   0x3   :  { %875 = vmatprep.subr.bf16.mxu0 %v4580_v0  ;;  %v4397_v7 = vld [vmem:[%s5990_s0 + $0x4] ss:$12 sps:$4 sm:$0xff]   ;;  %v4672_v10 = vld [vmem:[%s5989_s1 + $0x88] sm:$0xff]   ;;  %v4386_v11 = vld [vmem:[%s5989_s1 + $0x38] sm:$0xff]  }
   0x4   :  { %v4660_v8 = vld [vmem:[%s5989_s1 + $0x80] sm:$0xff]   ;;  %905 = vmatprep.mubr.bf16.mxu0 %v4397_v7  ;;  %v4385_v9 = vld [vmem:[%s5989_s1 + $0x30] sm:$0xff]   ;;  %v4694_v14 = vld [vmem:[%s5989_s1 + $0x98] sm:$0xff]  }
   0x5   :  { %4234 = vmatprep.subr.bf16.mxu1 %v4660_v8  ;;  %v4387_v12 = vld [vmem:[%s5989_s1 + $0x40] sm:$0xff]   ;;  %v4686_v13 = vld [vmem:[%s5989_s1 + $0x90] sm:$0xff]   ;;  %v4388_v15 = vld [vmem:[%s5989_s1 + $0x48] sm:$0xff]  }
   0x6   :  { %876 = vmatpush1.bf16.msra.mxu0 %v4380_v2  ;;  %4242 = vmatpush3.bf16.msra.mxu1 %v4660_v8  ;;  %v4704_v16 = vld [vmem:[%s5989_s1 + $0xa0] sm:$0xff]   ;;  %v4389_v17 = vld [vmem:[%s5989_s1 + $0x50] sm:$0xff]   ;;  %v4714_v18 = vld [vmem:[%s5989_s1 + $0xa8] sm:$0xff]  }
   0x7   :  { %877 = vmatprep.subr.bf16.mxu0 %v4580_v0  ;;  %4235 = vmatprep.subr.bf16.mxu1 %v4672_v10  ;;  %v4390_v19 = vld [vmem:[%s5989_s1 + $0x58] sm:$0xff]   ;;  %v4724_v20 = vld [vmem:[%s5989_s1 + $0xb0] sm:$0xff]   ;;  %v4391_v22 = vld [vmem:[%s5989_s1 + $0x60] sm:$0xff]  }
   0x8   :  { %v4442_v21 = vld [vmem:[%s5990_s0 + $0x128] ss:$12 sps:$4 sm:$0xff]   ;;  %v4738_v23 = vld [vmem:[%s5989_s1 + $0xb8] sm:$0xff]   ;;  %v4443_v25 = vld [vmem:[%s5990_s0 + $0x140] ss:$12 sps:$4 sm:$0xff]  }
   0x9   :  { %4034 = vmatprep.mubr.bf16.mxu1 %v4442_v21  ;;  %v4392_v24 = vld [vmem:[%s5989_s1 + $0x68] sm:$0xff]   ;;  %v4450_v26 = vld [vmem:[%s5990_s0 + $0x158] ss:$12 sps:$4 sm:$0xff]   ;;  %v4393_v27 = vld [vmem:[%s5989_s1 + $0x70] sm:$0xff]  }
   0xa   :  { %878 = vmatpush1.bf16.msra.mxu0 %v4381_v3  ;;  %4243 = vmatpush3.bf16.msra.mxu1 %v4672_v10  ;;  %v4394_v28 = vld [vmem:[%s5989_s1 + $0x78] sm:$0xff]   ;;  %v4395_v30 = vld [vmem:[%s5990_s0] ss:$12 sps:$4 sm:$0xff]   ;;  %v4458_v32 = vld [vmem:[%s5990_s0 + $0x188] ss:$12 sps:$4 sm:$0xff]  }
   0xb   :  { %879 = vmatprep.subr.bf16.mxu0 %v4580_v0  ;;  %4236 = vmatprep.subr.bf16.mxu1 %v4686_v13  ;;  %v4451_v29 = vld [vmem:[%s5990_s0 + $0x170] ss:$12 sps:$4 sm:$0xff]   ;;  %v4459_v33 = vld [vmem:[%s5990_s0 + $0x1a0] ss:$12 sps:$4 sm:$0xff]   ;;  %v4401_v34 = vld [vmem:[%s5990_s0 + $0x18] ss:$12 sps:$4 sm:$0xff]  }
   0xc   :  { %v4399_v31 = vld [vmem:[%s5990_s0 + $0x1c] ss:$12 sps:$4 sm:$0xff]   ;;  %v4402_v35 = vld [vmem:[%s5990_s0 + $0x34] ss:$12 sps:$4 sm:$0xff]   ;;  %v4405_v37 = vld [vmem:[%s5990_s0 + $0x4c] ss:$12 sps:$4 sm:$0xff]  }
   0xd   :  { %v4404_v36 = vld [vmem:[%s5990_s0 + $0x30] ss:$12 sps:$4 sm:$0xff]   ;;  %v4466_v38 = vld [vmem:[%s5990_s0 + $0x1b8] ss:$12 sps:$4 sm:$0xff]   ;;  %v4407_v40 = vld [vmem:[%s5990_s0 + $0x48] ss:$12 sps:$4 sm:$0xff]  }
   0xe   :  { %880 = vmatpush1.bf16.msra.mxu0 %v4382_v4  ;;  %4244 = vmatpush3.bf16.msra.mxu1 %v4686_v13  ;;  %v4467_v39 = vld [vmem:[%s5990_s0 + $0x1d0] ss:$12 sps:$4 sm:$0xff]   ;;  %v4410_v42 = vld [vmem:[%s5990_s0 + $0x60] ss:$12 sps:$4 sm:$0xff]   ;;  %v4474_v44 = vld [vmem:[%s5990_s0 + $0x1e8] ss:$12 sps:$4 sm:$0xff]  }
   0xf   :  { %881 = vmatprep.subr.bf16.mxu0 %v4580_v0  ;;  %4237 = vmatprep.subr.bf16.mxu1 %v4694_v14  ;;  %v4408_v41 = vld [vmem:[%s5990_s0 + $0x64] ss:$12 sps:$4 sm:$0xff]   ;;  %v4412_v43 = vld [vmem:[%s5990_s0 + $0x7c] ss:$12 sps:$4 sm:$0xff]   ;;  %v4475_v45 = vld [vmem:[%s5990_s0 + $0x200] ss:$12 sps:$4 sm:$0xff]  }
  0x10   :  { %v4414_v46 = vld [vmem:[%s5990_s0 + $0x78] ss:$12 sps:$4 sm:$0xff]   ;;  %v4415_v47 = vld [vmem:[%s5990_s0 + $0x94] ss:$12 sps:$4 sm:$0xff]   ;;  %v4417_v48 = vld [vmem:[%s5990_s0 + $0x90] ss:$12 sps:$4 sm:$0xff]  }
  0x11   :  { %v4418_v49 = vld [vmem:[%s5990_s0 + $0xac] ss:$12 sps:$4 sm:$0xff]   ;;  %v4483_v51 = vld [vmem:[%s5990_s0 + $0x230] ss:$12 sps:$4 sm:$0xff]   ;;  %v4420_v52 = vld [vmem:[%s5990_s0 + $0xa8] ss:$12 sps:$4 sm:$0xff]  }
  0x12   :  { %882 = vmatpush1.bf16.msra.mxu0 %v4383_v5  ;;  %4245 = vmatpush3.bf16.msra.mxu1 %v4694_v14  ;;  %v4482_v50 = vld [vmem:[%s5990_s0 + $0x218] ss:$12 sps:$4 sm:$0xff]   ;;  %v4423_v54 = vld [vmem:[%s5990_s0 + $0xc0] ss:$12 sps:$4 sm:$0xff]   ;;  %v4425_v55 = vld [vmem:[%s5990_s0 + $0xdc] ss:$12 sps:$4 sm:$0xff]  }
  0x13   :  { %883 = vmatprep.subr.bf16.mxu0 %v4580_v0  ;;  %4238 = vmatprep.subr.bf16.mxu1 %v4704_v16  ;;  %v4421_v53 = vld [vmem:[%s5990_s0 + $0xc4] ss:$12 sps:$4 sm:$0xff]   ;;  %v4490_v56 = vld [vmem:[%s5990_s0 + $0x248] ss:$12 sps:$4 sm:$0xff]   ;;  %v4491_v57 = vld [vmem:[%s5990_s0 + $0x260] ss:$12 sps:$4 sm:$0xff]  }
  0x14   :  { %v4427_v58 = vld [vmem:[%s5990_s0 + $0xd8] ss:$12 sps:$4 sm:$0xff]   ;;  %v4429_v59 = vld [vmem:[%s5990_s0 + $0xf4] ss:$12 sps:$4 sm:$0xff]   ;;  %v4431_v60 = vld [vmem:[%s5990_s0 + $0xf0] ss:$12 sps:$4 sm:$0xff]  }
  0x15   :  { %v4434_v61 = vld [vmem:[%s5990_s0 + $0x10c] ss:$12 sps:$4 sm:$0xff]   ;;  %v4499_v63 = vld [vmem:[%s5990_s0 + $0x290] ss:$12 sps:$4 sm:$0xff]   ;;  %v4506_v4 = vld [vmem:[%s5990_s0 + $0x2a8] ss:$12 sps:$4 sm:$0xff]  }
  0x16   :  { %884 = vmatpush1.bf16.msra.mxu0 %v4384_v6  ;;  %4246 = vmatpush3.bf16.msra.mxu1 %v4704_v16  ;;  %v4498_v62 = vld [vmem:[%s5990_s0 + $0x278] ss:$12 sps:$4 sm:$0xff]   ;;  %v4441_v2 = vld [vmem:[%s5990_s0 + $0x120] ss:$12 sps:$4 sm:$0xff]   ;;  %v4444_v3 = vld [vmem:[%s5990_s0 + $0x13c] ss:$12 sps:$4 sm:$0xff]  }
  0x17   :  { %885 = vmatprep.subr.bf16.mxu0 %v4580_v0  ;;  %4239 = vmatprep.subr.bf16.mxu1 %v4714_v18  ;;  %v4439_v1 = vld [vmem:[%s5990_s0 + $0x124] ss:$12 sps:$4 sm:$0xff]   ;;  %v4507_v5 = vld [vmem:[%s5990_s0 + $0x2c0] ss:$12 sps:$4 sm:$0xff]  }
  0x18   :  { %v4446_v6 = vld [vmem:[%s5990_s0 + $0x138] ss:$12 sps:$4 sm:$0xff]   ;;  %v4447_v7 = vld [vmem:[%s5990_s0 + $0x154] ss:$12 sps:$4 sm:$0xff]  }
  0x19   :  { %v4471_v21 = vld [vmem:[%s5990_s0 + $0x1e4] ss:$12 sps:$4 sm:$0xff]  }
  0x1a   :  { %886 = vmatpush1.bf16.msra.mxu0 %v4385_v9  ;;  %4247 = vmatpush3.bf16.msra.mxu1 %v4714_v18  ;;  %v4452_v9 = vld [vmem:[%s5990_s0 + $0x16c] ss:$12 sps:$4 sm:$0xff]  }
  0x1b   :  { %887 = vmatprep.subr.bf16.mxu0 %v4580_v0  ;;  %4240 = vmatprep.subr.bf16.mxu1 %v4724_v20 }
  0x1e   :  { %888 = vmatpush1.bf16.msra.mxu0 %v4386_v11  ;;  %4248 = vmatpush3.bf16.msra.mxu1 %v4724_v20  ;;  %v4515_v11 = vld [vmem:[%s5990_s0 + $0x2f0] ss:$12 sps:$4 sm:$0xff]  }
  0x1f   :  { %889 = vmatprep.subr.bf16.mxu0 %v4580_v0  ;;  %4241 = vmatprep.subr.bf16.mxu1 %v4738_v23 }
  0x22   :  { %890 = vmatpush1.bf16.msra.mxu0 %v4387_v12  ;;  %4249 = vmatpush3.bf16.msra.mxu1 %v4738_v23  ;;  %v4454_v12 = vld [vmem:[%s5990_s0 + $0x168] ss:$12 sps:$4 sm:$0xff]  }
  0x23   :  { %891 = vmatprep.subr.bf16.mxu0 %v4580_v0 }
  0x25   :  { %4035 = vmatmul.mubr.bf16.vlgmr.msra.gmra.mrb[0].mxu1 %v4443_v25  ;;  %v4479_v25 = vld [vmem:[%s5990_s0 + $0x214] ss:$12 sps:$4 sm:$0xff]  }
  0x26   :  { %892 = vmatpush1.bf16.msra.mxu0 %v4388_v15  ;;  %4038 = vmatprep.mubr.bf16.mxu1 %v4450_v26  ;;  %v4460_v15 = vld [vmem:[%s5990_s0 + $0x19c] ss:$12 sps:$4 sm:$0xff]  }
  0x27   :  { %893 = vmatprep.subr.bf16.mxu0 %v4580_v0  ;;  %v4481_v26 = vld [vmem:[%s5990_s0 + $0x210] ss:$12 sps:$4 sm:$0xff]  }
  0x2a   :  { %894 = vmatpush1.bf16.msra.mxu0 %v4389_v17  ;;  %v4463_v17 = vld [vmem:[%s5990_s0 + $0x1b4] ss:$12 sps:$4 sm:$0xff]  }
  0x2b   :  { %895 = vmatprep.subr.bf16.mxu0 %v4580_v0 }
  0x2d   :  { %4039 = vmatmul.mubr.bf16.gmra.mrb[4].mxu1 %v4451_v29  ;;  %v4487_v29 = vld [vmem:[%s5990_s0 + $0x244] ss:$12 sps:$4 sm:$0xff]  }
  0x2e   :  { %896 = vmatpush1.bf16.msra.mxu0 %v4390_v19  ;;  %4042 = vmatprep.mubr.bf16.mxu1 %v4458_v32  ;;  %v4468_v19 = vld [vmem:[%s5990_s0 + $0x1cc] ss:$12 sps:$4 sm:$0xff]  }
  0x2f   :  { %897 = vmatprep.subr.bf16.mxu0 %v4580_v0  ;;  %v4494_v32 = vld [vmem:[%s5990_s0 + $0x258] ss:$12 sps:$4 sm:$0xff]  }
  0x32   :  { %898 = vmatpush1.bf16.msra.mxu0 %v4391_v22  ;;  %v4473_v22 = vld [vmem:[%s5990_s0 + $0x1e0] ss:$12 sps:$4 sm:$0xff]  }
  0x33   :  { %899 = vmatprep.subr.bf16.mxu0 %v4580_v0 }
  0x35   :  { %4043 = vmatmul.mubr.bf16.gmra.mrb[8].mxu1 %v4459_v33  ;;  %v4495_v33 = vld [vmem:[%s5990_s0 + $0x274] ss:$12 sps:$4 sm:$0xff]  }
  0x36   :  { %900 = vmatpush1.bf16.msra.mxu0 %v4392_v24  ;;  %4046 = vmatprep.mubr.bf16.mxu1 %v4466_v38  ;;  %v4478_v24 = vld [vmem:[%s5990_s0 + $0x1f8] ss:$12 sps:$4 sm:$0xff]  }
  0x37   :  { %901 = vmatprep.subr.bf16.mxu0 %v4580_v0  ;;  %v4500_v38 = vld [vmem:[%s5990_s0 + $0x28c] ss:$12 sps:$4 sm:$0xff]  }
  0x3a   :  { %902 = vmatpush1.bf16.msra.mxu0 %v4393_v27  ;;  %v4484_v27 = vld [vmem:[%s5990_s0 + $0x22c] ss:$12 sps:$4 sm:$0xff]  }
  0x3b   :  { %903 = vmatprep.subr.bf16.mxu0 %v4580_v0  ;;  %v4436_v0 = vld [vmem:[%s5990_s0 + $0x108] ss:$12 sps:$4 sm:$0xff]  }
  0x3d   :  { %4047 = vmatmul.mubr.bf16.gmra.mrb[12].mxu1 %v4467_v39 }
  0x3e   :  { %904 = vmatpush1.bf16.msra.mxu0 %v4394_v28  ;;  %4050 = vmatprep.mubr.bf16.mxu1 %v4474_v44  ;;  %v4486_v28 = vld [vmem:[%s5990_s0 + $0x228] ss:$12 sps:$4 sm:$0xff]  }
  0x3f   :  { %3994 = vmatprep.subr.bf16.mxu0 %v4660_v8  ;;  %v4502_v44 = vld [vmem:[%s5990_s0 + $0x288] ss:$12 sps:$4 sm:$0xff]  }
  0x41   :  { %906 = vmatmul.mubr.bf16.vlgmr.msra.gmra.mrb[0].mxu0 %v4395_v30  ;;  %v4489_v30 = vld [vmem:[%s5990_s0 + $0x240] ss:$12 sps:$4 sm:$0xff]  }
  0x42   :  { %3995 = vmatpush3.bf16.msra.mxu0 %v4660_v8  ;;  %913 = vmatprep.mubr.bf16.mxu0 %v4399_v31  ;;  %v4449_v8 = vld [vmem:[%s5990_s0 + $0x150] ss:$12 sps:$4 sm:$0xff]  }
  0x43   :  { %3996 = vmatprep.subr.bf16.mxu0 %v4672_v10  ;;  %v4492_v31 = vld [vmem:[%s5990_s0 + $0x25c] ss:$12 sps:$4 sm:$0xff]  }
  0x45   :  { %4051 = vmatmul.mubr.bf16.gmra.mrb[16].mxu1 %v4475_v45 }
  0x46   :  { %3997 = vmatpush3.bf16.msra.mxu0 %v4672_v10  ;;  %4054 = vmatprep.mubr.bf16.mxu1 %v4482_v50  ;;  %v4514_v10 = vld [vmem:[%s5990_s0 + $0x2d8] ss:$12 sps:$4 sm:$0xff]  }
  0x47   :  { %3998 = vmatprep.subr.bf16.mxu0 %v4686_v13 }
  0x49   :  { %914 = vmatmul.mubr.bf16.gmra.mrb[4].mxu0 %v4401_v34 }
  0x4a   :  { %921 = vmatprep.mubr.bf16.mxu0 %v4402_v35  ;;  %3999 = vmatpush3.bf16.msra.mxu0 %v4686_v13  ;;  %v4455_v13 = vld [vmem:[%s5990_s0 + $0x184] ss:$12 sps:$4 sm:$0xff]  }
  0x4b   :  { %4000 = vmatprep.subr.bf16.mxu0 %v4694_v14 }
  0x4d   :  { %4055 = vmatmul.mubr.bf16.gmra.mrb[20].mxu1 %v4483_v51 }
  0x4e   :  { %4001 = vmatpush3.bf16.msra.mxu0 %v4694_v14  ;;  %4058 = vmatprep.mubr.bf16.mxu1 %v4490_v56  ;;  %v4457_v14 = vld [vmem:[%s5990_s0 + $0x180] ss:$12 sps:$4 sm:$0xff]  }
  0x4f   :  { %4002 = vmatprep.subr.bf16.mxu0 %v4704_v16 }
  0x51   :  { %922 = vmatmul.mubr.bf16.gmra.mrb[8].mxu0 %v4404_v36  ;;  %v4497_v36 = vld [vmem:[%s5990_s0 + $0x270] ss:$12 sps:$4 sm:$0xff]  }
  0x52   :  { %929 = vmatprep.mubr.bf16.mxu0 %v4405_v37  ;;  %4003 = vmatpush3.bf16.msra.mxu0 %v4704_v16  ;;  %v4462_v16 = vld [vmem:[%s5990_s0 + $0x198] ss:$12 sps:$4 sm:$0xff]  }
  0x53   :  { %4004 = vmatprep.subr.bf16.mxu0 %v4714_v18 }
  0x55   :  { %4059 = vmatmul.mubr.bf16.gmra.mrb[24].mxu1 %v4491_v57  ;;  %v4508_v57 = vld [vmem:[%s5990_s0 + $0x2bc] ss:$12 sps:$4 sm:$0xff]  }
  0x56   :  { %4005 = vmatpush3.bf16.msra.mxu0 %v4714_v18  ;;  %4062 = vmatprep.mubr.bf16.mxu1 %v4498_v62  ;;  %v4465_v18 = vld [vmem:[%s5990_s0 + $0x1b0] ss:$12 sps:$4 sm:$0xff]   ;;  %v4510_v62 = vld [vmem:[%s5990_s0 + $0x2b8] ss:$12 sps:$4 sm:$0xff]  }
  0x57   :  { %4006 = vmatprep.subr.bf16.mxu0 %v4724_v20 }
  0x59   :  { %930 = vmatmul.mubr.bf16.gmra.mrb[12].mxu0 %v4407_v40 }
  0x5a   :  { %937 = vmatprep.mubr.bf16.mxu0 %v4408_v41  ;;  %4007 = vmatpush3.bf16.msra.mxu0 %v4724_v20  ;;  %v4470_v20 = vld [vmem:[%s5990_s0 + $0x1c8] ss:$12 sps:$4 sm:$0xff]  }
  0x5b   :  { %4008 = vmatprep.subr.bf16.mxu0 %v4738_v23 }
  0x5d   :  { %4063 = vmatmul.mubr.bf16.gmra.mrb[28].mxu1 %v4499_v63 }
  0x5e   :  { %4009 = vmatpush3.bf16.msra.mxu0 %v4738_v23  ;;  %4066 = vmatprep.mubr.bf16.mxu1 %v4506_v4  ;;  %v4476_v23 = vld [vmem:[%s5990_s0 + $0x1fc] ss:$12 sps:$4 sm:$0xff]  }
  0x61   :  { %938 = vmatmul.mubr.bf16.gmra.mrb[16].mxu0 %v4410_v42 }
  0x62   :  { %945 = vmatprep.mubr.bf16.mxu0 %v4412_v43 }
  0x65   :  { %4067 = vmatmul.mubr.bf16.gmra.mrb[32].mxu1 %v4507_v5 }
  0x66   :  { %4070 = vmatprep.mubr.bf16.mxu1 %v4514_v10  ;;  %v4516_v10 = vld [vmem:[%s5990_s0 + $0x2ec] ss:$12 sps:$4 sm:$0xff]  }
  0x69   :  { %946 = vmatmul.mubr.bf16.gmra.mrb[20].mxu0 %v4414_v46 }
  0x6a   :  { %953 = vmatprep.mubr.bf16.mxu0 %v4415_v47  ;;  %v4503_v47 = vld [vmem:[%s5990_s0 + $0x2a4] ss:$12 sps:$4 sm:$0xff]  }
  0x6d   :  { %4071 = vmatmul.mubr.bf16.gmra.mrb[36].mxu1 %v4515_v11 }
  0x71   :  { %954 = vmatmul.mubr.bf16.gmra.mrb[24].mxu0 %v4417_v48 }
  0x72   :  { %961 = vmatprep.mubr.bf16.mxu0 %v4418_v49 }
  0x79   :  { %962 = vmatmul.mubr.bf16.gmra.mrb[28].mxu0 %v4420_v52 }
  0x7a   :  { %969 = vmatprep.mubr.bf16.mxu0 %v4421_v53 }
  0x81   :  { %970 = vmatmul.mubr.bf16.gmra.mrb[32].mxu0 %v4423_v54  ;;  %v4505_v54 = vld [vmem:[%s5990_s0 + $0x2a0] ss:$12 sps:$4 sm:$0xff]  }
  0x82   :  { %977 = vmatprep.mubr.bf16.mxu0 %v4425_v55 }
  0x89   :  { %978 = vmatmul.mubr.bf16.gmra.mrb[36].mxu0 %v4427_v58 }
  0x8a   :  { %985 = vmatprep.mubr.bf16.mxu0 %v4429_v59 }
  0x91   :  { %986 = vmatmul.mubr.bf16.gmra.mrb[40].mxu0 %v4431_v60 }
  0x92   :  { %993 = vmatprep.mubr.bf16.mxu0 %v4434_v61 }
  0x99   :  { %994 = vmatmul.mubr.bf16.gmra.mrb[44].mxu0 %v4436_v0  ;;  %v4511_v0 = vld [vmem:[%s5990_s0 + $0x2d4] ss:$12 sps:$4 sm:$0xff]  }
  0x9a   :  { %1001 = vmatprep.mubr.bf16.mxu0 %v4439_v1 }
  0xa1   :  { %1002 = vmatmul.mubr.bf16.gmra.mrb[48].mxu0 %v4441_v2 }
  0xa2   :  { %1009 = vmatprep.mubr.bf16.mxu0 %v4444_v3 }
  0xa9   :  { %1010 = vmatmul.mubr.bf16.gmra.mrb[52].mxu0 %v4446_v6 }
  0xaa   :  { %1017 = vmatprep.mubr.bf16.mxu0 %v4447_v7 }
  0xb1   :  { %1018 = vmatmul.mubr.bf16.gmra.mrb[56].mxu0 %v4449_v8  ;;  %v4513_v8 = vld [vmem:[%s5990_s0 + $0x2d0] ss:$12 sps:$4 sm:$0xff]  }
  0xb2   :  { %1025 = vmatprep.mubr.bf16.mxu0 %v4452_v9 }
  0xb9   :  { %1026 = vmatmul.mubr.bf16.gmra.mrb[60].mxu0 %v4454_v12 }
  0xba   :  { %1033 = vmatprep.mubr.bf16.mxu0 %v4455_v13 }
  0xc1   :  { %1034 = vmatmul.mubr.bf16.gmra.mrb[64].mxu0 %v4457_v14  ;;  %v4518_v14 = vld [vmem:[%s5990_s0 + $0x2e8] ss:$12 sps:$4 sm:$0xff]  }
  0xc2   :  { %1041 = vmatprep.mubr.bf16.mxu0 %v4460_v15 }
  0xc9   :  { %1042 = vmatmul.mubr.bf16.gmra.mrb[68].mxu0 %v4462_v16 }
  0xca   :  { %1049 = vmatprep.mubr.bf16.mxu0 %v4463_v17  ;;  %v4519_v17 = vld [vmem:[%s5990_s0 + $0x8] ss:$12 sps:$4 sm:$0xff]  }
  0xd1   :  { %1050 = vmatmul.mubr.bf16.gmra.mrb[72].mxu0 %v4465_v18 }
  0xd2   :  { %1057 = vmatprep.mubr.bf16.mxu0 %v4468_v19 }
  0xd9   :  { %1058 = vmatmul.mubr.bf16.gmra.mrb[76].mxu0 %v4470_v20 }
  0xda   :  { %1065 = vmatprep.mubr.bf16.mxu0 %v4471_v21 }
  0xe1   :  { %1066 = vmatmul.mubr.bf16.gmra.mrb[80].mxu0 %v4473_v22 }
  0xe2   :  { %1073 = vmatprep.mubr.bf16.mxu0 %v4476_v23 }
  0xe9   :  { %1074 = vmatmul.mubr.bf16.gmra.mrb[84].mxu0 %v4478_v24  ;;  %v4520_v24 = vld [vmem:[%s5990_s0 + $0x20] ss:$12 sps:$4 sm:$0xff]  }
  0xea   :  { %1081 = vmatprep.mubr.bf16.mxu0 %v4479_v25 }
  0xf1   :  { %1082 = vmatmul.mubr.bf16.gmra.mrb[88].mxu0 %v4481_v26  ;;  %v4521_v26 = vld [vmem:[%s5990_s0 + $0x38] ss:$12 sps:$4 sm:$0xff]  }
  0xf2   :  { %1089 = vmatprep.mubr.bf16.mxu0 %v4484_v27 }
  0xf8   :  { %v4986_v34 = vpop.f32.mrb[0].mxu1 }
  0xf9   :  { %1090 = vmatmul.mubr.bf16.gmra.mrb[92].mxu0 %v4486_v28  ;;  %v4988_v35 = vpop.f32.mrb[1].mxu1 }
  0xfa   :  { %1097 = vmatprep.mubr.bf16.mxu0 %v4487_v29  ;;  %v4993_v37 = vpop.f32.mrb[2].mxu1 }
  0xfb   :  { %v4998_v39 = vpop.f32.mrb[3].mxu1 }
 0x100   :  { %v5000_v40 = vpop.f32.mrb[4].mxu1 }
 0x101   :  { %1098 = vmatmul.mubr.bf16.gmra.mrb[96].mxu0 %v4489_v30  ;;  %v5004_v42 = vpop.f32.mrb[5].mxu1  ;;  %v4522_v30 = vld [vmem:[%s5990_s0 + $0x50] ss:$12 sps:$4 sm:$0xff]  }
 0x102   :  { %1105 = vmatprep.mubr.bf16.mxu0 %v4492_v31  ;;  %v5009_v45 = vpop.f32.mrb[6].mxu1 }
 0x103   :  { %v5016_v48 = vpop.f32.mrb[7].mxu1 }
 0x108   :  { %v5018_v50 = vpop.f32.mrb[8].mxu1 }
 0x109   :  { %1106 = vmatmul.mubr.bf16.gmra.mrb[100].mxu0 %v4494_v32  ;;  %v5022_v52 = vpop.f32.mrb[9].mxu1 }
 0x10a   :  { %1113 = vmatprep.mubr.bf16.mxu0 %v4495_v33  ;;  %v5027_v55 = vpop.f32.mrb[10].mxu1  ;;  %v4523_v33 = vld [vmem:[%s5990_s0 + $0x68] ss:$12 sps:$4 sm:$0xff]  }
 0x10b   :  { %v5034_v58 = vpop.f32.mrb[11].mxu1 }
 0x110   :  { %v5046_v1 = vpop.f32.mrb[12].mxu1 }
 0x111   :  { %1114 = vmatmul.mubr.bf16.gmra.mrb[104].mxu0 %v4497_v36  ;;  %v5048_v3 = vpop.f32.mrb[13].mxu1 }
 0x112   :  { %1121 = vmatprep.mubr.bf16.mxu0 %v4500_v38  ;;  %v5050_v4 = vpop.f32.mrb[14].mxu1 }
 0x113   :  { %v5052_v5 = vpop.f32.mrb[15].mxu1 }
 0x114   :  { %v5002_v41 = vpop.f32.mrb[0].mxu0 }
 0x115   :  { %v909_v43 = vpop.f32.mrb[1].mxu0 }
 0x116   :  { %v5011_v46 = vpop.f32.mrb[2].mxu0 }
 0x117   :  { %v912_v49 = vpop.f32.mrb[3].mxu0 }
 0x118   :  { %v5069_v15 = vpop.f32.mrb[16].mxu1 }
 0x119   :  { %1122 = vmatmul.mubr.bf16.gmra.mrb[108].mxu0 %v4502_v44  ;;  %v5076_v18 = vpop.f32.mrb[17].mxu1 }
 0x11a   :  { %1129 = vmatprep.mubr.bf16.mxu0 %v4503_v47  ;;  %v5078_v20 = vpop.f32.mrb[18].mxu1 }
 0x11b   :  { %v5080_v21 = vpop.f32.mrb[19].mxu1 }
 0x11c   :  { %v5020_v51 = vpop.f32.mrb[4].mxu0 }
 0x11d   :  { %v917_v53 = vpop.f32.mrb[5].mxu0 }
 0x11e   :  { %v5029_v56 = vpop.f32.mrb[6].mxu0  ;;  %v4524_v53 = vld [vmem:[%s5990_s0 + $0x80] ss:$12 sps:$4 sm:$0xff]  }
 0x11f   :  { %v920_v59 = vpop.f32.mrb[7].mxu0 }
 0x120   :  { %v5097_v31 = vpop.f32.mrb[20].mxu1 }
 0x121   :  { %1130 = vmatmul.mubr.bf16.gmra.mrb[112].mxu0 %v4505_v54  ;;  %v5104_v36 = vpop.f32.mrb[21].mxu1 }
 0x122   :  { %1137 = vmatprep.mubr.bf16.mxu0 %v4508_v57  ;;  %v5106_v43 = vpop.f32.mrb[22].mxu1  ;;  %v4525_v57 = vld [vmem:[%s5990_s0 + $0x98] ss:$12 sps:$4 sm:$0xff]  }
 0x123   :  { %v5108_v44 = vpop.f32.mrb[23].mxu1 }
 0x124   :  { %v5036_v60 = vpop.f32.mrb[8].mxu0 }
 0x125   :  { %v925_v61 = vpop.f32.mrb[9].mxu0 }
 0x126   :  { %v5041_v63 = vpop.f32.mrb[10].mxu0 }
 0x127   :  { %v928_v2 = vpop.f32.mrb[11].mxu0 }
 0x128   :  { %v4527_v2 = vld [vmem:[%s5990_s0 + $0xc8] ss:$12 sps:$4 sm:$0xff]  }
 0x129   :  { %1138 = vmatmul.mubr.bf16.gmra.mrb[116].mxu0 %v4510_v62 }
 0x12a   :  { %1145 = vmatprep.mubr.bf16.mxu0 %v4511_v0  ;;  %v4526_v0 = vld [vmem:[%s5990_s0 + $0xb0] ss:$12 sps:$4 sm:$0xff]  }
 0x12c   :  { %v5054_v6 = vpop.f32.mrb[12].mxu0 }
 0x12d   :  { %v933_v7 = vpop.f32.mrb[13].mxu0 }
 0x12e   :  { %v5059_v9 = vpop.f32.mrb[14].mxu0  ;;  %v5128_v7 = vpop.f32.mrb[24].mxu1 }
 0x12f   :  { %v936_v11 = vpop.f32.mrb[15].mxu0 }
 0x131   :  { %1146 = vmatmul.mubr.bf16.gmra.mrb[120].mxu0 %v4513_v8 }
 0x132   :  { %1153 = vmatprep.mubr.bf16.mxu0 %v4516_v10  ;;  %v4531_v10 = vld [vmem:[%s5991_s5] sm:$0xff]  }
 0x133   :  { %4074 = vmatprep.subr.bf16.mxu1 %v4531_v10 }
 0x134   :  { %v5064_v12 = vpop.f32.mrb[16].mxu0  ;;  %4075 = vmatpush3.bf16.msra.mxu1 %v4531_v10  ;;  %v4533_v10 = vld [vmem:[%s5991_s5 + $0x10] sm:$0xff]  }
 0x135   :  { %v941_v13 = vpop.f32.mrb[17].mxu0 }
 0x136   :  { %v5071_v16 = vpop.f32.mrb[18].mxu0  ;;  %v5135_v13 = vpop.f32.mrb[25].mxu1 }
 0x137   :  { %6012 = vst [vmem:[#allocation3_spill] sm:$0xff] %v5071_v16  ;;  %v944_v19 = vpop.f32.mrb[19].mxu0 }
 0x139   :  { %1154 = vmatmul.mubr.bf16.gmra.mrb[124].mxu0 %v4518_v14  ;;  %v5137_v14 = vpop.f32.mrb[26].mxu1 }
 0x13a   :  { %4010 = vmatprep.mubr.bf16.mxu0 %v4519_v17  ;;  %v5139_v17 = vpop.f32.mrb[27].mxu1 }
 0x13c   :  { %v5082_v22 = vpop.f32.mrb[20].mxu0 }
 0x13d   :  { %6013 = vst [vmem:[#allocation4_spill] sm:$0xff] %v5082_v22  ;;  %v949_v23 = vpop.f32.mrb[21].mxu0 }
 0x13e   :  { %v5087_v25 = vpop.f32.mrb[22].mxu0 }
 0x13f   :  { %6014 = vst [vmem:[#allocation5_spill] sm:$0xff] %v5087_v25  ;;  %v952_v27 = vpop.f32.mrb[23].mxu0 }
 0x140   :  { %v4529_v27 = vld [vmem:[%s5990_s0 + $0xf8] ss:$12 sps:$4 sm:$0xff]  }
 0x141   :  { %4011 = vmatmul.mubr.bf16.vlgmr.msra.gmra.mrb[128].mxu0 %v4520_v24  ;;  %v4528_v24 = vld [vmem:[%s5990_s0 + $0xe0] ss:$12 sps:$4 sm:$0xff]  }
 0x142   :  { %4014 = vmatprep.mubr.bf16.mxu0 %v4521_v26 }
 0x144   :  { %v5092_v28 = vpop.f32.mrb[24].mxu0 }
 0x145   :  { %6015 = vst [vmem:[#allocation6_spill] sm:$0xff] %v5092_v28  ;;  %v957_v29 = vpop.f32.mrb[25].mxu0 }
 0x146   :  { %v5099_v32 = vpop.f32.mrb[26].mxu0 }
 0x147   :  { %6016 = vst [vmem:[#allocation7_spill] sm:$0xff] %v5099_v32  ;;  %v960_v38 = vpop.f32.mrb[27].mxu0 }
 0x149   :  { %4015 = vmatmul.mubr.bf16.gmra.mrb[132].mxu0 %v4522_v30  ;;  %v4532_v30 = vld [vmem:[%s5991_s5 + $0x8] sm:$0xff]  }
 0x14a   :  { %4018 = vmatprep.mubr.bf16.mxu0 %v4523_v33  ;;  %4076 = vmatprep.subr.bf16.mxu1 %v4532_v30 }
 0x14b   :  { %4077 = vmatpush3.bf16.msra.mxu1 %v4532_v30  ;;  %v5182_v30 = vld [vmem:[%s5993_s2] ss:$0 sm:$0xff] }
 0x14c   :  { %v5110_v47 = vpop.f32.mrb[28].mxu0  ;;  %4078 = vmatprep.subr.bf16.mxu1 %v4533_v10 }
 0x14d   :  { %6017 = vst [vmem:[#allocation8_spill] sm:$0xff] %v5110_v47  ;;  %v965_v49 = vpop.f32.mrb[29].mxu0 }
 0x14e   :  { %v5115_v54 = vpop.f32.mrb[30].mxu0  ;;  %v4530_v49 = vld [vmem:[%s5990_s0 + $0x110] ss:$12 sps:$4 sm:$0xff]  }
 0x14f   :  { %6018 = vst [vmem:[#allocation9_spill] sm:$0xff] %v5115_v54  ;;  %v968_v59 = vpop.f32.mrb[31].mxu0  ;;  %4079 = vmatpush3.bf16.msra.mxu1 %v4533_v10 }
 0x151   :  { %4019 = vmatmul.mubr.bf16.gmra.mrb[136].mxu0 %v4524_v53  ;;  %v5159_v53 = vpop.f32.mrb[28].mxu1 }
 0x152   :  { %4022 = vmatprep.mubr.bf16.mxu0 %v4525_v57  ;;  %v5163_v59 = vpop.f32.mrb[29].mxu1 }
 0x154   :  { %v5120_v61 = vpop.f32.mrb[32].mxu0 }
 0x155   :  { %6019 = vst [vmem:[#allocation10_spill] sm:$0xff] %v5120_v61  ;;  %v973_v62 = vpop.f32.mrb[33].mxu0 }
 0x156   :  { %v5130_v8 = vpop.f32.mrb[34].mxu0 }
 0x157   :  { %6020 = vst [vmem:[#allocation11_spill] sm:$0xff] %v5130_v8  ;;  %v976_v11 = vpop.f32.mrb[35].mxu0 }
 0x159   :  { %4023 = vmatmul.mubr.bf16.gmra.mrb[140].mxu0 %v4526_v0  ;;  %v5165_v0 = vpop.f32.mrb[30].mxu1 }
 0x15a   :  { %4026 = vmatprep.mubr.bf16.mxu0 %v4527_v2  ;;  %v5167_v2 = vpop.f32.mrb[31].mxu1 }
 0x15b   :  { %v5188_v10 = vpop.f32.mrb[32].mxu1 }
 0x15c   :  { %v5141_v19 = vpop.f32.mrb[36].mxu0 }
 0x15d   :  { %6021 = vst [vmem:[#allocation12_spill] sm:$0xff] %v5141_v19  ;;  %v981_v23 = vpop.f32.mrb[37].mxu0 }
 0x15e   :  { %v5146_v26 = vpop.f32.mrb[38].mxu0 }
 0x15f   :  { %6022 = vst [vmem:[#allocation13_spill] sm:$0xff] %v5146_v26  ;;  %v984_v29 = vpop.f32.mrb[39].mxu0 }
 0x160   :  { %v3823_v29 = vld [vmem:[%s5992_s3 + $0x60] sm:$0xff]  }
 0x161   :  { %4027 = vmatmul.mubr.bf16.gmra.mrb[144].mxu0 %v4528_v24  ;;  %v3575_v19 = vunpack.c.h.bf16 %v3823_v29 }
 0x162   :  { %4030 = vmatprep.mubr.bf16.mxu0 %v4529_v27 }
 0x164   :  { %v5154_v33 = vpop.f32.mrb[40].mxu0 }
 0x165   :  { %6023 = vst [vmem:[#allocation14_spill] sm:$0xff] %v5154_v33  ;;  %v989_v38 = vpop.f32.mrb[41].mxu0 }
 0x166   :  { %v5161_v57 = vpop.f32.mrb[42].mxu0 }
 0x167   :  { %6024 = vst [vmem:[#allocation15_spill] sm:$0xff] %v5161_v57  ;;  %v992_v62 = vpop.f32.mrb[43].mxu0 }
 0x169   :  { %4031 = vmatmul.mubr.bf16.gmra.mrb[148].mxu0 %v4530_v49 }
 0x16c   :  { %v5172_v11 = vpop.f32.mrb[44].mxu0 }
 0x16d   :  { %6025 = vst [vmem:[#allocation16_spill] sm:$0xff] %v5172_v11  ;;  %v997_v23 = vpop.f32.mrb[45].mxu0  ;;  %v3574_v11 = vunpack.c.l.bf16 %v3823_v29 }
 0x16e   :  { %v5174_v24 = vpop.f32.mrb[46].mxu0  ;;  %v4534_v23 = vld [vmem:[%s5991_s5 + $0x18] sm:$0xff]  }
 0x16f   :  { %6026 = vst [vmem:[#allocation17_spill] sm:$0xff] %v5174_v24  ;;  %v1000_v27 = vpop.f32.mrb[47].mxu0  ;;  %v5190_v24 = vpop.f32.mrb[33].mxu1  ;;  %4080 = vmatprep.subr.bf16.mxu1 %v4534_v23 }
 0x170   :  { %v5194_v8 = vpop.f32.mrb[34].mxu1  ;;  %4081 = vmatpush3.bf16.msra.mxu1 %v4534_v23 }
 0x174   :  { %v1003_v38 = vpop.f32.mrb[48].mxu0 }
 0x175   :  { %v1004_v49 = vadd.f32 %v5182_v30, %v1003_v38  ;;  %v1005_v62 = vpop.f32.mrb[49].mxu0  ;;  %v5199_v38 = vstv %s5994_s4 }
 0x176   :  { %v1006_v27 = vpop.f32.mrb[50].mxu0  ;;  %v5201_v62 = vpop.f32.mrb[35].mxu1 }
 0x177   :  { %v1007_v57 = vadd.f32 %v5182_v30, %v1006_v27  ;;  %v1293_v33 = vadd.f32 %v4988_v35, %v1004_v49  ;;  %v1008_v26 = vpop.f32.mrb[51].mxu0  ;;  %v3824_v35 = vld [vmem:[%s5992_s3 + $0x68] sm:$0xff]  }
 0x178   :  { %v3578_v23 = vunpack.c.l.bf16 %v3824_v35 }
 0x179   :  { %v1603_v61 = vadd.f32 %v3574_v11, %v1293_v33  ;;  %v1296_v54 = vadd.f32 %v4998_v39, %v1007_v57  ;;  %v4535_v39 = vld [vmem:[%s5991_s5 + $0x20] sm:$0xff]   ;;  %v3579_v57 = vunpack.c.h.bf16 %v3824_v35  ;;  %v3825_v35 = vld [vmem:[%s5992_s3 + $0x70] sm:$0xff]  }
 0x17a   :  { %4082 = vmatprep.subr.bf16.mxu1 %v4535_v39 }
 0x17b   :  { %v1733_v26 = vmul.f32 %v5199_v38, %v1603_v61  ;;  %v1604_v29 = vadd.f32 %v3575_v19, %v1296_v54  ;;  %vm1668_vm0 = vcmp.ge.f32.partialorder %v1603_v61, 0.0  ;;  %4083 = vmatpush3.bf16.msra.mxu1 %v4535_v39  ;;  %v3583_v39 = vunpack.c.h.bf16 %v3825_v35 }
 0x17c   :  { %v1011_v49 = vpop.f32.mrb[52].mxu0 }
 0x17d   :  { %vm1669_vm1 = vcmp.ge.f32.partialorder %v1604_v29, 0.0  ;;  %v1734_v27 = vmul.f32 %v5199_v38, %v1604_v29  ;;  %v1012_v47 = vadd.f32 %v5182_v30, %v1011_v49  ;;  %v1013_v32 = vpop.f32.mrb[53].mxu0  ;;  %v5215_v19 = vsel %vm1668_vm0, %v1603_v61, %v1733_v26 }
 0x17e   :  { %v1014_v33 = vpop.f32.mrb[54].mxu0  ;;  %6027 = vst [vmem:[#allocation18_spill] sm:$0xff] %v5215_v19 }
 0x17f   :  { %v1301_v11 = vadd.f32 %v4986_v34, %v1012_v47  ;;  %v1015_v28 = vadd.f32 %v5182_v30, %v1014_v33  ;;  %v1016_v54 = vpop.f32.mrb[55].mxu0  ;;  %v5217_v25 = vsel %vm1669_vm1, %v1604_v29, %v1734_v27  ;;  %v3582_v27 = vunpack.c.l.bf16 %v3825_v35 }
 0x180   :  { %6028 = vst [vmem:[#allocation19_spill] sm:$0xff] %v5217_v25 }
 0x181   :  { %v1605_v49 = vadd.f32 %v3578_v23, %v1301_v11  ;;  %v1304_v22 = vadd.f32 %v4993_v37, %v1015_v28  ;;  %v4536_v23 = vld [vmem:[%s5991_s5 + $0x28] sm:$0xff]   ;;  %v5231_v37 = vpop.f32.mrb[36].mxu1 }
 0x182   :  { %v5233_v11 = vpop.f32.mrb[37].mxu1  ;;  %4084 = vmatprep.subr.bf16.mxu1 %v4536_v23 }
 0x183   :  { %v1735_v34 = vmul.f32 %v5199_v38, %v1605_v49  ;;  %v1606_v47 = vadd.f32 %v3579_v57, %v1304_v22  ;;  %vm1670_vm2 = vcmp.ge.f32.partialorder %v1605_v49, 0.0  ;;  %4085 = vmatpush3.bf16.msra.mxu1 %v4536_v23 }
 0x184   :  { %v1019_v33 = vpop.f32.mrb[56].mxu0 }
 0x185   :  { %v1736_v61 = vmul.f32 %v5199_v38, %v1606_v47  ;;  %v1020_v26 = vadd.f32 %v5182_v30, %v1019_v33  ;;  %v1021_v29 = vpop.f32.mrb[57].mxu0  ;;  %vm1671_vm3 = vcmp.ge.f32.partialorder %v1606_v47, 0.0  ;;  %v5237_v33 = vpop.f32.mrb[38].mxu1 }
 0x186   :  { %v1022_v28 = vpop.f32.mrb[58].mxu0  ;;  %v5240_v29 = vsel %vm1670_vm2, %v1605_v49, %v1735_v34  ;;  %v5244_v19 = vpop.f32.mrb[39].mxu1 }
 0x187   :  { %v1023_v22 = vadd.f32 %v5182_v30, %v1022_v28  ;;  %v1309_v57 = vadd.f32 %v5004_v42, %v1020_v26  ;;  %v1024_v54 = vpop.f32.mrb[59].mxu0  ;;  %6029 = vst [vmem:[#allocation20_spill] sm:$0xff] %v5240_v29  ;;  %v5242_v32 = vsel %vm1671_vm3, %v1606_v47, %v1736_v61  ;;  %v3826_v42 = vld [vmem:[%s5992_s3 + $0x78] sm:$0xff]  }
 0x188   :  { %6030 = vst [vmem:[#allocation21_spill] sm:$0xff] %v5242_v32  ;;  %v3586_v61 = vunpack.c.l.bf16 %v3826_v42 }
 0x189   :  { %v1607_v25 = vadd.f32 %v3582_v27, %v1309_v57  ;;  %v1312_v28 = vadd.f32 %v5016_v48, %v1023_v22  ;;  %v3587_v27 = vunpack.c.h.bf16 %v3826_v42 }
 0x18b   :  { %v1737_v26 = vmul.f32 %v5199_v38, %v1607_v25  ;;  %v1608_v54 = vadd.f32 %v3583_v39, %v1312_v28  ;;  %vm1672_vm4 = vcmp.ge.f32.partialorder %v1607_v25, 0.0 }
 0x18c   :  { %v1027_v49 = vpop.f32.mrb[60].mxu0 }
 0x18d   :  { %vm1673_vm5 = vcmp.ge.f32.partialorder %v1608_v54, 0.0  ;;  %v1738_v34 = vmul.f32 %v5199_v38, %v1608_v54  ;;  %v1028_v47 = vadd.f32 %v5182_v30, %v1027_v49  ;;  %v1029_v23 = vpop.f32.mrb[61].mxu0  ;;  %v5257_v29 = vsel %vm1672_vm4, %v1607_v25, %v1737_v26  ;;  %v3827_v49 = vld [vmem:[%s5992_s3 + $0x80] sm:$0xff]  }
 0x18e   :  { %v1030_v35 = vpop.f32.mrb[62].mxu0 }
 0x18f   :  { %v1317_v48 = vadd.f32 %v5000_v40, %v1028_v47  ;;  %v1031_v22 = vadd.f32 %v5182_v30, %v1030_v35  ;;  %v1032_v57 = vpop.f32.mrb[63].mxu0  ;;  %v5259_v32 = vsel %vm1673_vm5, %v1608_v54, %v1738_v34  ;;  %v3590_v54 = vunpack.c.l.bf16 %v3827_v49  ;;  %v4537_v34 = vld [vmem:[%s5991_s5 + $0x30] sm:$0xff]  }
 0x190   :  { %4086 = vmatprep.subr.bf16.mxu1 %v4537_v34 }
 0x191   :  { %v1609_v28 = vadd.f32 %v3586_v61, %v1317_v48  ;;  %v1320_v16 = vadd.f32 %v5009_v45, %v1031_v22  ;;  %v3591_v61 = vunpack.c.h.bf16 %v3827_v49  ;;  %4087 = vmatpush3.bf16.msra.mxu1 %v4537_v34  ;;  %v3828_v49 = vld [vmem:[%s5992_s3 + $0x88] sm:$0xff]  }
 0x192   :  { %v3595_v34 = vunpack.c.h.bf16 %v3828_v49 }
 0x193   :  { %v1739_v42 = vmul.f32 %v5199_v38, %v1609_v28  ;;  %v1610_v40 = vadd.f32 %v3587_v27, %v1320_v16  ;;  %vm1674_vm6 = vcmp.ge.f32.partialorder %v1609_v28, 0.0 }
 0x194   :  { %v1035_v47 = vpop.f32.mrb[64].mxu0 }
 0x195   :  { %v1740_v25 = vmul.f32 %v5199_v38, %v1610_v40  ;;  %v1036_v35 = vadd.f32 %v5182_v30, %v1035_v47  ;;  %v1037_v26 = vpop.f32.mrb[65].mxu0  ;;  %vm1675_vm7 = vcmp.ge.f32.partialorder %v1610_v40, 0.0  ;;  %v5275_v27 = vsel %vm1674_vm6, %v1609_v28, %v1739_v42  ;;  %v4538_v28 = vld [vmem:[%s5991_s5 + $0x38] sm:$0xff]  }
 0x196   :  { %v1038_v45 = vpop.f32.mrb[66].mxu0  ;;  %4088 = vmatprep.subr.bf16.mxu1 %v4538_v28 }
 0x197   :  { %v1039_v23 = vadd.f32 %v5182_v30, %v1038_v45  ;;  %v1325_v48 = vadd.f32 %v5022_v52, %v1036_v35  ;;  %v1040_v16 = vpop.f32.mrb[67].mxu0  ;;  %v5277_v22 = vsel %vm1675_vm7, %v1610_v40, %v1740_v25  ;;  %v3594_v25 = vunpack.c.l.bf16 %v3828_v49  ;;  %4089 = vmatpush3.bf16.msra.mxu1 %v4538_v28  ;;  %v3829_v49 = vld [vmem:[%s5992_s3 + $0x90] sm:$0xff]  }
 0x199   :  { %v1611_v47 = vadd.f32 %v3590_v54, %v1325_v48  ;;  %v1328_v26 = vadd.f32 %v5034_v58, %v1039_v23 }
 0x19b   :  { %v1741_v45 = vmul.f32 %v5199_v38, %v1611_v47  ;;  %v1612_v52 = vadd.f32 %v3591_v61, %v1328_v26  ;;  %vm1676_vm8 = vcmp.ge.f32.partialorder %v1611_v47, 0.0 }
 0x19c   :  { %v1043_v35 = vpop.f32.mrb[68].mxu0 }
 0x19d   :  { %vm1677_vm9 = vcmp.ge.f32.partialorder %v1612_v52, 0.0  ;;  %v1742_v42 = vmul.f32 %v5199_v38, %v1612_v52  ;;  %v1044_v40 = vadd.f32 %v5182_v30, %v1043_v35  ;;  %v1045_v58 = vpop.f32.mrb[69].mxu0  ;;  %v5293_v16 = vsel %vm1676_vm8, %v1611_v47, %v1741_v45 }
 0x19e   :  { %v1046_v54 = vpop.f32.mrb[70].mxu0 }
 0x19f   :  { %v1333_v23 = vadd.f32 %v5018_v50, %v1044_v40  ;;  %v1047_v61 = vadd.f32 %v5182_v30, %v1046_v54  ;;  %v1048_v48 = vpop.f32.mrb[71].mxu0  ;;  %v5295_v26 = vsel %vm1677_vm9, %v1612_v52, %v1742_v42  ;;  %v3598_v52 = vunpack.c.l.bf16 %v3829_v49  ;;  %v5309_v42 = vld [vmem:[%s5995_s8] sm:$0xff]  }
 0x1a0   :  { %4154 = vmatprep.subr.bf16.mxu1 %v5309_v42 }
 0x1a1   :  { %v1613_v39 = vadd.f32 %v3594_v25, %v1333_v23  ;;  %v1336_v35 = vadd.f32 %v5027_v55, %v1047_v61  ;;  %v3599_v23 = vunpack.c.h.bf16 %v3829_v49  ;;  %v3830_v61 = vld [vmem:[%s5992_s3 + $0x98] sm:$0xff]  }
 0x1a3   :  { %v1614_v58 = vadd.f32 %v3595_v34, %v1336_v35  ;;  %v1743_v40 = vmul.f32 %v5199_v38, %v1613_v39  ;;  %vm1678_vm10 = vcmp.ge.f32.partialorder %v1613_v39, 0.0 }
 0x1a4   :  { %v1051_v50 = vpop.f32.mrb[72].mxu0 }
 0x1a5   :  { %v1744_v28 = vmul.f32 %v5199_v38, %v1614_v58  ;;  %v1052_v47 = vadd.f32 %v5182_v30, %v1051_v50  ;;  %v1053_v45 = vpop.f32.mrb[73].mxu0  ;;  %vm1679_vm11 = vcmp.ge.f32.partialorder %v1614_v58, 0.0  ;;  %v5318_v50 = vsel %vm1678_vm10, %v1613_v39, %v1743_v40 }
 0x1a6   :  { %v1054_v55 = vpop.f32.mrb[74].mxu0  ;;  %6031 = vst [vmem:[#allocation22_spill] sm:$0xff] %v5318_v50  ;;  %v3603_v39 = vunpack.c.h.bf16 %v3830_v61 }
 0x1a7   :  { %v1055_v25 = vadd.f32 %v5182_v30, %v1054_v55  ;;  %v1341_v54 = vadd.f32 %v5048_v3, %v1052_v47  ;;  %v1056_v34 = vpop.f32.mrb[75].mxu0  ;;  %v5320_v45 = vsel %vm1679_vm11, %v1614_v58, %v1744_v28 }
 0x1a9   :  { %v1615_v48 = vadd.f32 %v3598_v52, %v1341_v54  ;;  %v1344_v35 = vadd.f32 %v5052_v5, %v1055_v25  ;;  %v3602_v52 = vunpack.c.l.bf16 %v3830_v61 }
 0x1ab   :  { %v1745_v3 = vmul.f32 %v5199_v38, %v1615_v48  ;;  %v1616_v49 = vadd.f32 %v3599_v23, %v1344_v35  ;;  %vm1680_vm12 = vcmp.ge.f32.partialorder %v1615_v48, 0.0 }
 0x1ac   :  { %v1059_v47 = vpop.f32.mrb[76].mxu0 }
 0x1ad   :  { %vm1681_vm13 = vcmp.ge.f32.partialorder %v1616_v49, 0.0  ;;  %v1746_v34 = vmul.f32 %v5199_v38, %v1616_v49  ;;  %v1060_v57 = vadd.f32 %v5182_v30, %v1059_v47  ;;  %v1061_v54 = vpop.f32.mrb[77].mxu0  ;;  %v5329_v25 = vsel %vm1680_vm12, %v1615_v48, %v1745_v3  ;;  %v3831_v47 = vld [vmem:[%s5992_s3 + $0xa0] sm:$0xff]  }
 0x1ae   :  { %v1062_v5 = vpop.f32.mrb[78].mxu0 }
 0x1af   :  { %v1349_v58 = vadd.f32 %v5046_v1, %v1060_v57  ;;  %v1063_v40 = vadd.f32 %v5182_v30, %v1062_v5  ;;  %v1064_v28 = vpop.f32.mrb[79].mxu0  ;;  %v5331_v55 = vsel %vm1681_vm13, %v1616_v49, %v1746_v34  ;;  %v3606_v34 = vunpack.c.l.bf16 %v3831_v47 }
 0x1b1   :  { %v1617_v35 = vadd.f32 %v3602_v52, %v1349_v58  ;;  %v1352_v50 = vadd.f32 %v5050_v4, %v1063_v40  ;;  %v3607_v52 = vunpack.c.h.bf16 %v3831_v47 }
 0x1b3   :  { %v1747_v61 = vmul.f32 %v5199_v38, %v1617_v35  ;;  %v1618_v1 = vadd.f32 %v3603_v39, %v1352_v50  ;;  %vm1682_vm14 = vcmp.ge.f32.partialorder %v1617_v35, 0.0 }
 0x1b4   :  { %v1067_v57 = vpop.f32.mrb[80].mxu0 }
 0x1b5   :  { %v1748_v48 = vmul.f32 %v5199_v38, %v1618_v1  ;;  %v1068_v3 = vadd.f32 %v5182_v30, %v1067_v57  ;;  %v1069_v49 = vpop.f32.mrb[81].mxu0  ;;  %vm1683_vm15 = vcmp.ge.f32.partialorder %v1618_v1, 0.0  ;;  %v5344_v40 = vsel %vm1682_vm14, %v1617_v35, %v1747_v61 }
 0x1b6   :  { %v1070_v54 = vpop.f32.mrb[82].mxu0  ;;  %v3832_v49 = vld [vmem:[%s5992_s3 + $0xa8] sm:$0xff]  }
 0x1b7   :  { %v1071_v4 = vadd.f32 %v5182_v30, %v1070_v54  ;;  %v1357_v5 = vadd.f32 %v5076_v18, %v1068_v3  ;;  %v1072_v58 = vpop.f32.mrb[83].mxu0  ;;  %v5346_v28 = vsel %vm1683_vm15, %v1618_v1, %v1748_v48  ;;  %v3610_v1 = vunpack.c.l.bf16 %v3832_v49 }
 0x1b9   :  { %v1619_v39 = vadd.f32 %v3606_v34, %v1357_v5  ;;  %v1360_v57 = vadd.f32 %v5080_v21, %v1071_v4  ;;  %v3611_v34 = vunpack.c.h.bf16 %v3832_v49 }
 0x1bb   :  { %v1749_v47 = vmul.f32 %v5199_v38, %v1619_v39  ;;  %v1620_v54 = vadd.f32 %v3607_v52, %v1360_v57  ;;  %vm1684_vm0 = vcmp.ge.f32.partialorder %v1619_v39, 0.0 }
 0x1bc   :  { %v1075_v18 = vpop.f32.mrb[84].mxu0 }
 0x1bd   :  { %vm1685_vm1 = vcmp.ge.f32.partialorder %v1620_v54, 0.0  ;;  %v1750_v35 = vmul.f32 %v5199_v38, %v1620_v54  ;;  %v1076_v61 = vadd.f32 %v5182_v30, %v1075_v18  ;;  %v1077_v48 = vpop.f32.mrb[85].mxu0  ;;  %v5359_v58 = vsel %vm1684_vm0, %v1619_v39, %v1749_v47  ;;  %v3833_v18 = vld [vmem:[%s5992_s3 + $0xb0] sm:$0xff]  }
 0x1be   :  { %v1078_v3 = vpop.f32.mrb[86].mxu0 }
 0x1bf   :  { %v1365_v21 = vadd.f32 %v5069_v15, %v1076_v61  ;;  %v1079_v4 = vadd.f32 %v5182_v30, %v1078_v3  ;;  %v1080_v5 = vpop.f32.mrb[87].mxu0  ;;  %v5361_v50 = vsel %vm1685_vm1, %v1620_v54, %v1750_v35  ;;  %v3614_v35 = vunpack.c.l.bf16 %v3833_v18 }
 0x1c1   :  { %v1621_v57 = vadd.f32 %v3610_v1, %v1365_v21  ;;  %v1368_v23 = vadd.f32 %v5078_v20, %v1079_v4  ;;  %v3615_v1 = vunpack.c.h.bf16 %v3833_v18 }
 0x1c3   :  { %v1751_v49 = vmul.f32 %v5199_v38, %v1621_v57  ;;  %v1622_v15 = vadd.f32 %v3611_v34, %v1368_v23  ;;  %vm1686_vm2 = vcmp.ge.f32.partialorder %v1621_v57, 0.0 }
 0x1c4   :  { %v1083_v61 = vpop.f32.mrb[88].mxu0 }
 0x1c5   :  { %v1752_v39 = vmul.f32 %v5199_v38, %v1622_v15  ;;  %v1084_v47 = vadd.f32 %v5182_v30, %v1083_v61  ;;  %v1085_v54 = vpop.f32.mrb[89].mxu0  ;;  %vm1687_vm3 = vcmp.ge.f32.partialorder %v1622_v15, 0.0  ;;  %v5374_v4 = vsel %vm1686_vm2, %v1621_v57, %v1751_v49 }
 0x1c6   :  { %v1086_v48 = vpop.f32.mrb[90].mxu0  ;;  %v3834_v54 = vld [vmem:[%s5992_s3 + $0xb8] sm:$0xff]  }
 0x1c7   :  { %v1087_v20 = vadd.f32 %v5182_v30, %v1086_v48  ;;  %v1373_v3 = vadd.f32 %v5104_v36, %v1084_v47  ;;  %v1088_v21 = vpop.f32.mrb[91].mxu0  ;;  %v5376_v5 = vsel %vm1687_vm3, %v1622_v15, %v1752_v39  ;;  %v3618_v15 = vunpack.c.l.bf16 %v3834_v54 }
 0x1c9   :  { %v1623_v34 = vadd.f32 %v3614_v35, %v1373_v3  ;;  %v1376_v61 = vadd.f32 %v5108_v44, %v1087_v20  ;;  %v3619_v35 = vunpack.c.h.bf16 %v3834_v54 }
 0x1cb   :  { %v1753_v18 = vmul.f32 %v5199_v38, %v1623_v34  ;;  %v1624_v48 = vadd.f32 %v3615_v1, %v1376_v61  ;;  %vm1688_vm4 = vcmp.ge.f32.partialorder %v1623_v34, 0.0 }
 0x1cc   :  { %v1091_v36 = vpop.f32.mrb[92].mxu0 }
 0x1cd   :  { %vm1689_vm5 = vcmp.ge.f32.partialorder %v1624_v48, 0.0  ;;  %v1754_v57 = vmul.f32 %v5199_v38, %v1624_v48  ;;  %v1092_v49 = vadd.f32 %v5182_v30, %v1091_v36  ;;  %v1093_v39 = vpop.f32.mrb[93].mxu0  ;;  %v5389_v21 = vsel %vm1688_vm4, %v1623_v34, %v1753_v18  ;;  %v3835_v36 = vld [vmem:[%s5992_s3 + $0xc0] sm:$0xff]  }
 0x1ce   :  { %v1094_v47 = vpop.f32.mrb[94].mxu0 }
 0x1cf   :  { %v1381_v44 = vadd.f32 %v5097_v31, %v1092_v49  ;;  %v1095_v20 = vadd.f32 %v5182_v30, %v1094_v47  ;;  %v1096_v3 = vpop.f32.mrb[95].mxu0  ;;  %v5391_v23 = vsel %vm1689_vm5, %v1624_v48, %v1754_v57  ;;  %v3622_v57 = vunpack.c.l.bf16 %v3835_v36 }
 0x1d1   :  { %v1625_v61 = vadd.f32 %v3618_v15, %v1381_v44  ;;  %v1384_v52 = vadd.f32 %v5106_v43, %v1095_v20  ;;  %v3623_v15 = vunpack.c.h.bf16 %v3835_v36 }
 0x1d3   :  { %v1755_v54 = vmul.f32 %v5199_v38, %v1625_v61  ;;  %v1626_v31 = vadd.f32 %v3619_v35, %v1384_v52  ;;  %vm1690_vm6 = vcmp.ge.f32.partialorder %v1625_v61, 0.0 }
 0x1d4   :  { %v1099_v49 = vpop.f32.mrb[96].mxu0 }
 0x1d5   :  { %v1756_v34 = vmul.f32 %v5199_v38, %v1626_v31  ;;  %v1100_v18 = vadd.f32 %v5182_v30, %v1099_v49  ;;  %v1101_v48 = vpop.f32.mrb[97].mxu0  ;;  %vm1691_vm7 = vcmp.ge.f32.partialorder %v1626_v31, 0.0  ;;  %v5404_v20 = vsel %vm1690_vm6, %v1625_v61, %v1755_v54 }
 0x1d6   :  { %v1102_v39 = vpop.f32.mrb[98].mxu0  ;;  %v3836_v48 = vld [vmem:[%s5992_s3 + $0xc8] sm:$0xff]  }
 0x1d7   :  { %v1103_v43 = vadd.f32 %v5182_v30, %v1102_v39  ;;  %v1389_v47 = vadd.f32 %v5135_v13, %v1100_v18  ;;  %v1104_v44 = vpop.f32.mrb[99].mxu0  ;;  %v5406_v3 = vsel %vm1691_vm7, %v1626_v31, %v1756_v34  ;;  %v3626_v31 = vunpack.c.l.bf16 %v3836_v48 }
 0x1d9   :  { %v1627_v35 = vadd.f32 %v3622_v57, %v1389_v47  ;;  %v1392_v49 = vadd.f32 %v5139_v17, %v1103_v43  ;;  %v3627_v57 = vunpack.c.h.bf16 %v3836_v48 }
 0x1db   :  { %v1757_v36 = vmul.f32 %v5199_v38, %v1627_v35  ;;  %v1628_v39 = vadd.f32 %v3623_v15, %v1392_v49  ;;  %vm1692_vm8 = vcmp.ge.f32.partialorder %v1627_v35, 0.0 }
 0x1dc   :  { %v1107_v13 = vpop.f32.mrb[100].mxu0 }
 0x1dd   :  { %vm1693_vm9 = vcmp.ge.f32.partialorder %v1628_v39, 0.0  ;;  %v1758_v61 = vmul.f32 %v5199_v38, %v1628_v39  ;;  %v1108_v54 = vadd.f32 %v5182_v30, %v1107_v13  ;;  %v1109_v34 = vpop.f32.mrb[101].mxu0  ;;  %v5419_v44 = vsel %vm1692_vm8, %v1627_v35, %v1757_v36  ;;  %v3837_v13 = vld [vmem:[%s5992_s3 + $0xd0] sm:$0xff]  }
 0x1de   :  { %v1110_v18 = vpop.f32.mrb[102].mxu0 }
 0x1df   :  { %v1397_v17 = vadd.f32 %v5128_v7, %v1108_v54  ;;  %v1111_v43 = vadd.f32 %v5182_v30, %v1110_v18  ;;  %v1112_v47 = vpop.f32.mrb[103].mxu0  ;;  %v5421_v52 = vsel %vm1693_vm9, %v1628_v39, %v1758_v61  ;;  %v3630_v61 = vunpack.c.l.bf16 %v3837_v13 }
 0x1e1   :  { %v1629_v49 = vadd.f32 %v3626_v31, %v1397_v17  ;;  %v1400_v1 = vadd.f32 %v5137_v14, %v1111_v43  ;;  %v3631_v31 = vunpack.c.h.bf16 %v3837_v13 }
 0x1e3   :  { %v1759_v48 = vmul.f32 %v5199_v38, %v1629_v49  ;;  %v1630_v7 = vadd.f32 %v3627_v57, %v1400_v1  ;;  %vm1694_vm10 = vcmp.ge.f32.partialorder %v1629_v49, 0.0 }
 0x1e4   :  { %v1115_v54 = vpop.f32.mrb[104].mxu0 }
 0x1e5   :  { %v1760_v35 = vmul.f32 %v5199_v38, %v1630_v7  ;;  %v1116_v36 = vadd.f32 %v5182_v30, %v1115_v54  ;;  %v1117_v39 = vpop.f32.mrb[105].mxu0  ;;  %vm1695_vm11 = vcmp.ge.f32.partialorder %v1630_v7, 0.0  ;;  %v5434_v43 = vsel %vm1694_vm10, %v1629_v49, %v1759_v48 }
 0x1e6   :  { %v1118_v34 = vpop.f32.mrb[106].mxu0  ;;  %v3838_v39 = vld [vmem:[%s5992_s3 + $0xd8] sm:$0xff]  }
 0x1e7   :  { %v1119_v14 = vadd.f32 %v5182_v30, %v1118_v34  ;;  %v1405_v18 = vadd.f32 %v5163_v59, %v1116_v36  ;;  %v1120_v17 = vpop.f32.mrb[107].mxu0  ;;  %v5436_v47 = vsel %vm1695_vm11, %v1630_v7, %v1760_v35  ;;  %v3634_v7 = vunpack.c.l.bf16 %v3838_v39 }
 0x1e9   :  { %v1631_v57 = vadd.f32 %v3630_v61, %v1405_v18  ;;  %v1408_v54 = vadd.f32 %v5167_v2, %v1119_v14  ;;  %v3635_v61 = vunpack.c.h.bf16 %v3838_v39 }
 0x1eb   :  { %v1761_v13 = vmul.f32 %v5199_v38, %v1631_v57  ;;  %v1632_v34 = vadd.f32 %v3631_v31, %v1408_v54  ;;  %vm1696_vm12 = vcmp.ge.f32.partialorder %v1631_v57, 0.0 }
 0x1ec   :  { %v1123_v59 = vpop.f32.mrb[108].mxu0 }
 0x1ed   :  { %vm1697_vm13 = vcmp.ge.f32.partialorder %v1632_v34, 0.0  ;;  %v1762_v49 = vmul.f32 %v5199_v38, %v1632_v34  ;;  %v1124_v48 = vadd.f32 %v5182_v30, %v1123_v59  ;;  %v1125_v35 = vpop.f32.mrb[109].mxu0  ;;  %v5449_v17 = vsel %vm1696_vm12, %v1631_v57, %v1761_v13  ;;  %v3839_v59 = vld [vmem:[%s5992_s3 + $0xe0] sm:$0xff]  }
 0x1ee   :  { %v1126_v36 = vpop.f32.mrb[110].mxu0 }
 0x1ef   :  { %v1413_v2 = vadd.f32 %v5159_v53, %v1124_v48  ;;  %v1127_v14 = vadd.f32 %v5182_v30, %v1126_v36  ;;  %v1128_v18 = vpop.f32.mrb[111].mxu0  ;;  %v5451_v1 = vsel %vm1697_vm13, %v1632_v34, %v1762_v49  ;;  %v3638_v49 = vunpack.c.l.bf16 %v3839_v59 }
 0x1f1   :  { %v1633_v54 = vadd.f32 %v3634_v7, %v1413_v2  ;;  %v1416_v15 = vadd.f32 %v5165_v0, %v1127_v14  ;;  %v3639_v7 = vunpack.c.h.bf16 %v3839_v59 }
 0x1f3   :  { %v1763_v39 = vmul.f32 %v5199_v38, %v1633_v54  ;;  %v1634_v53 = vadd.f32 %v3635_v61, %v1416_v15  ;;  %vm1698_vm14 = vcmp.ge.f32.partialorder %v1633_v54, 0.0 }
 0x1f4   :  { %v1131_v48 = vpop.f32.mrb[112].mxu0 }
 0x1f5   :  { %v1764_v57 = vmul.f32 %v5199_v38, %v1634_v53  ;;  %v1132_v13 = vadd.f32 %v5182_v30, %v1131_v48  ;;  %v1133_v34 = vpop.f32.mrb[113].mxu0  ;;  %vm1699_vm15 = vcmp.ge.f32.partialorder %v1634_v53, 0.0  ;;  %v5464_v14 = vsel %vm1698_vm14, %v1633_v54, %v1763_v39 }
 0x1f6   :  { %v1134_v35 = vpop.f32.mrb[114].mxu0  ;;  %v3840_v34 = vld [vmem:[%s5992_s3 + $0xe8] sm:$0xff]  }
 0x1f7   :  { %v1135_v0 = vadd.f32 %v5182_v30, %v1134_v35  ;;  %v1421_v36 = vadd.f32 %v5190_v24, %v1132_v13  ;;  %v1136_v2 = vpop.f32.mrb[115].mxu0  ;;  %v5466_v18 = vsel %vm1699_vm15, %v1634_v53, %v1764_v57  ;;  %v3642_v53 = vunpack.c.l.bf16 %v3840_v34 }
 0x1f9   :  { %v1635_v61 = vadd.f32 %v3638_v49, %v1421_v36  ;;  %v1424_v48 = vadd.f32 %v5201_v62, %v1135_v0  ;;  %v3643_v49 = vunpack.c.h.bf16 %v3840_v34 }
 0x1fb   :  { %v1765_v59 = vmul.f32 %v5199_v38, %v1635_v61  ;;  %v1636_v35 = vadd.f32 %v3639_v7, %v1424_v48  ;;  %vm1700_vm0 = vcmp.ge.f32.partialorder %v1635_v61, 0.0 }
 0x1fc   :  { %v1139_v24 = vpop.f32.mrb[116].mxu0 }
 0x1fd   :  { %vm1701_vm1 = vcmp.ge.f32.partialorder %v1636_v35, 0.0  ;;  %v1766_v54 = vmul.f32 %v5199_v38, %v1636_v35  ;;  %v1140_v39 = vadd.f32 %v5182_v30, %v1139_v24  ;;  %v1141_v57 = vpop.f32.mrb[117].mxu0  ;;  %v5479_v2 = vsel %vm1700_vm0, %v1635_v61, %v1765_v59  ;;  %v3841_v24 = vld [vmem:[%s5992_s3 + $0xf0] sm:$0xff]  }
 0x1fe   :  { %v1142_v13 = vpop.f32.mrb[118].mxu0  ;;  %6032 = vst [vmem:[#allocation23_spill] sm:$0xff] %v5479_v2 }
 0x1ff   :  { %v1429_v62 = vadd.f32 %v5188_v10, %v1140_v39  ;;  %v1143_v0 = vadd.f32 %v5182_v30, %v1142_v13  ;;  %v1144_v36 = vpop.f32.mrb[119].mxu0  ;;  %v5481_v15 = vsel %vm1701_vm1, %v1636_v35, %v1766_v54  ;;  %v3646_v54 = vunpack.c.l.bf16 %v3841_v24 }
 0x200   :  { %6033 = vst [vmem:[#allocation24_spill] sm:$0xff] %v5481_v15 }
 0x201   :  { %v1637_v48 = vadd.f32 %v3642_v53, %v1429_v62  ;;  %v1432_v31 = vadd.f32 %v5194_v8, %v1143_v0  ;;  %v3647_v53 = vunpack.c.h.bf16 %v3841_v24 }
 0x203   :  { %v1767_v34 = vmul.f32 %v5199_v38, %v1637_v48  ;;  %v1638_v10 = vadd.f32 %v3643_v49, %v1432_v31  ;;  %vm1702_vm2 = vcmp.ge.f32.partialorder %v1637_v48, 0.0 }
 0x204   :  { %v1147_v39 = vpop.f32.mrb[120].mxu0 }
 0x205   :  { %v1768_v61 = vmul.f32 %v5199_v38, %v1638_v10  ;;  %v1148_v59 = vadd.f32 %v5182_v30, %v1147_v39  ;;  %v1149_v35 = vpop.f32.mrb[121].mxu0  ;;  %vm1703_vm3 = vcmp.ge.f32.partialorder %v1638_v10, 0.0  ;;  %v5494_v0 = vsel %vm1702_vm2, %v1637_v48, %v1767_v34 }
 0x206   :  { %v1150_v57 = vpop.f32.mrb[122].mxu0  ;;  %6034 = vst [vmem:[#allocation25_spill] sm:$0xff] %v5494_v0  ;;  %v3842_v35 = vld [vmem:[%s5992_s3 + $0xf8] sm:$0xff]   ;;  %v924_v0 = vadd.f32 %v5182_v30, %v5036_v60  ;;  %v3813_v60 = vld [vmem:[%s5992_s3 + $0x10] sm:$0xff]  }
 0x207   :  { %v1151_v8 = vadd.f32 %v5182_v30, %v1150_v57  ;;  %v1437_v13 = vadd.f32 %v5233_v11, %v1148_v59  ;;  %v1152_v62 = vpop.f32.mrb[123].mxu0  ;;  %v5496_v36 = vsel %vm1703_vm3, %v1638_v10, %v1768_v61  ;;  %v3650_v10 = vunpack.c.l.bf16 %v3842_v35 }
 0x208   :  { %6035 = vst [vmem:[#allocation26_spill] sm:$0xff] %v5496_v36 }
 0x209   :  { %v1639_v49 = vadd.f32 %v3646_v54, %v1437_v13  ;;  %v1440_v39 = vadd.f32 %v5244_v19, %v1151_v8  ;;  %v3651_v54 = vunpack.c.h.bf16 %v3842_v35 }
 0x20b   :  { %v1769_v24 = vmul.f32 %v5199_v38, %v1639_v49  ;;  %v1640_v57 = vadd.f32 %v3647_v53, %v1440_v39  ;;  %vm1704_vm4 = vcmp.ge.f32.partialorder %v1639_v49, 0.0  ;;  %v3812_v53 = vld [vmem:[%s5992_s3 + $0x8] sm:$0xff]  }
 0x20c   :  { %v1155_v11 = vpop.f32.mrb[124].mxu0 }
 0x20d   :  { %vm1705_vm5 = vcmp.ge.f32.partialorder %v1640_v57, 0.0  ;;  %v1770_v48 = vmul.f32 %v5199_v38, %v1640_v57  ;;  %v1156_v34 = vadd.f32 %v5182_v30, %v1155_v11  ;;  %v1157_v61 = vpop.f32.mrb[125].mxu0  ;;  %v5509_v62 = vsel %vm1704_vm4, %v1639_v49, %v1769_v24 }
 0x20e   :  { %v1158_v59 = vpop.f32.mrb[126].mxu0  ;;  %6036 = vst [vmem:[#allocation27_spill] sm:$0xff] %v5509_v62  ;;  %v916_v49 = vadd.f32 %v5182_v30, %v5020_v51  ;;  %v911_v51 = vadd.f32 %v5182_v30, %v5011_v46 }
 0x20f   :  { %v1445_v19 = vadd.f32 %v5231_v37, %v1156_v34  ;;  %v1159_v8 = vadd.f32 %v5182_v30, %v1158_v59  ;;  %v1160_v13 = vpop.f32.mrb[127].mxu0  ;;  %v5511_v31 = vsel %vm1705_vm5, %v1640_v57, %v1770_v48  ;;  %v3525_v37 = vld [vmem:[%s5992_s3] sm:$0xff]   ;;  %v3530_v57 = vunpack.c.l.bf16 %v3812_v53 }
 0x210   :  { %6037 = vst [vmem:[#allocation28_spill] sm:$0xff] %v5511_v31  ;;  %v908_v48 = vadd.f32 %v5182_v30, %v5002_v41  ;;  %v919_v34 = vadd.f32 %v5182_v30, %v5029_v56  ;;  %v3526_v59 = vunpack.c.l.bf16 %v3525_v37  ;;  %v3531_v13 = vunpack.c.h.bf16 %v3812_v53  ;;  %v3814_v53 = vld [vmem:[%s5992_s3 + $0x18] sm:$0xff]  }
 0x211   :  { %v1641_v11 = vadd.f32 %v3650_v10, %v1445_v19  ;;  %v1448_v61 = vadd.f32 %v5237_v33, %v1159_v8  ;;  %v3527_v39 = vunpack.c.h.bf16 %v3525_v37  ;;  %v927_v37 = vadd.f32 %v5182_v30, %v5041_v63 }
 0x213   :  { %v1771_v35 = vmul.f32 %v5199_v38, %v1641_v11  ;;  %v1642_v24 = vadd.f32 %v3651_v54, %v1448_v61  ;;  %vm1706_vm6 = vcmp.ge.f32.partialorder %v1641_v11, 0.0 }
 0x214   :  { %v4012_v10 = vpop.f32.mrb[128].mxu0 }
 0x215   :  { %v1772_v33 = vmul.f32 %v5199_v38, %v1642_v24  ;;  %v1205_v19 = vadd.f32 %v4012_v10, %v916_v49  ;;  %v1196_v8 = vpop.f32.mrb[129].mxu0  ;;  %vm1707_vm7 = vcmp.ge.f32.partialorder %v1642_v24, 0.0  ;;  %v5532_v31 = vsel %vm1706_vm6, %v1641_v11, %v1771_v35 }
 0x216   :  { %v1197_v54 = vadd.f32 %v1196_v8, %v908_v48  ;;  %v4013_v61 = vpop.f32.mrb[130].mxu0  ;;  %6038 = vst [vmem:[#allocation29_spill] sm:$0xff] %v5532_v31  ;;  %v932_v11 = vadd.f32 %v5182_v30, %v5054_v6  ;;  %v3816_v31 = vld [vmem:[%s5992_s3 + $0x28] sm:$0xff]  }
 0x217   :  { %v1581_v7 = vadd.f32 %v3530_v57, %v1205_v19  ;;  %v1208_v41 = vadd.f32 %v4013_v61, %v919_v34  ;;  %v1199_v62 = vpop.f32.mrb[131].mxu0  ;;  %v5534_v56 = vsel %vm1707_vm7, %v1642_v24, %v1772_v33  ;;  %v3538_v34 = vunpack.c.l.bf16 %v3814_v53 }
 0x218   :  { %6039 = vst [vmem:[#allocation30_spill] sm:$0xff] %v5534_v56  ;;  %v1579_v49 = vadd.f32 %v3526_v59, %v1197_v54  ;;  %v1200_v10 = vadd.f32 %v1199_v62, %v911_v51  ;;  %v935_v62 = vadd.f32 %v5182_v30, %v5059_v9  ;;  %v3534_v33 = vunpack.c.l.bf16 %v3813_v60 }
 0x219   :  { %v1711_v35 = vmul.f32 %v5199_v38, %v1581_v7  ;;  %v1582_v24 = vadd.f32 %v3531_v13, %v1208_v41  ;;  %vm1646_vm8 = vcmp.ge.f32.partialorder %v1581_v7, 0.0  ;;  %v3539_v19 = vunpack.c.h.bf16 %v3814_v53 }
 0x21a   :  { %v1709_v57 = vmul.f32 %v5199_v38, %v1579_v49  ;;  %v1580_v48 = vadd.f32 %v3527_v39, %v1200_v10  ;;  %vm1644_vm9 = vcmp.ge.f32.partialorder %v1579_v49, 0.0  ;;  %v3535_v9 = vunpack.c.h.bf16 %v3813_v60 }
 0x21b   :  { %vm1647_vm10 = vcmp.ge.f32.partialorder %v1582_v24, 0.0  ;;  %v1712_v63 = vmul.f32 %v5199_v38, %v1582_v24  ;;  %v1775_v8 = vsel %vm1646_vm8, %v1581_v7, %v1711_v35  ;;  %v4540_v7 = vld [vmem:[%s5995_s8 + $0x8] sm:$0xff]   ;;  %v940_v53 = vadd.f32 %v5182_v30, %v5064_v12  ;;  %v6040_v35 = vld [vmem:[#allocation3_spill] sm:$0xff]  ;;  %v6042_v30 = vld [vmem:[#allocation5_spill] sm:$0xff] }
 0x21c   :  { %vm1645_vm11 = vcmp.ge.f32.partialorder %v1580_v48, 0.0  ;;  %v1710_v6 = vmul.f32 %v5199_v38, %v1580_v48  ;;  %v4016_v59 = vpop.f32.mrb[132].mxu0  ;;  %v1773_v39 = vsel %vm1644_vm9, %v1579_v49, %v1709_v57  ;;  %v5568_v49 = vld [vmem:[%s5993_s2] ss:$0 sm:$0xff] }
 0x21d   :  { %v1776_v13 = vsel %vm1647_vm10, %v1582_v24, %v1712_v63  ;;  %v1221_v51 = vadd.f32 %v4016_v59, %v932_v11  ;;  %v1212_v54 = vpop.f32.mrb[133].mxu0  ;;  %v943_v24 = vadd.f32 %v5568_v49, %v6040_v35  ;;  %v3815_v12 = vld [vmem:[%s5992_s3 + $0x20] sm:$0xff]   ;;  %v4541_v63 = vld [vmem:[%s5995_s8 + $0x10] sm:$0xff]  }
 0x21e   :  { %v1838_v61 = vpack.c.bf16 %v1776_v13, %v1775_v8  ;;  %v1213_v41 = vadd.f32 %v1212_v54, %v924_v0  ;;  %v4017_v46 = vpop.f32.mrb[134].mxu0  ;;  %v1774_v10 = vsel %vm1645_vm11, %v1580_v48, %v1710_v6  ;;  %v3542_v59 = vunpack.c.l.bf16 %v3815_v12 }
 0x21f   :  { %v1585_v56 = vadd.f32 %v3538_v34, %v1221_v51  ;;  %v1224_v36 = vadd.f32 %v4017_v46, %v935_v62  ;;  %v1215_v2 = vpop.f32.mrb[135].mxu0  ;;  %v1837_v15 = vpack.c.bf16 %v1774_v10, %v1773_v39  ;;  %v6041_v46 = vld [vmem:[#allocation4_spill] sm:$0xff]  ;;  %v3543_v13 = vunpack.c.h.bf16 %v3815_v12  ;;  %v3818_v10 = vld [vmem:[%s5992_s3 + $0x38] sm:$0xff]  }
 0x220   :  { %v1583_v0 = vadd.f32 %v3534_v33, %v1213_v41  ;;  %v1216_v11 = vadd.f32 %v1215_v2, %v927_v37  ;;  %v948_v60 = vadd.f32 %v5568_v49, %v6041_v46  ;;  %v951_v2 = vadd.f32 %v5568_v49, %v6042_v30  ;;  %v6045_v30 = vld [vmem:[#allocation8_spill] sm:$0xff] }
 0x221   :  { %v1715_v62 = vmul.f32 %v5199_v38, %v1585_v56  ;;  %v1586_v57 = vadd.f32 %v3539_v19, %v1224_v36  ;;  %4090 = vmatprep.mubr.bf16.mxu1 %v1837_v15  ;;  %vm1650_vm12 = vcmp.ge.f32.partialorder %v1585_v56, 0.0  ;;  %v3546_v36 = vunpack.c.l.bf16 %v3816_v31 }
 0x222   :  { %v1713_v37 = vmul.f32 %v5199_v38, %v1583_v0  ;;  %v1584_v48 = vadd.f32 %v3535_v9, %v1216_v11  ;;  %4091 = vmatmul.mubr.bf16.vlgmr.msra.gmra.mrb[40].mxu1 %v1838_v61  ;;  %vm1648_vm13 = vcmp.ge.f32.partialorder %v1583_v0, 0.0  ;;  %v3547_v33 = vunpack.c.h.bf16 %v3816_v31 }
 0x223   :  { %vm1651_vm14 = vcmp.ge.f32.partialorder %v1586_v57, 0.0  ;;  %v1716_v15 = vmul.f32 %v5199_v38, %v1586_v57  ;;  %4155 = vmatpush3.bf16.msra.mxu1 %v5309_v42  ;;  %v1779_v51 = vsel %vm1650_vm12, %v1585_v56, %v1715_v62  ;;  %v4542_v56 = vld [vmem:[%s5995_s8 + $0x18] sm:$0xff]  }
 0x224   :  { %vm1649_vm15 = vcmp.ge.f32.partialorder %v1584_v48, 0.0  ;;  %v1714_v34 = vmul.f32 %v5199_v38, %v1584_v48  ;;  %v4020_v6 = vpop.f32.mrb[136].mxu0  ;;  %4156 = vmatprep.subr.bf16.mxu1 %v4540_v7  ;;  %v1777_v41 = vsel %vm1648_vm13, %v1583_v0, %v1713_v37  ;;  %v964_v37 = vadd.f32 %v5568_v49, %v6045_v30 }
 0x225   :  { %v1237_v19 = vadd.f32 %v4020_v6, %v948_v60  ;;  %v1228_v8 = vpop.f32.mrb[137].mxu0  ;;  %v1780_v54 = vsel %vm1651_vm14, %v1586_v57, %v1716_v15  ;;  %v6043_v60 = vld [vmem:[#allocation6_spill] sm:$0xff]  ;;  %v6044_v57 = vld [vmem:[#allocation7_spill] sm:$0xff]  ;;  %v6046_v15 = vld [vmem:[#allocation9_spill] sm:$0xff] }
 0x226   :  { %v1229_v9 = vadd.f32 %v1228_v8, %v940_v53  ;;  %v4021_v61 = vpop.f32.mrb[138].mxu0  ;;  %v1778_v39 = vsel %vm1649_vm15, %v1584_v48, %v1714_v34  ;;  %v1840_v42 = vpack.c.bf16 %v1780_v54, %v1779_v51  ;;  %v956_v53 = vadd.f32 %v5568_v49, %v6043_v60  ;;  %v4543_v6 = vld [vmem:[%s5995_s8 + $0x20] sm:$0xff]  }
 0x227   :  { %v1589_v11 = vadd.f32 %v3546_v36, %v1237_v19  ;;  %v1240_v35 = vadd.f32 %v4021_v61, %v951_v2  ;;  %v1231_v31 = vpop.f32.mrb[139].mxu0  ;;  %v1839_v46 = vpack.c.bf16 %v1778_v39, %v1777_v41  ;;  %4157 = vmatpush3.bf16.msra.mxu1 %v4540_v7  ;;  %v959_v12 = vadd.f32 %v5568_v49, %v6044_v57  ;;  %v3817_v7 = vld [vmem:[%s5992_s3 + $0x30] sm:$0xff]  }
 0x228   :  { %v1587_v62 = vadd.f32 %v3542_v59, %v1229_v9  ;;  %v1232_v0 = vadd.f32 %v1231_v31, %v943_v24  ;;  %4158 = vmatprep.subr.bf16.mxu1 %v4541_v63  ;;  %v967_v36 = vadd.f32 %v5568_v49, %v6046_v15  ;;  %v3550_v51 = vunpack.c.l.bf16 %v3817_v7  ;;  %v6049_v15 = vld [vmem:[#allocation12_spill] sm:$0xff] }
 0x229   :  { %v1719_v2 = vmul.f32 %v5199_v38, %v1589_v11  ;;  %v1590_v48 = vadd.f32 %v3547_v33, %v1240_v35  ;;  %4094 = vmatprep.mubr.bf16.mxu1 %v1839_v46  ;;  %vm1654_vm0 = vcmp.ge.f32.partialorder %v1589_v11, 0.0  ;;  %v3554_v33 = vunpack.c.l.bf16 %v3818_v10 }
 0x22a   :  { %v1717_v24 = vmul.f32 %v5199_v38, %v1587_v62  ;;  %v1588_v34 = vadd.f32 %v3543_v13, %v1232_v0  ;;  %4095 = vmatmul.mubr.bf16.gmra.mrb[44].mxu1 %v1840_v42  ;;  %vm1652_vm1 = vcmp.ge.f32.partialorder %v1587_v62, 0.0  ;;  %v3555_v54 = vunpack.c.h.bf16 %v3818_v10 }
 0x22b   :  { %vm1655_vm2 = vcmp.ge.f32.partialorder %v1590_v48, 0.0  ;;  %v1720_v59 = vmul.f32 %v5199_v38, %v1590_v48  ;;  %4159 = vmatpush3.bf16.msra.mxu1 %v4541_v63  ;;  %v3551_v61 = vunpack.c.h.bf16 %v3817_v7  ;;  %v1783_v41 = vsel %vm1654_vm0, %v1589_v11, %v1719_v2  ;;  %v3820_v63 = vld [vmem:[%s5992_s3 + $0x48] sm:$0xff]  }
 0x22c   :  { %vm1653_vm3 = vcmp.ge.f32.partialorder %v1588_v34, 0.0  ;;  %v1718_v19 = vmul.f32 %v5199_v38, %v1588_v34  ;;  %v4024_v8 = vpop.f32.mrb[140].mxu0  ;;  %4160 = vmatprep.subr.bf16.mxu1 %v4542_v56  ;;  %v1781_v31 = vsel %vm1652_vm1, %v1587_v62, %v1717_v24  ;;  %v4544_v11 = vld [vmem:[%s5995_s8 + $0x28] sm:$0xff]   ;;  %v980_v24 = vadd.f32 %v5568_v49, %v6049_v15 }
 0x22d   :  { %v1253_v9 = vadd.f32 %v4024_v8, %v964_v37  ;;  %v1244_v13 = vpop.f32.mrb[141].mxu0  ;;  %v1784_v39 = vsel %vm1655_vm2, %v1590_v48, %v1720_v59  ;;  %v6047_v37 = vld [vmem:[#allocation10_spill] sm:$0xff]  ;;  %v6048_v48 = vld [vmem:[#allocation11_spill] sm:$0xff]  ;;  %v6050_v59 = vld [vmem:[#allocation13_spill] sm:$0xff] }
 0x22e   :  { %v1245_v42 = vadd.f32 %v1244_v13, %v956_v53  ;;  %v4025_v35 = vpop.f32.mrb[142].mxu0  ;;  %v1782_v46 = vsel %vm1653_vm3, %v1588_v34, %v1718_v19  ;;  %v1842_v60 = vpack.c.bf16 %v1784_v39, %v1783_v41  ;;  %v972_v53 = vadd.f32 %v5568_v49, %v6047_v37  ;;  %v4545_v8 = vld [vmem:[%s5995_s8 + $0x30] sm:$0xff]  }
 0x22f   :  { %v1593_v0 = vadd.f32 %v3554_v33, %v1253_v9  ;;  %v1256_v57 = vadd.f32 %v4025_v35, %v967_v36  ;;  %v1247_v10 = vpop.f32.mrb[143].mxu0  ;;  %v1841_v30 = vpack.c.bf16 %v1782_v46, %v1781_v31  ;;  %4161 = vmatpush3.bf16.msra.mxu1 %v4542_v56  ;;  %v975_v7 = vadd.f32 %v5568_v49, %v6048_v48  ;;  %v3819_v56 = vld [vmem:[%s5992_s3 + $0x40] sm:$0xff]  }
 0x230   :  { %v1591_v2 = vadd.f32 %v3550_v51, %v1245_v42  ;;  %v1248_v62 = vadd.f32 %v1247_v10, %v959_v12  ;;  %4162 = vmatprep.subr.bf16.mxu1 %v4543_v6  ;;  %v983_v33 = vadd.f32 %v5568_v49, %v6050_v59  ;;  %v3558_v41 = vunpack.c.l.bf16 %v3819_v56  ;;  %v6053_v59 = vld [vmem:[#allocation16_spill] sm:$0xff] }
 0x231   :  { %v1723_v36 = vmul.f32 %v5199_v38, %v1593_v0  ;;  %v1594_v34 = vadd.f32 %v3555_v54, %v1256_v57  ;;  %4098 = vmatprep.mubr.bf16.mxu1 %v1841_v30  ;;  %vm1658_vm4 = vcmp.ge.f32.partialorder %v1593_v0, 0.0  ;;  %v3562_v54 = vunpack.c.l.bf16 %v3820_v63 }
 0x232   :  { %v1721_v12 = vmul.f32 %v5199_v38, %v1591_v2  ;;  %v1592_v19 = vadd.f32 %v3551_v61, %v1248_v62  ;;  %4099 = vmatmul.mubr.bf16.gmra.mrb[48].mxu1 %v1842_v60  ;;  %vm1656_vm5 = vcmp.ge.f32.partialorder %v1591_v2, 0.0  ;;  %v3563_v39 = vunpack.c.h.bf16 %v3820_v63 }
 0x233   :  { %vm1659_vm6 = vcmp.ge.f32.partialorder %v1594_v34, 0.0  ;;  %v1724_v51 = vmul.f32 %v5199_v38, %v1594_v34  ;;  %4163 = vmatpush3.bf16.msra.mxu1 %v4543_v6  ;;  %v3559_v35 = vunpack.c.h.bf16 %v3819_v56  ;;  %v1787_v31 = vsel %vm1658_vm4, %v1593_v0, %v1723_v36  ;;  %v3822_v6 = vld [vmem:[%s5992_s3 + $0x58] sm:$0xff]  }
 0x234   :  { %vm1657_vm7 = vcmp.ge.f32.partialorder %v1592_v19, 0.0  ;;  %v1722_v9 = vmul.f32 %v5199_v38, %v1592_v19  ;;  %v4028_v13 = vpop.f32.mrb[144].mxu0  ;;  %4164 = vmatprep.subr.bf16.mxu1 %v4544_v11  ;;  %v1785_v10 = vsel %vm1656_vm5, %v1591_v2, %v1721_v12  ;;  %v4546_v0 = vld [vmem:[%s5995_s8 + $0x38] sm:$0xff]   ;;  %v996_v12 = vadd.f32 %v5568_v49, %v6053_v59 }
 0x235   :  { %v1269_v42 = vadd.f32 %v4028_v13, %v980_v24  ;;  %v1260_v61 = vpop.f32.mrb[145].mxu0  ;;  %v1788_v46 = vsel %vm1659_vm6, %v1594_v34, %v1724_v51  ;;  %v6051_v24 = vld [vmem:[#allocation14_spill] sm:$0xff]  ;;  %v6052_v34 = vld [vmem:[#allocation15_spill] sm:$0xff]  ;;  %v6054_v51 = vld [vmem:[#allocation17_spill] sm:$0xff] }
 0x236   :  { %v1261_v60 = vadd.f32 %v1260_v61, %v972_v53  ;;  %v4029_v57 = vpop.f32.mrb[146].mxu0  ;;  %v1786_v30 = vsel %vm1657_vm7, %v1592_v19, %v1722_v9  ;;  %v1844_v37 = vpack.c.bf16 %v1788_v46, %v1787_v31  ;;  %v988_v53 = vadd.f32 %v5568_v49, %v6051_v24 }
 0x237   :  { %v1597_v62 = vadd.f32 %v3562_v54, %v1269_v42  ;;  %v1272_v48 = vadd.f32 %v4029_v57, %v983_v33  ;;  %v1263_v63 = vpop.f32.mrb[147].mxu0  ;;  %v1843_v15 = vpack.c.bf16 %v1786_v30, %v1785_v10  ;;  %4165 = vmatpush3.bf16.msra.mxu1 %v4544_v11  ;;  %v991_v56 = vadd.f32 %v5568_v49, %v6052_v34  ;;  %v3821_v11 = vld [vmem:[%s5992_s3 + $0x50] sm:$0xff]  }
 0x238   :  { %v1595_v36 = vadd.f32 %v3558_v41, %v1261_v60  ;;  %v1264_v2 = vadd.f32 %v1263_v63, %v975_v7  ;;  %4166 = vmatprep.subr.bf16.mxu1 %v4545_v8  ;;  %v999_v54 = vadd.f32 %v5568_v49, %v6054_v51  ;;  %v3570_v41 = vunpack.c.l.bf16 %v3822_v6 }
 0x239   :  { %v1727_v33 = vmul.f32 %v5199_v38, %v1597_v62  ;;  %v1598_v19 = vadd.f32 %v3563_v39, %v1272_v48  ;;  %4102 = vmatprep.mubr.bf16.mxu1 %v1843_v15  ;;  %vm1662_vm8 = vcmp.ge.f32.partialorder %v1597_v62, 0.0  ;;  %v3566_v61 = vunpack.c.l.bf16 %v3821_v11 }
 0x23a   :  { %v1725_v7 = vmul.f32 %v5199_v38, %v1595_v36  ;;  %v1596_v9 = vadd.f32 %v3559_v35, %v1264_v2  ;;  %4103 = vmatmul.mubr.bf16.gmra.mrb[52].mxu1 %v1844_v37  ;;  %vm1660_vm9 = vcmp.ge.f32.partialorder %v1595_v36, 0.0  ;;  %v3571_v31 = vunpack.c.h.bf16 %v3822_v6 }
 0x23b   :  { %vm1663_vm10 = vcmp.ge.f32.partialorder %v1598_v19, 0.0  ;;  %v1728_v13 = vmul.f32 %v5199_v38, %v1598_v19  ;;  %4167 = vmatpush3.bf16.msra.mxu1 %v4545_v8  ;;  %v3567_v60 = vunpack.c.h.bf16 %v3821_v11  ;;  %v1791_v57 = vsel %vm1662_vm8, %v1597_v62, %v1727_v33 }
 0x23c   :  { %vm1661_vm11 = vcmp.ge.f32.partialorder %v1596_v9, 0.0  ;;  %v1726_v39 = vmul.f32 %v5199_v38, %v1596_v9  ;;  %v4032_v42 = vpop.f32.mrb[148].mxu0  ;;  %4168 = vmatprep.subr.bf16.mxu1 %v4546_v0  ;;  %v1789_v37 = vsel %vm1660_vm9, %v1595_v36, %v1725_v7  ;;  %v6055_v7 = vld [vmem:[#allocation19_spill] sm:$0xff] }
 0x23d   :  { %v1285_v46 = vadd.f32 %v4032_v42, %v996_v12  ;;  %v1276_v49 = vpop.f32.mrb[149].mxu0  ;;  %v1792_v35 = vsel %vm1663_vm10, %v1598_v19, %v1728_v13 }
 0x23e   :  { %v1277_v10 = vadd.f32 %v1276_v49, %v988_v53  ;;  %v4033_v30 = vpop.f32.mrb[150].mxu0  ;;  %v1790_v48 = vsel %vm1661_vm11, %v1596_v9, %v1726_v39  ;;  %v1846_v63 = vpack.c.bf16 %v1792_v35, %v1791_v57  ;;  %v6056_v9 = vld [vmem:[#allocation18_spill] sm:$0xff]  ;;  %v6059_v39 = vld [vmem:[#allocation20_spill] sm:$0xff]  ;;  %v4553_v57 = vld [vmem:[%s5996_s7 + $0x30] sm:$0xff]  }
 0x23f   :  { %v1601_v8 = vadd.f32 %v3570_v41, %v1285_v46  ;;  %v1288_v15 = vadd.f32 %v4033_v30, %v999_v54  ;;  %v1279_v24 = vpop.f32.mrb[151].mxu0  ;;  %v1845_v2 = vpack.c.bf16 %v1790_v48, %v1789_v37  ;;  %4169 = vmatpush3.bf16.msra.mxu1 %v4546_v0  ;;  %v6057_v13 = vpack.c.bf16 %v6055_v7, %v6056_v9  ;;  %v6058_v41 = vld [vmem:[#allocation21_spill] sm:$0xff]  ;;  %v6064_v46 = vld [vmem:[#allocation22_spill] sm:$0xff]  ;;  %v4556_v30 = vld [vmem:[%s5996_s7 + $0x48] sm:$0xff]  }
 0x240   :  { %v1599_v34 = vadd.f32 %v3566_v61, %v1277_v10  ;;  %v1280_v6 = vadd.f32 %v1279_v24, %v991_v56  ;;  %v6060_v42 = vpack.c.bf16 %v6058_v41, %v6059_v39  ;;  %v6061_v61 = vpack.c.bf16 %v5259_v32, %v5257_v29  ;;  %v4554_v35 = vld [vmem:[%s5996_s7 + $0x38] sm:$0xff]   ;;  %v4555_v10 = vld [vmem:[%s5996_s7 + $0x40] sm:$0xff]   ;;  %v4557_v37 = vld [vmem:[%s5996_s7 + $0x50] sm:$0xff]  }
 0x241   :  { %v1731_v59 = vmul.f32 %v5199_v38, %v1601_v8  ;;  %v1602_v12 = vadd.f32 %v3571_v31, %v1288_v15  ;;  %4106 = vmatprep.mubr.bf16.mxu1 %v1845_v2  ;;  %vm1666_vm12 = vcmp.ge.f32.partialorder %v1601_v8, 0.0  ;;  %v6063_v31 = vpack.c.bf16 %v5295_v26, %v5293_v16  ;;  %v4558_v48 = vld [vmem:[%s5996_s7 + $0x58] sm:$0xff]   ;;  %v4561_v15 = vld [vmem:[%s5996_s7 + $0x70] sm:$0xff]   ;;  %v4563_v2 = vld [vmem:[%s5996_s7 + $0x80] sm:$0xff]  }
 0x242   :  { %v1729_v62 = vmul.f32 %v5199_v38, %v1599_v34  ;;  %v1600_v53 = vadd.f32 %v3567_v60, %v1280_v6  ;;  %4107 = vmatmul.mubr.bf16.gmra.mrb[56].mxu1 %v1846_v63  ;;  %vm1664_vm13 = vcmp.ge.f32.partialorder %v1599_v34, 0.0  ;;  %v6065_v49 = vpack.c.bf16 %v5320_v45, %v6064_v46  ;;  %v4559_v63 = vld [vmem:[%s5996_s7 + $0x60] sm:$0xff]   ;;  %v4562_v24 = vld [vmem:[%s5996_s7 + $0x78] sm:$0xff]   ;;  %v4565_v6 = vld [vmem:[%s5996_s7 + $0x90] sm:$0xff]  }
 0x243   :  { %vm1667_vm14 = vcmp.ge.f32.partialorder %v1602_v12, 0.0  ;;  %v1732_v36 = vmul.f32 %v5199_v38, %v1602_v12  ;;  %v1795_v19 = vsel %vm1666_vm12, %v1601_v8, %v1731_v59  ;;  %v6066_v60 = vpack.c.bf16 %v5331_v55, %v5329_v25  ;;  %v4560_v8 = vld [vmem:[%s5996_s7 + $0x68] sm:$0xff]   ;;  %v4566_v59 = vld [vmem:[%s5996_s7 + $0x98] sm:$0xff]   ;;  %v5827_v9 = vld [vmem:[%s5997_s6] ss:$0 sm:$0xff] }
 0x244   :  { %vm1665_vm15 = vcmp.ge.f32.partialorder %v1600_v53, 0.0  ;;  %v1730_v33 = vmul.f32 %v5199_v38, %v1600_v53  ;;  %v1793_v11 = vsel %vm1664_vm13, %v1599_v34, %v1729_v62  ;;  %v6062_v38 = vpack.c.bf16 %v5277_v22, %v5275_v27  ;;  %v4564_v34 = vld [vmem:[%s5996_s7 + $0x88] sm:$0xff]   ;;  %v4578_v7 = vld [vmem:[%s5996_s7 + $0xf8] sm:$0xff]  }
 0x245   :  { %v1796_v0 = vsel %vm1667_vm14, %v1602_v12, %v1732_v36  ;;  %v6067_v32 = vpack.c.bf16 %v5346_v28, %v5344_v40  ;;  %v6068_v29 = vpack.c.bf16 %v5361_v50, %v5359_v58  ;;  %v6069_v27 = vpack.c.bf16 %v5376_v5, %v5374_v4  ;;  %v6076_v40 = vld [vmem:[#allocation24_spill] sm:$0xff]  ;;  %v6077_v28 = vld [vmem:[#allocation23_spill] sm:$0xff]  ;;  %v6079_v58 = vld [vmem:[#allocation26_spill] sm:$0xff] }
 0x246   :  { %v1794_v56 = vsel %vm1665_vm15, %v1600_v53, %v1730_v33  ;;  %v1848_v51 = vpack.c.bf16 %v1796_v0, %v1795_v19  ;;  %v6070_v22 = vpack.c.bf16 %v5391_v23, %v5389_v21  ;;  %v6071_v16 = vpack.c.bf16 %v5406_v3, %v5404_v20  ;;  %v6080_v4 = vld [vmem:[#allocation25_spill] sm:$0xff]  ;;  %v6082_v23 = vld [vmem:[#allocation28_spill] sm:$0xff]  ;;  %v6083_v21 = vld [vmem:[#allocation27_spill] sm:$0xff] }
 0x247   :  { %v1847_v54 = vpack.c.bf16 %v1794_v56, %v1793_v11  ;;  %v6072_v26 = vpack.c.bf16 %v5421_v52, %v5419_v44  ;;  %v6073_v45 = vpack.c.bf16 %v5436_v47, %v5434_v43  ;;  %v6074_v55 = vpack.c.bf16 %v5451_v1, %v5449_v17  ;;  %v4547_v3 = vld [vmem:[%s5996_s7] sm:$0xff]   ;;  %v6085_v52 = vld [vmem:[#allocation30_spill] sm:$0xff]  ;;  %v6086_v44 = vld [vmem:[#allocation29_spill] sm:$0xff] }
 0x248   :  { %v6075_v25 = vpack.c.bf16 %v5466_v18, %v5464_v14  ;;  %v6078_v50 = vpack.c.bf16 %v6076_v40, %v6077_v28  ;;  %v6081_v5 = vpack.c.bf16 %v6079_v58, %v6080_v4  ;;  %v6084_v20 = vpack.c.bf16 %v6082_v23, %v6083_v21  ;;  %v4548_v47 = vld [vmem:[%s5996_s7 + $0x8] sm:$0xff]   ;;  %v4549_v1 = vld [vmem:[%s5996_s7 + $0x10] sm:$0xff]   ;;  %v4550_v17 = vld [vmem:[%s5996_s7 + $0x18] sm:$0xff]  }
 0x249   :  { %4110 = vmatprep.mubr.bf16.mxu1 %v1847_v54  ;;  %v6087_v43 = vpack.c.bf16 %v6085_v52, %v6086_v44  ;;  %v4551_v14 = vld [vmem:[%s5996_s7 + $0x20] sm:$0xff]   ;;  %v4552_v18 = vld [vmem:[%s5996_s7 + $0x28] sm:$0xff]   ;;  %v4569_v53 = vld [vmem:[%s5996_s7 + $0xb0] sm:$0xff]  }
 0x24a   :  { %4111 = vmatmul.mubr.bf16.gmra.mrb[60].mxu1 %v1848_v51  ;;  %v4567_v12 = vld [vmem:[%s5996_s7 + $0xa0] sm:$0xff]   ;;  %v4568_v62 = vld [vmem:[%s5996_s7 + $0xa8] sm:$0xff]   ;;  %v4570_v36 = vld [vmem:[%s5996_s7 + $0xb8] sm:$0xff]  }
 0x24b   :  { %4114 = vmatprep.mubr.bf16.mxu1 %v6057_v13  ;;  %v4571_v33 = vld [vmem:[%s5996_s7 + $0xc0] sm:$0xff]   ;;  %v4572_v19 = vld [vmem:[%s5996_s7 + $0xc8] sm:$0xff]   ;;  %v4573_v0 = vld [vmem:[%s5996_s7 + $0xd0] sm:$0xff]  }
 0x24c   :  { %v4574_v11 = vld [vmem:[%s5996_s7 + $0xd8] sm:$0xff]   ;;  %v4575_v56 = vld [vmem:[%s5996_s7 + $0xe0] sm:$0xff]   ;;  %v4576_v51 = vld [vmem:[%s5996_s7 + $0xe8] sm:$0xff]  }
 0x24d   :  { %v4577_v54 = vld [vmem:[%s5996_s7 + $0xf0] sm:$0xff]  }
 0x252   :  { %4115 = vmatmul.mubr.bf16.gmra.mrb[64].mxu1 %v6060_v42 }
 0x253   :  { %4118 = vmatprep.mubr.bf16.mxu1 %v6061_v61 }
 0x25a   :  { %4119 = vmatmul.mubr.bf16.gmra.mrb[68].mxu1 %v6062_v38 }
 0x25b   :  { %4122 = vmatprep.mubr.bf16.mxu1 %v6063_v31 }
 0x262   :  { %4123 = vmatmul.mubr.bf16.gmra.mrb[72].mxu1 %v6065_v49 }
 0x263   :  { %4126 = vmatprep.mubr.bf16.mxu1 %v6066_v60 }
 0x26a   :  { %4127 = vmatmul.mubr.bf16.gmra.mrb[76].mxu1 %v6067_v32 }
 0x26b   :  { %4130 = vmatprep.mubr.bf16.mxu1 %v6068_v29 }
 0x272   :  { %4131 = vmatmul.mubr.bf16.gmra.mrb[80].mxu1 %v6069_v27 }
 0x273   :  { %4134 = vmatprep.mubr.bf16.mxu1 %v6070_v22 }
 0x27a   :  { %4135 = vmatmul.mubr.bf16.gmra.mrb[84].mxu1 %v6071_v16 }
 0x27b   :  { %4138 = vmatprep.mubr.bf16.mxu1 %v6072_v26 }
 0x282   :  { %4139 = vmatmul.mubr.bf16.gmra.mrb[88].mxu1 %v6073_v45 }
 0x283   :  { %4142 = vmatprep.mubr.bf16.mxu1 %v6074_v55 }
 0x28a   :  { %4143 = vmatmul.mubr.bf16.gmra.mrb[92].mxu1 %v6075_v25 }
 0x28b   :  { %4146 = vmatprep.mubr.bf16.mxu1 %v6078_v50 }
 0x292   :  { %4147 = vmatmul.mubr.bf16.gmra.mrb[96].mxu1 %v6081_v5 }
 0x293   :  { %4150 = vmatprep.mubr.bf16.mxu1 %v6084_v20 }
 0x29a   :  { %4151 = vmatmul.mubr.bf16.gmra.mrb[100].mxu1 %v6087_v43 }
 0x29b   :  { %4170 = vmatprep.mubr.bf16.mxu1 %v4547_v3 }
 0x2a2   :  { %4171 = vmatmul.mubr.bf16.vlgmr.msra.gmra.mrb[40].mxu1 %v4548_v47 }
 0x2a3   :  { %4174 = vmatprep.mubr.bf16.mxu1 %v4549_v1 }
 0x2aa   :  { %4175 = vmatmul.mubr.bf16.gmra.mrb[44].mxu1 %v4550_v17 }
 0x2ab   :  { %4178 = vmatprep.mubr.bf16.mxu1 %v4551_v14 }
 0x2b2   :  { %4179 = vmatmul.mubr.bf16.gmra.mrb[48].mxu1 %v4552_v18 }
 0x2b3   :  { %4182 = vmatprep.mubr.bf16.mxu1 %v4553_v57 }
 0x2ba   :  { %4183 = vmatmul.mubr.bf16.gmra.mrb[52].mxu1 %v4554_v35 }
 0x2bb   :  { %4186 = vmatprep.mubr.bf16.mxu1 %v4555_v10 }
 0x2c2   :  { %4187 = vmatmul.mubr.bf16.gmra.mrb[56].mxu1 %v4556_v30 }
 0x2c3   :  { %4190 = vmatprep.mubr.bf16.mxu1 %v4557_v37 }
 0x2ca   :  { %4191 = vmatmul.mubr.bf16.gmra.mrb[60].mxu1 %v4558_v48 }
 0x2cb   :  { %4194 = vmatprep.mubr.bf16.mxu1 %v4559_v63 }
 0x2d2   :  { %4195 = vmatmul.mubr.bf16.gmra.mrb[64].mxu1 %v4560_v8 }
 0x2d3   :  { %4198 = vmatprep.mubr.bf16.mxu1 %v4561_v15 }
 0x2da   :  { %4199 = vmatmul.mubr.bf16.gmra.mrb[68].mxu1 %v4562_v24 }
 0x2db   :  { %4202 = vmatprep.mubr.bf16.mxu1 %v4563_v2 }
 0x2e2   :  { %4203 = vmatmul.mubr.bf16.gmra.mrb[72].mxu1 %v4564_v34 }
 0x2e3   :  { %4206 = vmatprep.mubr.bf16.mxu1 %v4565_v6 }
 0x2ea   :  { %4207 = vmatmul.mubr.bf16.gmra.mrb[76].mxu1 %v4566_v59 }
 0x2eb   :  { %4210 = vmatprep.mubr.bf16.mxu1 %v4567_v12 }
 0x2f2   :  { %4211 = vmatmul.mubr.bf16.gmra.mrb[80].mxu1 %v4568_v62 }
 0x2f3   :  { %4214 = vmatprep.mubr.bf16.mxu1 %v4569_v53 }
 0x2fa   :  { %4215 = vmatmul.mubr.bf16.gmra.mrb[84].mxu1 %v4570_v36 }
 0x2fb   :  { %4218 = vmatprep.mubr.bf16.mxu1 %v4571_v33 }
 0x302   :  { %4219 = vmatmul.mubr.bf16.gmra.mrb[88].mxu1 %v4572_v19 }
 0x303   :  { %4222 = vmatprep.mubr.bf16.mxu1 %v4573_v0 }
 0x30a   :  { %4223 = vmatmul.mubr.bf16.gmra.mrb[92].mxu1 %v4574_v11 }
 0x30b   :  { %4226 = vmatprep.mubr.bf16.mxu1 %v4575_v56 }
 0x312   :  { %4227 = vmatmul.mubr.bf16.gmra.mrb[96].mxu1 %v4576_v51 }
 0x313   :  { %4230 = vmatprep.mubr.bf16.mxu1 %v4577_v54 }
 0x31a   :  { %4231 = vmatmul.mubr.bf16.gmra.mrb[100].mxu1 %v4578_v7 }
 0x375   :  { %v4172_v13 = vpop.f32.mrb[40].mxu1 }
 0x376   :  { %v2583_v41 = vpop.f32.mrb[41].mxu1  ;;  %v4250_v42 = vadd.f32 %v4172_v13, %v5827_v9 }
 0x377   :  { %v4173_v39 = vpop.f32.mrb[42].mxu1  ;;  %v4251_v31 = vadd.f32 %v5827_v9, %v2583_v41 }
 0x378   :  { %v4252_v61 = vadd.f32 %v4173_v39, %v5827_v9  ;;  %v2586_v38 = vpop.f32.mrb[43].mxu1 }
 0x379   :  { %v4253_v46 = vadd.f32 %v5827_v9, %v2586_v38 }
 0x37a   :  { %v3660_v49 = vpack.c.bf16 %v4252_v61, %v4250_v42 }
 0x37b   :  { %v3655_v60 = vpack.c.bf16 %v4253_v46, %v4251_v31 }
 0x37c   :  { %3843 = vst [vmem:[%s5998_s9 + $0x8] sm:$0xff] %v3660_v49  }
 0x37d   :  { %3656 = vst [vmem:[%s5998_s9] sm:$0xff] %v3655_v60   ;;  %v4176_v32 = vpop.f32.mrb[44].mxu1 }
 0x37e   :  { %v2599_v29 = vpop.f32.mrb[45].mxu1  ;;  %v4254_v22 = vadd.f32 %v4176_v32, %v5827_v9 }
 0x37f   :  { %v4177_v27 = vpop.f32.mrb[46].mxu1  ;;  %v4255_v45 = vadd.f32 %v5827_v9, %v2599_v29 }
 0x380   :  { %v4256_v16 = vadd.f32 %v4177_v27, %v5827_v9  ;;  %v2602_v26 = vpop.f32.mrb[47].mxu1 }
 0x381   :  { %v4257_v55 = vadd.f32 %v5827_v9, %v2602_v26 }
 0x382   :  { %v3670_v25 = vpack.c.bf16 %v4256_v16, %v4254_v22 }
 0x383   :  { %v3665_v40 = vpack.c.bf16 %v4257_v55, %v4255_v45 }
 0x384   :  { %3845 = vst [vmem:[%s5998_s9 + $0x18] sm:$0xff] %v3670_v25  }
 0x385   :  { %3844 = vst [vmem:[%s5998_s9 + $0x10] sm:$0xff] %v3665_v40   ;;  %v4180_v28 = vpop.f32.mrb[48].mxu1 }
 0x386   :  { %v2615_v50 = vpop.f32.mrb[49].mxu1  ;;  %v4258_v4 = vadd.f32 %v4180_v28, %v5827_v9 }
 0x387   :  { %v4181_v58 = vpop.f32.mrb[50].mxu1  ;;  %v4259_v21 = vadd.f32 %v5827_v9, %v2615_v50 }
 0x388   :  { %v4260_v5 = vadd.f32 %v4181_v58, %v5827_v9  ;;  %v2618_v23 = vpop.f32.mrb[51].mxu1 }
 0x389   :  { %v4261_v20 = vadd.f32 %v5827_v9, %v2618_v23 }
 0x38a   :  { %v3680_v3 = vpack.c.bf16 %v4260_v5, %v4258_v4 }
 0x38b   :  { %v3675_v52 = vpack.c.bf16 %v4261_v20, %v4259_v21 }
 0x38c   :  { %3847 = vst [vmem:[%s5998_s9 + $0x28] sm:$0xff] %v3680_v3  }
 0x38d   :  { %3846 = vst [vmem:[%s5998_s9 + $0x20] sm:$0xff] %v3675_v52   ;;  %v4184_v44 = vpop.f32.mrb[52].mxu1 }
 0x38e   :  { %v2631_v43 = vpop.f32.mrb[53].mxu1  ;;  %v4262_v1 = vadd.f32 %v4184_v44, %v5827_v9 }
 0x38f   :  { %v4185_v47 = vpop.f32.mrb[54].mxu1  ;;  %v4263_v18 = vadd.f32 %v5827_v9, %v2631_v43 }
 0x390   :  { %v4264_v17 = vadd.f32 %v4185_v47, %v5827_v9  ;;  %v2634_v14 = vpop.f32.mrb[55].mxu1 }
 0x391   :  { %v4265_v57 = vadd.f32 %v5827_v9, %v2634_v14 }
 0x392   :  { %v3690_v35 = vpack.c.bf16 %v4264_v17, %v4262_v1 }
 0x393   :  { %v3685_v10 = vpack.c.bf16 %v4265_v57, %v4263_v18 }
 0x394   :  { %3849 = vst [vmem:[%s5998_s9 + $0x38] sm:$0xff] %v3690_v35  }
 0x395   :  { %3848 = vst [vmem:[%s5998_s9 + $0x30] sm:$0xff] %v3685_v10   ;;  %v4188_v30 = vpop.f32.mrb[56].mxu1 }
 0x396   :  { %v2647_v37 = vpop.f32.mrb[57].mxu1  ;;  %v4266_v63 = vadd.f32 %v4188_v30, %v5827_v9 }
 0x397   :  { %v4189_v48 = vpop.f32.mrb[58].mxu1  ;;  %v4267_v24 = vadd.f32 %v5827_v9, %v2647_v37 }
 0x398   :  { %v4268_v8 = vadd.f32 %v4189_v48, %v5827_v9  ;;  %v2650_v15 = vpop.f32.mrb[59].mxu1 }
 0x399   :  { %v4269_v2 = vadd.f32 %v5827_v9, %v2650_v15 }
 0x39a   :  { %v3700_v34 = vpack.c.bf16 %v4268_v8, %v4266_v63 }
 0x39b   :  { %v3695_v6 = vpack.c.bf16 %v4269_v2, %v4267_v24 }
 0x39c   :  { %3851 = vst [vmem:[%s5998_s9 + $0x48] sm:$0xff] %v3700_v34  }
 0x39d   :  { %3850 = vst [vmem:[%s5998_s9 + $0x40] sm:$0xff] %v3695_v6   ;;  %v4192_v59 = vpop.f32.mrb[60].mxu1 }
 0x39e   :  { %v2663_v12 = vpop.f32.mrb[61].mxu1  ;;  %v4270_v53 = vadd.f32 %v4192_v59, %v5827_v9 }
 0x39f   :  { %v4193_v62 = vpop.f32.mrb[62].mxu1  ;;  %v4271_v19 = vadd.f32 %v5827_v9, %v2663_v12 }
 0x3a0   :  { %v4272_v36 = vadd.f32 %v4193_v62, %v5827_v9  ;;  %v2666_v33 = vpop.f32.mrb[63].mxu1 }
 0x3a1   :  { %v4273_v0 = vadd.f32 %v5827_v9, %v2666_v33 }
 0x3a2   :  { %v3710_v11 = vpack.c.bf16 %v4272_v36, %v4270_v53 }
 0x3a3   :  { %v3705_v56 = vpack.c.bf16 %v4273_v0, %v4271_v19 }
 0x3a4   :  { %3853 = vst [vmem:[%s5998_s9 + $0x58] sm:$0xff] %v3710_v11  }
 0x3a5   :  { %3852 = vst [vmem:[%s5998_s9 + $0x50] sm:$0xff] %v3705_v56   ;;  %v4196_v51 = vpop.f32.mrb[64].mxu1 }
 0x3a6   :  { %v2679_v54 = vpop.f32.mrb[65].mxu1  ;;  %v4274_v13 = vadd.f32 %v4196_v51, %v5827_v9 }
 0x3a7   :  { %v4197_v7 = vpop.f32.mrb[66].mxu1  ;;  %v4275_v42 = vadd.f32 %v5827_v9, %v2679_v54 }
 0x3a8   :  { %v4276_v41 = vadd.f32 %v4197_v7, %v5827_v9  ;;  %v2682_v39 = vpop.f32.mrb[67].mxu1 }
 0x3a9   :  { %v4277_v61 = vadd.f32 %v5827_v9, %v2682_v39 }
 0x3aa   :  { %v3720_v38 = vpack.c.bf16 %v4276_v41, %v4274_v13 }
 0x3ab   :  { %v3715_v31 = vpack.c.bf16 %v4277_v61, %v4275_v42 }
 0x3ac   :  { %3855 = vst [vmem:[%s5998_s9 + $0x68] sm:$0xff] %v3720_v38  }
 0x3ad   :  { %3854 = vst [vmem:[%s5998_s9 + $0x60] sm:$0xff] %v3715_v31   ;;  %v4200_v46 = vpop.f32.mrb[68].mxu1 }
 0x3ae   :  { %v2695_v49 = vpop.f32.mrb[69].mxu1  ;;  %v4278_v32 = vadd.f32 %v4200_v46, %v5827_v9 }
 0x3af   :  { %v4201_v60 = vpop.f32.mrb[70].mxu1  ;;  %v4279_v22 = vadd.f32 %v5827_v9, %v2695_v49 }
 0x3b0   :  { %v4280_v29 = vadd.f32 %v4201_v60, %v5827_v9  ;;  %v2698_v27 = vpop.f32.mrb[71].mxu1 }
 0x3b1   :  { %v4281_v16 = vadd.f32 %v5827_v9, %v2698_v27 }
 0x3b2   :  { %v3730_v26 = vpack.c.bf16 %v4280_v29, %v4278_v32 }
 0x3b3   :  { %v3725_v45 = vpack.c.bf16 %v4281_v16, %v4279_v22 }
 0x3b4   :  { %3857 = vst [vmem:[%s5998_s9 + $0x78] sm:$0xff] %v3730_v26  }
 0x3b5   :  { %3856 = vst [vmem:[%s5998_s9 + $0x70] sm:$0xff] %v3725_v45   ;;  %v4204_v55 = vpop.f32.mrb[72].mxu1 }
 0x3b6   :  { %v2711_v25 = vpop.f32.mrb[73].mxu1  ;;  %v4282_v28 = vadd.f32 %v4204_v55, %v5827_v9 }
 0x3b7   :  { %v4205_v40 = vpop.f32.mrb[74].mxu1  ;;  %v4283_v4 = vadd.f32 %v5827_v9, %v2711_v25 }
 0x3b8   :  { %v4284_v50 = vadd.f32 %v4205_v40, %v5827_v9  ;;  %v2714_v58 = vpop.f32.mrb[75].mxu1 }
 0x3b9   :  { %v4285_v5 = vadd.f32 %v5827_v9, %v2714_v58 }
 0x3ba   :  { %v3740_v23 = vpack.c.bf16 %v4284_v50, %v4282_v28 }
 0x3bb   :  { %v3735_v21 = vpack.c.bf16 %v4285_v5, %v4283_v4 }
 0x3bc   :  { %3859 = vst [vmem:[%s5998_s9 + $0x88] sm:$0xff] %v3740_v23  }
 0x3bd   :  { %3858 = vst [vmem:[%s5998_s9 + $0x80] sm:$0xff] %v3735_v21   ;;  %v4208_v20 = vpop.f32.mrb[76].mxu1 }
 0x3be   :  { %v2727_v3 = vpop.f32.mrb[77].mxu1  ;;  %v4286_v44 = vadd.f32 %v4208_v20, %v5827_v9 }
 0x3bf   :  { %v4209_v52 = vpop.f32.mrb[78].mxu1  ;;  %v4287_v1 = vadd.f32 %v5827_v9, %v2727_v3 }
 0x3c0   :  { %v4288_v43 = vadd.f32 %v4209_v52, %v5827_v9  ;;  %v2730_v47 = vpop.f32.mrb[79].mxu1 }
 0x3c1   :  { %v4289_v17 = vadd.f32 %v5827_v9, %v2730_v47 }
 0x3c2   :  { %v3750_v14 = vpack.c.bf16 %v4288_v43, %v4286_v44 }
 0x3c3   :  { %v3745_v18 = vpack.c.bf16 %v4289_v17, %v4287_v1 }
 0x3c4   :  { %3861 = vst [vmem:[%s5998_s9 + $0x98] sm:$0xff] %v3750_v14  }
 0x3c5   :  { %3860 = vst [vmem:[%s5998_s9 + $0x90] sm:$0xff] %v3745_v18   ;;  %v4212_v57 = vpop.f32.mrb[80].mxu1 }
 0x3c6   :  { %v2743_v35 = vpop.f32.mrb[81].mxu1  ;;  %v4290_v30 = vadd.f32 %v4212_v57, %v5827_v9 }
 0x3c7   :  { %v4213_v10 = vpop.f32.mrb[82].mxu1  ;;  %v4291_v63 = vadd.f32 %v5827_v9, %v2743_v35 }
 0x3c8   :  { %v4292_v37 = vadd.f32 %v4213_v10, %v5827_v9  ;;  %v2746_v48 = vpop.f32.mrb[83].mxu1 }
 0x3c9   :  { %v4293_v8 = vadd.f32 %v5827_v9, %v2746_v48 }
 0x3ca   :  { %v3760_v15 = vpack.c.bf16 %v4292_v37, %v4290_v30 }
 0x3cb   :  { %v3755_v24 = vpack.c.bf16 %v4293_v8, %v4291_v63 }
 0x3cc   :  { %3863 = vst [vmem:[%s5998_s9 + $0xa8] sm:$0xff] %v3760_v15  }
 0x3cd   :  { %3862 = vst [vmem:[%s5998_s9 + $0xa0] sm:$0xff] %v3755_v24   ;;  %v4216_v2 = vpop.f32.mrb[84].mxu1 }
 0x3ce   :  { %v2759_v34 = vpop.f32.mrb[85].mxu1  ;;  %v4294_v59 = vadd.f32 %v4216_v2, %v5827_v9 }
 0x3cf   :  { %v4217_v6 = vpop.f32.mrb[86].mxu1  ;;  %v4295_v53 = vadd.f32 %v5827_v9, %v2759_v34 }
 0x3d0   :  { %v4296_v12 = vadd.f32 %v4217_v6, %v5827_v9  ;;  %v2762_v62 = vpop.f32.mrb[87].mxu1 }
 0x3d1   :  { %v4297_v36 = vadd.f32 %v5827_v9, %v2762_v62 }
 0x3d2   :  { %v3770_v33 = vpack.c.bf16 %v4296_v12, %v4294_v59 }
 0x3d3   :  { %v3765_v19 = vpack.c.bf16 %v4297_v36, %v4295_v53 }
 0x3d4   :  { %3865 = vst [vmem:[%s5998_s9 + $0xb8] sm:$0xff] %v3770_v33  }
 0x3d5   :  { %3864 = vst [vmem:[%s5998_s9 + $0xb0] sm:$0xff] %v3765_v19   ;;  %v4220_v0 = vpop.f32.mrb[88].mxu1 }
 0x3d6   :  { %v2775_v11 = vpop.f32.mrb[89].mxu1  ;;  %v4298_v51 = vadd.f32 %v4220_v0, %v5827_v9 }
 0x3d7   :  { %v4221_v56 = vpop.f32.mrb[90].mxu1  ;;  %v4299_v13 = vadd.f32 %v5827_v9, %v2775_v11 }
 0x3d8   :  { %v4300_v54 = vadd.f32 %v4221_v56, %v5827_v9  ;;  %v2778_v7 = vpop.f32.mrb[91].mxu1 }
 0x3d9   :  { %v4301_v41 = vadd.f32 %v5827_v9, %v2778_v7 }
 0x3da   :  { %v3780_v39 = vpack.c.bf16 %v4300_v54, %v4298_v51 }
 0x3db   :  { %v3775_v42 = vpack.c.bf16 %v4301_v41, %v4299_v13 }
 0x3dc   :  { %3867 = vst [vmem:[%s5998_s9 + $0xc8] sm:$0xff] %v3780_v39  }
 0x3dd   :  { %3866 = vst [vmem:[%s5998_s9 + $0xc0] sm:$0xff] %v3775_v42   ;;  %v4224_v61 = vpop.f32.mrb[92].mxu1 }
 0x3de   :  { %v2791_v38 = vpop.f32.mrb[93].mxu1  ;;  %v4302_v46 = vadd.f32 %v4224_v61, %v5827_v9 }
 0x3df   :  { %v4225_v31 = vpop.f32.mrb[94].mxu1  ;;  %v4303_v32 = vadd.f32 %v5827_v9, %v2791_v38 }
 0x3e0   :  { %v4304_v49 = vadd.f32 %v4225_v31, %v5827_v9  ;;  %v2794_v60 = vpop.f32.mrb[95].mxu1 }
 0x3e1   :  { %v4305_v29 = vadd.f32 %v5827_v9, %v2794_v60 }
 0x3e2   :  { %v3790_v27 = vpack.c.bf16 %v4304_v49, %v4302_v46 }
 0x3e3   :  { %v3785_v22 = vpack.c.bf16 %v4305_v29, %v4303_v32 }
 0x3e4   :  { %3869 = vst [vmem:[%s5998_s9 + $0xd8] sm:$0xff] %v3790_v27  }
 0x3e5   :  { %3868 = vst [vmem:[%s5998_s9 + $0xd0] sm:$0xff] %v3785_v22   ;;  %v4228_v16 = vpop.f32.mrb[96].mxu1 }
 0x3e6   :  { %v2807_v26 = vpop.f32.mrb[97].mxu1  ;;  %v4306_v55 = vadd.f32 %v4228_v16, %v5827_v9 }
 0x3e7   :  { %v4229_v45 = vpop.f32.mrb[98].mxu1  ;;  %v4307_v28 = vadd.f32 %v5827_v9, %v2807_v26 }
 0x3e8   :  { %v4308_v25 = vadd.f32 %v4229_v45, %v5827_v9  ;;  %v2810_v40 = vpop.f32.mrb[99].mxu1 }
 0x3e9   :  { %v4309_v50 = vadd.f32 %v5827_v9, %v2810_v40 }
 0x3ea   :  { %v3800_v58 = vpack.c.bf16 %v4308_v25, %v4306_v55 }
 0x3eb   :  { %v3795_v4 = vpack.c.bf16 %v4309_v50, %v4307_v28 }
 0x3ec   :  { %3871 = vst [vmem:[%s5998_s9 + $0xe8] sm:$0xff] %v3800_v58  }
 0x3ed   :  { %3870 = vst [vmem:[%s5998_s9 + $0xe0] sm:$0xff] %v3795_v4   ;;  %v4232_v5 = vpop.f32.mrb[100].mxu1 }
 0x3ee   :  { %v2823_v23 = vpop.f32.mrb[101].mxu1  ;;  %v4310_v20 = vadd.f32 %v4232_v5, %v5827_v9 }
 0x3ef   :  { %v4233_v21 = vpop.f32.mrb[102].mxu1  ;;  %v4311_v44 = vadd.f32 %v5827_v9, %v2823_v23 }
 0x3f0   :  { %v4312_v3 = vadd.f32 %v4233_v21, %v5827_v9  ;;  %v2826_v52 = vpop.f32.mrb[103].mxu1 }
 0x3f1   :  { %v4313_v43 = vadd.f32 %v5827_v9, %v2826_v52 }
 0x3f2   :  { %v3810_v47 = vpack.c.bf16 %v4312_v3, %v4310_v20 }
 0x3f3   :  { %v3805_v1 = vpack.c.bf16 %v4313_v43, %v4311_v44 }
 0x3f4   :  { %3873 = vst [vmem:[%s5998_s9 + $0xf8] sm:$0xff] %v3810_v47  }
 0x3f5   :  { %3872 = vst [vmem:[%s5998_s9 + $0xf0] sm:$0xff] %v3805_v1  }

// kernel: cannet_forward.11
= control target key start
LH: loop header
LB: loop body
LE: loop exit
PB: predicated region body
PF: predicated region fallthrough
CT: control target
= control target key end

     0   :  { %v15394_v0 = vmov 0   ;;  %s19534_s1 = inlined_call_operand.vmem [shape: bf16[3456,128], index: 1, kind: input, shape index: {}]   ;;  %s19535_s0 = inlined_call_operand.vmem [shape: bf16[512,3456], index: 0, kind: input, shape index: {}]   ;;  %s19536_s2 = inlined_call_operand.vmem [shape: f32[1,128], index: 2, kind: input, shape index: {}]   ;;  %s19537_s3 = inlined_call_operand.vmem [shape: f32[512,128], index: 3, kind: output, shape index: {}]  }
   0x1   :  { %6998 = vmatprep.subr.bf16.mxu1 %v15394_v0  ;;  %8732 = vmatprep.subr.bf16.mxu0 %v15394_v0  ;;  %v13882_v1 = vld [vmem:[%s19534_s1] sm:$0xff]   ;;  %v13884_v3 = vld [vmem:[%s19534_s1 + $0x8] sm:$0xff]   ;;  %v13886_v5 = vld [vmem:[%s19534_s1 + $0x10] sm:$0xff]  }
   0x2   :  { %v13883_v2 = vld [vmem:[%s19534_s1 + $0x300] sm:$0xff]   ;;  %6999 = vmatpush1.bf16.msra.mxu1 %v13882_v1  ;;  %v13885_v4 = vld [vmem:[%s19534_s1 + $0x308] sm:$0xff]   ;;  %v13887_v6 = vld [vmem:[%s19534_s1 + $0x310] sm:$0xff]  }
   0x3   :  { %8733 = vmatpush1.bf16.msra.mxu0 %v13883_v2  ;;  %7000 = vmatprep.subr.bf16.mxu1 %v15394_v0  ;;  %v13888_v7 = vld [vmem:[%s19534_s1 + $0x18] sm:$0xff]   ;;  %v13890_v9 = vld [vmem:[%s19534_s1 + $0x20] sm:$0xff]   ;;  %v13892_v11 = vld [vmem:[%s19534_s1 + $0x28] sm:$0xff]  }
   0x4   :  { %8734 = vmatprep.subr.bf16.mxu0 %v15394_v0  ;;  %v13889_v8 = vld [vmem:[%s19534_s1 + $0x318] sm:$0xff]   ;;  %v13891_v10 = vld [vmem:[%s19534_s1 + $0x320] sm:$0xff]   ;;  %v13893_v12 = vld [vmem:[%s19534_s1 + $0x328] sm:$0xff]  }
   0x5   :  { %v13894_v13 = vld [vmem:[%s19534_s1 + $0x30] sm:$0xff]   ;;  %v13896_v15 = vld [vmem:[%s19534_s1 + $0x38] sm:$0xff]   ;;  %v13898_v17 = vld [vmem:[%s19534_s1 + $0x40] sm:$0xff]  }
   0x6   :  { %7001 = vmatpush1.bf16.msra.mxu1 %v13884_v3  ;;  %v13895_v14 = vld [vmem:[%s19534_s1 + $0x330] sm:$0xff]   ;;  %v13897_v16 = vld [vmem:[%s19534_s1 + $0x338] sm:$0xff]   ;;  %v13899_v18 = vld [vmem:[%s19534_s1 + $0x340] sm:$0xff]  }
   0x7   :  { %8735 = vmatpush1.bf16.msra.mxu0 %v13885_v4  ;;  %7002 = vmatprep.subr.bf16.mxu1 %v15394_v0  ;;  %v13916_v19 = vld [vmem:[%s19535_s0 + $0x4] ss:$108 sps:$4 sm:$0xff]   ;;  %v13900_v20 = vld [vmem:[%s19534_s1 + $0x48] sm:$0xff]   ;;  %v13919_v21 = vld [vmem:[%s19535_s0 + $0x34] ss:$108 sps:$4 sm:$0xff]  }
   0x8   :  { %8736 = vmatprep.subr.bf16.mxu0 %v15394_v0  ;;  %v13901_v22 = vld [vmem:[%s19534_s1 + $0x348] sm:$0xff]   ;;  %7030 = vmatprep.mubr.bf16.mxu1 %v13916_v19  ;;  %v13902_v23 = vld [vmem:[%s19534_s1 + $0x50] sm:$0xff]   ;;  %v13904_v25 = vld [vmem:[%s19534_s1 + $0x58] sm:$0xff]  }
   0x9   :  { %8764 = vmatprep.mubr.bf16.mxu0 %v13919_v21  ;;  %v13903_v24 = vld [vmem:[%s19534_s1 + $0x350] sm:$0xff]   ;;  %v13905_v26 = vld [vmem:[%s19534_s1 + $0x358] sm:$0xff]   ;;  %v13906_v27 = vld [vmem:[%s19534_s1 + $0x60] sm:$0xff]  }
   0xa   :  { %7003 = vmatpush1.bf16.msra.mxu1 %v13886_v5  ;;  %v13907_v28 = vld [vmem:[%s19534_s1 + $0x360] sm:$0xff]   ;;  %v13908_v29 = vld [vmem:[%s19534_s1 + $0x68] sm:$0xff]   ;;  %v13910_v31 = vld [vmem:[%s19534_s1 + $0x70] sm:$0xff]  }
   0xb   :  { %8737 = vmatpush1.bf16.msra.mxu0 %v13887_v6  ;;  %7004 = vmatprep.subr.bf16.mxu1 %v15394_v0  ;;  %v13909_v30 = vld [vmem:[%s19534_s1 + $0x368] sm:$0xff]   ;;  %v13911_v32 = vld [vmem:[%s19534_s1 + $0x370] sm:$0xff]   ;;  %v13912_v33 = vld [vmem:[%s19534_s1 + $0x78] sm:$0xff]  }
   0xc   :  { %8738 = vmatprep.subr.bf16.mxu0 %v15394_v0  ;;  %v13913_v34 = vld [vmem:[%s19534_s1 + $0x378] sm:$0xff]   ;;  %v13914_v35 = vld [vmem:[%s19535_s0] ss:$108 sps:$4 sm:$0xff]   ;;  %v13927_v44 = vld [vmem:[%s19535_s0 + $0x108] ss:$108 sps:$4 sm:$0xff]  }
   0xd   :  { %v13917_v36 = vld [vmem:[%s19535_s0 + $0x30] ss:$108 sps:$4 sm:$0xff]   ;;  %v13920_v37 = vld [vmem:[%s19534_s1 + $0x380] sm:$0xff]   ;;  %v13924_v40 = vld [vmem:[%s19535_s0 + $0x10c] ss:$108 sps:$4 sm:$0xff]  }
   0xe   :  { %7005 = vmatpush1.bf16.msra.mxu1 %v13888_v7  ;;  %v13921_v38 = vld [vmem:[%s19534_s1 + $0x80] sm:$0xff]   ;;  %v13922_v39 = vld [vmem:[%s19535_s0 + $0xdc] ss:$108 sps:$4 sm:$0xff]   ;;  %v13942_v47 = vld [vmem:[%s19534_s1 + $0x390] sm:$0xff]  }
   0xf   :  { %8739 = vmatpush1.bf16.msra.mxu0 %v13889_v8  ;;  %7006 = vmatprep.subr.bf16.mxu1 %v15394_v0  ;;  %v13935_v41 = vld [vmem:[%s19534_s1 + $0x88] sm:$0xff]   ;;  %v13926_v43 = vld [vmem:[%s19535_s0 + $0xd8] ss:$108 sps:$4 sm:$0xff]   ;;  %v13929_v45 = vld [vmem:[%s19535_s0 + $0x1b4] ss:$108 sps:$4 sm:$0xff]  }
  0x10   :  { %8740 = vmatprep.subr.bf16.mxu0 %v15394_v0  ;;  %v13928_v42 = vld [vmem:[%s19534_s1 + $0x388] sm:$0xff]   ;;  %v13931_v46 = vld [vmem:[%s19535_s0 + $0x1e4] ss:$108 sps:$4 sm:$0xff]   ;;  %v13950_v49 = vld [vmem:[%s19534_s1 + $0x398] sm:$0xff]  }
  0x11   :  { %v13949_v48 = vld [vmem:[%s19534_s1 + $0x90] sm:$0xff]   ;;  %v13964_v50 = vld [vmem:[%s19534_s1 + $0x98] sm:$0xff]   ;;  %v13934_v52 = vld [vmem:[%s19535_s0 + $0x1e0] ss:$108 sps:$4 sm:$0xff]  }
  0x12   :  { %7007 = vmatpush1.bf16.msra.mxu1 %v13890_v9  ;;  %v13933_v51 = vld [vmem:[%s19535_s0 + $0x1b0] ss:$108 sps:$4 sm:$0xff]   ;;  %v13936_v53 = vld [vmem:[%s19535_s0 + $0x28c] ss:$108 sps:$4 sm:$0xff]   ;;  %v13963_v55 = vld [vmem:[%s19534_s1 + $0x3a0] sm:$0xff]  }
  0x13   :  { %8741 = vmatpush1.bf16.msra.mxu0 %v13891_v10  ;;  %7008 = vmatprep.subr.bf16.mxu1 %v15394_v0  ;;  %v13938_v54 = vld [vmem:[%s19535_s0 + $0x2bc] ss:$108 sps:$4 sm:$0xff]   ;;  %v13978_v56 = vld [vmem:[%s19534_s1 + $0xa0] sm:$0xff]   ;;  %v13985_v63 = vld [vmem:[%s19534_s1 + $0x3b0] sm:$0xff]  }
  0x14   :  { %8742 = vmatprep.subr.bf16.mxu0 %v15394_v0  ;;  %v13940_v57 = vld [vmem:[%s19535_s0 + $0x288] ss:$108 sps:$4 sm:$0xff]   ;;  %v13941_v59 = vld [vmem:[%s19535_s0 + $0x2b8] ss:$108 sps:$4 sm:$0xff]   ;;  %v13947_v3 = vld [vmem:[%s19535_s0 + $0x360] ss:$108 sps:$4 sm:$0xff]  }
  0x15   :  { %v13971_v58 = vld [vmem:[%s19534_s1 + $0x3a8] sm:$0xff]   ;;  %v13943_v61 = vld [vmem:[%s19535_s0 + $0x364] ss:$108 sps:$4 sm:$0xff]   ;;  %v13945_v62 = vld [vmem:[%s19535_s0 + $0x394] ss:$108 sps:$4 sm:$0xff]  }
  0x16   :  { %7009 = vmatpush1.bf16.msra.mxu1 %v13892_v11  ;;  %v13992_v60 = vld [vmem:[%s19534_s1 + $0xa8] sm:$0xff]   ;;  %v14007_v1 = vld [vmem:[%s19534_s1 + $0xb0] sm:$0xff]   ;;  %v13993_v2 = vld [vmem:[%s19534_s1 + $0x3b8] sm:$0xff]  }
  0x17   :  { %8743 = vmatpush1.bf16.msra.mxu0 %v13893_v12  ;;  %7010 = vmatprep.subr.bf16.mxu1 %v15394_v0  ;;  %v14021_v4 = vld [vmem:[%s19534_s1 + $0xb8] sm:$0xff]   ;;  %v14006_v8 = vld [vmem:[%s19534_s1 + $0x3c0] sm:$0xff]   ;;  %v14014_v10 = vld [vmem:[%s19534_s1 + $0x3c8] sm:$0xff]  }
  0x18   :  { %8744 = vmatprep.subr.bf16.mxu0 %v15394_v0  ;;  %v13948_v5 = vld [vmem:[%s19535_s0 + $0x390] ss:$108 sps:$4 sm:$0xff]   ;;  %v13953_v7 = vld [vmem:[%s19535_s0 + $0x46c] ss:$108 sps:$4 sm:$0xff]   ;;  %v14035_v9 = vld [vmem:[%s19534_s1 + $0xc0] sm:$0xff]  }
  0x19   :  { %v13951_v6 = vld [vmem:[%s19535_s0 + $0x43c] ss:$108 sps:$4 sm:$0xff]   ;;  %v13955_v11 = vld [vmem:[%s19535_s0 + $0x438] ss:$108 sps:$4 sm:$0xff]   ;;  %v13962_v19 = vld [vmem:[%s19535_s0 + $0x540] ss:$108 sps:$4 sm:$0xff]  }
  0x1a   :  { %7011 = vmatpush1.bf16.msra.mxu1 %v13894_v13  ;;  %v13956_v12 = vld [vmem:[%s19535_s0 + $0x468] ss:$108 sps:$4 sm:$0xff]  }
  0x1b   :  { %8745 = vmatpush1.bf16.msra.mxu0 %v13895_v14  ;;  %7012 = vmatprep.subr.bf16.mxu1 %v15394_v0  ;;  %v13957_v13 = vld [vmem:[%s19535_s0 + $0x514] ss:$108 sps:$4 sm:$0xff]   ;;  %v13959_v14 = vld [vmem:[%s19535_s0 + $0x544] ss:$108 sps:$4 sm:$0xff]   ;;  %v13967_v21 = vld [vmem:[%s19535_s0 + $0x61c] ss:$108 sps:$4 sm:$0xff]  }
  0x1c   :  { %8746 = vmatprep.subr.bf16.mxu0 %v15394_v0 }
  0x1e   :  { %7013 = vmatpush1.bf16.msra.mxu1 %v13896_v15  ;;  %v14028_v15 = vld [vmem:[%s19534_s1 + $0x3d0] sm:$0xff]  }
  0x1f   :  { %8747 = vmatpush1.bf16.msra.mxu0 %v13897_v16  ;;  %7014 = vmatprep.subr.bf16.mxu1 %v15394_v0  ;;  %v14050_v16 = vld [vmem:[%s19534_s1 + $0xc8] sm:$0xff]  }
  0x20   :  { %8748 = vmatprep.subr.bf16.mxu0 %v15394_v0 }
  0x22   :  { %7015 = vmatpush1.bf16.msra.mxu1 %v13898_v17  ;;  %v14036_v17 = vld [vmem:[%s19534_s1 + $0x3d8] sm:$0xff]  }
  0x23   :  { %8749 = vmatpush1.bf16.msra.mxu0 %v13899_v18  ;;  %7016 = vmatprep.subr.bf16.mxu1 %v15394_v0  ;;  %v13961_v18 = vld [vmem:[%s19535_s0 + $0x510] ss:$108 sps:$4 sm:$0xff]  }
  0x24   :  { %8750 = vmatprep.subr.bf16.mxu0 %v15394_v0 }
  0x26   :  { %7017 = vmatpush1.bf16.msra.mxu1 %v13900_v20  ;;  %v13965_v20 = vld [vmem:[%s19535_s0 + $0x5ec] ss:$108 sps:$4 sm:$0xff]  }
  0x27   :  { %8751 = vmatpush1.bf16.msra.mxu0 %v13901_v22  ;;  %7018 = vmatprep.subr.bf16.mxu1 %v15394_v0  ;;  %v14049_v22 = vld [vmem:[%s19534_s1 + $0x3e0] sm:$0xff]  }
  0x28   :  { %8752 = vmatprep.subr.bf16.mxu0 %v15394_v0 }
  0x2a   :  { %7019 = vmatpush1.bf16.msra.mxu1 %v13902_v23  ;;  %v14064_v23 = vld [vmem:[%s19534_s1 + $0xd0] sm:$0xff]  }
  0x2b   :  { %8753 = vmatpush1.bf16.msra.mxu0 %v13903_v24  ;;  %7020 = vmatprep.subr.bf16.mxu1 %v15394_v0  ;;  %v14057_v24 = vld [vmem:[%s19534_s1 + $0x3e8] sm:$0xff]  }
  0x2c   :  { %8754 = vmatprep.subr.bf16.mxu0 %v15394_v0 }
  0x2e   :  { %7021 = vmatpush1.bf16.msra.mxu1 %v13904_v25  ;;  %v13969_v25 = vld [vmem:[%s19535_s0 + $0x5e8] ss:$108 sps:$4 sm:$0xff]  }
  0x2f   :  { %8755 = vmatpush1.bf16.msra.mxu0 %v13905_v26  ;;  %7022 = vmatprep.subr.bf16.mxu1 %v15394_v0  ;;  %v13970_v26 = vld [vmem:[%s19535_s0 + $0x618] ss:$108 sps:$4 sm:$0xff]  }
  0x30   :  { %8756 = vmatprep.subr.bf16.mxu0 %v15394_v0 }
  0x32   :  { %7023 = vmatpush1.bf16.msra.mxu1 %v13906_v27  ;;  %v13972_v27 = vld [vmem:[%s19535_s0 + $0x6c4] ss:$108 sps:$4 sm:$0xff]  }
  0x33   :  { %8757 = vmatpush1.bf16.msra.mxu0 %v13907_v28  ;;  %7024 = vmatprep.subr.bf16.mxu1 %v15394_v0  ;;  %v13974_v28 = vld [vmem:[%s19535_s0 + $0x6f4] ss:$108 sps:$4 sm:$0xff]  }
  0x34   :  { %8758 = vmatprep.subr.bf16.mxu0 %v15394_v0 }
  0x36   :  { %7025 = vmatpush1.bf16.msra.mxu1 %v13908_v29  ;;  %v14071_v29 = vld [vmem:[%s19534_s1 + $0x3f0] sm:$0xff]  }
  0x37   :  { %8759 = vmatpush1.bf16.msra.mxu0 %v13909_v30  ;;  %7026 = vmatprep.subr.bf16.mxu1 %v15394_v0  ;;  %v14078_v30 = vld [vmem:[%s19534_s1 + $0xd8] sm:$0xff]  }
  0x38   :  { %8760 = vmatprep.subr.bf16.mxu0 %v15394_v0 }
  0x3a   :  { %7027 = vmatpush1.bf16.msra.mxu1 %v13910_v31  ;;  %v14079_v31 = vld [vmem:[%s19534_s1 + $0x3f8] sm:$0xff]  }
  0x3b   :  { %8761 = vmatpush1.bf16.msra.mxu0 %v13911_v32  ;;  %7028 = vmatprep.subr.bf16.mxu1 %v15394_v0  ;;  %v13976_v32 = vld [vmem:[%s19535_s0 + $0x6c0] ss:$108 sps:$4 sm:$0xff]  }
  0x3c   :  { %8762 = vmatprep.subr.bf16.mxu0 %v15394_v0 }
  0x3e   :  { %7029 = vmatpush1.bf16.msra.mxu1 %v13912_v33  ;;  %v13977_v33 = vld [vmem:[%s19535_s0 + $0x6f0] ss:$108 sps:$4 sm:$0xff]  }
  0x3f   :  { %8763 = vmatpush1.bf16.msra.mxu0 %v13913_v34  ;;  %7287 = vmatprep.subr.bf16.mxu1 %v15394_v0  ;;  %v13979_v34 = vld [vmem:[%s19535_s0 + $0x79c] ss:$108 sps:$4 sm:$0xff]  }
  0x40   :  { %9021 = vmatprep.subr.bf16.mxu0 %v15394_v0 }
  0x41   :  { %7031 = vmatmul.mubr.bf16.vlgmr.msra.gmra.mrb[0].mxu1 %v13914_v35  ;;  %v13981_v35 = vld [vmem:[%s19535_s0 + $0x7cc] ss:$108 sps:$4 sm:$0xff]  }
  0x42   :  { %8765 = vmatmul.mubr.bf16.vlgmr.msra.gmra.mrb[0].mxu0 %v13917_v36  ;;  %7288 = vmatpush1.bf16.msra.mxu1 %v13921_v38  ;;  %v13983_v36 = vld [vmem:[%s19535_s0 + $0x798] ss:$108 sps:$4 sm:$0xff]   ;;  %v13984_v38 = vld [vmem:[%s19535_s0 + $0x7c8] ss:$108 sps:$4 sm:$0xff]  }
  0x43   :  { %9022 = vmatpush1.bf16.msra.mxu0 %v13920_v37  ;;  %7038 = vmatprep.mubr.bf16.mxu1 %v13922_v39  ;;  %v14093_v37 = vld [vmem:[%s19534_s1 + $0xe0] sm:$0xff]  }
  0x44   :  { %8772 = vmatprep.mubr.bf16.mxu0 %v13924_v40  ;;  %9023 = vmatprep.subr.bf16.mxu0 %v15394_v0  ;;  %v13986_v39 = vld [vmem:[%s19535_s0 + $0x874] ss:$108 sps:$4 sm:$0xff]   ;;  %v13988_v40 = vld [vmem:[%s19535_s0 + $0x8a4] ss:$108 sps:$4 sm:$0xff]  }
  0x45   :  { %7289 = vmatprep.subr.bf16.mxu1 %v15394_v0 }
  0x46   :  { %7290 = vmatpush1.bf16.msra.mxu1 %v13935_v41  ;;  %v13990_v41 = vld [vmem:[%s19535_s0 + $0x870] ss:$108 sps:$4 sm:$0xff]  }
  0x47   :  { %9024 = vmatpush1.bf16.msra.mxu0 %v13928_v42  ;;  %7291 = vmatprep.subr.bf16.mxu1 %v15394_v0  ;;  %v13991_v42 = vld [vmem:[%s19535_s0 + $0x8a0] ss:$108 sps:$4 sm:$0xff]  }
  0x48   :  { %9025 = vmatprep.subr.bf16.mxu0 %v15394_v0 }
  0x49   :  { %7039 = vmatmul.mubr.bf16.gmra.mrb[4].mxu1 %v13926_v43  ;;  %v13994_v43 = vld [vmem:[%s19535_s0 + $0x94c] ss:$108 sps:$4 sm:$0xff]  }
  0x4a   :  { %8773 = vmatmul.mubr.bf16.gmra.mrb[4].mxu0 %v13927_v44  ;;  %7046 = vmatprep.mubr.bf16.mxu1 %v13929_v45  ;;  %v13996_v44 = vld [vmem:[%s19535_s0 + $0x97c] ss:$108 sps:$4 sm:$0xff]  }
  0x4b   :  { %8780 = vmatprep.mubr.bf16.mxu0 %v13931_v46  ;;  %9026 = vmatpush1.bf16.msra.mxu0 %v13942_v47  ;;  %v14107_v45 = vld [vmem:[%s19534_s1 + $0xe8] sm:$0xff]   ;;  %v13999_v47 = vld [vmem:[%s19535_s0 + $0x978] ss:$108 sps:$4 sm:$0xff]  }
  0x4c   :  { %7292 = vmatpush1.bf16.msra.mxu1 %v13949_v48  ;;  %9027 = vmatprep.subr.bf16.mxu0 %v15394_v0  ;;  %v13998_v46 = vld [vmem:[%s19535_s0 + $0x948] ss:$108 sps:$4 sm:$0xff]   ;;  %v14000_v48 = vld [vmem:[%s19535_s0 + $0xa24] ss:$108 sps:$4 sm:$0xff]  }
  0x4d   :  { %7293 = vmatprep.subr.bf16.mxu1 %v15394_v0 }
  0x4f   :  { %9028 = vmatpush1.bf16.msra.mxu0 %v13950_v49  ;;  %v14002_v49 = vld [vmem:[%s19535_s0 + $0xa54] ss:$108 sps:$4 sm:$0xff]  }
  0x50   :  { %9029 = vmatprep.subr.bf16.mxu0 %v15394_v0  ;;  %7294 = vmatpush1.bf16.msra.mxu1 %v13964_v50  ;;  %v14004_v50 = vld [vmem:[%s19535_s0 + $0xa20] ss:$108 sps:$4 sm:$0xff]  }
  0x51   :  { %7047 = vmatmul.mubr.bf16.gmra.mrb[8].mxu1 %v13933_v51  ;;  %7295 = vmatprep.subr.bf16.mxu1 %v15394_v0  ;;  %v14005_v51 = vld [vmem:[%s19535_s0 + $0xa50] ss:$108 sps:$4 sm:$0xff]  }
  0x52   :  { %8781 = vmatmul.mubr.bf16.gmra.mrb[8].mxu0 %v13934_v52  ;;  %7054 = vmatprep.mubr.bf16.mxu1 %v13936_v53  ;;  %v14008_v52 = vld [vmem:[%s19535_s0 + $0xafc] ss:$108 sps:$4 sm:$0xff]   ;;  %v14010_v53 = vld [vmem:[%s19535_s0 + $0xb2c] ss:$108 sps:$4 sm:$0xff]  }
  0x53   :  { %8788 = vmatprep.mubr.bf16.mxu0 %v13938_v54  ;;  %9030 = vmatpush1.bf16.msra.mxu0 %v13963_v55  ;;  %v14121_v54 = vld [vmem:[%s19534_s1 + $0xf0] sm:$0xff]   ;;  %v14012_v55 = vld [vmem:[%s19535_s0 + $0xaf8] ss:$108 sps:$4 sm:$0xff]  }
  0x54   :  { %9031 = vmatprep.subr.bf16.mxu0 %v15394_v0  ;;  %7296 = vmatpush1.bf16.msra.mxu1 %v13978_v56  ;;  %v14013_v56 = vld [vmem:[%s19535_s0 + $0xb28] ss:$108 sps:$4 sm:$0xff]  }
  0x55   :  { %7297 = vmatprep.subr.bf16.mxu1 %v15394_v0 }
  0x57   :  { %9032 = vmatpush1.bf16.msra.mxu0 %v13971_v58  ;;  %v14017_v58 = vld [vmem:[%s19535_s0 + $0xc04] ss:$108 sps:$4 sm:$0xff]  }
  0x58   :  { %9033 = vmatprep.subr.bf16.mxu0 %v15394_v0  ;;  %7298 = vmatpush1.bf16.msra.mxu1 %v13992_v60  ;;  %v14020_v60 = vld [vmem:[%s19535_s0 + $0xc00] ss:$108 sps:$4 sm:$0xff]  }
  0x59   :  { %7055 = vmatmul.mubr.bf16.gmra.mrb[12].mxu1 %v13940_v57  ;;  %7299 = vmatprep.subr.bf16.mxu1 %v15394_v0  ;;  %v14015_v57 = vld [vmem:[%s19535_s0 + $0xbd4] ss:$108 sps:$4 sm:$0xff]  }
  0x5a   :  { %8789 = vmatmul.mubr.bf16.gmra.mrb[12].mxu0 %v13941_v59  ;;  %7062 = vmatprep.mubr.bf16.mxu1 %v13943_v61  ;;  %v14019_v59 = vld [vmem:[%s19535_s0 + $0xbd0] ss:$108 sps:$4 sm:$0xff]   ;;  %v14022_v61 = vld [vmem:[%s19535_s0 + $0xcac] ss:$108 sps:$4 sm:$0xff]  }
  0x5b   :  { %8796 = vmatprep.mubr.bf16.mxu0 %v13945_v62  ;;  %9034 = vmatpush1.bf16.msra.mxu0 %v13985_v63  ;;  %v14024_v62 = vld [vmem:[%s19535_s0 + $0xcdc] ss:$108 sps:$4 sm:$0xff]  }
  0x5c   :  { %9035 = vmatprep.subr.bf16.mxu0 %v15394_v0  ;;  %7300 = vmatpush1.bf16.msra.mxu1 %v14007_v1  ;;  %v14135_v63 = vld [vmem:[%s19534_s1 + $0xf8] sm:$0xff]   ;;  %v14026_v1 = vld [vmem:[%s19535_s0 + $0xca8] ss:$108 sps:$4 sm:$0xff]  }
  0x5d   :  { %7301 = vmatprep.subr.bf16.mxu1 %v15394_v0 }
  0x5f   :  { %9036 = vmatpush1.bf16.msra.mxu0 %v13993_v2  ;;  %v14027_v2 = vld [vmem:[%s19535_s0 + $0xcd8] ss:$108 sps:$4 sm:$0xff]  }
  0x60   :  { %9037 = vmatprep.subr.bf16.mxu0 %v15394_v0  ;;  %7302 = vmatpush1.bf16.msra.mxu1 %v14021_v4  ;;  %v14031_v4 = vld [vmem:[%s19535_s0 + $0xdb4] ss:$108 sps:$4 sm:$0xff]  }
  0x61   :  { %7063 = vmatmul.mubr.bf16.gmra.mrb[16].mxu1 %v13947_v3  ;;  %7303 = vmatprep.subr.bf16.mxu1 %v15394_v0  ;;  %v14029_v3 = vld [vmem:[%s19535_s0 + $0xd84] ss:$108 sps:$4 sm:$0xff]  }
  0x62   :  { %8797 = vmatmul.mubr.bf16.gmra.mrb[16].mxu0 %v13948_v5  ;;  %7070 = vmatprep.mubr.bf16.mxu1 %v13951_v6  ;;  %v14033_v5 = vld [vmem:[%s19535_s0 + $0xd80] ss:$108 sps:$4 sm:$0xff]   ;;  %v14034_v6 = vld [vmem:[%s19535_s0 + $0xdb0] ss:$108 sps:$4 sm:$0xff]  }
  0x63   :  { %8804 = vmatprep.mubr.bf16.mxu0 %v13953_v7  ;;  %9038 = vmatpush1.bf16.msra.mxu0 %v14006_v8  ;;  %v14037_v7 = vld [vmem:[%s19535_s0 + $0xe5c] ss:$108 sps:$4 sm:$0xff]   ;;  %v14039_v8 = vld [vmem:[%s19535_s0 + $0xe8c] ss:$108 sps:$4 sm:$0xff]  }
  0x64   :  { %9039 = vmatprep.subr.bf16.mxu0 %v15394_v0  ;;  %7304 = vmatpush1.bf16.msra.mxu1 %v14035_v9  ;;  %v14041_v9 = vld [vmem:[%s19535_s0 + $0xe58] ss:$108 sps:$4 sm:$0xff]  }
  0x65   :  { %7305 = vmatprep.subr.bf16.mxu1 %v15394_v0 }
  0x67   :  { %9040 = vmatpush1.bf16.msra.mxu0 %v14014_v10  ;;  %v14042_v10 = vld [vmem:[%s19535_s0 + $0xe88] ss:$108 sps:$4 sm:$0xff]  }
  0x68   :  { %9041 = vmatprep.subr.bf16.mxu0 %v15394_v0  ;;  %7306 = vmatpush1.bf16.msra.mxu1 %v14050_v16  ;;  %v14053_v16 = vld [vmem:[%s19535_s0 + $0x103c] ss:$108 sps:$4 sm:$0xff]  }
  0x69   :  { %7071 = vmatmul.mubr.bf16.gmra.mrb[20].mxu1 %v13955_v11  ;;  %7307 = vmatprep.subr.bf16.mxu1 %v15394_v0  ;;  %v14043_v11 = vld [vmem:[%s19535_s0 + $0xf34] ss:$108 sps:$4 sm:$0xff]  }
  0x6a   :  { %8805 = vmatmul.mubr.bf16.gmra.mrb[20].mxu0 %v13956_v12  ;;  %7078 = vmatprep.mubr.bf16.mxu1 %v13957_v13  ;;  %v14045_v12 = vld [vmem:[%s19535_s0 + $0xf64] ss:$108 sps:$4 sm:$0xff]  }
  0x6b   :  { %8812 = vmatprep.mubr.bf16.mxu0 %v13959_v14  ;;  %9042 = vmatpush1.bf16.msra.mxu0 %v14028_v15  ;;  %v14047_v13 = vld [vmem:[%s19535_s0 + $0xf30] ss:$108 sps:$4 sm:$0xff]   ;;  %v14048_v14 = vld [vmem:[%s19535_s0 + $0xf60] ss:$108 sps:$4 sm:$0xff]  }
  0x6c   :  { %9043 = vmatprep.subr.bf16.mxu0 %v15394_v0  ;;  %7308 = vmatpush1.bf16.msra.mxu1 %v14064_v23  ;;  %v14051_v15 = vld [vmem:[%s19535_s0 + $0x100c] ss:$108 sps:$4 sm:$0xff]   ;;  %v14065_v23 = vld [vmem:[%s19535_s0 + $0x11bc] ss:$108 sps:$4 sm:$0xff]  }
  0x6d   :  { %7309 = vmatprep.subr.bf16.mxu1 %v15394_v0 }
  0x6f   :  { %9044 = vmatpush1.bf16.msra.mxu0 %v14036_v17  ;;  %v14055_v17 = vld [vmem:[%s19535_s0 + $0x1008] ss:$108 sps:$4 sm:$0xff]  }
  0x70   :  { %9045 = vmatprep.subr.bf16.mxu0 %v15394_v0  ;;  %7310 = vmatpush1.bf16.msra.mxu1 %v14078_v30  ;;  %v14077_v30 = vld [vmem:[%s19535_s0 + $0x12c0] ss:$108 sps:$4 sm:$0xff]  }
  0x71   :  { %7079 = vmatmul.mubr.bf16.gmra.mrb[24].mxu1 %v13961_v18  ;;  %7311 = vmatprep.subr.bf16.mxu1 %v15394_v0  ;;  %v14056_v18 = vld [vmem:[%s19535_s0 + $0x1038] ss:$108 sps:$4 sm:$0xff]  }
  0x72   :  { %8813 = vmatmul.mubr.bf16.gmra.mrb[24].mxu0 %v13962_v19  ;;  %7086 = vmatprep.mubr.bf16.mxu1 %v13965_v20  ;;  %v14058_v19 = vld [vmem:[%s19535_s0 + $0x10e4] ss:$108 sps:$4 sm:$0xff]   ;;  %v14060_v20 = vld [vmem:[%s19535_s0 + $0x1114] ss:$108 sps:$4 sm:$0xff]  }
  0x73   :  { %8820 = vmatprep.mubr.bf16.mxu0 %v13967_v21  ;;  %9046 = vmatpush1.bf16.msra.mxu0 %v14049_v22  ;;  %v14062_v21 = vld [vmem:[%s19535_s0 + $0x10e0] ss:$108 sps:$4 sm:$0xff]   ;;  %v14063_v22 = vld [vmem:[%s19535_s0 + $0x1110] ss:$108 sps:$4 sm:$0xff]  }
  0x74   :  { %9047 = vmatprep.subr.bf16.mxu0 %v15394_v0  ;;  %7312 = vmatpush1.bf16.msra.mxu1 %v14093_v37  ;;  %v14091_v37 = vld [vmem:[%s19535_s0 + $0x1440] ss:$108 sps:$4 sm:$0xff]  }
  0x75   :  { %7313 = vmatprep.subr.bf16.mxu1 %v15394_v0 }
  0x77   :  { %9048 = vmatpush1.bf16.msra.mxu0 %v14057_v24  ;;  %v14067_v24 = vld [vmem:[%s19535_s0 + $0x11ec] ss:$108 sps:$4 sm:$0xff]  }
  0x78   :  { %9049 = vmatprep.subr.bf16.mxu0 %v15394_v0  ;;  %7314 = vmatpush1.bf16.msra.mxu1 %v14107_v45  ;;  %v14100_v45 = vld [vmem:[%s19535_s0 + $0x15f4] ss:$108 sps:$4 sm:$0xff]  }
  0x79   :  { %7087 = vmatmul.mubr.bf16.gmra.mrb[28].mxu1 %v13969_v25  ;;  %7315 = vmatprep.subr.bf16.mxu1 %v15394_v0  ;;  %v14069_v25 = vld [vmem:[%s19535_s0 + $0x11b8] ss:$108 sps:$4 sm:$0xff]  }
  0x7a   :  { %8821 = vmatmul.mubr.bf16.gmra.mrb[28].mxu0 %v13970_v26  ;;  %7094 = vmatprep.mubr.bf16.mxu1 %v13972_v27  ;;  %v14070_v26 = vld [vmem:[%s19535_s0 + $0x11e8] ss:$108 sps:$4 sm:$0xff]  }
  0x7b   :  { %8828 = vmatprep.mubr.bf16.mxu0 %v13974_v28  ;;  %9050 = vmatpush1.bf16.msra.mxu0 %v14071_v29  ;;  %v14072_v27 = vld [vmem:[%s19535_s0 + $0x1294] ss:$108 sps:$4 sm:$0xff]   ;;  %v14074_v28 = vld [vmem:[%s19535_s0 + $0x12c4] ss:$108 sps:$4 sm:$0xff]  }
  0x7c   :  { %9051 = vmatprep.subr.bf16.mxu0 %v15394_v0  ;;  %7316 = vmatpush1.bf16.msra.mxu1 %v14121_v54  ;;  %v14076_v29 = vld [vmem:[%s19535_s0 + $0x1290] ss:$108 sps:$4 sm:$0xff]   ;;  %v14112_v54 = vld [vmem:[%s19535_s0 + $0x16c8] ss:$108 sps:$4 sm:$0xff]  }
  0x7d   :  { %7317 = vmatprep.subr.bf16.mxu1 %v15394_v0 }
  0x7f   :  { %9052 = vmatpush1.bf16.msra.mxu0 %v14079_v31  ;;  %v14080_v31 = vld [vmem:[%s19535_s0 + $0x136c] ss:$108 sps:$4 sm:$0xff]  }
  0x80   :  { %9310 = vmatprep.subr.bf16.mxu0 %v15394_v0  ;;  %7318 = vmatpush1.bf16.msra.mxu1 %v14135_v63  ;;  %v14122_v63 = vld [vmem:[%s19535_s0 + $0x187c] ss:$108 sps:$4 sm:$0xff]  }
  0x81   :  { %7095 = vmatmul.mubr.bf16.gmra.mrb[32].mxu1 %v13976_v32  ;;  %7576 = vmatprep.subr.bf16.mxu1 %v15394_v0  ;;  %v14082_v32 = vld [vmem:[%s19535_s0 + $0x139c] ss:$108 sps:$4 sm:$0xff]  }
  0x82   :  { %8829 = vmatmul.mubr.bf16.gmra.mrb[32].mxu0 %v13977_v33  ;;  %7102 = vmatprep.mubr.bf16.mxu1 %v13979_v34  ;;  %v14084_v33 = vld [vmem:[%s19535_s0 + $0x1368] ss:$108 sps:$4 sm:$0xff]   ;;  %v14085_v34 = vld [vmem:[%s19535_s0 + $0x1398] ss:$108 sps:$4 sm:$0xff]  }
  0x83   :  { %8836 = vmatprep.mubr.bf16.mxu0 %v13981_v35  ;;  %v14086_v35 = vld [vmem:[%s19535_s0 + $0x1444] ss:$108 sps:$4 sm:$0xff]  }
  0x89   :  { %7103 = vmatmul.mubr.bf16.gmra.mrb[36].mxu1 %v13983_v36  ;;  %v14090_v36 = vld [vmem:[%s19535_s0 + $0x3c] ss:$108 sps:$4 sm:$0xff]  }
  0x8a   :  { %8837 = vmatmul.mubr.bf16.gmra.mrb[36].mxu0 %v13984_v38  ;;  %7110 = vmatprep.mubr.bf16.mxu1 %v13986_v39  ;;  %v14088_v38 = vld [vmem:[%s19535_s0 + $0x38] ss:$108 sps:$4 sm:$0xff]   ;;  %v14094_v39 = vld [vmem:[%s19535_s0 + $0x151c] ss:$108 sps:$4 sm:$0xff]  }
  0x8b   :  { %8844 = vmatprep.mubr.bf16.mxu0 %v13988_v40  ;;  %v14092_v40 = vld [vmem:[%s19534_s1 + $0x400] sm:$0xff]  }
  0x91   :  { %7111 = vmatmul.mubr.bf16.gmra.mrb[40].mxu1 %v13990_v41  ;;  %v14096_v41 = vld [vmem:[%s19535_s0 + $0x114] ss:$108 sps:$4 sm:$0xff]  }
  0x92   :  { %8845 = vmatmul.mubr.bf16.gmra.mrb[40].mxu0 %v13991_v42  ;;  %7118 = vmatprep.mubr.bf16.mxu1 %v13994_v43  ;;  %v14098_v42 = vld [vmem:[%s19535_s0 + $0x1518] ss:$108 sps:$4 sm:$0xff]   ;;  %v14106_v43 = vld [vmem:[%s19534_s1 + $0x408] sm:$0xff]  }
  0x93   :  { %8852 = vmatprep.mubr.bf16.mxu0 %v13996_v44  ;;  %v14099_v44 = vld [vmem:[%s19535_s0 + $0x110] ss:$108 sps:$4 sm:$0xff]  }
  0x99   :  { %7119 = vmatmul.mubr.bf16.gmra.mrb[44].mxu1 %v13998_v46  ;;  %v14102_v46 = vld [vmem:[%s19535_s0 + $0x1ec] ss:$108 sps:$4 sm:$0xff]  }
  0x9a   :  { %8853 = vmatmul.mubr.bf16.gmra.mrb[44].mxu0 %v13999_v47  ;;  %7126 = vmatprep.mubr.bf16.mxu1 %v14000_v48  ;;  %v14120_v47 = vld [vmem:[%s19534_s1 + $0x410] sm:$0xff]  }
  0x9b   :  { %8860 = vmatprep.mubr.bf16.mxu0 %v14002_v49  ;;  %v14104_v48 = vld [vmem:[%s19535_s0 + $0x15f0] ss:$108 sps:$4 sm:$0xff]  }
  0x9c   :  { %v14134_v49 = vld [vmem:[%s19534_s1 + $0x418] sm:$0xff]  }
  0xa1   :  { %7127 = vmatmul.mubr.bf16.gmra.mrb[48].mxu1 %v14004_v50  ;;  %v14105_v50 = vld [vmem:[%s19535_s0 + $0x1e8] ss:$108 sps:$4 sm:$0xff]  }
  0xa2   :  { %8861 = vmatmul.mubr.bf16.gmra.mrb[48].mxu0 %v14005_v51  ;;  %7134 = vmatprep.mubr.bf16.mxu1 %v14008_v52  ;;  %v14108_v51 = vld [vmem:[%s19535_s0 + $0x16cc] ss:$108 sps:$4 sm:$0xff]   ;;  %v14110_v52 = vld [vmem:[%s19535_s0 + $0x2c4] ss:$108 sps:$4 sm:$0xff]  }
  0xa3   :  { %8868 = vmatprep.mubr.bf16.mxu0 %v14010_v53  ;;  %v14148_v53 = vld [vmem:[%s19534_s1 + $0x420] sm:$0xff]  }
  0xa9   :  { %7135 = vmatmul.mubr.bf16.gmra.mrb[52].mxu1 %v14012_v55  ;;  %v14162_v55 = vld [vmem:[%s19534_s1 + $0x428] sm:$0xff]  }
  0xaa   :  { %8869 = vmatmul.mubr.bf16.gmra.mrb[52].mxu0 %v14013_v56  ;;  %7142 = vmatprep.mubr.bf16.mxu1 %v14015_v57  ;;  %v14113_v56 = vld [vmem:[%s19535_s0 + $0x2c0] ss:$108 sps:$4 sm:$0xff]   ;;  %v14114_v57 = vld [vmem:[%s19535_s0 + $0x17a4] ss:$108 sps:$4 sm:$0xff]  }
  0xab   :  { %8876 = vmatprep.mubr.bf16.mxu0 %v14017_v58  ;;  %v14116_v58 = vld [vmem:[%s19535_s0 + $0x39c] ss:$108 sps:$4 sm:$0xff]  }
  0xb1   :  { %7143 = vmatmul.mubr.bf16.gmra.mrb[56].mxu1 %v14019_v59  ;;  %v14176_v59 = vld [vmem:[%s19534_s1 + $0x430] sm:$0xff]  }
  0xb2   :  { %8877 = vmatmul.mubr.bf16.gmra.mrb[56].mxu0 %v14020_v60  ;;  %7150 = vmatprep.mubr.bf16.mxu1 %v14022_v61  ;;  %v14118_v60 = vld [vmem:[%s19535_s0 + $0x17a0] ss:$108 sps:$4 sm:$0xff]   ;;  %v14190_v61 = vld [vmem:[%s19534_s1 + $0x438] sm:$0xff]  }
  0xb3   :  { %8884 = vmatprep.mubr.bf16.mxu0 %v14024_v62  ;;  %v14119_v62 = vld [vmem:[%s19535_s0 + $0x398] ss:$108 sps:$4 sm:$0xff]  }
  0xb9   :  { %7151 = vmatmul.mubr.bf16.gmra.mrb[60].mxu1 %v14026_v1  ;;  %v14124_v1 = vld [vmem:[%s19535_s0 + $0x474] ss:$108 sps:$4 sm:$0xff]  }
  0xba   :  { %8885 = vmatmul.mubr.bf16.gmra.mrb[60].mxu0 %v14027_v2  ;;  %7158 = vmatprep.mubr.bf16.mxu1 %v14029_v3  ;;  %v14204_v2 = vld [vmem:[%s19534_s1 + $0x440] sm:$0xff]  }
  0xbb   :  { %8892 = vmatprep.mubr.bf16.mxu0 %v14031_v4  ;;  %v14126_v3 = vld [vmem:[%s19535_s0 + $0x1878] ss:$108 sps:$4 sm:$0xff]   ;;  %v14218_v4 = vld [vmem:[%s19534_s1 + $0x448] sm:$0xff]  }
  0xc1   :  { %7159 = vmatmul.mubr.bf16.gmra.mrb[64].mxu1 %v14033_v5  ;;  %v14127_v5 = vld [vmem:[%s19535_s0 + $0x470] ss:$108 sps:$4 sm:$0xff]  }
  0xc2   :  { %8893 = vmatmul.mubr.bf16.gmra.mrb[64].mxu0 %v14034_v6  ;;  %7166 = vmatprep.mubr.bf16.mxu1 %v14037_v7  ;;  %v14128_v6 = vld [vmem:[%s19535_s0 + $0x1954] ss:$108 sps:$4 sm:$0xff]   ;;  %v14130_v7 = vld [vmem:[%s19535_s0 + $0x54c] ss:$108 sps:$4 sm:$0xff]  }
  0xc3   :  { %8900 = vmatprep.mubr.bf16.mxu0 %v14039_v8  ;;  %v14232_v8 = vld [vmem:[%s19534_s1 + $0x450] sm:$0xff]  }
  0xc9   :  { %7167 = vmatmul.mubr.bf16.gmra.mrb[68].mxu1 %v14041_v9  ;;  %v14132_v9 = vld [vmem:[%s19535_s0 + $0x1950] ss:$108 sps:$4 sm:$0xff]  }
  0xca   :  { %8901 = vmatmul.mubr.bf16.gmra.mrb[68].mxu0 %v14042_v10  ;;  %7174 = vmatprep.mubr.bf16.mxu1 %v14043_v11  ;;  %v14133_v10 = vld [vmem:[%s19535_s0 + $0x548] ss:$108 sps:$4 sm:$0xff]   ;;  %v14136_v11 = vld [vmem:[%s19535_s0 + $0x1a2c] ss:$108 sps:$4 sm:$0xff]  }
  0xcb   :  { %8908 = vmatprep.mubr.bf16.mxu0 %v14045_v12  ;;  %v14138_v12 = vld [vmem:[%s19535_s0 + $0x624] ss:$108 sps:$4 sm:$0xff]  }
  0xd1   :  { %7175 = vmatmul.mubr.bf16.gmra.mrb[72].mxu1 %v14047_v13  ;;  %v14246_v13 = vld [vmem:[%s19534_s1 + $0x458] sm:$0xff]  }
  0xd2   :  { %8909 = vmatmul.mubr.bf16.gmra.mrb[72].mxu0 %v14048_v14  ;;  %7182 = vmatprep.mubr.bf16.mxu1 %v14051_v15  ;;  %v14140_v14 = vld [vmem:[%s19535_s0 + $0x1a28] ss:$108 sps:$4 sm:$0xff]   ;;  %v14141_v15 = vld [vmem:[%s19535_s0 + $0x620] ss:$108 sps:$4 sm:$0xff]  }
  0xd3   :  { %8916 = vmatprep.mubr.bf16.mxu0 %v14053_v16  ;;  %v14144_v16 = vld [vmem:[%s19535_s0 + $0xc] ss:$108 sps:$4 sm:$0xff]  }
  0xd9   :  { %7183 = vmatmul.mubr.bf16.gmra.mrb[76].mxu1 %v14055_v17  ;;  %v14145_v17 = vld [vmem:[%s19535_s0 + $0x6fc] ss:$108 sps:$4 sm:$0xff]  }
  0xda   :  { %8917 = vmatmul.mubr.bf16.gmra.mrb[76].mxu0 %v14056_v18  ;;  %7190 = vmatprep.mubr.bf16.mxu1 %v14058_v19  ;;  %v14142_v18 = vld [vmem:[%s19535_s0 + $0x8] ss:$108 sps:$4 sm:$0xff]   ;;  %v14147_v19 = vld [vmem:[%s19535_s0 + $0x6f8] ss:$108 sps:$4 sm:$0xff]  }
  0xdb   :  { %8924 = vmatprep.mubr.bf16.mxu0 %v14060_v20  ;;  %v14149_v20 = vld [vmem:[%s19534_s1 + $0x100] sm:$0xff]  }
  0xe1   :  { %7191 = vmatmul.mubr.bf16.gmra.mrb[80].mxu1 %v14062_v21  ;;  %v14150_v21 = vld [vmem:[%s19535_s0 + $0xe4] ss:$108 sps:$4 sm:$0xff]  }
  0xe2   :  { %8925 = vmatmul.mubr.bf16.gmra.mrb[80].mxu0 %v14063_v22  ;;  %7198 = vmatprep.mubr.bf16.mxu1 %v14065_v23  ;;  %v14152_v22 = vld [vmem:[%s19535_s0 + $0x7d4] ss:$108 sps:$4 sm:$0xff]   ;;  %v14163_v23 = vld [vmem:[%s19534_s1 + $0x108] sm:$0xff]  }
  0xe3   :  { %8932 = vmatprep.mubr.bf16.mxu0 %v14067_v24  ;;  %v14260_v24 = vld [vmem:[%s19534_s1 + $0x460] sm:$0xff]  }
  0xe9   :  { %7199 = vmatmul.mubr.bf16.gmra.mrb[84].mxu1 %v14069_v25  ;;  %v14154_v25 = vld [vmem:[%s19535_s0 + $0xe0] ss:$108 sps:$4 sm:$0xff]  }
  0xea   :  { %8933 = vmatmul.mubr.bf16.gmra.mrb[84].mxu0 %v14070_v26  ;;  %7206 = vmatprep.mubr.bf16.mxu1 %v14072_v27  ;;  %v14155_v26 = vld [vmem:[%s19535_s0 + $0x7d0] ss:$108 sps:$4 sm:$0xff]  }
  0xeb   :  { %8940 = vmatprep.mubr.bf16.mxu0 %v14074_v28  ;;  %v14156_v27 = vld [vmem:[%s19535_s0 + $0x1bc] ss:$108 sps:$4 sm:$0xff]   ;;  %v14158_v28 = vld [vmem:[%s19535_s0 + $0x8ac] ss:$108 sps:$4 sm:$0xff]  }
  0xf1   :  { %7207 = vmatmul.mubr.bf16.gmra.mrb[88].mxu1 %v14076_v29  ;;  %v14177_v29 = vld [vmem:[%s19534_s1 + $0x110] sm:$0xff]  }
  0xf2   :  { %8941 = vmatmul.mubr.bf16.gmra.mrb[88].mxu0 %v14077_v30  ;;  %7214 = vmatprep.mubr.bf16.mxu1 %v14080_v31  ;;  %v14160_v30 = vld [vmem:[%s19535_s0 + $0x1b8] ss:$108 sps:$4 sm:$0xff]  }
  0xf3   :  { %8948 = vmatprep.mubr.bf16.mxu0 %v14082_v32  ;;  %v14191_v31 = vld [vmem:[%s19534_s1 + $0x118] sm:$0xff]   ;;  %v14161_v32 = vld [vmem:[%s19535_s0 + $0x8a8] ss:$108 sps:$4 sm:$0xff]  }
  0xf9   :  { %7215 = vmatmul.mubr.bf16.gmra.mrb[92].mxu1 %v14084_v33  ;;  %v14164_v33 = vld [vmem:[%s19535_s0 + $0x294] ss:$108 sps:$4 sm:$0xff]  }
  0xfa   :  { %8949 = vmatmul.mubr.bf16.gmra.mrb[92].mxu0 %v14085_v34  ;;  %7222 = vmatprep.mubr.bf16.mxu1 %v14086_v35  ;;  %v14166_v34 = vld [vmem:[%s19535_s0 + $0x984] ss:$108 sps:$4 sm:$0xff]  }
  0xfb   :  { %9053 = vmatprep.mubr.bf16.mxu0 %v14090_v36  ;;  %v14205_v35 = vld [vmem:[%s19534_s1 + $0x120] sm:$0xff]   ;;  %v14274_v36 = vld [vmem:[%s19534_s1 + $0x468] sm:$0xff]  }
 0x101   :  { %7223 = vmatmul.mubr.bf16.gmra.mrb[96].mxu1 %v14091_v37  ;;  %v14168_v37 = vld [vmem:[%s19535_s0 + $0x290] ss:$108 sps:$4 sm:$0xff]  }
 0x102   :  { %9054 = vmatmul.mubr.bf16.vlgmr.msra.gmra.mrb[0].mxu0 %v14088_v38  ;;  %7230 = vmatprep.mubr.bf16.mxu1 %v14094_v39  ;;  %v14219_v38 = vld [vmem:[%s19534_s1 + $0x128] sm:$0xff]  }
 0x103   :  { %9311 = vmatpush1.bf16.msra.mxu0 %v14092_v40  ;;  %9061 = vmatprep.mubr.bf16.mxu0 %v14096_v41  ;;  %v14169_v39 = vld [vmem:[%s19535_s0 + $0x980] ss:$108 sps:$4 sm:$0xff]   ;;  %v14172_v41 = vld [vmem:[%s19535_s0 + $0xa5c] ss:$108 sps:$4 sm:$0xff]  }
 0x104   :  { %9312 = vmatprep.subr.bf16.mxu0 %v15394_v0  ;;  %v14170_v40 = vld [vmem:[%s19535_s0 + $0x36c] ss:$108 sps:$4 sm:$0xff]  }
 0x107   :  { %9313 = vmatpush1.bf16.msra.mxu0 %v14106_v43  ;;  %v14174_v43 = vld [vmem:[%s19535_s0 + $0x368] ss:$108 sps:$4 sm:$0xff]  }
 0x108   :  { %9314 = vmatprep.subr.bf16.mxu0 %v15394_v0 }
 0x109   :  { %7231 = vmatmul.mubr.bf16.gmra.mrb[100].mxu1 %v14098_v42  ;;  %v14233_v42 = vld [vmem:[%s19534_s1 + $0x130] sm:$0xff]  }
 0x10a   :  { %9062 = vmatmul.mubr.bf16.gmra.mrb[4].mxu0 %v14099_v44  ;;  %7238 = vmatprep.mubr.bf16.mxu1 %v14100_v45  ;;  %v14247_v44 = vld [vmem:[%s19534_s1 + $0x138] sm:$0xff]  }
 0x10b   :  { %9069 = vmatprep.mubr.bf16.mxu0 %v14102_v46  ;;  %9315 = vmatpush1.bf16.msra.mxu0 %v14120_v47  ;;  %v14175_v45 = vld [vmem:[%s19535_s0 + $0xa58] ss:$108 sps:$4 sm:$0xff]   ;;  %v14180_v47 = vld [vmem:[%s19535_s0 + $0xb34] ss:$108 sps:$4 sm:$0xff]  }
 0x10c   :  { %9316 = vmatprep.subr.bf16.mxu0 %v15394_v0  ;;  %v14178_v46 = vld [vmem:[%s19535_s0 + $0x444] ss:$108 sps:$4 sm:$0xff]  }
 0x10f   :  { %9317 = vmatpush1.bf16.msra.mxu0 %v14134_v49  ;;  %v14288_v49 = vld [vmem:[%s19534_s1 + $0x470] sm:$0xff]  }
 0x110   :  { %9318 = vmatprep.subr.bf16.mxu0 %v15394_v0 }
 0x111   :  { %7239 = vmatmul.mubr.bf16.gmra.mrb[104].mxu1 %v14104_v48  ;;  %v14261_v48 = vld [vmem:[%s19534_s1 + $0x140] sm:$0xff]  }
 0x112   :  { %9070 = vmatmul.mubr.bf16.gmra.mrb[8].mxu0 %v14105_v50  ;;  %7246 = vmatprep.mubr.bf16.mxu1 %v14108_v51  ;;  %v14182_v50 = vld [vmem:[%s19535_s0 + $0x440] ss:$108 sps:$4 sm:$0xff]  }
 0x113   :  { %9077 = vmatprep.mubr.bf16.mxu0 %v14110_v52  ;;  %9319 = vmatpush1.bf16.msra.mxu0 %v14148_v53  ;;  %v14275_v51 = vld [vmem:[%s19534_s1 + $0x148] sm:$0xff]   ;;  %v14183_v52 = vld [vmem:[%s19535_s0 + $0xb30] ss:$108 sps:$4 sm:$0xff]  }
 0x114   :  { %9320 = vmatprep.subr.bf16.mxu0 %v15394_v0  ;;  %v14184_v53 = vld [vmem:[%s19535_s0 + $0x51c] ss:$108 sps:$4 sm:$0xff]  }
 0x117   :  { %9321 = vmatpush1.bf16.msra.mxu0 %v14162_v55  ;;  %v14289_v55 = vld [vmem:[%s19534_s1 + $0x150] sm:$0xff]  }
 0x118   :  { %9322 = vmatprep.subr.bf16.mxu0 %v15394_v0 }
 0x119   :  { %7247 = vmatmul.mubr.bf16.gmra.mrb[108].mxu1 %v14112_v54  ;;  %v14186_v54 = vld [vmem:[%s19535_s0 + $0xc0c] ss:$108 sps:$4 sm:$0xff]  }
 0x11a   :  { %9078 = vmatmul.mubr.bf16.gmra.mrb[12].mxu0 %v14113_v56  ;;  %7254 = vmatprep.mubr.bf16.mxu1 %v14114_v57  ;;  %v14188_v56 = vld [vmem:[%s19535_s0 + $0x518] ss:$108 sps:$4 sm:$0xff]   ;;  %v14189_v57 = vld [vmem:[%s19535_s0 + $0xc08] ss:$108 sps:$4 sm:$0xff]  }
 0x11b   :  { %9085 = vmatprep.mubr.bf16.mxu0 %v14116_v58  ;;  %9323 = vmatpush1.bf16.msra.mxu0 %v14176_v59  ;;  %v14192_v58 = vld [vmem:[%s19535_s0 + $0x5f4] ss:$108 sps:$4 sm:$0xff]   ;;  %v14194_v59 = vld [vmem:[%s19535_s0 + $0xce4] ss:$108 sps:$4 sm:$0xff]  }
 0x11c   :  { %9324 = vmatprep.subr.bf16.mxu0 %v15394_v0 }
 0x11f   :  { %9325 = vmatpush1.bf16.msra.mxu0 %v14190_v61  ;;  %v14303_v61 = vld [vmem:[%s19534_s1 + $0x158] sm:$0xff]  }
 0x120   :  { %9326 = vmatprep.subr.bf16.mxu0 %v15394_v0 }
 0x121   :  { %7255 = vmatmul.mubr.bf16.gmra.mrb[112].mxu1 %v14118_v60  ;;  %v14302_v60 = vld [vmem:[%s19534_s1 + $0x478] sm:$0xff]  }
 0x122   :  { %9086 = vmatmul.mubr.bf16.gmra.mrb[16].mxu0 %v14119_v62  ;;  %7262 = vmatprep.mubr.bf16.mxu1 %v14122_v63  ;;  %v14196_v62 = vld [vmem:[%s19535_s0 + $0x5f0] ss:$108 sps:$4 sm:$0xff]   ;;  %v14197_v63 = vld [vmem:[%s19535_s0 + $0xce0] ss:$108 sps:$4 sm:$0xff]  }
 0x123   :  { %9093 = vmatprep.mubr.bf16.mxu0 %v14124_v1  ;;  %9327 = vmatpush1.bf16.msra.mxu0 %v14204_v2  ;;  %v14198_v1 = vld [vmem:[%s19535_s0 + $0x6cc] ss:$108 sps:$4 sm:$0xff]   ;;  %v14200_v2 = vld [vmem:[%s19535_s0 + $0xdbc] ss:$108 sps:$4 sm:$0xff]  }
 0x124   :  { %9328 = vmatprep.subr.bf16.mxu0 %v15394_v0 }
 0x127   :  { %9329 = vmatpush1.bf16.msra.mxu0 %v14218_v4  ;;  %v14203_v4 = vld [vmem:[%s19535_s0 + $0xdb8] ss:$108 sps:$4 sm:$0xff]  }
 0x128   :  { %9330 = vmatprep.subr.bf16.mxu0 %v15394_v0 }
 0x129   :  { %7263 = vmatmul.mubr.bf16.gmra.mrb[116].mxu1 %v14126_v3  ;;  %v14202_v3 = vld [vmem:[%s19535_s0 + $0x6c8] ss:$108 sps:$4 sm:$0xff]  }
 0x12a   :  { %9094 = vmatmul.mubr.bf16.gmra.mrb[20].mxu0 %v14127_v5  ;;  %7270 = vmatprep.mubr.bf16.mxu1 %v14128_v6  ;;  %v14206_v5 = vld [vmem:[%s19535_s0 + $0x7a4] ss:$108 sps:$4 sm:$0xff]   ;;  %v14208_v6 = vld [vmem:[%s19535_s0 + $0xe94] ss:$108 sps:$4 sm:$0xff]  }
 0x12b   :  { %9101 = vmatprep.mubr.bf16.mxu0 %v14130_v7  ;;  %9331 = vmatpush1.bf16.msra.mxu0 %v14232_v8  ;;  %v14210_v7 = vld [vmem:[%s19535_s0 + $0x7a0] ss:$108 sps:$4 sm:$0xff]  }
 0x12c   :  { %9332 = vmatprep.subr.bf16.mxu0 %v15394_v0  ;;  %v14317_v8 = vld [vmem:[%s19534_s1 + $0x160] sm:$0xff]  }
 0x12f   :  { %9333 = vmatpush1.bf16.msra.mxu0 %v14246_v13  ;;  %v14217_v13 = vld [vmem:[%s19535_s0 + $0xf68] ss:$108 sps:$4 sm:$0xff]  }
 0x130   :  { %9334 = vmatprep.subr.bf16.mxu0 %v15394_v0 }
 0x131   :  { %7271 = vmatmul.mubr.bf16.gmra.mrb[120].mxu1 %v14132_v9  ;;  %v14211_v9 = vld [vmem:[%s19535_s0 + $0xe90] ss:$108 sps:$4 sm:$0xff]  }
 0x132   :  { %9102 = vmatmul.mubr.bf16.gmra.mrb[24].mxu0 %v14133_v10  ;;  %7278 = vmatprep.mubr.bf16.mxu1 %v14136_v11  ;;  %v14212_v10 = vld [vmem:[%s19535_s0 + $0x87c] ss:$108 sps:$4 sm:$0xff]   ;;  %v14214_v11 = vld [vmem:[%s19535_s0 + $0xf6c] ss:$108 sps:$4 sm:$0xff]  }
 0x133   :  { %9109 = vmatprep.mubr.bf16.mxu0 %v14138_v12  ;;  %9335 = vmatpush1.bf16.msra.mxu0 %v14260_v24  ;;  %v14216_v12 = vld [vmem:[%s19535_s0 + $0x878] ss:$108 sps:$4 sm:$0xff]   ;;  %v14236_v24 = vld [vmem:[%s19535_s0 + $0x11f4] ss:$108 sps:$4 sm:$0xff]  }
 0x134   :  { %9336 = vmatprep.subr.bf16.mxu0 %v15394_v0 }
 0x137   :  { %9337 = vmatpush1.bf16.msra.mxu0 %v14274_v36  ;;  %v14253_v36 = vld [vmem:[%s19535_s0 + $0x13a0] ss:$108 sps:$4 sm:$0xff]  }
 0x138   :  { %9338 = vmatprep.subr.bf16.mxu0 %v15394_v0 }
 0x139   :  { %7279 = vmatmul.mubr.bf16.gmra.mrb[124].mxu1 %v14140_v14  ;;  %v14220_v14 = vld [vmem:[%s19535_s0 + $0x954] ss:$108 sps:$4 sm:$0xff]  }
 0x13a   :  { %9110 = vmatmul.mubr.bf16.gmra.mrb[28].mxu0 %v14141_v15  ;;  %7319 = vmatprep.mubr.bf16.mxu1 %v14144_v16  ;;  %v14222_v15 = vld [vmem:[%s19535_s0 + $0x1044] ss:$108 sps:$4 sm:$0xff]   ;;  %v14331_v16 = vld [vmem:[%s19534_s1 + $0x168] sm:$0xff]  }
 0x13b   :  { %9117 = vmatprep.mubr.bf16.mxu0 %v14145_v17  ;;  %9339 = vmatpush1.bf16.msra.mxu0 %v14288_v49  ;;  %v14224_v17 = vld [vmem:[%s19535_s0 + $0x950] ss:$108 sps:$4 sm:$0xff]   ;;  %v14276_v49 = vld [vmem:[%s19535_s0 + $0x1014] ss:$108 sps:$4 sm:$0xff]  }
 0x13c   :  { %9340 = vmatprep.subr.bf16.mxu0 %v15394_v0 }
 0x13f   :  { %9341 = vmatpush1.bf16.msra.mxu0 %v14302_v60  ;;  %v14295_v60 = vld [vmem:[%s19535_s0 + $0x18b0] ss:$108 sps:$4 sm:$0xff]  }
 0x140   :  { %9599 = vmatprep.subr.bf16.mxu0 %v15394_v0 }
 0x141   :  { %7320 = vmatmul.mubr.bf16.vlgmr.msra.gmra.mrb[0].mxu1 %v14142_v18  ;;  %v14225_v18 = vld [vmem:[%s19535_s0 + $0x1040] ss:$108 sps:$4 sm:$0xff]  }
 0x142   :  { %9118 = vmatmul.mubr.bf16.gmra.mrb[32].mxu0 %v14147_v19  ;;  %7577 = vmatpush1.bf16.msra.mxu1 %v14149_v20  ;;  %v14226_v19 = vld [vmem:[%s19535_s0 + $0xa2c] ss:$108 sps:$4 sm:$0xff]   ;;  %v14228_v20 = vld [vmem:[%s19535_s0 + $0x111c] ss:$108 sps:$4 sm:$0xff]  }
 0x143   :  { %7327 = vmatprep.mubr.bf16.mxu1 %v14150_v21  ;;  %9125 = vmatprep.mubr.bf16.mxu0 %v14152_v22  ;;  %v14230_v21 = vld [vmem:[%s19535_s0 + $0xa28] ss:$108 sps:$4 sm:$0xff]   ;;  %v14231_v22 = vld [vmem:[%s19535_s0 + $0x1118] ss:$108 sps:$4 sm:$0xff]  }
 0x144   :  { %7578 = vmatprep.subr.bf16.mxu1 %v15394_v0 }
 0x146   :  { %7579 = vmatpush1.bf16.msra.mxu1 %v14163_v23  ;;  %v14234_v23 = vld [vmem:[%s19535_s0 + $0xb04] ss:$108 sps:$4 sm:$0xff]  }
 0x147   :  { %7580 = vmatprep.subr.bf16.mxu1 %v15394_v0 }
 0x149   :  { %7328 = vmatmul.mubr.bf16.gmra.mrb[4].mxu1 %v14154_v25  ;;  %v14345_v25 = vld [vmem:[%s19534_s1 + $0x170] sm:$0xff]  }
 0x14a   :  { %9126 = vmatmul.mubr.bf16.gmra.mrb[36].mxu0 %v14155_v26  ;;  %7335 = vmatprep.mubr.bf16.mxu1 %v14156_v27  ;;  %v14238_v26 = vld [vmem:[%s19535_s0 + $0xb00] ss:$108 sps:$4 sm:$0xff]   ;;  %v14239_v27 = vld [vmem:[%s19535_s0 + $0x11f0] ss:$108 sps:$4 sm:$0xff]  }
 0x14b   :  { %9133 = vmatprep.mubr.bf16.mxu0 %v14158_v28  ;;  %7581 = vmatpush1.bf16.msra.mxu1 %v14177_v29  ;;  %v14240_v28 = vld [vmem:[%s19535_s0 + $0xbdc] ss:$108 sps:$4 sm:$0xff]   ;;  %v14242_v29 = vld [vmem:[%s19535_s0 + $0x12cc] ss:$108 sps:$4 sm:$0xff]  }
 0x14c   :  { %7582 = vmatprep.subr.bf16.mxu1 %v15394_v0 }
 0x14f   :  { %7583 = vmatpush1.bf16.msra.mxu1 %v14191_v31  ;;  %v14245_v31 = vld [vmem:[%s19535_s0 + $0x12c8] ss:$108 sps:$4 sm:$0xff]  }
 0x150   :  { %7584 = vmatprep.subr.bf16.mxu1 %v15394_v0 }
 0x151   :  { %7336 = vmatmul.mubr.bf16.gmra.mrb[8].mxu1 %v14160_v30  ;;  %v14244_v30 = vld [vmem:[%s19535_s0 + $0xbd8] ss:$108 sps:$4 sm:$0xff]  }
 0x152   :  { %9134 = vmatmul.mubr.bf16.gmra.mrb[40].mxu0 %v14161_v32  ;;  %7343 = vmatprep.mubr.bf16.mxu1 %v14164_v33  ;;  %v14248_v32 = vld [vmem:[%s19535_s0 + $0xcb4] ss:$108 sps:$4 sm:$0xff]   ;;  %v14250_v33 = vld [vmem:[%s19535_s0 + $0x13a4] ss:$108 sps:$4 sm:$0xff]  }
 0x153   :  { %9141 = vmatprep.mubr.bf16.mxu0 %v14166_v34  ;;  %7585 = vmatpush1.bf16.msra.mxu1 %v14205_v35  ;;  %v14359_v34 = vld [vmem:[%s19534_s1 + $0x178] sm:$0xff]  }
 0x154   :  { %7586 = vmatprep.subr.bf16.mxu1 %v15394_v0  ;;  %v14252_v35 = vld [vmem:[%s19535_s0 + $0xcb0] ss:$108 sps:$4 sm:$0xff]  }
 0x157   :  { %7587 = vmatpush1.bf16.msra.mxu1 %v14219_v38  ;;  %v14256_v38 = vld [vmem:[%s19535_s0 + $0x147c] ss:$108 sps:$4 sm:$0xff]  }
 0x158   :  { %7588 = vmatprep.subr.bf16.mxu1 %v15394_v0 }
 0x159   :  { %7344 = vmatmul.mubr.bf16.gmra.mrb[12].mxu1 %v14168_v37  ;;  %v14254_v37 = vld [vmem:[%s19535_s0 + $0xd8c] ss:$108 sps:$4 sm:$0xff]  }
 0x15a   :  { %9142 = vmatmul.mubr.bf16.gmra.mrb[44].mxu0 %v14169_v39  ;;  %7351 = vmatprep.mubr.bf16.mxu1 %v14170_v40  ;;  %v14258_v39 = vld [vmem:[%s19535_s0 + $0xd88] ss:$108 sps:$4 sm:$0xff]   ;;  %v14259_v40 = vld [vmem:[%s19535_s0 + $0x1478] ss:$108 sps:$4 sm:$0xff]  }
 0x15b   :  { %9149 = vmatprep.mubr.bf16.mxu0 %v14172_v41  ;;  %7589 = vmatpush1.bf16.msra.mxu1 %v14233_v42  ;;  %v14262_v41 = vld [vmem:[%s19535_s0 + $0xe64] ss:$108 sps:$4 sm:$0xff]   ;;  %v14264_v42 = vld [vmem:[%s19535_s0 + $0x1554] ss:$108 sps:$4 sm:$0xff]  }
 0x15c   :  { %7590 = vmatprep.subr.bf16.mxu1 %v15394_v0 }
 0x15f   :  { %7591 = vmatpush1.bf16.msra.mxu1 %v14247_v44  ;;  %v14267_v44 = vld [vmem:[%s19535_s0 + $0x1550] ss:$108 sps:$4 sm:$0xff]  }
 0x160   :  { %7592 = vmatprep.subr.bf16.mxu1 %v15394_v0 }
 0x161   :  { %7352 = vmatmul.mubr.bf16.gmra.mrb[16].mxu1 %v14174_v43  ;;  %v14266_v43 = vld [vmem:[%s19535_s0 + $0xe60] ss:$108 sps:$4 sm:$0xff]  }
 0x162   :  { %9150 = vmatmul.mubr.bf16.gmra.mrb[48].mxu0 %v14175_v45  ;;  %7359 = vmatprep.mubr.bf16.mxu1 %v14178_v46  ;;  %v14268_v45 = vld [vmem:[%s19535_s0 + $0xf3c] ss:$108 sps:$4 sm:$0xff]   ;;  %v14270_v46 = vld [vmem:[%s19535_s0 + $0x162c] ss:$108 sps:$4 sm:$0xff]  }
 0x163   :  { %9157 = vmatprep.mubr.bf16.mxu0 %v14180_v47  ;;  %7593 = vmatpush1.bf16.msra.mxu1 %v14261_v48  ;;  %v14272_v47 = vld [vmem:[%s19535_s0 + $0xf38] ss:$108 sps:$4 sm:$0xff]   ;;  %v14273_v48 = vld [vmem:[%s19535_s0 + $0x1628] ss:$108 sps:$4 sm:$0xff]  }
 0x164   :  { %7594 = vmatprep.subr.bf16.mxu1 %v15394_v0 }
 0x167   :  { %7595 = vmatpush1.bf16.msra.mxu1 %v14275_v51  ;;  %v14280_v51 = vld [vmem:[%s19535_s0 + $0x1010] ss:$108 sps:$4 sm:$0xff]  }
 0x168   :  { %7596 = vmatprep.subr.bf16.mxu1 %v15394_v0 }
 0x169   :  { %7360 = vmatmul.mubr.bf16.gmra.mrb[20].mxu1 %v14182_v50  ;;  %v14278_v50 = vld [vmem:[%s19535_s0 + $0x1704] ss:$108 sps:$4 sm:$0xff]  }
 0x16a   :  { %9158 = vmatmul.mubr.bf16.gmra.mrb[52].mxu0 %v14183_v52  ;;  %7367 = vmatprep.mubr.bf16.mxu1 %v14184_v53  ;;  %v14281_v52 = vld [vmem:[%s19535_s0 + $0x1700] ss:$108 sps:$4 sm:$0xff]  }
 0x16b   :  { %9165 = vmatprep.mubr.bf16.mxu0 %v14186_v54  ;;  %7597 = vmatpush1.bf16.msra.mxu1 %v14289_v55  ;;  %v14282_v53 = vld [vmem:[%s19535_s0 + $0x10ec] ss:$108 sps:$4 sm:$0xff]   ;;  %v14284_v54 = vld [vmem:[%s19535_s0 + $0x17dc] ss:$108 sps:$4 sm:$0xff]  }
 0x16c   :  { %7598 = vmatprep.subr.bf16.mxu1 %v15394_v0  ;;  %v14286_v55 = vld [vmem:[%s19535_s0 + $0x10e8] ss:$108 sps:$4 sm:$0xff]  }
 0x16f   :  { %7599 = vmatpush1.bf16.msra.mxu1 %v14303_v61  ;;  %v14296_v61 = vld [vmem:[%s19535_s0 + $0x129c] ss:$108 sps:$4 sm:$0xff]  }
 0x170   :  { %7600 = vmatprep.subr.bf16.mxu1 %v15394_v0 }
 0x171   :  { %7368 = vmatmul.mubr.bf16.gmra.mrb[24].mxu1 %v14188_v56  ;;  %v14287_v56 = vld [vmem:[%s19535_s0 + $0x17d8] ss:$108 sps:$4 sm:$0xff]  }
 0x172   :  { %9166 = vmatmul.mubr.bf16.gmra.mrb[56].mxu0 %v14189_v57  ;;  %7375 = vmatprep.mubr.bf16.mxu1 %v14192_v58  ;;  %v14290_v57 = vld [vmem:[%s19535_s0 + $0x11c4] ss:$108 sps:$4 sm:$0xff]   ;;  %v14292_v58 = vld [vmem:[%s19535_s0 + $0x18b4] ss:$108 sps:$4 sm:$0xff]  }
 0x173   :  { %9173 = vmatprep.mubr.bf16.mxu0 %v14194_v59  ;;  %7601 = vmatpush1.bf16.msra.mxu1 %v14317_v8  ;;  %v14294_v59 = vld [vmem:[%s19535_s0 + $0x11c0] ss:$108 sps:$4 sm:$0xff]   ;;  %v14315_v8 = vld [vmem:[%s19535_s0 + $0x1448] ss:$108 sps:$4 sm:$0xff]  }
 0x174   :  { %7602 = vmatprep.subr.bf16.mxu1 %v15394_v0 }
 0x177   :  { %7603 = vmatpush1.bf16.msra.mxu1 %v14331_v16  ;;  %v14324_v16 = vld [vmem:[%s19535_s0 + $0x15fc] ss:$108 sps:$4 sm:$0xff]  }
 0x178   :  { %7604 = vmatprep.subr.bf16.mxu1 %v15394_v0 }
 0x179   :  { %7376 = vmatmul.mubr.bf16.gmra.mrb[28].mxu1 %v14196_v62  ;;  %v14298_v62 = vld [vmem:[%s19535_s0 + $0x198c] ss:$108 sps:$4 sm:$0xff]  }
 0x17a   :  { %9174 = vmatmul.mubr.bf16.gmra.mrb[60].mxu0 %v14197_v63  ;;  %7383 = vmatprep.mubr.bf16.mxu1 %v14198_v1  ;;  %v14300_v63 = vld [vmem:[%s19535_s0 + $0x1298] ss:$108 sps:$4 sm:$0xff]   ;;  %v14301_v1 = vld [vmem:[%s19535_s0 + $0x1988] ss:$108 sps:$4 sm:$0xff]  }
 0x17b   :  { %9181 = vmatprep.mubr.bf16.mxu0 %v14200_v2  ;;  %7605 = vmatpush1.bf16.msra.mxu1 %v14345_v25  ;;  %v14304_v2 = vld [vmem:[%s19535_s0 + $0x1374] ss:$108 sps:$4 sm:$0xff]   ;;  %v14336_v25 = vld [vmem:[%s19535_s0 + $0x16d0] ss:$108 sps:$4 sm:$0xff]  }
 0x17c   :  { %7606 = vmatprep.subr.bf16.mxu1 %v15394_v0 }
 0x17f   :  { %7607 = vmatpush1.bf16.msra.mxu1 %v14359_v34  ;;  %v14346_v34 = vld [vmem:[%s19535_s0 + $0x1884] ss:$108 sps:$4 sm:$0xff]  }
 0x180   :  { %7865 = vmatprep.subr.bf16.mxu1 %v15394_v0 }
 0x181   :  { %7384 = vmatmul.mubr.bf16.gmra.mrb[32].mxu1 %v14202_v3  ;;  %v14306_v3 = vld [vmem:[%s19535_s0 + $0x1a64] ss:$108 sps:$4 sm:$0xff]  }
 0x182   :  { %9182 = vmatmul.mubr.bf16.gmra.mrb[64].mxu0 %v14203_v4  ;;  %7391 = vmatprep.mubr.bf16.mxu1 %v14206_v5  ;;  %v14308_v4 = vld [vmem:[%s19535_s0 + $0x1370] ss:$108 sps:$4 sm:$0xff]   ;;  %v14309_v5 = vld [vmem:[%s19535_s0 + $0x1a60] ss:$108 sps:$4 sm:$0xff]  }
 0x183   :  { %9189 = vmatprep.mubr.bf16.mxu0 %v14208_v6  ;;  %v14310_v6 = vld [vmem:[%s19535_s0 + $0x144c] ss:$108 sps:$4 sm:$0xff]  }
 0x189   :  { %7392 = vmatmul.mubr.bf16.gmra.mrb[36].mxu1 %v14210_v7  ;;  %v14314_v7 = vld [vmem:[%s19535_s0 + $0x44] ss:$108 sps:$4 sm:$0xff]  }
 0x18a   :  { %9190 = vmatmul.mubr.bf16.gmra.mrb[68].mxu0 %v14211_v9  ;;  %7399 = vmatprep.mubr.bf16.mxu1 %v14212_v10  ;;  %v14312_v9 = vld [vmem:[%s19535_s0 + $0x40] ss:$108 sps:$4 sm:$0xff]   ;;  %v14318_v10 = vld [vmem:[%s19535_s0 + $0x1524] ss:$108 sps:$4 sm:$0xff]  }
 0x18b   :  { %9197 = vmatprep.mubr.bf16.mxu0 %v14214_v11  ;;  %v14316_v11 = vld [vmem:[%s19534_s1 + $0x480] sm:$0xff]  }
 0x191   :  { %7400 = vmatmul.mubr.bf16.gmra.mrb[40].mxu1 %v14216_v12  ;;  %v14320_v12 = vld [vmem:[%s19535_s0 + $0x11c] ss:$108 sps:$4 sm:$0xff]  }
 0x192   :  { %9198 = vmatmul.mubr.bf16.gmra.mrb[72].mxu0 %v14217_v13  ;;  %7407 = vmatprep.mubr.bf16.mxu1 %v14220_v14  ;;  %v14322_v13 = vld [vmem:[%s19535_s0 + $0x1520] ss:$108 sps:$4 sm:$0xff]  }
 0x193   :  { %9205 = vmatprep.mubr.bf16.mxu0 %v14222_v15  ;;  %v14330_v14 = vld [vmem:[%s19534_s1 + $0x488] sm:$0xff]   ;;  %v14323_v15 = vld [vmem:[%s19535_s0 + $0x118] ss:$108 sps:$4 sm:$0xff]  }
 0x199   :  { %7408 = vmatmul.mubr.bf16.gmra.mrb[44].mxu1 %v14224_v17  ;;  %v14326_v17 = vld [vmem:[%s19535_s0 + $0x1f4] ss:$108 sps:$4 sm:$0xff]  }
 0x19a   :  { %9206 = vmatmul.mubr.bf16.gmra.mrb[76].mxu0 %v14225_v18  ;;  %7415 = vmatprep.mubr.bf16.mxu1 %v14226_v19  ;;  %v14344_v18 = vld [vmem:[%s19534_s1 + $0x490] sm:$0xff]   ;;  %v14328_v19 = vld [vmem:[%s19535_s0 + $0x15f8] ss:$108 sps:$4 sm:$0xff]  }
 0x19b   :  { %9213 = vmatprep.mubr.bf16.mxu0 %v14228_v20  ;;  %v14358_v20 = vld [vmem:[%s19534_s1 + $0x498] sm:$0xff]  }
 0x1a1   :  { %7416 = vmatmul.mubr.bf16.gmra.mrb[48].mxu1 %v14230_v21  ;;  %v14329_v21 = vld [vmem:[%s19535_s0 + $0x1f0] ss:$108 sps:$4 sm:$0xff]  }
 0x1a2   :  { %9214 = vmatmul.mubr.bf16.gmra.mrb[80].mxu0 %v14231_v22  ;;  %7423 = vmatprep.mubr.bf16.mxu1 %v14234_v23  ;;  %v14332_v22 = vld [vmem:[%s19535_s0 + $0x16d4] ss:$108 sps:$4 sm:$0xff]   ;;  %v14334_v23 = vld [vmem:[%s19535_s0 + $0x2cc] ss:$108 sps:$4 sm:$0xff]  }
 0x1a3   :  { %9221 = vmatprep.mubr.bf16.mxu0 %v14236_v24  ;;  %v14372_v24 = vld [vmem:[%s19534_s1 + $0x4a0] sm:$0xff]  }
 0x1a9   :  { %7424 = vmatmul.mubr.bf16.gmra.mrb[52].mxu1 %v14238_v26  ;;  %v14386_v26 = vld [vmem:[%s19534_s1 + $0x4a8] sm:$0xff]  }
 0x1aa   :  { %9222 = vmatmul.mubr.bf16.gmra.mrb[84].mxu0 %v14239_v27  ;;  %7431 = vmatprep.mubr.bf16.mxu1 %v14240_v28  ;;  %v14337_v27 = vld [vmem:[%s19535_s0 + $0x2c8] ss:$108 sps:$4 sm:$0xff]   ;;  %v14338_v28 = vld [vmem:[%s19535_s0 + $0x17ac] ss:$108 sps:$4 sm:$0xff]  }
 0x1ab   :  { %9229 = vmatprep.mubr.bf16.mxu0 %v14242_v29  ;;  %v14340_v29 = vld [vmem:[%s19535_s0 + $0x3a4] ss:$108 sps:$4 sm:$0xff]  }
 0x1b1   :  { %7432 = vmatmul.mubr.bf16.gmra.mrb[56].mxu1 %v14244_v30  ;;  %v14400_v30 = vld [vmem:[%s19534_s1 + $0x4b0] sm:$0xff]  }
 0x1b2   :  { %9230 = vmatmul.mubr.bf16.gmra.mrb[88].mxu0 %v14245_v31  ;;  %7439 = vmatprep.mubr.bf16.mxu1 %v14248_v32  ;;  %v14342_v31 = vld [vmem:[%s19535_s0 + $0x17a8] ss:$108 sps:$4 sm:$0xff]   ;;  %v14414_v32 = vld [vmem:[%s19534_s1 + $0x4b8] sm:$0xff]  }
 0x1b3   :  { %9237 = vmatprep.mubr.bf16.mxu0 %v14250_v33  ;;  %v14343_v33 = vld [vmem:[%s19535_s0 + $0x3a0] ss:$108 sps:$4 sm:$0xff]  }
 0x1b9   :  { %7440 = vmatmul.mubr.bf16.gmra.mrb[60].mxu1 %v14252_v35  ;;  %v14348_v35 = vld [vmem:[%s19535_s0 + $0x47c] ss:$108 sps:$4 sm:$0xff]  }
 0x1ba   :  { %9238 = vmatmul.mubr.bf16.gmra.mrb[92].mxu0 %v14253_v36  ;;  %7447 = vmatprep.mubr.bf16.mxu1 %v14254_v37  ;;  %v14428_v36 = vld [vmem:[%s19534_s1 + $0x4c0] sm:$0xff]  }
 0x1bb   :  { %9245 = vmatprep.mubr.bf16.mxu0 %v14256_v38  ;;  %v14350_v37 = vld [vmem:[%s19535_s0 + $0x1880] ss:$108 sps:$4 sm:$0xff]  }
 0x1bc   :  { %v14442_v38 = vld [vmem:[%s19534_s1 + $0x4c8] sm:$0xff]  }
 0x1c1   :  { %7448 = vmatmul.mubr.bf16.gmra.mrb[64].mxu1 %v14258_v39  ;;  %v14351_v39 = vld [vmem:[%s19535_s0 + $0x478] ss:$108 sps:$4 sm:$0xff]  }
 0x1c2   :  { %9246 = vmatmul.mubr.bf16.gmra.mrb[96].mxu0 %v14259_v40  ;;  %7455 = vmatprep.mubr.bf16.mxu1 %v14262_v41  ;;  %v14352_v40 = vld [vmem:[%s19535_s0 + $0x195c] ss:$108 sps:$4 sm:$0xff]   ;;  %v14354_v41 = vld [vmem:[%s19535_s0 + $0x554] ss:$108 sps:$4 sm:$0xff]  }
 0x1c3   :  { %9253 = vmatprep.mubr.bf16.mxu0 %v14264_v42  ;;  %v14456_v42 = vld [vmem:[%s19534_s1 + $0x4d0] sm:$0xff]  }
 0x1c9   :  { %7456 = vmatmul.mubr.bf16.gmra.mrb[68].mxu1 %v14266_v43  ;;  %v14356_v43 = vld [vmem:[%s19535_s0 + $0x1958] ss:$108 sps:$4 sm:$0xff]  }
 0x1ca   :  { %9254 = vmatmul.mubr.bf16.gmra.mrb[100].mxu0 %v14267_v44  ;;  %7463 = vmatprep.mubr.bf16.mxu1 %v14268_v45  ;;  %v14357_v44 = vld [vmem:[%s19535_s0 + $0x550] ss:$108 sps:$4 sm:$0xff]   ;;  %v14360_v45 = vld [vmem:[%s19535_s0 + $0x1a34] ss:$108 sps:$4 sm:$0xff]  }
 0x1cb   :  { %9261 = vmatprep.mubr.bf16.mxu0 %v14270_v46  ;;  %v14362_v46 = vld [vmem:[%s19535_s0 + $0x62c] ss:$108 sps:$4 sm:$0xff]  }
 0x1d1   :  { %7464 = vmatmul.mubr.bf16.gmra.mrb[72].mxu1 %v14272_v47  ;;  %v14470_v47 = vld [vmem:[%s19534_s1 + $0x4d8] sm:$0xff]  }
 0x1d2   :  { %9262 = vmatmul.mubr.bf16.gmra.mrb[104].mxu0 %v14273_v48  ;;  %7471 = vmatprep.mubr.bf16.mxu1 %v14276_v49  ;;  %v14364_v48 = vld [vmem:[%s19535_s0 + $0x1a30] ss:$108 sps:$4 sm:$0xff]   ;;  %v14365_v49 = vld [vmem:[%s19535_s0 + $0x628] ss:$108 sps:$4 sm:$0xff]  }
 0x1d3   :  { %9269 = vmatprep.mubr.bf16.mxu0 %v14278_v50  ;;  %v14368_v50 = vld [vmem:[%s19535_s0 + $0x14] ss:$108 sps:$4 sm:$0xff]  }
 0x1d9   :  { %7472 = vmatmul.mubr.bf16.gmra.mrb[76].mxu1 %v14280_v51  ;;  %v14369_v51 = vld [vmem:[%s19535_s0 + $0x704] ss:$108 sps:$4 sm:$0xff]  }
 0x1da   :  { %9270 = vmatmul.mubr.bf16.gmra.mrb[108].mxu0 %v14281_v52  ;;  %7479 = vmatprep.mubr.bf16.mxu1 %v14282_v53  ;;  %v14366_v52 = vld [vmem:[%s19535_s0 + $0x10] ss:$108 sps:$4 sm:$0xff]   ;;  %v14371_v53 = vld [vmem:[%s19535_s0 + $0x700] ss:$108 sps:$4 sm:$0xff]  }
 0x1db   :  { %9277 = vmatprep.mubr.bf16.mxu0 %v14284_v54  ;;  %v14373_v54 = vld [vmem:[%s19534_s1 + $0x180] sm:$0xff]  }
 0x1e1   :  { %7480 = vmatmul.mubr.bf16.gmra.mrb[80].mxu1 %v14286_v55  ;;  %v14374_v55 = vld [vmem:[%s19535_s0 + $0xec] ss:$108 sps:$4 sm:$0xff]  }
 0x1e2   :  { %9278 = vmatmul.mubr.bf16.gmra.mrb[112].mxu0 %v14287_v56  ;;  %7487 = vmatprep.mubr.bf16.mxu1 %v14290_v57  ;;  %v14376_v56 = vld [vmem:[%s19535_s0 + $0x7dc] ss:$108 sps:$4 sm:$0xff]  }
 0x1e3   :  { %9285 = vmatprep.mubr.bf16.mxu0 %v14292_v58  ;;  %v14387_v57 = vld [vmem:[%s19534_s1 + $0x188] sm:$0xff]   ;;  %v14484_v58 = vld [vmem:[%s19534_s1 + $0x4e0] sm:$0xff]  }
 0x1e9   :  { %7488 = vmatmul.mubr.bf16.gmra.mrb[84].mxu1 %v14294_v59  ;;  %v14378_v59 = vld [vmem:[%s19535_s0 + $0xe8] ss:$108 sps:$4 sm:$0xff]  }
 0x1ea   :  { %9286 = vmatmul.mubr.bf16.gmra.mrb[116].mxu0 %v14295_v60  ;;  %7495 = vmatprep.mubr.bf16.mxu1 %v14296_v61  ;;  %v14379_v60 = vld [vmem:[%s19535_s0 + $0x7d8] ss:$108 sps:$4 sm:$0xff]  }
 0x1eb   :  { %9293 = vmatprep.mubr.bf16.mxu0 %v14298_v62  ;;  %v14380_v61 = vld [vmem:[%s19535_s0 + $0x1c4] ss:$108 sps:$4 sm:$0xff]   ;;  %v14382_v62 = vld [vmem:[%s19535_s0 + $0x8b4] ss:$108 sps:$4 sm:$0xff]  }
 0x1f1   :  { %7496 = vmatmul.mubr.bf16.gmra.mrb[88].mxu1 %v14300_v63  ;;  %v14401_v63 = vld [vmem:[%s19534_s1 + $0x190] sm:$0xff]  }
 0x1f2   :  { %9294 = vmatmul.mubr.bf16.gmra.mrb[120].mxu0 %v14301_v1  ;;  %7503 = vmatprep.mubr.bf16.mxu1 %v14304_v2  ;;  %v14384_v1 = vld [vmem:[%s19535_s0 + $0x1c0] ss:$108 sps:$4 sm:$0xff]   ;;  %v14415_v2 = vld [vmem:[%s19534_s1 + $0x198] sm:$0xff]  }
 0x1f3   :  { %9301 = vmatprep.mubr.bf16.mxu0 %v14306_v3  ;;  %v14385_v3 = vld [vmem:[%s19535_s0 + $0x8b0] ss:$108 sps:$4 sm:$0xff]  }
 0x1f9   :  { %7504 = vmatmul.mubr.bf16.gmra.mrb[92].mxu1 %v14308_v4  ;;  %v14388_v4 = vld [vmem:[%s19535_s0 + $0x29c] ss:$108 sps:$4 sm:$0xff]  }
 0x1fa   :  { %9302 = vmatmul.mubr.bf16.gmra.mrb[124].mxu0 %v14309_v5  ;;  %7511 = vmatprep.mubr.bf16.mxu1 %v14310_v6  ;;  %v14390_v5 = vld [vmem:[%s19535_s0 + $0x98c] ss:$108 sps:$4 sm:$0xff]   ;;  %v14429_v6 = vld [vmem:[%s19534_s1 + $0x1a0] sm:$0xff]  }
 0x1fb   :  { %9342 = vmatprep.mubr.bf16.mxu0 %v14314_v7  ;;  %v14498_v7 = vld [vmem:[%s19534_s1 + $0x4e8] sm:$0xff]  }
 0x201   :  { %7512 = vmatmul.mubr.bf16.gmra.mrb[96].mxu1 %v14315_v8  ;;  %v14443_v8 = vld [vmem:[%s19534_s1 + $0x1a8] sm:$0xff]  }
 0x202   :  { %9343 = vmatmul.mubr.bf16.vlgmr.msra.gmra.mrb[0].mxu0 %v14312_v9  ;;  %7519 = vmatprep.mubr.bf16.mxu1 %v14318_v10  ;;  %v14392_v9 = vld [vmem:[%s19535_s0 + $0x298] ss:$108 sps:$4 sm:$0xff]   ;;  %v14393_v10 = vld [vmem:[%s19535_s0 + $0x988] ss:$108 sps:$4 sm:$0xff]  }
 0x203   :  { %9600 = vmatpush1.bf16.msra.mxu0 %v14316_v11  ;;  %9350 = vmatprep.mubr.bf16.mxu0 %v14320_v12  ;;  %v14394_v11 = vld [vmem:[%s19535_s0 + $0x374] ss:$108 sps:$4 sm:$0xff]   ;;  %v14396_v12 = vld [vmem:[%s19535_s0 + $0xa64] ss:$108 sps:$4 sm:$0xff]  }
 0x204   :  { %9601 = vmatprep.subr.bf16.mxu0 %v15394_v0 }
 0x207   :  { %9602 = vmatpush1.bf16.msra.mxu0 %v14330_v14  ;;  %v14471_v14 = vld [vmem:[%s19534_s1 + $0x1b8] sm:$0xff]  }
 0x208   :  { %9603 = vmatprep.subr.bf16.mxu0 %v15394_v0 }
 0x209   :  { %7520 = vmatmul.mubr.bf16.gmra.mrb[100].mxu1 %v14322_v13  ;;  %v14457_v13 = vld [vmem:[%s19534_s1 + $0x1b0] sm:$0xff]  }
 0x20a   :  { %9351 = vmatmul.mubr.bf16.gmra.mrb[4].mxu0 %v14323_v15  ;;  %7527 = vmatprep.mubr.bf16.mxu1 %v14324_v16  ;;  %v14398_v15 = vld [vmem:[%s19535_s0 + $0x370] ss:$108 sps:$4 sm:$0xff]   ;;  %v14399_v16 = vld [vmem:[%s19535_s0 + $0xa60] ss:$108 sps:$4 sm:$0xff]  }
 0x20b   :  { %9358 = vmatprep.mubr.bf16.mxu0 %v14326_v17  ;;  %9604 = vmatpush1.bf16.msra.mxu0 %v14344_v18  ;;  %v14402_v17 = vld [vmem:[%s19535_s0 + $0x44c] ss:$108 sps:$4 sm:$0xff]   ;;  %v14404_v18 = vld [vmem:[%s19535_s0 + $0xb3c] ss:$108 sps:$4 sm:$0xff]  }
 0x20c   :  { %9605 = vmatprep.subr.bf16.mxu0 %v15394_v0 }
 0x20f   :  { %9606 = vmatpush1.bf16.msra.mxu0 %v14358_v20  ;;  %v14512_v20 = vld [vmem:[%s19534_s1 + $0x4f0] sm:$0xff]  }
 0x210   :  { %9607 = vmatprep.subr.bf16.mxu0 %v15394_v0 }
 0x211   :  { %7528 = vmatmul.mubr.bf16.gmra.mrb[104].mxu1 %v14328_v19  ;;  %v14485_v19 = vld [vmem:[%s19534_s1 + $0x1c0] sm:$0xff]  }
 0x212   :  { %9359 = vmatmul.mubr.bf16.gmra.mrb[8].mxu0 %v14329_v21  ;;  %7535 = vmatprep.mubr.bf16.mxu1 %v14332_v22  ;;  %v14499_v21 = vld [vmem:[%s19534_s1 + $0x1c8] sm:$0xff]  }
 0x213   :  { %9366 = vmatprep.mubr.bf16.mxu0 %v14334_v23  ;;  %9608 = vmatpush1.bf16.msra.mxu0 %v14372_v24  ;;  %v14406_v22 = vld [vmem:[%s19535_s0 + $0x448] ss:$108 sps:$4 sm:$0xff]   ;;  %v14407_v23 = vld [vmem:[%s19535_s0 + $0xb38] ss:$108 sps:$4 sm:$0xff]  }
 0x214   :  { %9609 = vmatprep.subr.bf16.mxu0 %v15394_v0  ;;  %v14408_v24 = vld [vmem:[%s19535_s0 + $0x524] ss:$108 sps:$4 sm:$0xff]  }
 0x217   :  { %9610 = vmatpush1.bf16.msra.mxu0 %v14386_v26  ;;  %v14513_v26 = vld [vmem:[%s19534_s1 + $0x1d0] sm:$0xff]  }
 0x218   :  { %9611 = vmatprep.subr.bf16.mxu0 %v15394_v0 }
 0x219   :  { %7536 = vmatmul.mubr.bf16.gmra.mrb[108].mxu1 %v14336_v25  ;;  %v14410_v25 = vld [vmem:[%s19535_s0 + $0xc14] ss:$108 sps:$4 sm:$0xff]  }
 0x21a   :  { %9367 = vmatmul.mubr.bf16.gmra.mrb[12].mxu0 %v14337_v27  ;;  %7543 = vmatprep.mubr.bf16.mxu1 %v14338_v28  ;;  %v14412_v27 = vld [vmem:[%s19535_s0 + $0x520] ss:$108 sps:$4 sm:$0xff]   ;;  %v14413_v28 = vld [vmem:[%s19535_s0 + $0xc10] ss:$108 sps:$4 sm:$0xff]  }
 0x21b   :  { %9374 = vmatprep.mubr.bf16.mxu0 %v14340_v29  ;;  %9612 = vmatpush1.bf16.msra.mxu0 %v14400_v30  ;;  %v14416_v29 = vld [vmem:[%s19535_s0 + $0x5fc] ss:$108 sps:$4 sm:$0xff]   ;;  %v14418_v30 = vld [vmem:[%s19535_s0 + $0xcec] ss:$108 sps:$4 sm:$0xff]  }
 0x21c   :  { %9613 = vmatprep.subr.bf16.mxu0 %v15394_v0 }
 0x21f   :  { %9614 = vmatpush1.bf16.msra.mxu0 %v14414_v32  ;;  %v14527_v32 = vld [vmem:[%s19534_s1 + $0x1d8] sm:$0xff]  }
 0x220   :  { %9615 = vmatprep.subr.bf16.mxu0 %v15394_v0 }
 0x221   :  { %7544 = vmatmul.mubr.bf16.gmra.mrb[112].mxu1 %v14342_v31  ;;  %v14526_v31 = vld [vmem:[%s19534_s1 + $0x4f8] sm:$0xff]  }
 0x222   :  { %9375 = vmatmul.mubr.bf16.gmra.mrb[16].mxu0 %v14343_v33  ;;  %7551 = vmatprep.mubr.bf16.mxu1 %v14346_v34  ;;  %v14420_v33 = vld [vmem:[%s19535_s0 + $0x5f8] ss:$108 sps:$4 sm:$0xff]   ;;  %v14421_v34 = vld [vmem:[%s19535_s0 + $0xce8] ss:$108 sps:$4 sm:$0xff]  }
 0x223   :  { %9382 = vmatprep.mubr.bf16.mxu0 %v14348_v35  ;;  %9616 = vmatpush1.bf16.msra.mxu0 %v14428_v36  ;;  %v14422_v35 = vld [vmem:[%s19535_s0 + $0x6d4] ss:$108 sps:$4 sm:$0xff]   ;;  %v14424_v36 = vld [vmem:[%s19535_s0 + $0xdc4] ss:$108 sps:$4 sm:$0xff]  }
 0x224   :  { %9617 = vmatprep.subr.bf16.mxu0 %v15394_v0 }
 0x227   :  { %9618 = vmatpush1.bf16.msra.mxu0 %v14442_v38  ;;  %v14427_v38 = vld [vmem:[%s19535_s0 + $0xdc0] ss:$108 sps:$4 sm:$0xff]  }
 0x228   :  { %9619 = vmatprep.subr.bf16.mxu0 %v15394_v0 }
 0x229   :  { %7552 = vmatmul.mubr.bf16.gmra.mrb[116].mxu1 %v14350_v37  ;;  %v14426_v37 = vld [vmem:[%s19535_s0 + $0x6d0] ss:$108 sps:$4 sm:$0xff]  }
 0x22a   :  { %9383 = vmatmul.mubr.bf16.gmra.mrb[20].mxu0 %v14351_v39  ;;  %7559 = vmatprep.mubr.bf16.mxu1 %v14352_v40  ;;  %v14430_v39 = vld [vmem:[%s19535_s0 + $0x7ac] ss:$108 sps:$4 sm:$0xff]   ;;  %v14432_v40 = vld [vmem:[%s19535_s0 + $0xe9c] ss:$108 sps:$4 sm:$0xff]  }
 0x22b   :  { %9390 = vmatprep.mubr.bf16.mxu0 %v14354_v41  ;;  %9620 = vmatpush1.bf16.msra.mxu0 %v14456_v42  ;;  %v14541_v41 = vld [vmem:[%s19534_s1 + $0x1e0] sm:$0xff]   ;;  %v14434_v42 = vld [vmem:[%s19535_s0 + $0x7a8] ss:$108 sps:$4 sm:$0xff]  }
 0x22c   :  { %9621 = vmatprep.subr.bf16.mxu0 %v15394_v0 }
 0x22f   :  { %9622 = vmatpush1.bf16.msra.mxu0 %v14470_v47  ;;  %v14441_v47 = vld [vmem:[%s19535_s0 + $0xf70] ss:$108 sps:$4 sm:$0xff]  }
 0x230   :  { %9623 = vmatprep.subr.bf16.mxu0 %v15394_v0 }
 0x231   :  { %7560 = vmatmul.mubr.bf16.gmra.mrb[120].mxu1 %v14356_v43  ;;  %v14435_v43 = vld [vmem:[%s19535_s0 + $0xe98] ss:$108 sps:$4 sm:$0xff]  }
 0x232   :  { %9391 = vmatmul.mubr.bf16.gmra.mrb[24].mxu0 %v14357_v44  ;;  %7567 = vmatprep.mubr.bf16.mxu1 %v14360_v45  ;;  %v14436_v44 = vld [vmem:[%s19535_s0 + $0x884] ss:$108 sps:$4 sm:$0xff]   ;;  %v14438_v45 = vld [vmem:[%s19535_s0 + $0xf74] ss:$108 sps:$4 sm:$0xff]  }
 0x233   :  { %9398 = vmatprep.mubr.bf16.mxu0 %v14362_v46  ;;  %9624 = vmatpush1.bf16.msra.mxu0 %v14484_v58  ;;  %v14440_v46 = vld [vmem:[%s19535_s0 + $0x880] ss:$108 sps:$4 sm:$0xff]   ;;  %v14460_v58 = vld [vmem:[%s19535_s0 + $0x11fc] ss:$108 sps:$4 sm:$0xff]  }
 0x234   :  { %9625 = vmatprep.subr.bf16.mxu0 %v15394_v0 }
 0x237   :  { %9626 = vmatpush1.bf16.msra.mxu0 %v14498_v7  ;;  %v14477_v7 = vld [vmem:[%s19535_s0 + $0x13a8] ss:$108 sps:$4 sm:$0xff]  }
 0x238   :  { %9627 = vmatprep.subr.bf16.mxu0 %v15394_v0 }
 0x239   :  { %7568 = vmatmul.mubr.bf16.gmra.mrb[124].mxu1 %v14364_v48  ;;  %v14444_v48 = vld [vmem:[%s19535_s0 + $0x95c] ss:$108 sps:$4 sm:$0xff]  }
 0x23a   :  { %9399 = vmatmul.mubr.bf16.gmra.mrb[28].mxu0 %v14365_v49  ;;  %7608 = vmatprep.mubr.bf16.mxu1 %v14368_v50  ;;  %v14446_v49 = vld [vmem:[%s19535_s0 + $0x104c] ss:$108 sps:$4 sm:$0xff]  }
 0x23b   :  { %9406 = vmatprep.mubr.bf16.mxu0 %v14369_v51  ;;  %9628 = vmatpush1.bf16.msra.mxu0 %v14512_v20  ;;  %v14555_v50 = vld [vmem:[%s19534_s1 + $0x1e8] sm:$0xff]   ;;  %v14448_v51 = vld [vmem:[%s19535_s0 + $0x958] ss:$108 sps:$4 sm:$0xff]  }
 0x23c   :  { %9629 = vmatprep.subr.bf16.mxu0 %v15394_v0  ;;  %v14500_v20 = vld [vmem:[%s19535_s0 + $0x101c] ss:$108 sps:$4 sm:$0xff]  }
 0x23f   :  { %9630 = vmatpush1.bf16.msra.mxu0 %v14526_v31  ;;  %v14519_v31 = vld [vmem:[%s19535_s0 + $0x18b8] ss:$108 sps:$4 sm:$0xff]  }
 0x240   :  { %9888 = vmatprep.subr.bf16.mxu0 %v15394_v0 }
 0x241   :  { %7609 = vmatmul.mubr.bf16.vlgmr.msra.gmra.mrb[0].mxu1 %v14366_v52  ;;  %v14449_v52 = vld [vmem:[%s19535_s0 + $0x1048] ss:$108 sps:$4 sm:$0xff]  }
 0x242   :  { %9407 = vmatmul.mubr.bf16.gmra.mrb[32].mxu0 %v14371_v53  ;;  %7866 = vmatpush1.bf16.msra.mxu1 %v14373_v54  ;;  %v14450_v53 = vld [vmem:[%s19535_s0 + $0xa34] ss:$108 sps:$4 sm:$0xff]   ;;  %v14452_v54 = vld [vmem:[%s19535_s0 + $0x1124] ss:$108 sps:$4 sm:$0xff]  }
 0x243   :  { %7616 = vmatprep.mubr.bf16.mxu1 %v14374_v55  ;;  %9414 = vmatprep.mubr.bf16.mxu0 %v14376_v56  ;;  %v14454_v55 = vld [vmem:[%s19535_s0 + $0xa30] ss:$108 sps:$4 sm:$0xff]   ;;  %v14455_v56 = vld [vmem:[%s19535_s0 + $0x1120] ss:$108 sps:$4 sm:$0xff]  }
 0x244   :  { %7867 = vmatprep.subr.bf16.mxu1 %v15394_v0 }
 0x246   :  { %7868 = vmatpush1.bf16.msra.mxu1 %v14387_v57  ;;  %v14458_v57 = vld [vmem:[%s19535_s0 + $0xb0c] ss:$108 sps:$4 sm:$0xff]  }
 0x247   :  { %7869 = vmatprep.subr.bf16.mxu1 %v15394_v0 }
 0x249   :  { %7617 = vmatmul.mubr.bf16.gmra.mrb[4].mxu1 %v14378_v59  ;;  %v14569_v59 = vld [vmem:[%s19534_s1 + $0x1f0] sm:$0xff]  }
 0x24a   :  { %9415 = vmatmul.mubr.bf16.gmra.mrb[36].mxu0 %v14379_v60  ;;  %7624 = vmatprep.mubr.bf16.mxu1 %v14380_v61  ;;  %v14462_v60 = vld [vmem:[%s19535_s0 + $0xb08] ss:$108 sps:$4 sm:$0xff]   ;;  %v14463_v61 = vld [vmem:[%s19535_s0 + $0x11f8] ss:$108 sps:$4 sm:$0xff]  }
 0x24b   :  { %9422 = vmatprep.mubr.bf16.mxu0 %v14382_v62  ;;  %7870 = vmatpush1.bf16.msra.mxu1 %v14401_v63  ;;  %v14464_v62 = vld [vmem:[%s19535_s0 + $0xbe4] ss:$108 sps:$4 sm:$0xff]   ;;  %v14466_v63 = vld [vmem:[%s19535_s0 + $0x12d4] ss:$108 sps:$4 sm:$0xff]  }
 0x24c   :  { %7871 = vmatprep.subr.bf16.mxu1 %v15394_v0 }
 0x24f   :  { %7872 = vmatpush1.bf16.msra.mxu1 %v14415_v2  ;;  %v14469_v2 = vld [vmem:[%s19535_s0 + $0x12d0] ss:$108 sps:$4 sm:$0xff]  }
 0x250   :  { %7873 = vmatprep.subr.bf16.mxu1 %v15394_v0 }
 0x251   :  { %7625 = vmatmul.mubr.bf16.gmra.mrb[8].mxu1 %v14384_v1  ;;  %v14468_v1 = vld [vmem:[%s19535_s0 + $0xbe0] ss:$108 sps:$4 sm:$0xff]  }
 0x252   :  { %9423 = vmatmul.mubr.bf16.gmra.mrb[40].mxu0 %v14385_v3  ;;  %7632 = vmatprep.mubr.bf16.mxu1 %v14388_v4  ;;  %v14472_v3 = vld [vmem:[%s19535_s0 + $0xcbc] ss:$108 sps:$4 sm:$0xff]   ;;  %v14474_v4 = vld [vmem:[%s19535_s0 + $0x13ac] ss:$108 sps:$4 sm:$0xff]  }
 0x253   :  { %9430 = vmatprep.mubr.bf16.mxu0 %v14390_v5  ;;  %7874 = vmatpush1.bf16.msra.mxu1 %v14429_v6  ;;  %v14583_v5 = vld [vmem:[%s19534_s1 + $0x1f8] sm:$0xff]  }
 0x254   :  { %7875 = vmatprep.subr.bf16.mxu1 %v15394_v0  ;;  %v14476_v6 = vld [vmem:[%s19535_s0 + $0xcb8] ss:$108 sps:$4 sm:$0xff]  }
 0x257   :  { %7876 = vmatpush1.bf16.msra.mxu1 %v14443_v8  ;;  %v14478_v8 = vld [vmem:[%s19535_s0 + $0xd94] ss:$108 sps:$4 sm:$0xff]  }
 0x258   :  { %7877 = vmatprep.subr.bf16.mxu1 %v15394_v0 }
 0x259   :  { %7633 = vmatmul.mubr.bf16.gmra.mrb[12].mxu1 %v14392_v9  ;;  %v14480_v9 = vld [vmem:[%s19535_s0 + $0x1484] ss:$108 sps:$4 sm:$0xff]  }
 0x25a   :  { %9431 = vmatmul.mubr.bf16.gmra.mrb[44].mxu0 %v14393_v10  ;;  %7640 = vmatprep.mubr.bf16.mxu1 %v14394_v11  ;;  %v14482_v10 = vld [vmem:[%s19535_s0 + $0xd90] ss:$108 sps:$4 sm:$0xff]   ;;  %v14483_v11 = vld [vmem:[%s19535_s0 + $0x1480] ss:$108 sps:$4 sm:$0xff]  }
 0x25b   :  { %9438 = vmatprep.mubr.bf16.mxu0 %v14396_v12  ;;  %7878 = vmatpush1.bf16.msra.mxu1 %v14457_v13  ;;  %v14486_v12 = vld [vmem:[%s19535_s0 + $0xe6c] ss:$108 sps:$4 sm:$0xff]   ;;  %v14488_v13 = vld [vmem:[%s19535_s0 + $0x155c] ss:$108 sps:$4 sm:$0xff]  }
 0x25c   :  { %7879 = vmatprep.subr.bf16.mxu1 %v15394_v0 }
 0x25f   :  { %7880 = vmatpush1.bf16.msra.mxu1 %v14471_v14  ;;  %v14490_v14 = vld [vmem:[%s19535_s0 + $0xe68] ss:$108 sps:$4 sm:$0xff]  }
 0x260   :  { %7881 = vmatprep.subr.bf16.mxu1 %v15394_v0 }
 0x261   :  { %7641 = vmatmul.mubr.bf16.gmra.mrb[16].mxu1 %v14398_v15  ;;  %v14491_v15 = vld [vmem:[%s19535_s0 + $0x1558] ss:$108 sps:$4 sm:$0xff]  }
 0x262   :  { %9439 = vmatmul.mubr.bf16.gmra.mrb[48].mxu0 %v14399_v16  ;;  %7648 = vmatprep.mubr.bf16.mxu1 %v14402_v17  ;;  %v14492_v16 = vld [vmem:[%s19535_s0 + $0xf44] ss:$108 sps:$4 sm:$0xff]   ;;  %v14494_v17 = vld [vmem:[%s19535_s0 + $0x1634] ss:$108 sps:$4 sm:$0xff]  }
 0x263   :  { %9446 = vmatprep.mubr.bf16.mxu0 %v14404_v18  ;;  %7882 = vmatpush1.bf16.msra.mxu1 %v14485_v19  ;;  %v14496_v18 = vld [vmem:[%s19535_s0 + $0xf40] ss:$108 sps:$4 sm:$0xff]   ;;  %v14497_v19 = vld [vmem:[%s19535_s0 + $0x1630] ss:$108 sps:$4 sm:$0xff]  }
 0x264   :  { %7883 = vmatprep.subr.bf16.mxu1 %v15394_v0 }
 0x267   :  { %7884 = vmatpush1.bf16.msra.mxu1 %v14499_v21  ;;  %v14502_v21 = vld [vmem:[%s19535_s0 + $0x170c] ss:$108 sps:$4 sm:$0xff]  }
 0x268   :  { %7885 = vmatprep.subr.bf16.mxu1 %v15394_v0 }
 0x269   :  { %7649 = vmatmul.mubr.bf16.gmra.mrb[20].mxu1 %v14406_v22  ;;  %v14504_v22 = vld [vmem:[%s19535_s0 + $0x1018] ss:$108 sps:$4 sm:$0xff]  }
 0x26a   :  { %9447 = vmatmul.mubr.bf16.gmra.mrb[52].mxu0 %v14407_v23  ;;  %7656 = vmatprep.mubr.bf16.mxu1 %v14408_v24  ;;  %v14505_v23 = vld [vmem:[%s19535_s0 + $0x1708] ss:$108 sps:$4 sm:$0xff]  }
 0x26b   :  { %9454 = vmatprep.mubr.bf16.mxu0 %v14410_v25  ;;  %7886 = vmatpush1.bf16.msra.mxu1 %v14513_v26  ;;  %v14506_v24 = vld [vmem:[%s19535_s0 + $0x10f4] ss:$108 sps:$4 sm:$0xff]   ;;  %v14508_v25 = vld [vmem:[%s19535_s0 + $0x17e4] ss:$108 sps:$4 sm:$0xff]  }
 0x26c   :  { %7887 = vmatprep.subr.bf16.mxu1 %v15394_v0  ;;  %v14510_v26 = vld [vmem:[%s19535_s0 + $0x10f0] ss:$108 sps:$4 sm:$0xff]  }
 0x26f   :  { %7888 = vmatpush1.bf16.msra.mxu1 %v14527_v32  ;;  %v14520_v32 = vld [vmem:[%s19535_s0 + $0x12a4] ss:$108 sps:$4 sm:$0xff]  }
 0x270   :  { %7889 = vmatprep.subr.bf16.mxu1 %v15394_v0 }
 0x271   :  { %7657 = vmatmul.mubr.bf16.gmra.mrb[24].mxu1 %v14412_v27  ;;  %v14511_v27 = vld [vmem:[%s19535_s0 + $0x17e0] ss:$108 sps:$4 sm:$0xff]  }
 0x272   :  { %9455 = vmatmul.mubr.bf16.gmra.mrb[56].mxu0 %v14413_v28  ;;  %7664 = vmatprep.mubr.bf16.mxu1 %v14416_v29  ;;  %v14514_v28 = vld [vmem:[%s19535_s0 + $0x11cc] ss:$108 sps:$4 sm:$0xff]   ;;  %v14516_v29 = vld [vmem:[%s19535_s0 + $0x18bc] ss:$108 sps:$4 sm:$0xff]  }
 0x273   :  { %9462 = vmatprep.mubr.bf16.mxu0 %v14418_v30  ;;  %7890 = vmatpush1.bf16.msra.mxu1 %v14541_v41  ;;  %v14518_v30 = vld [vmem:[%s19535_s0 + $0x11c8] ss:$108 sps:$4 sm:$0xff]   ;;  %v14538_v41 = vld [vmem:[%s19535_s0 + $0x4c] ss:$108 sps:$4 sm:$0xff]  }
 0x274   :  { %7891 = vmatprep.subr.bf16.mxu1 %v15394_v0 }
 0x277   :  { %7892 = vmatpush1.bf16.msra.mxu1 %v14555_v50  ;;  %v14548_v50 = vld [vmem:[%s19535_s0 + $0x1604] ss:$108 sps:$4 sm:$0xff]  }
 0x278   :  { %7893 = vmatprep.subr.bf16.mxu1 %v15394_v0 }
 0x279   :  { %7665 = vmatmul.mubr.bf16.gmra.mrb[28].mxu1 %v14420_v33  ;;  %v14522_v33 = vld [vmem:[%s19535_s0 + $0x1994] ss:$108 sps:$4 sm:$0xff]  }
 0x27a   :  { %9463 = vmatmul.mubr.bf16.gmra.mrb[60].mxu0 %v14421_v34  ;;  %7672 = vmatprep.mubr.bf16.mxu1 %v14422_v35  ;;  %v14524_v34 = vld [vmem:[%s19535_s0 + $0x12a0] ss:$108 sps:$4 sm:$0xff]   ;;  %v14525_v35 = vld [vmem:[%s19535_s0 + $0x1990] ss:$108 sps:$4 sm:$0xff]  }
 0x27b   :  { %9470 = vmatprep.mubr.bf16.mxu0 %v14424_v36  ;;  %7894 = vmatpush1.bf16.msra.mxu1 %v14569_v59  ;;  %v14528_v36 = vld [vmem:[%s19535_s0 + $0x137c] ss:$108 sps:$4 sm:$0xff]  }
 0x27c   :  { %7895 = vmatprep.subr.bf16.mxu1 %v15394_v0  ;;  %v14610_v59 = vld [vmem:[%s19534_s1 + $0x528] sm:$0xff]  }
 0x27f   :  { %7896 = vmatpush1.bf16.msra.mxu1 %v14583_v5  ;;  %v14570_v5 = vld [vmem:[%s19535_s0 + $0x188c] ss:$108 sps:$4 sm:$0xff]  }
 0x280   :  { %8154 = vmatprep.subr.bf16.mxu1 %v15394_v0 }
 0x281   :  { %7673 = vmatmul.mubr.bf16.gmra.mrb[32].mxu1 %v14426_v37  ;;  %v14530_v37 = vld [vmem:[%s19535_s0 + $0x1a6c] ss:$108 sps:$4 sm:$0xff]  }
 0x282   :  { %9471 = vmatmul.mubr.bf16.gmra.mrb[64].mxu0 %v14427_v38  ;;  %7680 = vmatprep.mubr.bf16.mxu1 %v14430_v39  ;;  %v14532_v38 = vld [vmem:[%s19535_s0 + $0x1378] ss:$108 sps:$4 sm:$0xff]   ;;  %v14533_v39 = vld [vmem:[%s19535_s0 + $0x1a68] ss:$108 sps:$4 sm:$0xff]  }
 0x283   :  { %9478 = vmatprep.mubr.bf16.mxu0 %v14432_v40  ;;  %v14534_v40 = vld [vmem:[%s19535_s0 + $0x1454] ss:$108 sps:$4 sm:$0xff]  }
 0x289   :  { %7681 = vmatmul.mubr.bf16.gmra.mrb[36].mxu1 %v14434_v42  ;;  %v14539_v42 = vld [vmem:[%s19535_s0 + $0x1450] ss:$108 sps:$4 sm:$0xff]  }
 0x28a   :  { %9479 = vmatmul.mubr.bf16.gmra.mrb[68].mxu0 %v14435_v43  ;;  %7688 = vmatprep.mubr.bf16.mxu1 %v14436_v44  ;;  %v14536_v43 = vld [vmem:[%s19535_s0 + $0x48] ss:$108 sps:$4 sm:$0xff]   ;;  %v14542_v44 = vld [vmem:[%s19535_s0 + $0x152c] ss:$108 sps:$4 sm:$0xff]  }
 0x28b   :  { %9486 = vmatprep.mubr.bf16.mxu0 %v14438_v45  ;;  %v14540_v45 = vld [vmem:[%s19534_s1 + $0x500] sm:$0xff]  }
 0x291   :  { %7689 = vmatmul.mubr.bf16.gmra.mrb[40].mxu1 %v14440_v46  ;;  %v14544_v46 = vld [vmem:[%s19535_s0 + $0x124] ss:$108 sps:$4 sm:$0xff]  }
 0x292   :  { %9487 = vmatmul.mubr.bf16.gmra.mrb[72].mxu0 %v14441_v47  ;;  %7696 = vmatprep.mubr.bf16.mxu1 %v14444_v48  ;;  %v14554_v47 = vld [vmem:[%s19534_s1 + $0x508] sm:$0xff]  }
 0x293   :  { %9494 = vmatprep.mubr.bf16.mxu0 %v14446_v49  ;;  %v14546_v48 = vld [vmem:[%s19535_s0 + $0x1528] ss:$108 sps:$4 sm:$0xff]   ;;  %v14547_v49 = vld [vmem:[%s19535_s0 + $0x120] ss:$108 sps:$4 sm:$0xff]  }
 0x299   :  { %7697 = vmatmul.mubr.bf16.gmra.mrb[44].mxu1 %v14448_v51  ;;  %v14550_v51 = vld [vmem:[%s19535_s0 + $0x1fc] ss:$108 sps:$4 sm:$0xff]  }
 0x29a   :  { %9495 = vmatmul.mubr.bf16.gmra.mrb[76].mxu0 %v14449_v52  ;;  %7704 = vmatprep.mubr.bf16.mxu1 %v14450_v53  ;;  %v14568_v52 = vld [vmem:[%s19534_s1 + $0x510] sm:$0xff]   ;;  %v14582_v53 = vld [vmem:[%s19534_s1 + $0x518] sm:$0xff]  }
 0x29b   :  { %9502 = vmatprep.mubr.bf16.mxu0 %v14452_v54  ;;  %v14552_v54 = vld [vmem:[%s19535_s0 + $0x1600] ss:$108 sps:$4 sm:$0xff]  }
 0x2a1   :  { %7705 = vmatmul.mubr.bf16.gmra.mrb[48].mxu1 %v14454_v55  ;;  %v14553_v55 = vld [vmem:[%s19535_s0 + $0x1f8] ss:$108 sps:$4 sm:$0xff]  }
 0x2a2   :  { %9503 = vmatmul.mubr.bf16.gmra.mrb[80].mxu0 %v14455_v56  ;;  %7712 = vmatprep.mubr.bf16.mxu1 %v14458_v57  ;;  %v14556_v56 = vld [vmem:[%s19535_s0 + $0x16dc] ss:$108 sps:$4 sm:$0xff]   ;;  %v14558_v57 = vld [vmem:[%s19535_s0 + $0x2d4] ss:$108 sps:$4 sm:$0xff]  }
 0x2a3   :  { %9510 = vmatprep.mubr.bf16.mxu0 %v14460_v58  ;;  %v14596_v58 = vld [vmem:[%s19534_s1 + $0x520] sm:$0xff]  }
 0x2a9   :  { %7713 = vmatmul.mubr.bf16.gmra.mrb[52].mxu1 %v14462_v60  ;;  %v14560_v60 = vld [vmem:[%s19535_s0 + $0x16d8] ss:$108 sps:$4 sm:$0xff]  }
 0x2aa   :  { %9511 = vmatmul.mubr.bf16.gmra.mrb[84].mxu0 %v14463_v61  ;;  %7720 = vmatprep.mubr.bf16.mxu1 %v14464_v62  ;;  %v14561_v61 = vld [vmem:[%s19535_s0 + $0x2d0] ss:$108 sps:$4 sm:$0xff]   ;;  %v14562_v62 = vld [vmem:[%s19535_s0 + $0x17b4] ss:$108 sps:$4 sm:$0xff]  }
 0x2ab   :  { %9518 = vmatprep.mubr.bf16.mxu0 %v14466_v63  ;;  %v14564_v63 = vld [vmem:[%s19535_s0 + $0x3ac] ss:$108 sps:$4 sm:$0xff]  }
 0x2b1   :  { %7721 = vmatmul.mubr.bf16.gmra.mrb[56].mxu1 %v14468_v1  ;;  %v14624_v1 = vld [vmem:[%s19534_s1 + $0x530] sm:$0xff]  }
 0x2b2   :  { %9519 = vmatmul.mubr.bf16.gmra.mrb[88].mxu0 %v14469_v2  ;;  %7728 = vmatprep.mubr.bf16.mxu1 %v14472_v3  ;;  %v14638_v2 = vld [vmem:[%s19534_s1 + $0x538] sm:$0xff]  }
 0x2b3   :  { %9526 = vmatprep.mubr.bf16.mxu0 %v14474_v4  ;;  %v14566_v3 = vld [vmem:[%s19535_s0 + $0x17b0] ss:$108 sps:$4 sm:$0xff]   ;;  %v14567_v4 = vld [vmem:[%s19535_s0 + $0x3a8] ss:$108 sps:$4 sm:$0xff]  }
 0x2b9   :  { %7729 = vmatmul.mubr.bf16.gmra.mrb[60].mxu1 %v14476_v6  ;;  %v14572_v6 = vld [vmem:[%s19535_s0 + $0x484] ss:$108 sps:$4 sm:$0xff]  }
 0x2ba   :  { %9527 = vmatmul.mubr.bf16.gmra.mrb[92].mxu0 %v14477_v7  ;;  %7736 = vmatprep.mubr.bf16.mxu1 %v14478_v8  ;;  %v14652_v7 = vld [vmem:[%s19534_s1 + $0x540] sm:$0xff]   ;;  %v14666_v8 = vld [vmem:[%s19534_s1 + $0x548] sm:$0xff]  }
 0x2bb   :  { %9534 = vmatprep.mubr.bf16.mxu0 %v14480_v9  ;;  %v14574_v9 = vld [vmem:[%s19535_s0 + $0x1888] ss:$108 sps:$4 sm:$0xff]  }
 0x2c1   :  { %7737 = vmatmul.mubr.bf16.gmra.mrb[64].mxu1 %v14482_v10  ;;  %v14575_v10 = vld [vmem:[%s19535_s0 + $0x480] ss:$108 sps:$4 sm:$0xff]  }
 0x2c2   :  { %9535 = vmatmul.mubr.bf16.gmra.mrb[96].mxu0 %v14483_v11  ;;  %7744 = vmatprep.mubr.bf16.mxu1 %v14486_v12  ;;  %v14576_v11 = vld [vmem:[%s19535_s0 + $0x1964] ss:$108 sps:$4 sm:$0xff]   ;;  %v14578_v12 = vld [vmem:[%s19535_s0 + $0x55c] ss:$108 sps:$4 sm:$0xff]  }
 0x2c3   :  { %9542 = vmatprep.mubr.bf16.mxu0 %v14488_v13  ;;  %v14680_v13 = vld [vmem:[%s19534_s1 + $0x550] sm:$0xff]  }
 0x2c9   :  { %7745 = vmatmul.mubr.bf16.gmra.mrb[68].mxu1 %v14490_v14  ;;  %v14580_v14 = vld [vmem:[%s19535_s0 + $0x1960] ss:$108 sps:$4 sm:$0xff]  }
 0x2ca   :  { %9543 = vmatmul.mubr.bf16.gmra.mrb[100].mxu0 %v14491_v15  ;;  %7752 = vmatprep.mubr.bf16.mxu1 %v14492_v16  ;;  %v14581_v15 = vld [vmem:[%s19535_s0 + $0x558] ss:$108 sps:$4 sm:$0xff]   ;;  %v14584_v16 = vld [vmem:[%s19535_s0 + $0x1a3c] ss:$108 sps:$4 sm:$0xff]  }
 0x2cb   :  { %9550 = vmatprep.mubr.bf16.mxu0 %v14494_v17  ;;  %v14586_v17 = vld [vmem:[%s19535_s0 + $0x634] ss:$108 sps:$4 sm:$0xff]  }
 0x2d1   :  { %7753 = vmatmul.mubr.bf16.gmra.mrb[72].mxu1 %v14496_v18  ;;  %v14694_v18 = vld [vmem:[%s19534_s1 + $0x558] sm:$0xff]  }
 0x2d2   :  { %9551 = vmatmul.mubr.bf16.gmra.mrb[104].mxu0 %v14497_v19  ;;  %7760 = vmatprep.mubr.bf16.mxu1 %v14500_v20  ;;  %v14588_v19 = vld [vmem:[%s19535_s0 + $0x1a38] ss:$108 sps:$4 sm:$0xff]   ;;  %v14589_v20 = vld [vmem:[%s19535_s0 + $0x630] ss:$108 sps:$4 sm:$0xff]  }
 0x2d3   :  { %9558 = vmatprep.mubr.bf16.mxu0 %v14502_v21  ;;  %v14592_v21 = vld [vmem:[%s19535_s0 + $0x1c] ss:$108 sps:$4 sm:$0xff]  }
 0x2d9   :  { %7761 = vmatmul.mubr.bf16.gmra.mrb[76].mxu1 %v14504_v22  ;;  %v14593_v22 = vld [vmem:[%s19535_s0 + $0x70c] ss:$108 sps:$4 sm:$0xff]  }
 0x2da   :  { %9559 = vmatmul.mubr.bf16.gmra.mrb[108].mxu0 %v14505_v23  ;;  %7768 = vmatprep.mubr.bf16.mxu1 %v14506_v24  ;;  %v14590_v23 = vld [vmem:[%s19535_s0 + $0x18] ss:$108 sps:$4 sm:$0xff]   ;;  %v14595_v24 = vld [vmem:[%s19535_s0 + $0x708] ss:$108 sps:$4 sm:$0xff]  }
 0x2db   :  { %9566 = vmatprep.mubr.bf16.mxu0 %v14508_v25  ;;  %v14597_v25 = vld [vmem:[%s19534_s1 + $0x200] sm:$0xff]  }
 0x2e1   :  { %7769 = vmatmul.mubr.bf16.gmra.mrb[80].mxu1 %v14510_v26  ;;  %v14598_v26 = vld [vmem:[%s19535_s0 + $0xf4] ss:$108 sps:$4 sm:$0xff]  }
 0x2e2   :  { %9567 = vmatmul.mubr.bf16.gmra.mrb[112].mxu0 %v14511_v27  ;;  %7776 = vmatprep.mubr.bf16.mxu1 %v14514_v28  ;;  %v14600_v27 = vld [vmem:[%s19535_s0 + $0x7e4] ss:$108 sps:$4 sm:$0xff]   ;;  %v14611_v28 = vld [vmem:[%s19534_s1 + $0x208] sm:$0xff]  }
 0x2e3   :  { %9574 = vmatprep.mubr.bf16.mxu0 %v14516_v29  ;;  %v14708_v29 = vld [vmem:[%s19534_s1 + $0x560] sm:$0xff]  }
 0x2e9   :  { %7777 = vmatmul.mubr.bf16.gmra.mrb[84].mxu1 %v14518_v30  ;;  %v14602_v30 = vld [vmem:[%s19535_s0 + $0xf0] ss:$108 sps:$4 sm:$0xff]  }
 0x2ea   :  { %9575 = vmatmul.mubr.bf16.gmra.mrb[116].mxu0 %v14519_v31  ;;  %7784 = vmatprep.mubr.bf16.mxu1 %v14520_v32  ;;  %v14603_v31 = vld [vmem:[%s19535_s0 + $0x7e0] ss:$108 sps:$4 sm:$0xff]  }
 0x2eb   :  { %9582 = vmatprep.mubr.bf16.mxu0 %v14522_v33  ;;  %v14604_v32 = vld [vmem:[%s19535_s0 + $0x1cc] ss:$108 sps:$4 sm:$0xff]   ;;  %v14606_v33 = vld [vmem:[%s19535_s0 + $0x8bc] ss:$108 sps:$4 sm:$0xff]  }
 0x2f1   :  { %7785 = vmatmul.mubr.bf16.gmra.mrb[88].mxu1 %v14524_v34  ;;  %v14625_v34 = vld [vmem:[%s19534_s1 + $0x210] sm:$0xff]  }
 0x2f2   :  { %9583 = vmatmul.mubr.bf16.gmra.mrb[120].mxu0 %v14525_v35  ;;  %7792 = vmatprep.mubr.bf16.mxu1 %v14528_v36  ;;  %v14639_v35 = vld [vmem:[%s19534_s1 + $0x218] sm:$0xff]   ;;  %v14608_v36 = vld [vmem:[%s19535_s0 + $0x1c8] ss:$108 sps:$4 sm:$0xff]  }
 0x2f3   :  { %9590 = vmatprep.mubr.bf16.mxu0 %v14530_v37  ;;  %v14609_v37 = vld [vmem:[%s19535_s0 + $0x8b8] ss:$108 sps:$4 sm:$0xff]  }
 0x2f9   :  { %7793 = vmatmul.mubr.bf16.gmra.mrb[92].mxu1 %v14532_v38  ;;  %v14612_v38 = vld [vmem:[%s19535_s0 + $0x2a4] ss:$108 sps:$4 sm:$0xff]  }
 0x2fa   :  { %9591 = vmatmul.mubr.bf16.gmra.mrb[124].mxu0 %v14533_v39  ;;  %7800 = vmatprep.mubr.bf16.mxu1 %v14534_v40  ;;  %v14614_v39 = vld [vmem:[%s19535_s0 + $0x994] ss:$108 sps:$4 sm:$0xff]  }
 0x2fb   :  { %9631 = vmatprep.mubr.bf16.mxu0 %v14538_v41  ;;  %v14653_v40 = vld [vmem:[%s19534_s1 + $0x220] sm:$0xff]   ;;  %v14722_v41 = vld [vmem:[%s19534_s1 + $0x568] sm:$0xff]  }
 0x301   :  { %7801 = vmatmul.mubr.bf16.gmra.mrb[96].mxu1 %v14539_v42  ;;  %v14667_v42 = vld [vmem:[%s19534_s1 + $0x228] sm:$0xff]  }
 0x302   :  { %9632 = vmatmul.mubr.bf16.vlgmr.msra.gmra.mrb[0].mxu0 %v14536_v43  ;;  %7808 = vmatprep.mubr.bf16.mxu1 %v14542_v44  ;;  %v14616_v43 = vld [vmem:[%s19535_s0 + $0x2a0] ss:$108 sps:$4 sm:$0xff]   ;;  %v14617_v44 = vld [vmem:[%s19535_s0 + $0x990] ss:$108 sps:$4 sm:$0xff]  }
 0x303   :  { %9889 = vmatpush1.bf16.msra.mxu0 %v14540_v45  ;;  %9639 = vmatprep.mubr.bf16.mxu0 %v14544_v46  ;;  %v14618_v45 = vld [vmem:[%s19535_s0 + $0x37c] ss:$108 sps:$4 sm:$0xff]   ;;  %v14620_v46 = vld [vmem:[%s19535_s0 + $0xa6c] ss:$108 sps:$4 sm:$0xff]  }
 0x304   :  { %9890 = vmatprep.subr.bf16.mxu0 %v15394_v0 }
 0x307   :  { %9891 = vmatpush1.bf16.msra.mxu0 %v14554_v47  ;;  %v14681_v47 = vld [vmem:[%s19534_s1 + $0x230] sm:$0xff]  }
 0x308   :  { %9892 = vmatprep.subr.bf16.mxu0 %v15394_v0 }
 0x309   :  { %7809 = vmatmul.mubr.bf16.gmra.mrb[100].mxu1 %v14546_v48  ;;  %v14695_v48 = vld [vmem:[%s19534_s1 + $0x238] sm:$0xff]  }
 0x30a   :  { %9640 = vmatmul.mubr.bf16.gmra.mrb[4].mxu0 %v14547_v49  ;;  %7816 = vmatprep.mubr.bf16.mxu1 %v14548_v50  ;;  %v14622_v49 = vld [vmem:[%s19535_s0 + $0x378] ss:$108 sps:$4 sm:$0xff]   ;;  %v14623_v50 = vld [vmem:[%s19535_s0 + $0xa68] ss:$108 sps:$4 sm:$0xff]  }
 0x30b   :  { %9647 = vmatprep.mubr.bf16.mxu0 %v14550_v51  ;;  %9893 = vmatpush1.bf16.msra.mxu0 %v14568_v52  ;;  %v14626_v51 = vld [vmem:[%s19535_s0 + $0x454] ss:$108 sps:$4 sm:$0xff]   ;;  %v14628_v52 = vld [vmem:[%s19535_s0 + $0xb44] ss:$108 sps:$4 sm:$0xff]  }
 0x30c   :  { %9894 = vmatprep.subr.bf16.mxu0 %v15394_v0 }
 0x30f   :  { %9895 = vmatpush1.bf16.msra.mxu0 %v14582_v53  ;;  %v14709_v53 = vld [vmem:[%s19534_s1 + $0x240] sm:$0xff]  }
 0x310   :  { %9896 = vmatprep.subr.bf16.mxu0 %v15394_v0 }
 0x311   :  { %7817 = vmatmul.mubr.bf16.gmra.mrb[104].mxu1 %v14552_v54  ;;  %v14736_v54 = vld [vmem:[%s19534_s1 + $0x570] sm:$0xff]  }
 0x312   :  { %9648 = vmatmul.mubr.bf16.gmra.mrb[8].mxu0 %v14553_v55  ;;  %7824 = vmatprep.mubr.bf16.mxu1 %v14556_v56  ;;  %v14723_v55 = vld [vmem:[%s19534_s1 + $0x248] sm:$0xff]   ;;  %v14630_v56 = vld [vmem:[%s19535_s0 + $0x450] ss:$108 sps:$4 sm:$0xff]  }
 0x313   :  { %9655 = vmatprep.mubr.bf16.mxu0 %v14558_v57  ;;  %9897 = vmatpush1.bf16.msra.mxu0 %v14596_v58  ;;  %v14631_v57 = vld [vmem:[%s19535_s0 + $0xb40] ss:$108 sps:$4 sm:$0xff]  }
 0x314   :  { %9898 = vmatprep.subr.bf16.mxu0 %v15394_v0  ;;  %v14632_v58 = vld [vmem:[%s19535_s0 + $0x52c] ss:$108 sps:$4 sm:$0xff]  }
 0x317   :  { %9899 = vmatpush1.bf16.msra.mxu0 %v14610_v59  ;;  %v14634_v59 = vld [vmem:[%s19535_s0 + $0xc1c] ss:$108 sps:$4 sm:$0xff]  }
 0x318   :  { %9900 = vmatprep.subr.bf16.mxu0 %v15394_v0 }
 0x319   :  { %7825 = vmatmul.mubr.bf16.gmra.mrb[108].mxu1 %v14560_v60  ;;  %v14737_v60 = vld [vmem:[%s19534_s1 + $0x250] sm:$0xff]  }
 0x31a   :  { %9656 = vmatmul.mubr.bf16.gmra.mrb[12].mxu0 %v14561_v61  ;;  %7832 = vmatprep.mubr.bf16.mxu1 %v14562_v62  ;;  %v14636_v61 = vld [vmem:[%s19535_s0 + $0x528] ss:$108 sps:$4 sm:$0xff]   ;;  %v14637_v62 = vld [vmem:[%s19535_s0 + $0xc18] ss:$108 sps:$4 sm:$0xff]  }
 0x31b   :  { %9663 = vmatprep.mubr.bf16.mxu0 %v14564_v63  ;;  %9901 = vmatpush1.bf16.msra.mxu0 %v14624_v1  ;;  %v14640_v63 = vld [vmem:[%s19535_s0 + $0x604] ss:$108 sps:$4 sm:$0xff]   ;;  %v14642_v1 = vld [vmem:[%s19535_s0 + $0xcf4] ss:$108 sps:$4 sm:$0xff]  }
 0x31c   :  { %9902 = vmatprep.subr.bf16.mxu0 %v15394_v0 }
 0x31f   :  { %9903 = vmatpush1.bf16.msra.mxu0 %v14638_v2  ;;  %v14750_v2 = vld [vmem:[%s19534_s1 + $0x578] sm:$0xff]  }
 0x320   :  { %9904 = vmatprep.subr.bf16.mxu0 %v15394_v0 }
 0x321   :  { %7833 = vmatmul.mubr.bf16.gmra.mrb[112].mxu1 %v14566_v3  ;;  %v14751_v3 = vld [vmem:[%s19534_s1 + $0x258] sm:$0xff]  }
 0x322   :  { %9664 = vmatmul.mubr.bf16.gmra.mrb[16].mxu0 %v14567_v4  ;;  %7840 = vmatprep.mubr.bf16.mxu1 %v14570_v5  ;;  %v14644_v4 = vld [vmem:[%s19535_s0 + $0x600] ss:$108 sps:$4 sm:$0xff]   ;;  %v14645_v5 = vld [vmem:[%s19535_s0 + $0xcf0] ss:$108 sps:$4 sm:$0xff]  }
 0x323   :  { %9671 = vmatprep.mubr.bf16.mxu0 %v14572_v6  ;;  %9905 = vmatpush1.bf16.msra.mxu0 %v14652_v7  ;;  %v14646_v6 = vld [vmem:[%s19535_s0 + $0x6dc] ss:$108 sps:$4 sm:$0xff]   ;;  %v14648_v7 = vld [vmem:[%s19535_s0 + $0xdcc] ss:$108 sps:$4 sm:$0xff]  }
 0x324   :  { %9906 = vmatprep.subr.bf16.mxu0 %v15394_v0 }
 0x327   :  { %9907 = vmatpush1.bf16.msra.mxu0 %v14666_v8  ;;  %v14650_v8 = vld [vmem:[%s19535_s0 + $0x6d8] ss:$108 sps:$4 sm:$0xff]  }
 0x328   :  { %9908 = vmatprep.subr.bf16.mxu0 %v15394_v0 }
 0x329   :  { %7841 = vmatmul.mubr.bf16.gmra.mrb[116].mxu1 %v14574_v9  ;;  %v14651_v9 = vld [vmem:[%s19535_s0 + $0xdc8] ss:$108 sps:$4 sm:$0xff]  }
 0x32a   :  { %9672 = vmatmul.mubr.bf16.gmra.mrb[20].mxu0 %v14575_v10  ;;  %7848 = vmatprep.mubr.bf16.mxu1 %v14576_v11  ;;  %v14654_v10 = vld [vmem:[%s19535_s0 + $0x7b4] ss:$108 sps:$4 sm:$0xff]   ;;  %v14656_v11 = vld [vmem:[%s19535_s0 + $0xea4] ss:$108 sps:$4 sm:$0xff]  }
 0x32b   :  { %9679 = vmatprep.mubr.bf16.mxu0 %v14578_v12  ;;  %9909 = vmatpush1.bf16.msra.mxu0 %v14680_v13  ;;  %v14765_v12 = vld [vmem:[%s19534_s1 + $0x260] sm:$0xff]   ;;  %v14658_v13 = vld [vmem:[%s19535_s0 + $0x7b0] ss:$108 sps:$4 sm:$0xff]  }
 0x32c   :  { %9910 = vmatprep.subr.bf16.mxu0 %v15394_v0 }
 0x32f   :  { %9911 = vmatpush1.bf16.msra.mxu0 %v14694_v18  ;;  %v14665_v18 = vld [vmem:[%s19535_s0 + $0xf78] ss:$108 sps:$4 sm:$0xff]  }
 0x330   :  { %9912 = vmatprep.subr.bf16.mxu0 %v15394_v0 }
 0x331   :  { %7849 = vmatmul.mubr.bf16.gmra.mrb[120].mxu1 %v14580_v14  ;;  %v14659_v14 = vld [vmem:[%s19535_s0 + $0xea0] ss:$108 sps:$4 sm:$0xff]  }
 0x332   :  { %9680 = vmatmul.mubr.bf16.gmra.mrb[24].mxu0 %v14581_v15  ;;  %7856 = vmatprep.mubr.bf16.mxu1 %v14584_v16  ;;  %v14660_v15 = vld [vmem:[%s19535_s0 + $0x88c] ss:$108 sps:$4 sm:$0xff]   ;;  %v14662_v16 = vld [vmem:[%s19535_s0 + $0xf7c] ss:$108 sps:$4 sm:$0xff]  }
 0x333   :  { %9687 = vmatprep.mubr.bf16.mxu0 %v14586_v17  ;;  %9913 = vmatpush1.bf16.msra.mxu0 %v14708_v29  ;;  %v14664_v17 = vld [vmem:[%s19535_s0 + $0x888] ss:$108 sps:$4 sm:$0xff]   ;;  %v14684_v29 = vld [vmem:[%s19535_s0 + $0x1204] ss:$108 sps:$4 sm:$0xff]  }
 0x334   :  { %9914 = vmatprep.subr.bf16.mxu0 %v15394_v0 }
 0x337   :  { %9915 = vmatpush1.bf16.msra.mxu0 %v14722_v41  ;;  %v14701_v41 = vld [vmem:[%s19535_s0 + $0x13b0] ss:$108 sps:$4 sm:$0xff]  }
 0x338   :  { %9916 = vmatprep.subr.bf16.mxu0 %v15394_v0 }
 0x339   :  { %7857 = vmatmul.mubr.bf16.gmra.mrb[124].mxu1 %v14588_v19  ;;  %v14668_v19 = vld [vmem:[%s19535_s0 + $0x964] ss:$108 sps:$4 sm:$0xff]  }
 0x33a   :  { %9688 = vmatmul.mubr.bf16.gmra.mrb[28].mxu0 %v14589_v20  ;;  %7897 = vmatprep.mubr.bf16.mxu1 %v14592_v21  ;;  %v14670_v20 = vld [vmem:[%s19535_s0 + $0x1054] ss:$108 sps:$4 sm:$0xff]   ;;  %v14779_v21 = vld [vmem:[%s19534_s1 + $0x268] sm:$0xff]  }
 0x33b   :  { %9695 = vmatprep.mubr.bf16.mxu0 %v14593_v22  ;;  %9917 = vmatpush1.bf16.msra.mxu0 %v14736_v54  ;;  %v14672_v22 = vld [vmem:[%s19535_s0 + $0x960] ss:$108 sps:$4 sm:$0xff]   ;;  %v14724_v54 = vld [vmem:[%s19535_s0 + $0x1024] ss:$108 sps:$4 sm:$0xff]  }
 0x33c   :  { %9918 = vmatprep.subr.bf16.mxu0 %v15394_v0 }
 0x33f   :  { %9919 = vmatpush1.bf16.msra.mxu0 %v14750_v2  ;;  %v14743_v2 = vld [vmem:[%s19535_s0 + $0x18c0] ss:$108 sps:$4 sm:$0xff]  }
 0x340   :  { %10177 = vmatprep.subr.bf16.mxu0 %v15394_v0 }
 0x341   :  { %7898 = vmatmul.mubr.bf16.vlgmr.msra.gmra.mrb[0].mxu1 %v14590_v23  ;;  %v14673_v23 = vld [vmem:[%s19535_s0 + $0x1050] ss:$108 sps:$4 sm:$0xff]  }
 0x342   :  { %9696 = vmatmul.mubr.bf16.gmra.mrb[32].mxu0 %v14595_v24  ;;  %8155 = vmatpush1.bf16.msra.mxu1 %v14597_v25  ;;  %v14674_v24 = vld [vmem:[%s19535_s0 + $0xa3c] ss:$108 sps:$4 sm:$0xff]   ;;  %v14676_v25 = vld [vmem:[%s19535_s0 + $0x112c] ss:$108 sps:$4 sm:$0xff]  }
 0x343   :  { %7905 = vmatprep.mubr.bf16.mxu1 %v14598_v26  ;;  %9703 = vmatprep.mubr.bf16.mxu0 %v14600_v27  ;;  %v14678_v26 = vld [vmem:[%s19535_s0 + $0xa38] ss:$108 sps:$4 sm:$0xff]   ;;  %v14679_v27 = vld [vmem:[%s19535_s0 + $0x1128] ss:$108 sps:$4 sm:$0xff]  }
 0x344   :  { %8156 = vmatprep.subr.bf16.mxu1 %v15394_v0 }
 0x346   :  { %8157 = vmatpush1.bf16.msra.mxu1 %v14611_v28  ;;  %v14682_v28 = vld [vmem:[%s19535_s0 + $0xb14] ss:$108 sps:$4 sm:$0xff]  }
 0x347   :  { %8158 = vmatprep.subr.bf16.mxu1 %v15394_v0 }
 0x349   :  { %7906 = vmatmul.mubr.bf16.gmra.mrb[4].mxu1 %v14602_v30  ;;  %v14793_v30 = vld [vmem:[%s19534_s1 + $0x270] sm:$0xff]  }
 0x34a   :  { %9704 = vmatmul.mubr.bf16.gmra.mrb[36].mxu0 %v14603_v31  ;;  %7913 = vmatprep.mubr.bf16.mxu1 %v14604_v32  ;;  %v14686_v31 = vld [vmem:[%s19535_s0 + $0xb10] ss:$108 sps:$4 sm:$0xff]   ;;  %v14687_v32 = vld [vmem:[%s19535_s0 + $0x1200] ss:$108 sps:$4 sm:$0xff]  }
 0x34b   :  { %9711 = vmatprep.mubr.bf16.mxu0 %v14606_v33  ;;  %8159 = vmatpush1.bf16.msra.mxu1 %v14625_v34  ;;  %v14688_v33 = vld [vmem:[%s19535_s0 + $0xbec] ss:$108 sps:$4 sm:$0xff]   ;;  %v14690_v34 = vld [vmem:[%s19535_s0 + $0x12dc] ss:$108 sps:$4 sm:$0xff]  }
 0x34c   :  { %8160 = vmatprep.subr.bf16.mxu1 %v15394_v0 }
 0x34f   :  { %8161 = vmatpush1.bf16.msra.mxu1 %v14639_v35  ;;  %v14692_v35 = vld [vmem:[%s19535_s0 + $0xbe8] ss:$108 sps:$4 sm:$0xff]  }
 0x350   :  { %8162 = vmatprep.subr.bf16.mxu1 %v15394_v0 }
 0x351   :  { %7914 = vmatmul.mubr.bf16.gmra.mrb[8].mxu1 %v14608_v36  ;;  %v14693_v36 = vld [vmem:[%s19535_s0 + $0x12d8] ss:$108 sps:$4 sm:$0xff]  }
 0x352   :  { %9712 = vmatmul.mubr.bf16.gmra.mrb[40].mxu0 %v14609_v37  ;;  %7921 = vmatprep.mubr.bf16.mxu1 %v14612_v38  ;;  %v14696_v37 = vld [vmem:[%s19535_s0 + $0xcc4] ss:$108 sps:$4 sm:$0xff]   ;;  %v14698_v38 = vld [vmem:[%s19535_s0 + $0x13b4] ss:$108 sps:$4 sm:$0xff]  }
 0x353   :  { %9719 = vmatprep.mubr.bf16.mxu0 %v14614_v39  ;;  %8163 = vmatpush1.bf16.msra.mxu1 %v14653_v40  ;;  %v14807_v39 = vld [vmem:[%s19534_s1 + $0x278] sm:$0xff]   ;;  %v14700_v40 = vld [vmem:[%s19535_s0 + $0xcc0] ss:$108 sps:$4 sm:$0xff]  }
 0x354   :  { %8164 = vmatprep.subr.bf16.mxu1 %v15394_v0 }
 0x357   :  { %8165 = vmatpush1.bf16.msra.mxu1 %v14667_v42  ;;  %v14702_v42 = vld [vmem:[%s19535_s0 + $0xd9c] ss:$108 sps:$4 sm:$0xff]  }
 0x358   :  { %8166 = vmatprep.subr.bf16.mxu1 %v15394_v0 }
 0x359   :  { %7922 = vmatmul.mubr.bf16.gmra.mrb[12].mxu1 %v14616_v43  ;;  %v14704_v43 = vld [vmem:[%s19535_s0 + $0x148c] ss:$108 sps:$4 sm:$0xff]  }
 0x35a   :  { %9720 = vmatmul.mubr.bf16.gmra.mrb[44].mxu0 %v14617_v44  ;;  %7929 = vmatprep.mubr.bf16.mxu1 %v14618_v45  ;;  %v14706_v44 = vld [vmem:[%s19535_s0 + $0xd98] ss:$108 sps:$4 sm:$0xff]   ;;  %v14707_v45 = vld [vmem:[%s19535_s0 + $0x1488] ss:$108 sps:$4 sm:$0xff]  }
 0x35b   :  { %9727 = vmatprep.mubr.bf16.mxu0 %v14620_v46  ;;  %8167 = vmatpush1.bf16.msra.mxu1 %v14681_v47  ;;  %v14710_v46 = vld [vmem:[%s19535_s0 + $0xe74] ss:$108 sps:$4 sm:$0xff]   ;;  %v14712_v47 = vld [vmem:[%s19535_s0 + $0x1564] ss:$108 sps:$4 sm:$0xff]  }
 0x35c   :  { %8168 = vmatprep.subr.bf16.mxu1 %v15394_v0 }
 0x35f   :  { %8169 = vmatpush1.bf16.msra.mxu1 %v14695_v48  ;;  %v14714_v48 = vld [vmem:[%s19535_s0 + $0xe70] ss:$108 sps:$4 sm:$0xff]  }
 0x360   :  { %8170 = vmatprep.subr.bf16.mxu1 %v15394_v0 }
 0x361   :  { %7930 = vmatmul.mubr.bf16.gmra.mrb[16].mxu1 %v14622_v49  ;;  %v14715_v49 = vld [vmem:[%s19535_s0 + $0x1560] ss:$108 sps:$4 sm:$0xff]  }
 0x362   :  { %9728 = vmatmul.mubr.bf16.gmra.mrb[48].mxu0 %v14623_v50  ;;  %7937 = vmatprep.mubr.bf16.mxu1 %v14626_v51  ;;  %v14716_v50 = vld [vmem:[%s19535_s0 + $0xf4c] ss:$108 sps:$4 sm:$0xff]   ;;  %v14718_v51 = vld [vmem:[%s19535_s0 + $0x163c] ss:$108 sps:$4 sm:$0xff]  }
 0x363   :  { %9735 = vmatprep.mubr.bf16.mxu0 %v14628_v52  ;;  %8171 = vmatpush1.bf16.msra.mxu1 %v14709_v53  ;;  %v14720_v52 = vld [vmem:[%s19535_s0 + $0xf48] ss:$108 sps:$4 sm:$0xff]   ;;  %v14721_v53 = vld [vmem:[%s19535_s0 + $0x1638] ss:$108 sps:$4 sm:$0xff]  }
 0x364   :  { %8172 = vmatprep.subr.bf16.mxu1 %v15394_v0 }
 0x367   :  { %8173 = vmatpush1.bf16.msra.mxu1 %v14723_v55  ;;  %v14726_v55 = vld [vmem:[%s19535_s0 + $0x1714] ss:$108 sps:$4 sm:$0xff]  }
 0x368   :  { %8174 = vmatprep.subr.bf16.mxu1 %v15394_v0 }
 0x369   :  { %7938 = vmatmul.mubr.bf16.gmra.mrb[20].mxu1 %v14630_v56  ;;  %v14728_v56 = vld [vmem:[%s19535_s0 + $0x1020] ss:$108 sps:$4 sm:$0xff]  }
 0x36a   :  { %9736 = vmatmul.mubr.bf16.gmra.mrb[52].mxu0 %v14631_v57  ;;  %7945 = vmatprep.mubr.bf16.mxu1 %v14632_v58  ;;  %v14729_v57 = vld [vmem:[%s19535_s0 + $0x1710] ss:$108 sps:$4 sm:$0xff]  }
 0x36b   :  { %9743 = vmatprep.mubr.bf16.mxu0 %v14634_v59  ;;  %8175 = vmatpush1.bf16.msra.mxu1 %v14737_v60  ;;  %v14730_v58 = vld [vmem:[%s19535_s0 + $0x10fc] ss:$108 sps:$4 sm:$0xff]   ;;  %v14732_v59 = vld [vmem:[%s19535_s0 + $0x17ec] ss:$108 sps:$4 sm:$0xff]  }
 0x36c   :  { %8176 = vmatprep.subr.bf16.mxu1 %v15394_v0  ;;  %v14734_v60 = vld [vmem:[%s19535_s0 + $0x10f8] ss:$108 sps:$4 sm:$0xff]  }
 0x36f   :  { %8177 = vmatpush1.bf16.msra.mxu1 %v14751_v3  ;;  %v14744_v3 = vld [vmem:[%s19535_s0 + $0x12ac] ss:$108 sps:$4 sm:$0xff]  }
 0x370   :  { %8178 = vmatprep.subr.bf16.mxu1 %v15394_v0 }
 0x371   :  { %7946 = vmatmul.mubr.bf16.gmra.mrb[24].mxu1 %v14636_v61  ;;  %v14735_v61 = vld [vmem:[%s19535_s0 + $0x17e8] ss:$108 sps:$4 sm:$0xff]  }
 0x372   :  { %9744 = vmatmul.mubr.bf16.gmra.mrb[56].mxu0 %v14637_v62  ;;  %7953 = vmatprep.mubr.bf16.mxu1 %v14640_v63  ;;  %v14738_v62 = vld [vmem:[%s19535_s0 + $0x11d4] ss:$108 sps:$4 sm:$0xff]   ;;  %v14740_v63 = vld [vmem:[%s19535_s0 + $0x18c4] ss:$108 sps:$4 sm:$0xff]  }
 0x373   :  { %9751 = vmatprep.mubr.bf16.mxu0 %v14642_v1  ;;  %8179 = vmatpush1.bf16.msra.mxu1 %v14765_v12  ;;  %v14742_v1 = vld [vmem:[%s19535_s0 + $0x11d0] ss:$108 sps:$4 sm:$0xff]   ;;  %v14762_v12 = vld [vmem:[%s19535_s0 + $0x54] ss:$108 sps:$4 sm:$0xff]  }
 0x374   :  { %8180 = vmatprep.subr.bf16.mxu1 %v15394_v0 }
 0x377   :  { %8181 = vmatpush1.bf16.msra.mxu1 %v14779_v21  ;;  %v14772_v21 = vld [vmem:[%s19535_s0 + $0x160c] ss:$108 sps:$4 sm:$0xff]  }
 0x378   :  { %8182 = vmatprep.subr.bf16.mxu1 %v15394_v0 }
 0x379   :  { %7954 = vmatmul.mubr.bf16.gmra.mrb[28].mxu1 %v14644_v4  ;;  %v14746_v4 = vld [vmem:[%s19535_s0 + $0x199c] ss:$108 sps:$4 sm:$0xff]  }
 0x37a   :  { %9752 = vmatmul.mubr.bf16.gmra.mrb[60].mxu0 %v14645_v5  ;;  %7961 = vmatprep.mubr.bf16.mxu1 %v14646_v6  ;;  %v14748_v5 = vld [vmem:[%s19535_s0 + $0x12a8] ss:$108 sps:$4 sm:$0xff]   ;;  %v14749_v6 = vld [vmem:[%s19535_s0 + $0x1998] ss:$108 sps:$4 sm:$0xff]  }
 0x37b   :  { %9759 = vmatprep.mubr.bf16.mxu0 %v14648_v7  ;;  %8183 = vmatpush1.bf16.msra.mxu1 %v14793_v30  ;;  %v14752_v7 = vld [vmem:[%s19535_s0 + $0x1384] ss:$108 sps:$4 sm:$0xff]   ;;  %v14834_v30 = vld [vmem:[%s19534_s1 + $0x5a8] sm:$0xff]  }
 0x37c   :  { %8184 = vmatprep.subr.bf16.mxu1 %v15394_v0 }
 0x37f   :  { %8185 = vmatpush1.bf16.msra.mxu1 %v14807_v39  ;;  %v14794_v39 = vld [vmem:[%s19535_s0 + $0x1894] ss:$108 sps:$4 sm:$0xff]  }
 0x380   :  { %8443 = vmatprep.subr.bf16.mxu1 %v15394_v0 }
 0x381   :  { %7962 = vmatmul.mubr.bf16.gmra.mrb[32].mxu1 %v14650_v8  ;;  %v14754_v8 = vld [vmem:[%s19535_s0 + $0x1a74] ss:$108 sps:$4 sm:$0xff]  }
 0x382   :  { %9760 = vmatmul.mubr.bf16.gmra.mrb[64].mxu0 %v14651_v9  ;;  %7969 = vmatprep.mubr.bf16.mxu1 %v14654_v10  ;;  %v14756_v9 = vld [vmem:[%s19535_s0 + $0x1380] ss:$108 sps:$4 sm:$0xff]   ;;  %v14757_v10 = vld [vmem:[%s19535_s0 + $0x1a70] ss:$108 sps:$4 sm:$0xff]  }
 0x383   :  { %9767 = vmatprep.mubr.bf16.mxu0 %v14656_v11  ;;  %v14758_v11 = vld [vmem:[%s19535_s0 + $0x145c] ss:$108 sps:$4 sm:$0xff]  }
 0x389   :  { %7970 = vmatmul.mubr.bf16.gmra.mrb[36].mxu1 %v14658_v13  ;;  %v14763_v13 = vld [vmem:[%s19535_s0 + $0x1458] ss:$108 sps:$4 sm:$0xff]  }
 0x38a   :  { %9768 = vmatmul.mubr.bf16.gmra.mrb[68].mxu0 %v14659_v14  ;;  %7977 = vmatprep.mubr.bf16.mxu1 %v14660_v15  ;;  %v14760_v14 = vld [vmem:[%s19535_s0 + $0x50] ss:$108 sps:$4 sm:$0xff]   ;;  %v14766_v15 = vld [vmem:[%s19535_s0 + $0x1534] ss:$108 sps:$4 sm:$0xff]  }
 0x38b   :  { %9775 = vmatprep.mubr.bf16.mxu0 %v14662_v16  ;;  %v14764_v16 = vld [vmem:[%s19534_s1 + $0x580] sm:$0xff]  }
 0x391   :  { %7978 = vmatmul.mubr.bf16.gmra.mrb[40].mxu1 %v14664_v17  ;;  %v14768_v17 = vld [vmem:[%s19535_s0 + $0x12c] ss:$108 sps:$4 sm:$0xff]  }
 0x392   :  { %9776 = vmatmul.mubr.bf16.gmra.mrb[72].mxu0 %v14665_v18  ;;  %7985 = vmatprep.mubr.bf16.mxu1 %v14668_v19  ;;  %v14778_v18 = vld [vmem:[%s19534_s1 + $0x588] sm:$0xff]   ;;  %v14770_v19 = vld [vmem:[%s19535_s0 + $0x1530] ss:$108 sps:$4 sm:$0xff]  }
 0x393   :  { %9783 = vmatprep.mubr.bf16.mxu0 %v14670_v20  ;;  %v14771_v20 = vld [vmem:[%s19535_s0 + $0x128] ss:$108 sps:$4 sm:$0xff]  }
 0x399   :  { %7986 = vmatmul.mubr.bf16.gmra.mrb[44].mxu1 %v14672_v22  ;;  %v14774_v22 = vld [vmem:[%s19535_s0 + $0x204] ss:$108 sps:$4 sm:$0xff]  }
 0x39a   :  { %9784 = vmatmul.mubr.bf16.gmra.mrb[76].mxu0 %v14673_v23  ;;  %7993 = vmatprep.mubr.bf16.mxu1 %v14674_v24  ;;  %v14792_v23 = vld [vmem:[%s19534_s1 + $0x590] sm:$0xff]   ;;  %v14806_v24 = vld [vmem:[%s19534_s1 + $0x598] sm:$0xff]  }
 0x39b   :  { %9791 = vmatprep.mubr.bf16.mxu0 %v14676_v25  ;;  %v14776_v25 = vld [vmem:[%s19535_s0 + $0x1608] ss:$108 sps:$4 sm:$0xff]  }
 0x3a1   :  { %7994 = vmatmul.mubr.bf16.gmra.mrb[48].mxu1 %v14678_v26  ;;  %v14777_v26 = vld [vmem:[%s19535_s0 + $0x200] ss:$108 sps:$4 sm:$0xff]  }
 0x3a2   :  { %9792 = vmatmul.mubr.bf16.gmra.mrb[80].mxu0 %v14679_v27  ;;  %8001 = vmatprep.mubr.bf16.mxu1 %v14682_v28  ;;  %v14780_v27 = vld [vmem:[%s19535_s0 + $0x16e4] ss:$108 sps:$4 sm:$0xff]   ;;  %v14782_v28 = vld [vmem:[%s19535_s0 + $0x2dc] ss:$108 sps:$4 sm:$0xff]  }
 0x3a3   :  { %9799 = vmatprep.mubr.bf16.mxu0 %v14684_v29  ;;  %v14820_v29 = vld [vmem:[%s19534_s1 + $0x5a0] sm:$0xff]  }
 0x3a9   :  { %8002 = vmatmul.mubr.bf16.gmra.mrb[52].mxu1 %v14686_v31  ;;  %v14784_v31 = vld [vmem:[%s19535_s0 + $0x16e0] ss:$108 sps:$4 sm:$0xff]  }
 0x3aa   :  { %9800 = vmatmul.mubr.bf16.gmra.mrb[84].mxu0 %v14687_v32  ;;  %8009 = vmatprep.mubr.bf16.mxu1 %v14688_v33  ;;  %v14785_v32 = vld [vmem:[%s19535_s0 + $0x2d8] ss:$108 sps:$4 sm:$0xff]   ;;  %v14786_v33 = vld [vmem:[%s19535_s0 + $0x17bc] ss:$108 sps:$4 sm:$0xff]  }
 0x3ab   :  { %9807 = vmatprep.mubr.bf16.mxu0 %v14690_v34  ;;  %v14788_v34 = vld [vmem:[%s19535_s0 + $0x3b4] ss:$108 sps:$4 sm:$0xff]  }
 0x3b1   :  { %8010 = vmatmul.mubr.bf16.gmra.mrb[56].mxu1 %v14692_v35  ;;  %v14848_v35 = vld [vmem:[%s19534_s1 + $0x5b0] sm:$0xff]  }
 0x3b2   :  { %9808 = vmatmul.mubr.bf16.gmra.mrb[88].mxu0 %v14693_v36  ;;  %8017 = vmatprep.mubr.bf16.mxu1 %v14696_v37  ;;  %v14862_v36 = vld [vmem:[%s19534_s1 + $0x5b8] sm:$0xff]  }
 0x3b3   :  { %9815 = vmatprep.mubr.bf16.mxu0 %v14698_v38  ;;  %v14790_v37 = vld [vmem:[%s19535_s0 + $0x17b8] ss:$108 sps:$4 sm:$0xff]   ;;  %v14791_v38 = vld [vmem:[%s19535_s0 + $0x3b0] ss:$108 sps:$4 sm:$0xff]  }
 0x3b9   :  { %8018 = vmatmul.mubr.bf16.gmra.mrb[60].mxu1 %v14700_v40  ;;  %v14796_v40 = vld [vmem:[%s19535_s0 + $0x48c] ss:$108 sps:$4 sm:$0xff]  }
 0x3ba   :  { %9816 = vmatmul.mubr.bf16.gmra.mrb[92].mxu0 %v14701_v41  ;;  %8025 = vmatprep.mubr.bf16.mxu1 %v14702_v42  ;;  %v14876_v41 = vld [vmem:[%s19534_s1 + $0x5c0] sm:$0xff]   ;;  %v14890_v42 = vld [vmem:[%s19534_s1 + $0x5c8] sm:$0xff]  }
 0x3bb   :  { %9823 = vmatprep.mubr.bf16.mxu0 %v14704_v43  ;;  %v14798_v43 = vld [vmem:[%s19535_s0 + $0x1890] ss:$108 sps:$4 sm:$0xff]  }
 0x3c1   :  { %8026 = vmatmul.mubr.bf16.gmra.mrb[64].mxu1 %v14706_v44  ;;  %v14799_v44 = vld [vmem:[%s19535_s0 + $0x488] ss:$108 sps:$4 sm:$0xff]  }
 0x3c2   :  { %9824 = vmatmul.mubr.bf16.gmra.mrb[96].mxu0 %v14707_v45  ;;  %8033 = vmatprep.mubr.bf16.mxu1 %v14710_v46  ;;  %v14800_v45 = vld [vmem:[%s19535_s0 + $0x196c] ss:$108 sps:$4 sm:$0xff]   ;;  %v14802_v46 = vld [vmem:[%s19535_s0 + $0x564] ss:$108 sps:$4 sm:$0xff]  }
 0x3c3   :  { %9831 = vmatprep.mubr.bf16.mxu0 %v14712_v47  ;;  %v14904_v47 = vld [vmem:[%s19534_s1 + $0x5d0] sm:$0xff]  }
 0x3c9   :  { %8034 = vmatmul.mubr.bf16.gmra.mrb[68].mxu1 %v14714_v48  ;;  %v14804_v48 = vld [vmem:[%s19535_s0 + $0x1968] ss:$108 sps:$4 sm:$0xff]  }
 0x3ca   :  { %9832 = vmatmul.mubr.bf16.gmra.mrb[100].mxu0 %v14715_v49  ;;  %8041 = vmatprep.mubr.bf16.mxu1 %v14716_v50  ;;  %v14805_v49 = vld [vmem:[%s19535_s0 + $0x560] ss:$108 sps:$4 sm:$0xff]   ;;  %v14808_v50 = vld [vmem:[%s19535_s0 + $0x1a44] ss:$108 sps:$4 sm:$0xff]  }
 0x3cb   :  { %9839 = vmatprep.mubr.bf16.mxu0 %v14718_v51  ;;  %v14810_v51 = vld [vmem:[%s19535_s0 + $0x63c] ss:$108 sps:$4 sm:$0xff]  }
 0x3d1   :  { %8042 = vmatmul.mubr.bf16.gmra.mrb[72].mxu1 %v14720_v52  ;;  %v14918_v52 = vld [vmem:[%s19534_s1 + $0x5d8] sm:$0xff]  }
 0x3d2   :  { %9840 = vmatmul.mubr.bf16.gmra.mrb[104].mxu0 %v14721_v53  ;;  %8049 = vmatprep.mubr.bf16.mxu1 %v14724_v54  ;;  %v14812_v53 = vld [vmem:[%s19535_s0 + $0x1a40] ss:$108 sps:$4 sm:$0xff]   ;;  %v14813_v54 = vld [vmem:[%s19535_s0 + $0x638] ss:$108 sps:$4 sm:$0xff]  }
 0x3d3   :  { %9847 = vmatprep.mubr.bf16.mxu0 %v14726_v55  ;;  %v14816_v55 = vld [vmem:[%s19535_s0 + $0x24] ss:$108 sps:$4 sm:$0xff]  }
 0x3d9   :  { %8050 = vmatmul.mubr.bf16.gmra.mrb[76].mxu1 %v14728_v56  ;;  %v14817_v56 = vld [vmem:[%s19535_s0 + $0x714] ss:$108 sps:$4 sm:$0xff]  }
 0x3da   :  { %9848 = vmatmul.mubr.bf16.gmra.mrb[108].mxu0 %v14729_v57  ;;  %8057 = vmatprep.mubr.bf16.mxu1 %v14730_v58  ;;  %v14814_v57 = vld [vmem:[%s19535_s0 + $0x20] ss:$108 sps:$4 sm:$0xff]   ;;  %v14819_v58 = vld [vmem:[%s19535_s0 + $0x710] ss:$108 sps:$4 sm:$0xff]  }
 0x3db   :  { %9855 = vmatprep.mubr.bf16.mxu0 %v14732_v59  ;;  %v14821_v59 = vld [vmem:[%s19534_s1 + $0x280] sm:$0xff]  }
 0x3e1   :  { %8058 = vmatmul.mubr.bf16.gmra.mrb[80].mxu1 %v14734_v60  ;;  %v14822_v60 = vld [vmem:[%s19535_s0 + $0xfc] ss:$108 sps:$4 sm:$0xff]  }
 0x3e2   :  { %9856 = vmatmul.mubr.bf16.gmra.mrb[112].mxu0 %v14735_v61  ;;  %8065 = vmatprep.mubr.bf16.mxu1 %v14738_v62  ;;  %v14824_v61 = vld [vmem:[%s19535_s0 + $0x7ec] ss:$108 sps:$4 sm:$0xff]  }
 0x3e3   :  { %9863 = vmatprep.mubr.bf16.mxu0 %v14740_v63  ;;  %v14835_v62 = vld [vmem:[%s19534_s1 + $0x288] sm:$0xff]   ;;  %v14932_v63 = vld [vmem:[%s19534_s1 + $0x5e0] sm:$0xff]  }
 0x3e9   :  { %8066 = vmatmul.mubr.bf16.gmra.mrb[84].mxu1 %v14742_v1  ;;  %v14826_v1 = vld [vmem:[%s19535_s0 + $0xf8] ss:$108 sps:$4 sm:$0xff]  }
 0x3ea   :  { %9864 = vmatmul.mubr.bf16.gmra.mrb[116].mxu0 %v14743_v2  ;;  %8073 = vmatprep.mubr.bf16.mxu1 %v14744_v3  ;;  %v14827_v2 = vld [vmem:[%s19535_s0 + $0x7e8] ss:$108 sps:$4 sm:$0xff]  }
 0x3eb   :  { %9871 = vmatprep.mubr.bf16.mxu0 %v14746_v4  ;;  %v14828_v3 = vld [vmem:[%s19535_s0 + $0x1d4] ss:$108 sps:$4 sm:$0xff]   ;;  %v14830_v4 = vld [vmem:[%s19535_s0 + $0x8c4] ss:$108 sps:$4 sm:$0xff]  }
 0x3f1   :  { %8074 = vmatmul.mubr.bf16.gmra.mrb[88].mxu1 %v14748_v5  ;;  %v14849_v5 = vld [vmem:[%s19534_s1 + $0x290] sm:$0xff]  }
 0x3f2   :  { %9872 = vmatmul.mubr.bf16.gmra.mrb[120].mxu0 %v14749_v6  ;;  %8081 = vmatprep.mubr.bf16.mxu1 %v14752_v7  ;;  %v14863_v6 = vld [vmem:[%s19534_s1 + $0x298] sm:$0xff]  }
 0x3f3   :  { %9879 = vmatprep.mubr.bf16.mxu0 %v14754_v8  ;;  %v14832_v7 = vld [vmem:[%s19535_s0 + $0x1d0] ss:$108 sps:$4 sm:$0xff]   ;;  %v14833_v8 = vld [vmem:[%s19535_s0 + $0x8c0] ss:$108 sps:$4 sm:$0xff]  }
 0x3f9   :  { %8082 = vmatmul.mubr.bf16.gmra.mrb[92].mxu1 %v14756_v9  ;;  %v14836_v9 = vld [vmem:[%s19535_s0 + $0x2ac] ss:$108 sps:$4 sm:$0xff]  }
 0x3fa   :  { %9880 = vmatmul.mubr.bf16.gmra.mrb[124].mxu0 %v14757_v10  ;;  %8089 = vmatprep.mubr.bf16.mxu1 %v14758_v11  ;;  %v14838_v10 = vld [vmem:[%s19535_s0 + $0x99c] ss:$108 sps:$4 sm:$0xff]   ;;  %v14877_v11 = vld [vmem:[%s19534_s1 + $0x2a0] sm:$0xff]  }
 0x3fb   :  { %9920 = vmatprep.mubr.bf16.mxu0 %v14762_v12  ;;  %v14946_v12 = vld [vmem:[%s19534_s1 + $0x5e8] sm:$0xff]  }
 0x401   :  { %8090 = vmatmul.mubr.bf16.gmra.mrb[96].mxu1 %v14763_v13  ;;  %v14891_v13 = vld [vmem:[%s19534_s1 + $0x2a8] sm:$0xff]  }
 0x402   :  { %9921 = vmatmul.mubr.bf16.vlgmr.msra.gmra.mrb[0].mxu0 %v14760_v14  ;;  %8097 = vmatprep.mubr.bf16.mxu1 %v14766_v15  ;;  %v14840_v14 = vld [vmem:[%s19535_s0 + $0x2a8] ss:$108 sps:$4 sm:$0xff]   ;;  %v14841_v15 = vld [vmem:[%s19535_s0 + $0x998] ss:$108 sps:$4 sm:$0xff]  }
 0x403   :  { %10178 = vmatpush1.bf16.msra.mxu0 %v14764_v16  ;;  %9928 = vmatprep.mubr.bf16.mxu0 %v14768_v17  ;;  %v14842_v16 = vld [vmem:[%s19535_s0 + $0x384] ss:$108 sps:$4 sm:$0xff]   ;;  %v14844_v17 = vld [vmem:[%s19535_s0 + $0xa74] ss:$108 sps:$4 sm:$0xff]  }
 0x404   :  { %10179 = vmatprep.subr.bf16.mxu0 %v15394_v0 }
 0x407   :  { %10180 = vmatpush1.bf16.msra.mxu0 %v14778_v18  ;;  %v14905_v18 = vld [vmem:[%s19534_s1 + $0x2b0] sm:$0xff]  }
 0x408   :  { %10181 = vmatprep.subr.bf16.mxu0 %v15394_v0 }
 0x409   :  { %8098 = vmatmul.mubr.bf16.gmra.mrb[100].mxu1 %v14770_v19  ;;  %v14919_v19 = vld [vmem:[%s19534_s1 + $0x2b8] sm:$0xff]  }
 0x40a   :  { %9929 = vmatmul.mubr.bf16.gmra.mrb[4].mxu0 %v14771_v20  ;;  %8105 = vmatprep.mubr.bf16.mxu1 %v14772_v21  ;;  %v14846_v20 = vld [vmem:[%s19535_s0 + $0x380] ss:$108 sps:$4 sm:$0xff]   ;;  %v14847_v21 = vld [vmem:[%s19535_s0 + $0xa70] ss:$108 sps:$4 sm:$0xff]  }
 0x40b   :  { %9936 = vmatprep.mubr.bf16.mxu0 %v14774_v22  ;;  %10182 = vmatpush1.bf16.msra.mxu0 %v14792_v23  ;;  %v14850_v22 = vld [vmem:[%s19535_s0 + $0x45c] ss:$108 sps:$4 sm:$0xff]   ;;  %v14852_v23 = vld [vmem:[%s19535_s0 + $0xb4c] ss:$108 sps:$4 sm:$0xff]  }
 0x40c   :  { %10183 = vmatprep.subr.bf16.mxu0 %v15394_v0 }
 0x40f   :  { %10184 = vmatpush1.bf16.msra.mxu0 %v14806_v24  ;;  %v14933_v24 = vld [vmem:[%s19534_s1 + $0x2c0] sm:$0xff]  }
 0x410   :  { %10185 = vmatprep.subr.bf16.mxu0 %v15394_v0 }
 0x411   :  { %8106 = vmatmul.mubr.bf16.gmra.mrb[104].mxu1 %v14776_v25  ;;  %v14960_v25 = vld [vmem:[%s19534_s1 + $0x5f0] sm:$0xff]  }
 0x412   :  { %9937 = vmatmul.mubr.bf16.gmra.mrb[8].mxu0 %v14777_v26  ;;  %8113 = vmatprep.mubr.bf16.mxu1 %v14780_v27  ;;  %v14947_v26 = vld [vmem:[%s19534_s1 + $0x2c8] sm:$0xff]   ;;  %v14854_v27 = vld [vmem:[%s19535_s0 + $0x458] ss:$108 sps:$4 sm:$0xff]  }
 0x413   :  { %9944 = vmatprep.mubr.bf16.mxu0 %v14782_v28  ;;  %10186 = vmatpush1.bf16.msra.mxu0 %v14820_v29  ;;  %v14855_v28 = vld [vmem:[%s19535_s0 + $0xb48] ss:$108 sps:$4 sm:$0xff]  }
 0x414   :  { %10187 = vmatprep.subr.bf16.mxu0 %v15394_v0  ;;  %v14856_v29 = vld [vmem:[%s19535_s0 + $0x534] ss:$108 sps:$4 sm:$0xff]  }
 0x417   :  { %10188 = vmatpush1.bf16.msra.mxu0 %v14834_v30  ;;  %v14858_v30 = vld [vmem:[%s19535_s0 + $0xc24] ss:$108 sps:$4 sm:$0xff]  }
 0x418   :  { %10189 = vmatprep.subr.bf16.mxu0 %v15394_v0 }
 0x419   :  { %8114 = vmatmul.mubr.bf16.gmra.mrb[108].mxu1 %v14784_v31  ;;  %v14961_v31 = vld [vmem:[%s19534_s1 + $0x2d0] sm:$0xff]  }
 0x41a   :  { %9945 = vmatmul.mubr.bf16.gmra.mrb[12].mxu0 %v14785_v32  ;;  %8121 = vmatprep.mubr.bf16.mxu1 %v14786_v33  ;;  %v14860_v32 = vld [vmem:[%s19535_s0 + $0x530] ss:$108 sps:$4 sm:$0xff]   ;;  %v14861_v33 = vld [vmem:[%s19535_s0 + $0xc20] ss:$108 sps:$4 sm:$0xff]  }
 0x41b   :  { %9952 = vmatprep.mubr.bf16.mxu0 %v14788_v34  ;;  %10190 = vmatpush1.bf16.msra.mxu0 %v14848_v35  ;;  %v14864_v34 = vld [vmem:[%s19535_s0 + $0x60c] ss:$108 sps:$4 sm:$0xff]   ;;  %v14866_v35 = vld [vmem:[%s19535_s0 + $0xcfc] ss:$108 sps:$4 sm:$0xff]  }
 0x41c   :  { %10191 = vmatprep.subr.bf16.mxu0 %v15394_v0 }
 0x41f   :  { %10192 = vmatpush1.bf16.msra.mxu0 %v14862_v36  ;;  %v14974_v36 = vld [vmem:[%s19534_s1 + $0x5f8] sm:$0xff]  }
 0x420   :  { %10193 = vmatprep.subr.bf16.mxu0 %v15394_v0 }
 0x421   :  { %8122 = vmatmul.mubr.bf16.gmra.mrb[112].mxu1 %v14790_v37  ;;  %v14975_v37 = vld [vmem:[%s19534_s1 + $0x2d8] sm:$0xff]  }
 0x422   :  { %9953 = vmatmul.mubr.bf16.gmra.mrb[16].mxu0 %v14791_v38  ;;  %8129 = vmatprep.mubr.bf16.mxu1 %v14794_v39  ;;  %v14868_v38 = vld [vmem:[%s19535_s0 + $0x608] ss:$108 sps:$4 sm:$0xff]   ;;  %v14869_v39 = vld [vmem:[%s19535_s0 + $0xcf8] ss:$108 sps:$4 sm:$0xff]  }
 0x423   :  { %9960 = vmatprep.mubr.bf16.mxu0 %v14796_v40  ;;  %10194 = vmatpush1.bf16.msra.mxu0 %v14876_v41  ;;  %v14870_v40 = vld [vmem:[%s19535_s0 + $0x6e4] ss:$108 sps:$4 sm:$0xff]   ;;  %v14872_v41 = vld [vmem:[%s19535_s0 + $0xdd4] ss:$108 sps:$4 sm:$0xff]  }
 0x424   :  { %10195 = vmatprep.subr.bf16.mxu0 %v15394_v0 }
 0x427   :  { %10196 = vmatpush1.bf16.msra.mxu0 %v14890_v42  ;;  %v14874_v42 = vld [vmem:[%s19535_s0 + $0x6e0] ss:$108 sps:$4 sm:$0xff]  }
 0x428   :  { %10197 = vmatprep.subr.bf16.mxu0 %v15394_v0 }
 0x429   :  { %8130 = vmatmul.mubr.bf16.gmra.mrb[116].mxu1 %v14798_v43  ;;  %v14875_v43 = vld [vmem:[%s19535_s0 + $0xdd0] ss:$108 sps:$4 sm:$0xff]  }
 0x42a   :  { %9961 = vmatmul.mubr.bf16.gmra.mrb[20].mxu0 %v14799_v44  ;;  %8137 = vmatprep.mubr.bf16.mxu1 %v14800_v45  ;;  %v14878_v44 = vld [vmem:[%s19535_s0 + $0x7bc] ss:$108 sps:$4 sm:$0xff]   ;;  %v14880_v45 = vld [vmem:[%s19535_s0 + $0xeac] ss:$108 sps:$4 sm:$0xff]  }
 0x42b   :  { %9968 = vmatprep.mubr.bf16.mxu0 %v14802_v46  ;;  %10198 = vmatpush1.bf16.msra.mxu0 %v14904_v47  ;;  %v14989_v46 = vld [vmem:[%s19534_s1 + $0x2e0] sm:$0xff]  }
 0x42c   :  { %10199 = vmatprep.subr.bf16.mxu0 %v15394_v0  ;;  %v14882_v47 = vld [vmem:[%s19535_s0 + $0x7b8] ss:$108 sps:$4 sm:$0xff]  }
 0x42f   :  { %10200 = vmatpush1.bf16.msra.mxu0 %v14918_v52  ;;  %v14889_v52 = vld [vmem:[%s19535_s0 + $0xf80] ss:$108 sps:$4 sm:$0xff]  }
 0x430   :  { %10201 = vmatprep.subr.bf16.mxu0 %v15394_v0 }
 0x431   :  { %8138 = vmatmul.mubr.bf16.gmra.mrb[120].mxu1 %v14804_v48  ;;  %v14883_v48 = vld [vmem:[%s19535_s0 + $0xea8] ss:$108 sps:$4 sm:$0xff]  }
 0x432   :  { %9969 = vmatmul.mubr.bf16.gmra.mrb[24].mxu0 %v14805_v49  ;;  %8145 = vmatprep.mubr.bf16.mxu1 %v14808_v50  ;;  %v14884_v49 = vld [vmem:[%s19535_s0 + $0x894] ss:$108 sps:$4 sm:$0xff]   ;;  %v14886_v50 = vld [vmem:[%s19535_s0 + $0xf84] ss:$108 sps:$4 sm:$0xff]  }
 0x433   :  { %9976 = vmatprep.mubr.bf16.mxu0 %v14810_v51  ;;  %10202 = vmatpush1.bf16.msra.mxu0 %v14932_v63  ;;  %v14888_v51 = vld [vmem:[%s19535_s0 + $0x890] ss:$108 sps:$4 sm:$0xff]   ;;  %v14908_v63 = vld [vmem:[%s19535_s0 + $0x120c] ss:$108 sps:$4 sm:$0xff]  }
 0x434   :  { %10203 = vmatprep.subr.bf16.mxu0 %v15394_v0 }
 0x437   :  { %10204 = vmatpush1.bf16.msra.mxu0 %v14946_v12  ;;  %v14925_v12 = vld [vmem:[%s19535_s0 + $0x13b8] ss:$108 sps:$4 sm:$0xff]  }
 0x438   :  { %10205 = vmatprep.subr.bf16.mxu0 %v15394_v0 }
 0x439   :  { %8146 = vmatmul.mubr.bf16.gmra.mrb[124].mxu1 %v14812_v53  ;;  %v14892_v53 = vld [vmem:[%s19535_s0 + $0x96c] ss:$108 sps:$4 sm:$0xff]  }
 0x43a   :  { %9977 = vmatmul.mubr.bf16.gmra.mrb[28].mxu0 %v14813_v54  ;;  %8186 = vmatprep.mubr.bf16.mxu1 %v14816_v55  ;;  %v14894_v54 = vld [vmem:[%s19535_s0 + $0x105c] ss:$108 sps:$4 sm:$0xff]  }
 0x43b   :  { %9984 = vmatprep.mubr.bf16.mxu0 %v14817_v56  ;;  %10206 = vmatpush1.bf16.msra.mxu0 %v14960_v25  ;;  %v15003_v55 = vld [vmem:[%s19534_s1 + $0x2e8] sm:$0xff]  }
 0x43c   :  { %10207 = vmatprep.subr.bf16.mxu0 %v15394_v0  ;;  %v14896_v56 = vld [vmem:[%s19535_s0 + $0x968] ss:$108 sps:$4 sm:$0xff]   ;;  %v14948_v25 = vld [vmem:[%s19535_s0 + $0x102c] ss:$108 sps:$4 sm:$0xff]  }
 0x43f   :  { %10208 = vmatpush1.bf16.msra.mxu0 %v14974_v36  ;;  %v14967_v36 = vld [vmem:[%s19535_s0 + $0x18c8] ss:$108 sps:$4 sm:$0xff]  }
 0x440   :  { %10466 = vmatprep.subr.bf16.mxu0 %v15394_v0 }
 0x441   :  { %8187 = vmatmul.mubr.bf16.vlgmr.msra.gmra.mrb[0].mxu1 %v14814_v57  ;;  %v14897_v57 = vld [vmem:[%s19535_s0 + $0x1058] ss:$108 sps:$4 sm:$0xff]  }
 0x442   :  { %9985 = vmatmul.mubr.bf16.gmra.mrb[32].mxu0 %v14819_v58  ;;  %8444 = vmatpush1.bf16.msra.mxu1 %v14821_v59  ;;  %v14898_v58 = vld [vmem:[%s19535_s0 + $0xa44] ss:$108 sps:$4 sm:$0xff]   ;;  %v14900_v59 = vld [vmem:[%s19535_s0 + $0x1134] ss:$108 sps:$4 sm:$0xff]  }
 0x443   :  { %8194 = vmatprep.mubr.bf16.mxu1 %v14822_v60  ;;  %9992 = vmatprep.mubr.bf16.mxu0 %v14824_v61  ;;  %v14902_v60 = vld [vmem:[%s19535_s0 + $0xa40] ss:$108 sps:$4 sm:$0xff]   ;;  %v14903_v61 = vld [vmem:[%s19535_s0 + $0x1130] ss:$108 sps:$4 sm:$0xff]  }
 0x444   :  { %8445 = vmatprep.subr.bf16.mxu1 %v15394_v0 }
 0x446   :  { %8446 = vmatpush1.bf16.msra.mxu1 %v14835_v62  ;;  %v14906_v62 = vld [vmem:[%s19535_s0 + $0xb1c] ss:$108 sps:$4 sm:$0xff]  }
 0x447   :  { %8447 = vmatprep.subr.bf16.mxu1 %v15394_v0 }
 0x449   :  { %8195 = vmatmul.mubr.bf16.gmra.mrb[4].mxu1 %v14826_v1  ;;  %v15017_v1 = vld [vmem:[%s19534_s1 + $0x2f0] sm:$0xff]  }
 0x44a   :  { %9993 = vmatmul.mubr.bf16.gmra.mrb[36].mxu0 %v14827_v2  ;;  %8202 = vmatprep.mubr.bf16.mxu1 %v14828_v3  ;;  %v14910_v2 = vld [vmem:[%s19535_s0 + $0xb18] ss:$108 sps:$4 sm:$0xff]   ;;  %v14911_v3 = vld [vmem:[%s19535_s0 + $0x1208] ss:$108 sps:$4 sm:$0xff]  }
 0x44b   :  { %10000 = vmatprep.mubr.bf16.mxu0 %v14830_v4  ;;  %8448 = vmatpush1.bf16.msra.mxu1 %v14849_v5  ;;  %v14912_v4 = vld [vmem:[%s19535_s0 + $0xbf4] ss:$108 sps:$4 sm:$0xff]   ;;  %v14914_v5 = vld [vmem:[%s19535_s0 + $0x12e4] ss:$108 sps:$4 sm:$0xff]  }
 0x44c   :  { %8449 = vmatprep.subr.bf16.mxu1 %v15394_v0 }
 0x44f   :  { %8450 = vmatpush1.bf16.msra.mxu1 %v14863_v6  ;;  %v14916_v6 = vld [vmem:[%s19535_s0 + $0xbf0] ss:$108 sps:$4 sm:$0xff]  }
 0x450   :  { %8451 = vmatprep.subr.bf16.mxu1 %v15394_v0 }
 0x451   :  { %8203 = vmatmul.mubr.bf16.gmra.mrb[8].mxu1 %v14832_v7  ;;  %v14917_v7 = vld [vmem:[%s19535_s0 + $0x12e0] ss:$108 sps:$4 sm:$0xff]  }
 0x452   :  { %10001 = vmatmul.mubr.bf16.gmra.mrb[40].mxu0 %v14833_v8  ;;  %8210 = vmatprep.mubr.bf16.mxu1 %v14836_v9  ;;  %v14920_v8 = vld [vmem:[%s19535_s0 + $0xccc] ss:$108 sps:$4 sm:$0xff]   ;;  %v14922_v9 = vld [vmem:[%s19535_s0 + $0x13bc] ss:$108 sps:$4 sm:$0xff]  }
 0x453   :  { %10008 = vmatprep.mubr.bf16.mxu0 %v14838_v10  ;;  %8452 = vmatpush1.bf16.msra.mxu1 %v14877_v11  ;;  %v15031_v10 = vld [vmem:[%s19534_s1 + $0x2f8] sm:$0xff]   ;;  %v14924_v11 = vld [vmem:[%s19535_s0 + $0xcc8] ss:$108 sps:$4 sm:$0xff]  }
 0x454   :  { %8453 = vmatprep.subr.bf16.mxu1 %v15394_v0 }
 0x457   :  { %8454 = vmatpush1.bf16.msra.mxu1 %v14891_v13  ;;  %v14926_v13 = vld [vmem:[%s19535_s0 + $0xda4] ss:$108 sps:$4 sm:$0xff]  }
 0x458   :  { %8455 = vmatprep.subr.bf16.mxu1 %v15394_v0 }
 0x459   :  { %8211 = vmatmul.mubr.bf16.gmra.mrb[12].mxu1 %v14840_v14  ;;  %v14928_v14 = vld [vmem:[%s19535_s0 + $0x1494] ss:$108 sps:$4 sm:$0xff]  }
 0x45a   :  { %10009 = vmatmul.mubr.bf16.gmra.mrb[44].mxu0 %v14841_v15  ;;  %8218 = vmatprep.mubr.bf16.mxu1 %v14842_v16  ;;  %v14930_v15 = vld [vmem:[%s19535_s0 + $0xda0] ss:$108 sps:$4 sm:$0xff]   ;;  %v14931_v16 = vld [vmem:[%s19535_s0 + $0x1490] ss:$108 sps:$4 sm:$0xff]  }
 0x45b   :  { %10016 = vmatprep.mubr.bf16.mxu0 %v14844_v17  ;;  %8456 = vmatpush1.bf16.msra.mxu1 %v14905_v18  ;;  %v14934_v17 = vld [vmem:[%s19535_s0 + $0xe7c] ss:$108 sps:$4 sm:$0xff]   ;;  %v14936_v18 = vld [vmem:[%s19535_s0 + $0x156c] ss:$108 sps:$4 sm:$0xff]  }
 0x45c   :  { %8457 = vmatprep.subr.bf16.mxu1 %v15394_v0 }
 0x45f   :  { %8458 = vmatpush1.bf16.msra.mxu1 %v14919_v19  ;;  %v14938_v19 = vld [vmem:[%s19535_s0 + $0xe78] ss:$108 sps:$4 sm:$0xff]  }
 0x460   :  { %8459 = vmatprep.subr.bf16.mxu1 %v15394_v0 }
 0x461   :  { %8219 = vmatmul.mubr.bf16.gmra.mrb[16].mxu1 %v14846_v20  ;;  %v14939_v20 = vld [vmem:[%s19535_s0 + $0x1568] ss:$108 sps:$4 sm:$0xff]  }
 0x462   :  { %10017 = vmatmul.mubr.bf16.gmra.mrb[48].mxu0 %v14847_v21  ;;  %8226 = vmatprep.mubr.bf16.mxu1 %v14850_v22  ;;  %v14940_v21 = vld [vmem:[%s19535_s0 + $0xf54] ss:$108 sps:$4 sm:$0xff]   ;;  %v14942_v22 = vld [vmem:[%s19535_s0 + $0x1644] ss:$108 sps:$4 sm:$0xff]  }
 0x463   :  { %10024 = vmatprep.mubr.bf16.mxu0 %v14852_v23  ;;  %8460 = vmatpush1.bf16.msra.mxu1 %v14933_v24  ;;  %v14944_v23 = vld [vmem:[%s19535_s0 + $0xf50] ss:$108 sps:$4 sm:$0xff]   ;;  %v14945_v24 = vld [vmem:[%s19535_s0 + $0x1640] ss:$108 sps:$4 sm:$0xff]  }
 0x464   :  { %8461 = vmatprep.subr.bf16.mxu1 %v15394_v0 }
 0x467   :  { %8462 = vmatpush1.bf16.msra.mxu1 %v14947_v26  ;;  %v14950_v26 = vld [vmem:[%s19535_s0 + $0x171c] ss:$108 sps:$4 sm:$0xff]  }
 0x468   :  { %8463 = vmatprep.subr.bf16.mxu1 %v15394_v0 }
 0x469   :  { %8227 = vmatmul.mubr.bf16.gmra.mrb[20].mxu1 %v14854_v27  ;;  %v14952_v27 = vld [vmem:[%s19535_s0 + $0x1028] ss:$108 sps:$4 sm:$0xff]  }
 0x46a   :  { %10025 = vmatmul.mubr.bf16.gmra.mrb[52].mxu0 %v14855_v28  ;;  %8234 = vmatprep.mubr.bf16.mxu1 %v14856_v29  ;;  %v14953_v28 = vld [vmem:[%s19535_s0 + $0x1718] ss:$108 sps:$4 sm:$0xff]  }
 0x46b   :  { %10032 = vmatprep.mubr.bf16.mxu0 %v14858_v30  ;;  %8464 = vmatpush1.bf16.msra.mxu1 %v14961_v31  ;;  %v14954_v29 = vld [vmem:[%s19535_s0 + $0x1104] ss:$108 sps:$4 sm:$0xff]   ;;  %v14956_v30 = vld [vmem:[%s19535_s0 + $0x17f4] ss:$108 sps:$4 sm:$0xff]  }
 0x46c   :  { %8465 = vmatprep.subr.bf16.mxu1 %v15394_v0  ;;  %v14958_v31 = vld [vmem:[%s19535_s0 + $0x1100] ss:$108 sps:$4 sm:$0xff]  }
 0x46f   :  { %8466 = vmatpush1.bf16.msra.mxu1 %v14975_v37  ;;  %v14968_v37 = vld [vmem:[%s19535_s0 + $0x12b4] ss:$108 sps:$4 sm:$0xff]  }
 0x470   :  { %8467 = vmatprep.subr.bf16.mxu1 %v15394_v0 }
 0x471   :  { %8235 = vmatmul.mubr.bf16.gmra.mrb[24].mxu1 %v14860_v32  ;;  %v14959_v32 = vld [vmem:[%s19535_s0 + $0x17f0] ss:$108 sps:$4 sm:$0xff]  }
 0x472   :  { %10033 = vmatmul.mubr.bf16.gmra.mrb[56].mxu0 %v14861_v33  ;;  %8242 = vmatprep.mubr.bf16.mxu1 %v14864_v34  ;;  %v14962_v33 = vld [vmem:[%s19535_s0 + $0x11dc] ss:$108 sps:$4 sm:$0xff]   ;;  %v14964_v34 = vld [vmem:[%s19535_s0 + $0x18cc] ss:$108 sps:$4 sm:$0xff]  }
 0x473   :  { %10040 = vmatprep.mubr.bf16.mxu0 %v14866_v35  ;;  %8468 = vmatpush1.bf16.msra.mxu1 %v14989_v46  ;;  %v14966_v35 = vld [vmem:[%s19535_s0 + $0x11d8] ss:$108 sps:$4 sm:$0xff]   ;;  %v14986_v46 = vld [vmem:[%s19535_s0 + $0x5c] ss:$108 sps:$4 sm:$0xff]  }
 0x474   :  { %8469 = vmatprep.subr.bf16.mxu1 %v15394_v0 }
 0x477   :  { %8470 = vmatpush1.bf16.msra.mxu1 %v15003_v55  ;;  %v14996_v55 = vld [vmem:[%s19535_s0 + $0x1614] ss:$108 sps:$4 sm:$0xff]  }
 0x478   :  { %8471 = vmatprep.subr.bf16.mxu1 %v15394_v0 }
 0x479   :  { %8243 = vmatmul.mubr.bf16.gmra.mrb[28].mxu1 %v14868_v38  ;;  %v14970_v38 = vld [vmem:[%s19535_s0 + $0x19a4] ss:$108 sps:$4 sm:$0xff]  }
 0x47a   :  { %10041 = vmatmul.mubr.bf16.gmra.mrb[60].mxu0 %v14869_v39  ;;  %8250 = vmatprep.mubr.bf16.mxu1 %v14870_v40  ;;  %v14972_v39 = vld [vmem:[%s19535_s0 + $0x12b0] ss:$108 sps:$4 sm:$0xff]   ;;  %v14973_v40 = vld [vmem:[%s19535_s0 + $0x19a0] ss:$108 sps:$4 sm:$0xff]  }
 0x47b   :  { %10048 = vmatprep.mubr.bf16.mxu0 %v14872_v41  ;;  %8472 = vmatpush1.bf16.msra.mxu1 %v15017_v1  ;;  %v14976_v41 = vld [vmem:[%s19535_s0 + $0x138c] ss:$108 sps:$4 sm:$0xff]  }
 0x47c   :  { %8473 = vmatprep.subr.bf16.mxu1 %v15394_v0  ;;  %v15057_v1 = vld [vmem:[%s19534_s1 + $0x628] sm:$0xff]  }
 0x47f   :  { %8474 = vmatpush1.bf16.msra.mxu1 %v15031_v10  ;;  %v15018_v10 = vld [vmem:[%s19535_s0 + $0x189c] ss:$108 sps:$4 sm:$0xff]  }
 0x480   :  { %12313 = vmatprep.subr.bf16.mxu1 %v15394_v0 }
 0x481   :  { %8251 = vmatmul.mubr.bf16.gmra.mrb[32].mxu1 %v14874_v42  ;;  %v14978_v42 = vld [vmem:[%s19535_s0 + $0x1a7c] ss:$108 sps:$4 sm:$0xff]  }
 0x482   :  { %10049 = vmatmul.mubr.bf16.gmra.mrb[64].mxu0 %v14875_v43  ;;  %8258 = vmatprep.mubr.bf16.mxu1 %v14878_v44  ;;  %v14980_v43 = vld [vmem:[%s19535_s0 + $0x1388] ss:$108 sps:$4 sm:$0xff]   ;;  %v14981_v44 = vld [vmem:[%s19535_s0 + $0x1a78] ss:$108 sps:$4 sm:$0xff]  }
 0x483   :  { %10056 = vmatprep.mubr.bf16.mxu0 %v14880_v45  ;;  %v14982_v45 = vld [vmem:[%s19535_s0 + $0x1464] ss:$108 sps:$4 sm:$0xff]  }
 0x489   :  { %8259 = vmatmul.mubr.bf16.gmra.mrb[36].mxu1 %v14882_v47  ;;  %v14987_v47 = vld [vmem:[%s19535_s0 + $0x1460] ss:$108 sps:$4 sm:$0xff]  }
 0x48a   :  { %10057 = vmatmul.mubr.bf16.gmra.mrb[68].mxu0 %v14883_v48  ;;  %8266 = vmatprep.mubr.bf16.mxu1 %v14884_v49  ;;  %v14984_v48 = vld [vmem:[%s19535_s0 + $0x58] ss:$108 sps:$4 sm:$0xff]   ;;  %v14990_v49 = vld [vmem:[%s19535_s0 + $0x153c] ss:$108 sps:$4 sm:$0xff]  }
 0x48b   :  { %10064 = vmatprep.mubr.bf16.mxu0 %v14886_v50  ;;  %v14988_v50 = vld [vmem:[%s19534_s1 + $0x600] sm:$0xff]  }
 0x491   :  { %8267 = vmatmul.mubr.bf16.gmra.mrb[40].mxu1 %v14888_v51  ;;  %v14992_v51 = vld [vmem:[%s19535_s0 + $0x134] ss:$108 sps:$4 sm:$0xff]  }
 0x492   :  { %10065 = vmatmul.mubr.bf16.gmra.mrb[72].mxu0 %v14889_v52  ;;  %8274 = vmatprep.mubr.bf16.mxu1 %v14892_v53  ;;  %v15002_v52 = vld [vmem:[%s19534_s1 + $0x608] sm:$0xff]   ;;  %v14994_v53 = vld [vmem:[%s19535_s0 + $0x1538] ss:$108 sps:$4 sm:$0xff]  }
 0x493   :  { %10072 = vmatprep.mubr.bf16.mxu0 %v14894_v54  ;;  %v14995_v54 = vld [vmem:[%s19535_s0 + $0x130] ss:$108 sps:$4 sm:$0xff]  }
 0x499   :  { %8275 = vmatmul.mubr.bf16.gmra.mrb[44].mxu1 %v14896_v56  ;;  %v14998_v56 = vld [vmem:[%s19535_s0 + $0x20c] ss:$108 sps:$4 sm:$0xff]  }
 0x49a   :  { %10073 = vmatmul.mubr.bf16.gmra.mrb[76].mxu0 %v14897_v57  ;;  %8282 = vmatprep.mubr.bf16.mxu1 %v14898_v58  ;;  %v15016_v57 = vld [vmem:[%s19534_s1 + $0x610] sm:$0xff]   ;;  %v15030_v58 = vld [vmem:[%s19534_s1 + $0x618] sm:$0xff]  }
 0x49b   :  { %10080 = vmatprep.mubr.bf16.mxu0 %v14900_v59  ;;  %v15000_v59 = vld [vmem:[%s19535_s0 + $0x1610] ss:$108 sps:$4 sm:$0xff]  }
 0x4a1   :  { %8283 = vmatmul.mubr.bf16.gmra.mrb[48].mxu1 %v14902_v60  ;;  %v15001_v60 = vld [vmem:[%s19535_s0 + $0x208] ss:$108 sps:$4 sm:$0xff]  }
 0x4a2   :  { %10081 = vmatmul.mubr.bf16.gmra.mrb[80].mxu0 %v14903_v61  ;;  %8290 = vmatprep.mubr.bf16.mxu1 %v14906_v62  ;;  %v15004_v61 = vld [vmem:[%s19535_s0 + $0x16ec] ss:$108 sps:$4 sm:$0xff]   ;;  %v15006_v62 = vld [vmem:[%s19535_s0 + $0x2e4] ss:$108 sps:$4 sm:$0xff]  }
 0x4a3   :  { %10088 = vmatprep.mubr.bf16.mxu0 %v14908_v63  ;;  %v15044_v63 = vld [vmem:[%s19534_s1 + $0x620] sm:$0xff]  }
 0x4a9   :  { %8291 = vmatmul.mubr.bf16.gmra.mrb[52].mxu1 %v14910_v2  ;;  %v15008_v2 = vld [vmem:[%s19535_s0 + $0x16e8] ss:$108 sps:$4 sm:$0xff]  }
 0x4aa   :  { %10089 = vmatmul.mubr.bf16.gmra.mrb[84].mxu0 %v14911_v3  ;;  %8298 = vmatprep.mubr.bf16.mxu1 %v14912_v4  ;;  %v15009_v3 = vld [vmem:[%s19535_s0 + $0x2e0] ss:$108 sps:$4 sm:$0xff]   ;;  %v15010_v4 = vld [vmem:[%s19535_s0 + $0x17c4] ss:$108 sps:$4 sm:$0xff]  }
 0x4ab   :  { %10096 = vmatprep.mubr.bf16.mxu0 %v14914_v5  ;;  %v15012_v5 = vld [vmem:[%s19535_s0 + $0x3bc] ss:$108 sps:$4 sm:$0xff]  }
 0x4b1   :  { %8299 = vmatmul.mubr.bf16.gmra.mrb[56].mxu1 %v14916_v6  ;;  %v15070_v6 = vld [vmem:[%s19534_s1 + $0x630] sm:$0xff]  }
 0x4b2   :  { %10097 = vmatmul.mubr.bf16.gmra.mrb[88].mxu0 %v14917_v7  ;;  %8306 = vmatprep.mubr.bf16.mxu1 %v14920_v8  ;;  %v15083_v7 = vld [vmem:[%s19534_s1 + $0x638] sm:$0xff]   ;;  %v15014_v8 = vld [vmem:[%s19535_s0 + $0x17c0] ss:$108 sps:$4 sm:$0xff]  }
 0x4b3   :  { %10104 = vmatprep.mubr.bf16.mxu0 %v14922_v9  ;;  %v15015_v9 = vld [vmem:[%s19535_s0 + $0x3b8] ss:$108 sps:$4 sm:$0xff]  }
 0x4b9   :  { %8307 = vmatmul.mubr.bf16.gmra.mrb[60].mxu1 %v14924_v11  ;;  %v15020_v11 = vld [vmem:[%s19535_s0 + $0x494] ss:$108 sps:$4 sm:$0xff]  }
 0x4ba   :  { %10105 = vmatmul.mubr.bf16.gmra.mrb[92].mxu0 %v14925_v12  ;;  %8314 = vmatprep.mubr.bf16.mxu1 %v14926_v13  ;;  %v15096_v12 = vld [vmem:[%s19534_s1 + $0x640] sm:$0xff]   ;;  %v15109_v13 = vld [vmem:[%s19534_s1 + $0x648] sm:$0xff]  }
 0x4bb   :  { %10112 = vmatprep.mubr.bf16.mxu0 %v14928_v14  ;;  %v15022_v14 = vld [vmem:[%s19535_s0 + $0x1898] ss:$108 sps:$4 sm:$0xff]  }
 0x4c1   :  { %8315 = vmatmul.mubr.bf16.gmra.mrb[64].mxu1 %v14930_v15  ;;  %v15023_v15 = vld [vmem:[%s19535_s0 + $0x490] ss:$108 sps:$4 sm:$0xff]  }
 0x4c2   :  { %10113 = vmatmul.mubr.bf16.gmra.mrb[96].mxu0 %v14931_v16  ;;  %8322 = vmatprep.mubr.bf16.mxu1 %v14934_v17  ;;  %v15024_v16 = vld [vmem:[%s19535_s0 + $0x1974] ss:$108 sps:$4 sm:$0xff]   ;;  %v15026_v17 = vld [vmem:[%s19535_s0 + $0x56c] ss:$108 sps:$4 sm:$0xff]  }
 0x4c3   :  { %10120 = vmatprep.mubr.bf16.mxu0 %v14936_v18  ;;  %v15122_v18 = vld [vmem:[%s19534_s1 + $0x650] sm:$0xff]  }
 0x4c9   :  { %8323 = vmatmul.mubr.bf16.gmra.mrb[68].mxu1 %v14938_v19  ;;  %v15028_v19 = vld [vmem:[%s19535_s0 + $0x1970] ss:$108 sps:$4 sm:$0xff]  }
 0x4ca   :  { %10121 = vmatmul.mubr.bf16.gmra.mrb[100].mxu0 %v14939_v20  ;;  %8330 = vmatprep.mubr.bf16.mxu1 %v14940_v21  ;;  %v15029_v20 = vld [vmem:[%s19535_s0 + $0x568] ss:$108 sps:$4 sm:$0xff]   ;;  %v15032_v21 = vld [vmem:[%s19535_s0 + $0x1a4c] ss:$108 sps:$4 sm:$0xff]  }
 0x4cb   :  { %10128 = vmatprep.mubr.bf16.mxu0 %v14942_v22  ;;  %v15034_v22 = vld [vmem:[%s19535_s0 + $0x644] ss:$108 sps:$4 sm:$0xff]  }
 0x4d1   :  { %8331 = vmatmul.mubr.bf16.gmra.mrb[72].mxu1 %v14944_v23  ;;  %v15135_v23 = vld [vmem:[%s19534_s1 + $0x658] sm:$0xff]  }
 0x4d2   :  { %10129 = vmatmul.mubr.bf16.gmra.mrb[104].mxu0 %v14945_v24  ;;  %8338 = vmatprep.mubr.bf16.mxu1 %v14948_v25  ;;  %v15036_v24 = vld [vmem:[%s19535_s0 + $0x1a48] ss:$108 sps:$4 sm:$0xff]   ;;  %v15037_v25 = vld [vmem:[%s19535_s0 + $0x640] ss:$108 sps:$4 sm:$0xff]  }
 0x4d3   :  { %10136 = vmatprep.mubr.bf16.mxu0 %v14950_v26  ;;  %v15040_v26 = vld [vmem:[%s19535_s0 + $0x2c] ss:$108 sps:$4 sm:$0xff]  }
 0x4d9   :  { %8339 = vmatmul.mubr.bf16.gmra.mrb[76].mxu1 %v14952_v27  ;;  %v15041_v27 = vld [vmem:[%s19535_s0 + $0x71c] ss:$108 sps:$4 sm:$0xff]  }
 0x4da   :  { %10137 = vmatmul.mubr.bf16.gmra.mrb[108].mxu0 %v14953_v28  ;;  %8346 = vmatprep.mubr.bf16.mxu1 %v14954_v29  ;;  %v15038_v28 = vld [vmem:[%s19535_s0 + $0x28] ss:$108 sps:$4 sm:$0xff]   ;;  %v15043_v29 = vld [vmem:[%s19535_s0 + $0x718] ss:$108 sps:$4 sm:$0xff]  }
 0x4db   :  { %10144 = vmatprep.mubr.bf16.mxu0 %v14956_v30  ;;  %v15045_v30 = vld [vmem:[%s19535_s0 + $0x104] ss:$108 sps:$4 sm:$0xff]  }
 0x4e1   :  { %8347 = vmatmul.mubr.bf16.gmra.mrb[80].mxu1 %v14958_v31  ;;  %v15047_v31 = vld [vmem:[%s19535_s0 + $0x7f4] ss:$108 sps:$4 sm:$0xff]  }
 0x4e2   :  { %10145 = vmatmul.mubr.bf16.gmra.mrb[112].mxu0 %v14959_v32  ;;  %8354 = vmatprep.mubr.bf16.mxu1 %v14962_v33  ;;  %v15378_v32 = vld [vmem:[%s19534_s1 + $0x300] sm:$0xff]  }
 0x4e3   :  { %10152 = vmatprep.mubr.bf16.mxu0 %v14964_v34  ;;  %v15148_v33 = vld [vmem:[%s19534_s1 + $0x660] sm:$0xff]  }
 0x4e4   :  { %v15049_v34 = vld [vmem:[%s19535_s0 + $0x100] ss:$108 sps:$4 sm:$0xff]  }
 0x4e9   :  { %8355 = vmatmul.mubr.bf16.gmra.mrb[84].mxu1 %v14966_v35  ;;  %v15050_v35 = vld [vmem:[%s19535_s0 + $0x7f0] ss:$108 sps:$4 sm:$0xff]  }
 0x4ea   :  { %10153 = vmatmul.mubr.bf16.gmra.mrb[116].mxu0 %v14967_v36  ;;  %8362 = vmatprep.mubr.bf16.mxu1 %v14968_v37  ;;  %v15051_v36 = vld [vmem:[%s19535_s0 + $0x1dc] ss:$108 sps:$4 sm:$0xff]  }
 0x4eb   :  { %10160 = vmatprep.mubr.bf16.mxu0 %v14970_v38  ;;  %v15379_v37 = vld [vmem:[%s19534_s1 + $0x308] sm:$0xff]  }
 0x4ec   :  { %v15053_v38 = vld [vmem:[%s19535_s0 + $0x8cc] ss:$108 sps:$4 sm:$0xff]  }
 0x4f1   :  { %8363 = vmatmul.mubr.bf16.gmra.mrb[88].mxu1 %v14972_v39  ;;  %v15380_v39 = vld [vmem:[%s19534_s1 + $0x310] sm:$0xff]  }
 0x4f2   :  { %10161 = vmatmul.mubr.bf16.gmra.mrb[120].mxu0 %v14973_v40  ;;  %8370 = vmatprep.mubr.bf16.mxu1 %v14976_v41  ;;  %v15055_v40 = vld [vmem:[%s19535_s0 + $0x1d8] ss:$108 sps:$4 sm:$0xff]   ;;  %v15056_v41 = vld [vmem:[%s19535_s0 + $0x8c8] ss:$108 sps:$4 sm:$0xff]  }
 0x4f3   :  { %10168 = vmatprep.mubr.bf16.mxu0 %v14978_v42  ;;  %v15058_v42 = vld [vmem:[%s19535_s0 + $0x2b4] ss:$108 sps:$4 sm:$0xff]  }
 0x4f9   :  { %8371 = vmatmul.mubr.bf16.gmra.mrb[92].mxu1 %v14980_v43  ;;  %v15060_v43 = vld [vmem:[%s19535_s0 + $0x9a4] ss:$108 sps:$4 sm:$0xff]  }
 0x4fa   :  { %10169 = vmatmul.mubr.bf16.gmra.mrb[124].mxu0 %v14981_v44  ;;  %8378 = vmatprep.mubr.bf16.mxu1 %v14982_v45  ;;  %v15381_v44 = vld [vmem:[%s19534_s1 + $0x318] sm:$0xff]   ;;  %v15161_v45 = vld [vmem:[%s19534_s1 + $0x668] sm:$0xff]  }
 0x4fb   :  { %10209 = vmatprep.mubr.bf16.mxu0 %v14986_v46  ;;  %v15382_v46 = vld [vmem:[%s19534_s1 + $0x320] sm:$0xff]  }
 0x501   :  { %8379 = vmatmul.mubr.bf16.gmra.mrb[96].mxu1 %v14987_v47  ;;  %v15062_v47 = vld [vmem:[%s19535_s0 + $0x2b0] ss:$108 sps:$4 sm:$0xff]  }
 0x502   :  { %10210 = vmatmul.mubr.bf16.vlgmr.msra.gmra.mrb[0].mxu0 %v14984_v48  ;;  %8386 = vmatprep.mubr.bf16.mxu1 %v14990_v49  ;;  %v15063_v48 = vld [vmem:[%s19535_s0 + $0x9a0] ss:$108 sps:$4 sm:$0xff]  }
 0x503   :  { %10467 = vmatpush1.bf16.msra.mxu0 %v14988_v50  ;;  %10217 = vmatprep.mubr.bf16.mxu0 %v14992_v51  ;;  %v15064_v49 = vld [vmem:[%s19535_s0 + $0x38c] ss:$108 sps:$4 sm:$0xff]   ;;  %v15066_v50 = vld [vmem:[%s19535_s0 + $0xa7c] ss:$108 sps:$4 sm:$0xff]  }
 0x504   :  { %10468 = vmatprep.subr.bf16.mxu0 %v15394_v0  ;;  %v15383_v51 = vld [vmem:[%s19534_s1 + $0x328] sm:$0xff]  }
 0x507   :  { %10469 = vmatpush1.bf16.msra.mxu0 %v15002_v52  ;;  %v15384_v52 = vld [vmem:[%s19534_s1 + $0x330] sm:$0xff]  }
 0x508   :  { %10470 = vmatprep.subr.bf16.mxu0 %v15394_v0 }
 0x509   :  { %8387 = vmatmul.mubr.bf16.gmra.mrb[100].mxu1 %v14994_v53  ;;  %v15068_v53 = vld [vmem:[%s19535_s0 + $0x388] ss:$108 sps:$4 sm:$0xff]  }
 0x50a   :  { %10218 = vmatmul.mubr.bf16.gmra.mrb[4].mxu0 %v14995_v54  ;;  %8394 = vmatprep.mubr.bf16.mxu1 %v14996_v55  ;;  %v15069_v54 = vld [vmem:[%s19535_s0 + $0xa78] ss:$108 sps:$4 sm:$0xff]  }
 0x50b   :  { %10225 = vmatprep.mubr.bf16.mxu0 %v14998_v56  ;;  %10471 = vmatpush1.bf16.msra.mxu0 %v15016_v57  ;;  %v15071_v55 = vld [vmem:[%s19535_s0 + $0x464] ss:$108 sps:$4 sm:$0xff]   ;;  %v15073_v56 = vld [vmem:[%s19535_s0 + $0xb54] ss:$108 sps:$4 sm:$0xff]   ;;  %v15385_v57 = vld [vmem:[%s19534_s1 + $0x338] sm:$0xff]  }
 0x50c   :  { %10472 = vmatprep.subr.bf16.mxu0 %v15394_v0 }
 0x50f   :  { %10473 = vmatpush1.bf16.msra.mxu0 %v15030_v58  ;;  %v15174_v58 = vld [vmem:[%s19534_s1 + $0x670] sm:$0xff]  }
 0x510   :  { %10474 = vmatprep.subr.bf16.mxu0 %v15394_v0 }
 0x511   :  { %8395 = vmatmul.mubr.bf16.gmra.mrb[104].mxu1 %v15000_v59  ;;  %v15386_v59 = vld [vmem:[%s19534_s1 + $0x340] sm:$0xff]  }
 0x512   :  { %10226 = vmatmul.mubr.bf16.gmra.mrb[8].mxu0 %v15001_v60  ;;  %8402 = vmatprep.mubr.bf16.mxu1 %v15004_v61  ;;  %v15075_v60 = vld [vmem:[%s19535_s0 + $0x460] ss:$108 sps:$4 sm:$0xff]   ;;  %v15076_v61 = vld [vmem:[%s19535_s0 + $0xb50] ss:$108 sps:$4 sm:$0xff]  }
 0x513   :  { %10233 = vmatprep.mubr.bf16.mxu0 %v15006_v62  ;;  %10475 = vmatpush1.bf16.msra.mxu0 %v15044_v63  ;;  %v15077_v62 = vld [vmem:[%s19535_s0 + $0x53c] ss:$108 sps:$4 sm:$0xff]   ;;  %v15079_v63 = vld [vmem:[%s19535_s0 + $0xc2c] ss:$108 sps:$4 sm:$0xff]  }
 0x514   :  { %10476 = vmatprep.subr.bf16.mxu0 %v15394_v0 }
 0x517   :  { %10477 = vmatpush1.bf16.msra.mxu0 %v15057_v1  ;;  %v15387_v1 = vld [vmem:[%s19534_s1 + $0x348] sm:$0xff]  }
 0x518   :  { %10478 = vmatprep.subr.bf16.mxu0 %v15394_v0 }
 0x519   :  { %8403 = vmatmul.mubr.bf16.gmra.mrb[108].mxu1 %v15008_v2  ;;  %v15388_v2 = vld [vmem:[%s19534_s1 + $0x350] sm:$0xff]  }
 0x51a   :  { %10234 = vmatmul.mubr.bf16.gmra.mrb[12].mxu0 %v15009_v3  ;;  %8410 = vmatprep.mubr.bf16.mxu1 %v15010_v4  ;;  %v15081_v3 = vld [vmem:[%s19535_s0 + $0x538] ss:$108 sps:$4 sm:$0xff]   ;;  %v15082_v4 = vld [vmem:[%s19535_s0 + $0xc28] ss:$108 sps:$4 sm:$0xff]  }
 0x51b   :  { %10241 = vmatprep.mubr.bf16.mxu0 %v15012_v5  ;;  %10479 = vmatpush1.bf16.msra.mxu0 %v15070_v6  ;;  %v15084_v5 = vld [vmem:[%s19535_s0 + $0x614] ss:$108 sps:$4 sm:$0xff]   ;;  %v15086_v6 = vld [vmem:[%s19535_s0 + $0xd04] ss:$108 sps:$4 sm:$0xff]  }
 0x51c   :  { %10480 = vmatprep.subr.bf16.mxu0 %v15394_v0 }
 0x51f   :  { %10481 = vmatpush1.bf16.msra.mxu0 %v15083_v7  ;;  %v15389_v7 = vld [vmem:[%s19534_s1 + $0x358] sm:$0xff]  }
 0x520   :  { %10482 = vmatprep.subr.bf16.mxu0 %v15394_v0 }
 0x521   :  { %8411 = vmatmul.mubr.bf16.gmra.mrb[112].mxu1 %v15014_v8  ;;  %v15187_v8 = vld [vmem:[%s19534_s1 + $0x678] sm:$0xff]  }
 0x522   :  { %10242 = vmatmul.mubr.bf16.gmra.mrb[16].mxu0 %v15015_v9  ;;  %8418 = vmatprep.mubr.bf16.mxu1 %v15018_v10  ;;  %v15390_v9 = vld [vmem:[%s19534_s1 + $0x360] sm:$0xff]   ;;  %v15088_v10 = vld [vmem:[%s19535_s0 + $0x610] ss:$108 sps:$4 sm:$0xff]  }
 0x523   :  { %10249 = vmatprep.mubr.bf16.mxu0 %v15020_v11  ;;  %10483 = vmatpush1.bf16.msra.mxu0 %v15096_v12  ;;  %v15089_v11 = vld [vmem:[%s19535_s0 + $0xd00] ss:$108 sps:$4 sm:$0xff]  }
 0x524   :  { %10484 = vmatprep.subr.bf16.mxu0 %v15394_v0  ;;  %v15090_v12 = vld [vmem:[%s19535_s0 + $0x6ec] ss:$108 sps:$4 sm:$0xff]  }
 0x527   :  { %10485 = vmatpush1.bf16.msra.mxu0 %v15109_v13  ;;  %v15092_v13 = vld [vmem:[%s19535_s0 + $0xddc] ss:$108 sps:$4 sm:$0xff]  }
 0x528   :  { %10486 = vmatprep.subr.bf16.mxu0 %v15394_v0 }
 0x529   :  { %8419 = vmatmul.mubr.bf16.gmra.mrb[116].mxu1 %v15022_v14  ;;  %v15391_v14 = vld [vmem:[%s19534_s1 + $0x368] sm:$0xff]  }
 0x52a   :  { %10250 = vmatmul.mubr.bf16.gmra.mrb[20].mxu0 %v15023_v15  ;;  %8426 = vmatprep.mubr.bf16.mxu1 %v15024_v16  ;;  %v15392_v15 = vld [vmem:[%s19534_s1 + $0x370] sm:$0xff]  }
 0x52b   :  { %10257 = vmatprep.mubr.bf16.mxu0 %v15026_v17  ;;  %10487 = vmatpush1.bf16.msra.mxu0 %v15122_v18  ;;  %v15094_v16 = vld [vmem:[%s19535_s0 + $0x6e8] ss:$108 sps:$4 sm:$0xff]   ;;  %v15095_v17 = vld [vmem:[%s19535_s0 + $0xdd8] ss:$108 sps:$4 sm:$0xff]  }
 0x52c   :  { %10488 = vmatprep.subr.bf16.mxu0 %v15394_v0  ;;  %v15097_v18 = vld [vmem:[%s19535_s0 + $0x7c4] ss:$108 sps:$4 sm:$0xff]  }
 0x52f   :  { %10489 = vmatpush1.bf16.msra.mxu0 %v15135_v23  ;;  %v15105_v23 = vld [vmem:[%s19535_s0 + $0xf8c] ss:$108 sps:$4 sm:$0xff]  }
 0x530   :  { %10490 = vmatprep.subr.bf16.mxu0 %v15394_v0 }
 0x531   :  { %8427 = vmatmul.mubr.bf16.gmra.mrb[120].mxu1 %v15028_v19  ;;  %v15099_v19 = vld [vmem:[%s19535_s0 + $0xeb4] ss:$108 sps:$4 sm:$0xff]  }
 0x532   :  { %10258 = vmatmul.mubr.bf16.gmra.mrb[24].mxu0 %v15029_v20  ;;  %8434 = vmatprep.mubr.bf16.mxu1 %v15032_v21  ;;  %v15101_v20 = vld [vmem:[%s19535_s0 + $0x7c0] ss:$108 sps:$4 sm:$0xff]   ;;  %v15102_v21 = vld [vmem:[%s19535_s0 + $0xeb0] ss:$108 sps:$4 sm:$0xff]  }
 0x533   :  { %10265 = vmatprep.mubr.bf16.mxu0 %v15034_v22  ;;  %10491 = vmatpush1.bf16.msra.mxu0 %v15148_v33  ;;  %v15103_v22 = vld [vmem:[%s19535_s0 + $0x89c] ss:$108 sps:$4 sm:$0xff]   ;;  %v15121_v33 = vld [vmem:[%s19535_s0 + $0x1138] ss:$108 sps:$4 sm:$0xff]  }
 0x534   :  { %10492 = vmatprep.subr.bf16.mxu0 %v15394_v0 }
 0x537   :  { %10493 = vmatpush1.bf16.msra.mxu0 %v15161_v45  ;;  %v15141_v45 = vld [vmem:[%s19535_s0 + $0x13c0] ss:$108 sps:$4 sm:$0xff]  }
 0x538   :  { %10494 = vmatprep.subr.bf16.mxu0 %v15394_v0 }
 0x539   :  { %8435 = vmatmul.mubr.bf16.gmra.mrb[124].mxu1 %v15036_v24  ;;  %v15107_v24 = vld [vmem:[%s19535_s0 + $0x898] ss:$108 sps:$4 sm:$0xff]  }
 0x53a   :  { %10266 = vmatmul.mubr.bf16.gmra.mrb[28].mxu0 %v15037_v25  ;;  %8475 = vmatprep.mubr.bf16.mxu1 %v15040_v26  ;;  %v15108_v25 = vld [vmem:[%s19535_s0 + $0xf88] ss:$108 sps:$4 sm:$0xff]  }
 0x53b   :  { %10273 = vmatprep.mubr.bf16.mxu0 %v15041_v27  ;;  %10495 = vmatpush1.bf16.msra.mxu0 %v15174_v58  ;;  %v15110_v26 = vld [vmem:[%s19535_s0 + $0x974] ss:$108 sps:$4 sm:$0xff]   ;;  %v15112_v27 = vld [vmem:[%s19535_s0 + $0x1064] ss:$108 sps:$4 sm:$0xff]  }
 0x53c   :  { %10496 = vmatprep.subr.bf16.mxu0 %v15394_v0  ;;  %v15160_v58 = vld [vmem:[%s19535_s0 + $0x1648] ss:$108 sps:$4 sm:$0xff]  }
 0x53f   :  { %10497 = vmatpush1.bf16.msra.mxu0 %v15187_v8  ;;  %v15181_v8 = vld [vmem:[%s19535_s0 + $0x12bc] ss:$108 sps:$4 sm:$0xff]  }
 0x541   :  { %8476 = vmatmul.mubr.bf16.vlgmr.msra.gmra.mrb[0].mxu1 %v15038_v28  ;;  %v15114_v28 = vld [vmem:[%s19535_s0 + $0x970] ss:$108 sps:$4 sm:$0xff]  }
 0x542   :  { %10274 = vmatmul.mubr.bf16.gmra.mrb[32].mxu0 %v15043_v29  ;;  %12329 = vmatpush1.bf16.msra.mxu1 %v15378_v32  ;;  %v15115_v29 = vld [vmem:[%s19535_s0 + $0x1060] ss:$108 sps:$4 sm:$0xff]   ;;  %v15120_v32 = vld [vmem:[%s19535_s0 + $0xa48] ss:$108 sps:$4 sm:$0xff]  }
 0x543   :  { %8483 = vmatprep.mubr.bf16.mxu1 %v15045_v30  ;;  %10281 = vmatprep.mubr.bf16.mxu0 %v15047_v31  ;;  %v15116_v30 = vld [vmem:[%s19535_s0 + $0xa4c] ss:$108 sps:$4 sm:$0xff]   ;;  %v15118_v31 = vld [vmem:[%s19535_s0 + $0x113c] ss:$108 sps:$4 sm:$0xff]  }
 0x544   :  { %12314 = vmatprep.subr.bf16.mxu1 %v15394_v0 }
 0x546   :  { %12330 = vmatpush1.bf16.msra.mxu1 %v15379_v37  ;;  %v15128_v37 = vld [vmem:[%s19535_s0 + $0x1210] ss:$108 sps:$4 sm:$0xff]  }
 0x547   :  { %12315 = vmatprep.subr.bf16.mxu1 %v15394_v0 }
 0x549   :  { %8484 = vmatmul.mubr.bf16.gmra.mrb[4].mxu1 %v15049_v34  ;;  %v15123_v34 = vld [vmem:[%s19535_s0 + $0xb24] ss:$108 sps:$4 sm:$0xff]  }
 0x54a   :  { %10282 = vmatmul.mubr.bf16.gmra.mrb[36].mxu0 %v15050_v35  ;;  %8491 = vmatprep.mubr.bf16.mxu1 %v15051_v36  ;;  %v15125_v35 = vld [vmem:[%s19535_s0 + $0x1214] ss:$108 sps:$4 sm:$0xff]  }
 0x54b   :  { %10289 = vmatprep.mubr.bf16.mxu0 %v15053_v38  ;;  %12331 = vmatpush1.bf16.msra.mxu1 %v15380_v39  ;;  %v15127_v36 = vld [vmem:[%s19535_s0 + $0xb20] ss:$108 sps:$4 sm:$0xff]   ;;  %v15129_v38 = vld [vmem:[%s19535_s0 + $0xbfc] ss:$108 sps:$4 sm:$0xff]  }
 0x54c   :  { %12316 = vmatprep.subr.bf16.mxu1 %v15394_v0  ;;  %v15131_v39 = vld [vmem:[%s19535_s0 + $0x12ec] ss:$108 sps:$4 sm:$0xff]  }
 0x54f   :  { %12332 = vmatpush1.bf16.msra.mxu1 %v15381_v44  ;;  %v15140_v44 = vld [vmem:[%s19535_s0 + $0xcd0] ss:$108 sps:$4 sm:$0xff]  }
 0x550   :  { %12317 = vmatprep.subr.bf16.mxu1 %v15394_v0 }
 0x551   :  { %8492 = vmatmul.mubr.bf16.gmra.mrb[8].mxu1 %v15055_v40  ;;  %v15133_v40 = vld [vmem:[%s19535_s0 + $0xbf8] ss:$108 sps:$4 sm:$0xff]  }
 0x552   :  { %10290 = vmatmul.mubr.bf16.gmra.mrb[40].mxu0 %v15056_v41  ;;  %8499 = vmatprep.mubr.bf16.mxu1 %v15058_v42  ;;  %v15134_v41 = vld [vmem:[%s19535_s0 + $0x12e8] ss:$108 sps:$4 sm:$0xff]  }
 0x553   :  { %10297 = vmatprep.mubr.bf16.mxu0 %v15060_v43  ;;  %12333 = vmatpush1.bf16.msra.mxu1 %v15382_v46  ;;  %v15136_v42 = vld [vmem:[%s19535_s0 + $0xcd4] ss:$108 sps:$4 sm:$0xff]   ;;  %v15138_v43 = vld [vmem:[%s19535_s0 + $0x13c4] ss:$108 sps:$4 sm:$0xff]   ;;  %v15142_v46 = vld [vmem:[%s19535_s0 + $0xdac] ss:$108 sps:$4 sm:$0xff]  }
 0x554   :  { %12318 = vmatprep.subr.bf16.mxu1 %v15394_v0 }
 0x557   :  { %12334 = vmatpush1.bf16.msra.mxu1 %v15383_v51  ;;  %v15151_v51 = vld [vmem:[%s19535_s0 + $0x1574] ss:$108 sps:$4 sm:$0xff]  }
 0x558   :  { %12319 = vmatprep.subr.bf16.mxu1 %v15394_v0 }
 0x559   :  { %8500 = vmatmul.mubr.bf16.gmra.mrb[12].mxu1 %v15062_v47  ;;  %v15144_v47 = vld [vmem:[%s19535_s0 + $0x149c] ss:$108 sps:$4 sm:$0xff]  }
 0x55a   :  { %10298 = vmatmul.mubr.bf16.gmra.mrb[44].mxu0 %v15063_v48  ;;  %8507 = vmatprep.mubr.bf16.mxu1 %v15064_v49  ;;  %v15146_v48 = vld [vmem:[%s19535_s0 + $0xda8] ss:$108 sps:$4 sm:$0xff]   ;;  %v15147_v49 = vld [vmem:[%s19535_s0 + $0x1498] ss:$108 sps:$4 sm:$0xff]  }
 0x55b   :  { %10305 = vmatprep.mubr.bf16.mxu0 %v15066_v50  ;;  %12335 = vmatpush1.bf16.msra.mxu1 %v15384_v52  ;;  %v15149_v50 = vld [vmem:[%s19535_s0 + $0xe84] ss:$108 sps:$4 sm:$0xff]  }
 0x55c   :  { %12320 = vmatprep.subr.bf16.mxu1 %v15394_v0  ;;  %v18444_v52 = vld [vmem:[%s19534_s1 + $0x680] sm:$0xff]  }
 0x55f   :  { %12336 = vmatpush1.bf16.msra.mxu1 %v15385_v57  ;;  %v15159_v57 = vld [vmem:[%s19535_s0 + $0xf58] ss:$108 sps:$4 sm:$0xff]  }
 0x560   :  { %12321 = vmatprep.subr.bf16.mxu1 %v15394_v0 }
 0x561   :  { %8508 = vmatmul.mubr.bf16.gmra.mrb[16].mxu1 %v15068_v53  ;;  %v15153_v53 = vld [vmem:[%s19535_s0 + $0xe80] ss:$108 sps:$4 sm:$0xff]  }
 0x562   :  { %10306 = vmatmul.mubr.bf16.gmra.mrb[48].mxu0 %v15069_v54  ;;  %8515 = vmatprep.mubr.bf16.mxu1 %v15071_v55  ;;  %v15154_v54 = vld [vmem:[%s19535_s0 + $0x1570] ss:$108 sps:$4 sm:$0xff]  }
 0x563   :  { %10313 = vmatprep.mubr.bf16.mxu0 %v15073_v56  ;;  %12337 = vmatpush1.bf16.msra.mxu1 %v15386_v59  ;;  %v15155_v55 = vld [vmem:[%s19535_s0 + $0xf5c] ss:$108 sps:$4 sm:$0xff]   ;;  %v15157_v56 = vld [vmem:[%s19535_s0 + $0x164c] ss:$108 sps:$4 sm:$0xff]   ;;  %v15162_v59 = vld [vmem:[%s19535_s0 + $0x1034] ss:$108 sps:$4 sm:$0xff]  }
 0x564   :  { %12322 = vmatprep.subr.bf16.mxu1 %v15394_v0 }
 0x567   :  { %12338 = vmatpush1.bf16.msra.mxu1 %v15387_v1  ;;  %v15170_v1 = vld [vmem:[%s19535_s0 + $0x17fc] ss:$108 sps:$4 sm:$0xff]  }
 0x568   :  { %12323 = vmatprep.subr.bf16.mxu1 %v15394_v0 }
 0x569   :  { %8516 = vmatmul.mubr.bf16.gmra.mrb[20].mxu1 %v15075_v60  ;;  %v15164_v60 = vld [vmem:[%s19535_s0 + $0x1724] ss:$108 sps:$4 sm:$0xff]  }
 0x56a   :  { %10314 = vmatmul.mubr.bf16.gmra.mrb[52].mxu0 %v15076_v61  ;;  %8523 = vmatprep.mubr.bf16.mxu1 %v15077_v62  ;;  %v15166_v61 = vld [vmem:[%s19535_s0 + $0x1030] ss:$108 sps:$4 sm:$0xff]   ;;  %v15167_v62 = vld [vmem:[%s19535_s0 + $0x1720] ss:$108 sps:$4 sm:$0xff]  }
 0x56b   :  { %10321 = vmatprep.mubr.bf16.mxu0 %v15079_v63  ;;  %12339 = vmatpush1.bf16.msra.mxu1 %v15388_v2  ;;  %v15168_v63 = vld [vmem:[%s19535_s0 + $0x110c] ss:$108 sps:$4 sm:$0xff]   ;;  %v15172_v2 = vld [vmem:[%s19535_s0 + $0x1108] ss:$108 sps:$4 sm:$0xff]  }
 0x56c   :  { %12324 = vmatprep.subr.bf16.mxu1 %v15394_v0 }
 0x56f   :  { %12340 = vmatpush1.bf16.msra.mxu1 %v15389_v7  ;;  %v15180_v7 = vld [vmem:[%s19535_s0 + $0x18d0] ss:$108 sps:$4 sm:$0xff]  }
 0x570   :  { %12325 = vmatprep.subr.bf16.mxu1 %v15394_v0 }
 0x571   :  { %8524 = vmatmul.mubr.bf16.gmra.mrb[24].mxu1 %v15081_v3  ;;  %v15173_v3 = vld [vmem:[%s19535_s0 + $0x17f8] ss:$108 sps:$4 sm:$0xff]  }
 0x572   :  { %10322 = vmatmul.mubr.bf16.gmra.mrb[56].mxu0 %v15082_v4  ;;  %8531 = vmatprep.mubr.bf16.mxu1 %v15084_v5  ;;  %v15175_v4 = vld [vmem:[%s19535_s0 + $0x11e4] ss:$108 sps:$4 sm:$0xff]   ;;  %v15177_v5 = vld [vmem:[%s19535_s0 + $0x18d4] ss:$108 sps:$4 sm:$0xff]  }
 0x573   :  { %10329 = vmatprep.mubr.bf16.mxu0 %v15086_v6  ;;  %12341 = vmatpush1.bf16.msra.mxu1 %v15390_v9  ;;  %v15179_v6 = vld [vmem:[%s19535_s0 + $0x11e0] ss:$108 sps:$4 sm:$0xff]  }
 0x574   :  { %12326 = vmatprep.subr.bf16.mxu1 %v15394_v0  ;;  %v15183_v9 = vld [vmem:[%s19535_s0 + $0x19ac] ss:$108 sps:$4 sm:$0xff]  }
 0x577   :  { %12342 = vmatpush1.bf16.msra.mxu1 %v15391_v14  ;;  %v15192_v14 = vld [vmem:[%s19535_s0 + $0x1390] ss:$108 sps:$4 sm:$0xff]  }
 0x578   :  { %12327 = vmatprep.subr.bf16.mxu1 %v15394_v0 }
 0x579   :  { %8532 = vmatmul.mubr.bf16.gmra.mrb[28].mxu1 %v15088_v10  ;;  %v15185_v10 = vld [vmem:[%s19535_s0 + $0x12b8] ss:$108 sps:$4 sm:$0xff]  }
 0x57a   :  { %10330 = vmatmul.mubr.bf16.gmra.mrb[60].mxu0 %v15089_v11  ;;  %8539 = vmatprep.mubr.bf16.mxu1 %v15090_v12  ;;  %v15186_v11 = vld [vmem:[%s19535_s0 + $0x19a8] ss:$108 sps:$4 sm:$0xff]  }
 0x57b   :  { %10337 = vmatprep.mubr.bf16.mxu0 %v15092_v13  ;;  %12343 = vmatpush1.bf16.msra.mxu1 %v15392_v15  ;;  %v15188_v12 = vld [vmem:[%s19535_s0 + $0x1394] ss:$108 sps:$4 sm:$0xff]   ;;  %v15190_v13 = vld [vmem:[%s19535_s0 + $0x1a84] ss:$108 sps:$4 sm:$0xff]  }
 0x57c   :  { %12328 = vmatprep.subr.bf16.mxu1 %v15394_v0  ;;  %v15393_v0 = vld [vmem:[%s19534_s1 + $0x378] sm:$0xff]   ;;  %v15193_v15 = vld [vmem:[%s19535_s0 + $0x1a80] ss:$108 sps:$4 sm:$0xff]  }
 0x57f   :  { %12344 = vmatpush1.bf16.msra.mxu1 %v15393_v0  ;;  %v15200_v0 = vld [vmem:[%s19535_s0 + $0x1544] ss:$108 sps:$4 sm:$0xff]  }
 0x580   :  { %12233 = vmatprep.subr.bf16.mxu1 %v18444_v52 }
 0x581   :  { %8540 = vmatmul.mubr.bf16.gmra.mrb[32].mxu1 %v15094_v16  ;;  %v15194_v16 = vld [vmem:[%s19535_s0 + $0x146c] ss:$108 sps:$4 sm:$0xff]  }
 0x582   :  { %10338 = vmatmul.mubr.bf16.gmra.mrb[64].mxu0 %v15095_v17  ;;  %8547 = vmatprep.mubr.bf16.mxu1 %v15097_v18  ;;  %v15198_v17 = vld [vmem:[%s19535_s0 + $0x64] ss:$108 sps:$4 sm:$0xff]   ;;  %v15199_v18 = vld [vmem:[%s19535_s0 + $0x1468] ss:$108 sps:$4 sm:$0xff]  }
 0x583   :  { %10345 = vmatprep.mubr.bf16.mxu0 %v15099_v19  ;;  %v15196_v19 = vld [vmem:[%s19535_s0 + $0x60] ss:$108 sps:$4 sm:$0xff]  }
 0x589   :  { %8548 = vmatmul.mubr.bf16.gmra.mrb[36].mxu1 %v15101_v20  ;;  %v15202_v20 = vld [vmem:[%s19535_s0 + $0x13c] ss:$108 sps:$4 sm:$0xff]  }
 0x58a   :  { %10346 = vmatmul.mubr.bf16.gmra.mrb[68].mxu0 %v15102_v21  ;;  %8555 = vmatprep.mubr.bf16.mxu1 %v15103_v22  ;;  %v15204_v21 = vld [vmem:[%s19535_s0 + $0x1540] ss:$108 sps:$4 sm:$0xff]   ;;  %v15205_v22 = vld [vmem:[%s19535_s0 + $0x138] ss:$108 sps:$4 sm:$0xff]  }
 0x58b   :  { %10353 = vmatprep.mubr.bf16.mxu0 %v15105_v23  ;;  %v15206_v23 = vld [vmem:[%s19535_s0 + $0x161c] ss:$108 sps:$4 sm:$0xff]  }
 0x591   :  { %8556 = vmatmul.mubr.bf16.gmra.mrb[40].mxu1 %v15107_v24  ;;  %v15208_v24 = vld [vmem:[%s19535_s0 + $0x214] ss:$108 sps:$4 sm:$0xff]  }
 0x592   :  { %10354 = vmatmul.mubr.bf16.gmra.mrb[72].mxu0 %v15108_v25  ;;  %8563 = vmatprep.mubr.bf16.mxu1 %v15110_v26  ;;  %v15210_v25 = vld [vmem:[%s19535_s0 + $0x1618] ss:$108 sps:$4 sm:$0xff]   ;;  %v15211_v26 = vld [vmem:[%s19535_s0 + $0x210] ss:$108 sps:$4 sm:$0xff]  }
 0x593   :  { %10361 = vmatprep.mubr.bf16.mxu0 %v15112_v27  ;;  %v15212_v27 = vld [vmem:[%s19535_s0 + $0x16f4] ss:$108 sps:$4 sm:$0xff]  }
 0x599   :  { %8564 = vmatmul.mubr.bf16.gmra.mrb[44].mxu1 %v15114_v28  ;;  %v15214_v28 = vld [vmem:[%s19535_s0 + $0x2ec] ss:$108 sps:$4 sm:$0xff]  }
 0x59a   :  { %10362 = vmatmul.mubr.bf16.gmra.mrb[76].mxu0 %v15115_v29  ;;  %8571 = vmatprep.mubr.bf16.mxu1 %v15116_v30 }
 0x59b   :  { %10369 = vmatprep.mubr.bf16.mxu0 %v15118_v31  ;;  %v15216_v31 = vld [vmem:[%s19535_s0 + $0x16f0] ss:$108 sps:$4 sm:$0xff]  }
 0x5a1   :  { %8572 = vmatmul.mubr.bf16.gmra.mrb[48].mxu1 %v15120_v32 }
 0x5a2   :  { %10370 = vmatmul.mubr.bf16.gmra.mrb[80].mxu0 %v15121_v33  ;;  %8579 = vmatprep.mubr.bf16.mxu1 %v15123_v34  ;;  %v15217_v33 = vld [vmem:[%s19535_s0 + $0x2e8] ss:$108 sps:$4 sm:$0xff]   ;;  %v15218_v34 = vld [vmem:[%s19535_s0 + $0x17cc] ss:$108 sps:$4 sm:$0xff]  }
 0x5a3   :  { %10377 = vmatprep.mubr.bf16.mxu0 %v15125_v35 }
 0x5a9   :  { %8580 = vmatmul.mubr.bf16.gmra.mrb[52].mxu1 %v15127_v36  ;;  %v15220_v36 = vld [vmem:[%s19535_s0 + $0x3c4] ss:$108 sps:$4 sm:$0xff]  }
 0x5aa   :  { %10378 = vmatmul.mubr.bf16.gmra.mrb[84].mxu0 %v15128_v37  ;;  %8587 = vmatprep.mubr.bf16.mxu1 %v15129_v38 }
 0x5ab   :  { %10385 = vmatprep.mubr.bf16.mxu0 %v15131_v39  ;;  %v15222_v39 = vld [vmem:[%s19535_s0 + $0x17c8] ss:$108 sps:$4 sm:$0xff]  }
 0x5b1   :  { %8588 = vmatmul.mubr.bf16.gmra.mrb[56].mxu1 %v15133_v40 }
 0x5b2   :  { %10386 = vmatmul.mubr.bf16.gmra.mrb[88].mxu0 %v15134_v41  ;;  %8595 = vmatprep.mubr.bf16.mxu1 %v15136_v42  ;;  %v15223_v41 = vld [vmem:[%s19535_s0 + $0x3c0] ss:$108 sps:$4 sm:$0xff]   ;;  %v15224_v42 = vld [vmem:[%s19535_s0 + $0x18a4] ss:$108 sps:$4 sm:$0xff]  }
 0x5b3   :  { %10393 = vmatprep.mubr.bf16.mxu0 %v15138_v43 }
 0x5b9   :  { %8596 = vmatmul.mubr.bf16.gmra.mrb[60].mxu1 %v15140_v44  ;;  %v15226_v44 = vld [vmem:[%s19535_s0 + $0x49c] ss:$108 sps:$4 sm:$0xff]  }
 0x5ba   :  { %10394 = vmatmul.mubr.bf16.gmra.mrb[92].mxu0 %v15141_v45  ;;  %8603 = vmatprep.mubr.bf16.mxu1 %v15142_v46 }
 0x5bb   :  { %10401 = vmatprep.mubr.bf16.mxu0 %v15144_v47  ;;  %v15228_v47 = vld [vmem:[%s19535_s0 + $0x18a0] ss:$108 sps:$4 sm:$0xff]  }
 0x5c1   :  { %8604 = vmatmul.mubr.bf16.gmra.mrb[64].mxu1 %v15146_v48 }
 0x5c2   :  { %10402 = vmatmul.mubr.bf16.gmra.mrb[96].mxu0 %v15147_v49  ;;  %8611 = vmatprep.mubr.bf16.mxu1 %v15149_v50  ;;  %v15229_v49 = vld [vmem:[%s19535_s0 + $0x498] ss:$108 sps:$4 sm:$0xff]   ;;  %v15230_v50 = vld [vmem:[%s19535_s0 + $0x197c] ss:$108 sps:$4 sm:$0xff]  }
 0x5c3   :  { %10409 = vmatprep.mubr.bf16.mxu0 %v15151_v51 }
 0x5c9   :  { %8612 = vmatmul.mubr.bf16.gmra.mrb[68].mxu1 %v15153_v53  ;;  %v15232_v53 = vld [vmem:[%s19535_s0 + $0x574] ss:$108 sps:$4 sm:$0xff]  }
 0x5ca   :  { %10410 = vmatmul.mubr.bf16.gmra.mrb[100].mxu0 %v15154_v54  ;;  %8619 = vmatprep.mubr.bf16.mxu1 %v15155_v55 }
 0x5cb   :  { %10417 = vmatprep.mubr.bf16.mxu0 %v15157_v56  ;;  %v15234_v56 = vld [vmem:[%s19535_s0 + $0x1978] ss:$108 sps:$4 sm:$0xff]  }
 0x5d1   :  { %8620 = vmatmul.mubr.bf16.gmra.mrb[72].mxu1 %v15159_v57 }
 0x5d2   :  { %10418 = vmatmul.mubr.bf16.gmra.mrb[104].mxu0 %v15160_v58  ;;  %8627 = vmatprep.mubr.bf16.mxu1 %v15162_v59  ;;  %v15235_v58 = vld [vmem:[%s19535_s0 + $0x570] ss:$108 sps:$4 sm:$0xff]   ;;  %v15236_v59 = vld [vmem:[%s19535_s0 + $0x1a54] ss:$108 sps:$4 sm:$0xff]  }
 0x5d3   :  { %10425 = vmatprep.mubr.bf16.mxu0 %v15164_v60 }
 0x5d9   :  { %8628 = vmatmul.mubr.bf16.gmra.mrb[76].mxu1 %v15166_v61  ;;  %v15238_v61 = vld [vmem:[%s19535_s0 + $0x64c] ss:$108 sps:$4 sm:$0xff]  }
 0x5da   :  { %10426 = vmatmul.mubr.bf16.gmra.mrb[108].mxu0 %v15167_v62  ;;  %8635 = vmatprep.mubr.bf16.mxu1 %v15168_v63 }
 0x5db   :  { %10433 = vmatprep.mubr.bf16.mxu0 %v15170_v1  ;;  %v15240_v1 = vld [vmem:[%s19535_s0 + $0x1a50] ss:$108 sps:$4 sm:$0xff]  }
 0x5e1   :  { %8636 = vmatmul.mubr.bf16.gmra.mrb[80].mxu1 %v15172_v2 }
 0x5e2   :  { %10434 = vmatmul.mubr.bf16.gmra.mrb[112].mxu0 %v15173_v3  ;;  %8643 = vmatprep.mubr.bf16.mxu1 %v15175_v4  ;;  %v15241_v3 = vld [vmem:[%s19535_s0 + $0x648] ss:$108 sps:$4 sm:$0xff]  }
 0x5e3   :  { %10441 = vmatprep.mubr.bf16.mxu0 %v15177_v5  ;;  %v15244_v4 = vld [vmem:[%s19535_s0 + $0x1474] ss:$108 sps:$4 sm:$0xff]  }
 0x5e9   :  { %8644 = vmatmul.mubr.bf16.gmra.mrb[84].mxu1 %v15179_v6  ;;  %v15245_v6 = vld [vmem:[%s19535_s0 + $0x724] ss:$108 sps:$4 sm:$0xff]  }
 0x5ea   :  { %10442 = vmatmul.mubr.bf16.gmra.mrb[116].mxu0 %v15180_v7  ;;  %8651 = vmatprep.mubr.bf16.mxu1 %v15181_v8 }
 0x5eb   :  { %10449 = vmatprep.mubr.bf16.mxu0 %v15183_v9  ;;  %v15242_v9 = vld [vmem:[%s19535_s0 + $0x1470] ss:$108 sps:$4 sm:$0xff]  }
 0x5f1   :  { %8652 = vmatmul.mubr.bf16.gmra.mrb[88].mxu1 %v15185_v10 }
 0x5f2   :  { %10450 = vmatmul.mubr.bf16.gmra.mrb[120].mxu0 %v15186_v11  ;;  %8659 = vmatprep.mubr.bf16.mxu1 %v15188_v12  ;;  %v15247_v11 = vld [vmem:[%s19535_s0 + $0x720] ss:$108 sps:$4 sm:$0xff]  }
 0x5f3   :  { %10457 = vmatprep.mubr.bf16.mxu0 %v15190_v13  ;;  %v15249_v13 = vld [vmem:[%s19535_s0 + $0x154c] ss:$108 sps:$4 sm:$0xff]  }
 0x5f9   :  { %8660 = vmatmul.mubr.bf16.gmra.mrb[92].mxu1 %v15192_v14  ;;  %v15251_v14 = vld [vmem:[%s19535_s0 + $0x7fc] ss:$108 sps:$4 sm:$0xff]  }
 0x5fa   :  { %10458 = vmatmul.mubr.bf16.gmra.mrb[124].mxu0 %v15193_v15  ;;  %8667 = vmatprep.mubr.bf16.mxu1 %v15194_v16  ;;  %v15255_v15 = vld [vmem:[%s19534_s1 + $0x688] sm:$0xff]   ;;  %v15262_v16 = vld [vmem:[%s19534_s1 + $0x690] sm:$0xff]  }
 0x5fb   :  { %10498 = vmatprep.mubr.bf16.mxu0 %v15198_v17 }
 0x601   :  { %8668 = vmatmul.mubr.bf16.gmra.mrb[96].mxu1 %v15199_v18 }
 0x602   :  { %10499 = vmatmul.mubr.bf16.vlgmr.msra.gmra.mrb[0].mxu0 %v15196_v19  ;;  %8675 = vmatprep.mubr.bf16.mxu1 %v15200_v0  ;;  %v15253_v19 = vld [vmem:[%s19535_s0 + $0x1548] ss:$108 sps:$4 sm:$0xff]  }
 0x603   :  { %10506 = vmatprep.mubr.bf16.mxu0 %v15202_v20  ;;  %v15256_v20 = vld [vmem:[%s19535_s0 + $0x1624] ss:$108 sps:$4 sm:$0xff]  }
 0x609   :  { %8676 = vmatmul.mubr.bf16.gmra.mrb[100].mxu1 %v15204_v21 }
 0x60a   :  { %10507 = vmatmul.mubr.bf16.gmra.mrb[4].mxu0 %v15205_v22  ;;  %8683 = vmatprep.mubr.bf16.mxu1 %v15206_v23  ;;  %v15258_v22 = vld [vmem:[%s19535_s0 + $0x8d4] ss:$108 sps:$4 sm:$0xff]   ;;  %v15269_v23 = vld [vmem:[%s19534_s1 + $0x698] sm:$0xff]  }
 0x60b   :  { %10514 = vmatprep.mubr.bf16.mxu0 %v15208_v24 }
 0x611   :  { %8684 = vmatmul.mubr.bf16.gmra.mrb[104].mxu1 %v15210_v25  ;;  %v15276_v25 = vld [vmem:[%s19534_s1 + $0x6a0] sm:$0xff]  }
 0x612   :  { %10515 = vmatmul.mubr.bf16.gmra.mrb[8].mxu0 %v15211_v26  ;;  %8691 = vmatprep.mubr.bf16.mxu1 %v15212_v27  ;;  %v15260_v27 = vld [vmem:[%s19535_s0 + $0x1620] ss:$108 sps:$4 sm:$0xff]  }
 0x613   :  { %10522 = vmatprep.mubr.bf16.mxu0 %v15214_v28 }
 0x614   :  { %v18567_v29 = vpop.f32.mrb[0].mxu1 }
 0x615   :  { %v8479_v30 = vpop.f32.mrb[1].mxu1 }
 0x616   :  { %v18572_v32 = vpop.f32.mrb[2].mxu1  ;;  %v15261_v30 = vld [vmem:[%s19535_s0 + $0x8d0] ss:$108 sps:$4 sm:$0xff]  }
 0x617   :  { %v8482_v35 = vpop.f32.mrb[3].mxu1 }
 0x618   :  { %v15283_v35 = vld [vmem:[%s19534_s1 + $0x6a8] sm:$0xff]  }
 0x619   :  { %8692 = vmatmul.mubr.bf16.gmra.mrb[108].mxu1 %v15216_v31  ;;  %v15263_v31 = vld [vmem:[%s19535_s0 + $0x16fc] ss:$108 sps:$4 sm:$0xff]  }
 0x61a   :  { %10523 = vmatmul.mubr.bf16.gmra.mrb[12].mxu0 %v15217_v33  ;;  %8699 = vmatprep.mubr.bf16.mxu1 %v15218_v34  ;;  %v15265_v34 = vld [vmem:[%s19535_s0 + $0x9ac] ss:$108 sps:$4 sm:$0xff]  }
 0x61b   :  { %10530 = vmatprep.mubr.bf16.mxu0 %v15220_v36 }
 0x61c   :  { %v18583_v37 = vpop.f32.mrb[4].mxu1 }
 0x61d   :  { %v8487_v38 = vpop.f32.mrb[5].mxu1 }
 0x61e   :  { %v18588_v40 = vpop.f32.mrb[6].mxu1  ;;  %v15290_v38 = vld [vmem:[%s19534_s1 + $0x6b0] sm:$0xff]  }
 0x61f   :  { %v8490_v43 = vpop.f32.mrb[7].mxu1 }
 0x620   :  { %v15268_v43 = vld [vmem:[%s19535_s0 + $0x9a8] ss:$108 sps:$4 sm:$0xff]  }
 0x621   :  { %8700 = vmatmul.mubr.bf16.gmra.mrb[112].mxu1 %v15222_v39 }
 0x622   :  { %10531 = vmatmul.mubr.bf16.gmra.mrb[16].mxu0 %v15223_v41  ;;  %8707 = vmatprep.mubr.bf16.mxu1 %v15224_v42  ;;  %v15267_v41 = vld [vmem:[%s19535_s0 + $0x16f8] ss:$108 sps:$4 sm:$0xff]  }
 0x623   :  { %10538 = vmatprep.mubr.bf16.mxu0 %v15226_v44  ;;  %v15270_v44 = vld [vmem:[%s19535_s0 + $0x17d4] ss:$108 sps:$4 sm:$0xff]  }
 0x624   :  { %v18599_v45 = vpop.f32.mrb[8].mxu1 }
 0x625   :  { %v8495_v46 = vpop.f32.mrb[9].mxu1 }
 0x626   :  { %v18604_v48 = vpop.f32.mrb[10].mxu1 }
 0x627   :  { %v8498_v51 = vpop.f32.mrb[11].mxu1 }
 0x629   :  { %8708 = vmatmul.mubr.bf16.gmra.mrb[116].mxu1 %v15228_v47  ;;  %v15272_v47 = vld [vmem:[%s19535_s0 + $0xa84] ss:$108 sps:$4 sm:$0xff]  }
 0x62a   :  { %10539 = vmatmul.mubr.bf16.gmra.mrb[20].mxu0 %v15229_v49  ;;  %8715 = vmatprep.mubr.bf16.mxu1 %v15230_v50  ;;  %v15297_v49 = vld [vmem:[%s19534_s1 + $0x6b8] sm:$0xff]  }
 0x62b   :  { %10546 = vmatprep.mubr.bf16.mxu0 %v15232_v53  ;;  %v15274_v53 = vld [vmem:[%s19535_s0 + $0x17d0] ss:$108 sps:$4 sm:$0xff]  }
 0x62c   :  { %v18615_v54 = vpop.f32.mrb[12].mxu1 }
 0x62d   :  { %v8503_v55 = vpop.f32.mrb[13].mxu1 }
 0x62e   :  { %v18620_v57 = vpop.f32.mrb[14].mxu1 }
 0x62f   :  { %v8506_v60 = vpop.f32.mrb[15].mxu1 }
 0x630   :  { %v15279_v60 = vld [vmem:[%s19535_s0 + $0xb5c] ss:$108 sps:$4 sm:$0xff]  }
 0x631   :  { %8716 = vmatmul.mubr.bf16.gmra.mrb[120].mxu1 %v15234_v56  ;;  %v15275_v56 = vld [vmem:[%s19535_s0 + $0xa80] ss:$108 sps:$4 sm:$0xff]  }
 0x632   :  { %10547 = vmatmul.mubr.bf16.gmra.mrb[24].mxu0 %v15235_v58  ;;  %8723 = vmatprep.mubr.bf16.mxu1 %v15236_v59  ;;  %v15277_v58 = vld [vmem:[%s19535_s0 + $0x18ac] ss:$108 sps:$4 sm:$0xff]  }
 0x633   :  { %10554 = vmatprep.mubr.bf16.mxu0 %v15238_v61 }
 0x634   :  { %v18631_v62 = vpop.f32.mrb[16].mxu1 }
 0x635   :  { %v8511_v63 = vpop.f32.mrb[17].mxu1 }
 0x636   :  { %v18636_v2 = vpop.f32.mrb[18].mxu1 }
 0x637   :  { %v8514_v5 = vpop.f32.mrb[19].mxu1 }
 0x638   :  { %v15284_v5 = vld [vmem:[%s19535_s0 + $0x1984] ss:$108 sps:$4 sm:$0xff]  }
 0x639   :  { %8724 = vmatmul.mubr.bf16.gmra.mrb[124].mxu1 %v15240_v1  ;;  %v15281_v1 = vld [vmem:[%s19535_s0 + $0x18a8] ss:$108 sps:$4 sm:$0xff]  }
 0x63a   :  { %10555 = vmatmul.mubr.bf16.gmra.mrb[28].mxu0 %v15241_v3  ;;  %8956 = vmatprep.mubr.bf16.mxu1 %v15244_v4  ;;  %v15282_v4 = vld [vmem:[%s19535_s0 + $0xb58] ss:$108 sps:$4 sm:$0xff]  }
 0x63b   :  { %10562 = vmatprep.mubr.bf16.mxu0 %v15245_v6 }
 0x63c   :  { %v18647_v7 = vpop.f32.mrb[20].mxu1 }
 0x63d   :  { %v8519_v8 = vpop.f32.mrb[21].mxu1 }
 0x63e   :  { %v18652_v10 = vpop.f32.mrb[22].mxu1  ;;  %v15286_v8 = vld [vmem:[%s19535_s0 + $0xc34] ss:$108 sps:$4 sm:$0xff]  }
 0x63f   :  { %v8522_v12 = vpop.f32.mrb[23].mxu1 }
 0x640   :  { %v15288_v12 = vld [vmem:[%s19535_s0 + $0x1980] ss:$108 sps:$4 sm:$0xff]  }
 0x641   :  { %8957 = vmatmul.mubr.bf16.vlgmr.msra.gmra.mrb[96].mxu1 %v15242_v9 }
 0x642   :  { %10563 = vmatmul.mubr.bf16.gmra.mrb[32].mxu0 %v15247_v11  ;;  %12234 = vmatpush3.bf16.msra.mxu1 %v18444_v52  ;;  %v15254_v52 = vld [vmem:[%s19535_s0 + $0x7f8] ss:$108 sps:$4 sm:$0xff]  }
 0x643   :  { %8964 = vmatprep.mubr.bf16.mxu1 %v15249_v13  ;;  %10570 = vmatprep.mubr.bf16.mxu0 %v15251_v14  ;;  %v15289_v14 = vld [vmem:[%s19535_s0 + $0xc30] ss:$108 sps:$4 sm:$0xff]  }
 0x644   :  { %v18670_v17 = vpop.f32.mrb[24].mxu1  ;;  %12235 = vmatprep.subr.bf16.mxu1 %v15255_v15 }
 0x645   :  { %v8527_v18 = vpop.f32.mrb[25].mxu1 }
 0x646   :  { %v18675_v0 = vpop.f32.mrb[26].mxu1  ;;  %12236 = vmatpush3.bf16.msra.mxu1 %v15255_v15  ;;  %v15291_v15 = vld [vmem:[%s19535_s0 + $0x1a5c] ss:$108 sps:$4 sm:$0xff]   ;;  %v15293_v18 = vld [vmem:[%s19535_s0 + $0xd0c] ss:$108 sps:$4 sm:$0xff]  }
 0x647   :  { %v8530_v21 = vpop.f32.mrb[27].mxu1  ;;  %12237 = vmatprep.subr.bf16.mxu1 %v15262_v16 }
 0x649   :  { %8965 = vmatmul.mubr.bf16.gmra.mrb[100].mxu1 %v15253_v19 }
 0x64a   :  { %10571 = vmatmul.mubr.bf16.gmra.mrb[36].mxu0 %v15254_v52  ;;  %8972 = vmatprep.mubr.bf16.mxu1 %v15256_v20  ;;  %v15295_v20 = vld [vmem:[%s19535_s0 + $0x1a58] ss:$108 sps:$4 sm:$0xff]  }
 0x64b   :  { %10578 = vmatprep.mubr.bf16.mxu0 %v15258_v22  ;;  %12238 = vmatpush3.bf16.msra.mxu1 %v15262_v16  ;;  %v15296_v22 = vld [vmem:[%s19535_s0 + $0xd08] ss:$108 sps:$4 sm:$0xff]  }
 0x64c   :  { %v18689_v24 = vpop.f32.mrb[28].mxu1  ;;  %12239 = vmatprep.subr.bf16.mxu1 %v15269_v23 }
 0x64d   :  { %v8535_v26 = vpop.f32.mrb[29].mxu1 }
 0x64e   :  { %v18697_v28 = vpop.f32.mrb[30].mxu1  ;;  %v15298_v26 = vld [vmem:[%s19535_s0 + $0xde4] ss:$108 sps:$4 sm:$0xff]  }
 0x64f   :  { %v8538_v33 = vpop.f32.mrb[31].mxu1  ;;  %12240 = vmatpush3.bf16.msra.mxu1 %v15269_v23  ;;  %v15300_v23 = vld [vmem:[%s19535_s0 + $0x68] ss:$108 sps:$4 sm:$0xff]  }
 0x650   :  { %12241 = vmatprep.subr.bf16.mxu1 %v15276_v25 }
 0x651   :  { %8973 = vmatmul.mubr.bf16.gmra.mrb[104].mxu1 %v15260_v27 }
 0x652   :  { %10579 = vmatmul.mubr.bf16.gmra.mrb[40].mxu0 %v15261_v30  ;;  %8980 = vmatprep.mubr.bf16.mxu1 %v15263_v31  ;;  %v15302_v31 = vld [vmem:[%s19535_s0 + $0x140] ss:$108 sps:$4 sm:$0xff]  }
 0x653   :  { %10586 = vmatprep.mubr.bf16.mxu0 %v15265_v34  ;;  %12242 = vmatpush3.bf16.msra.mxu1 %v15276_v25  ;;  %v15301_v34 = vld [vmem:[%s19535_s0 + $0xde0] ss:$108 sps:$4 sm:$0xff]  }
 0x654   :  { %v18711_v36 = vpop.f32.mrb[32].mxu1  ;;  %12243 = vmatprep.subr.bf16.mxu1 %v15283_v35 }
 0x655   :  { %v8543_v39 = vpop.f32.mrb[33].mxu1 }
 0x656   :  { %v18719_v42 = vpop.f32.mrb[34].mxu1  ;;  %v15303_v39 = vld [vmem:[%s19535_s0 + $0xebc] ss:$108 sps:$4 sm:$0xff]  }
 0x657   :  { %v8546_v46 = vpop.f32.mrb[35].mxu1  ;;  %12244 = vmatpush3.bf16.msra.mxu1 %v15283_v35  ;;  %v15305_v35 = vld [vmem:[%s19535_s0 + $0x218] ss:$108 sps:$4 sm:$0xff]  }
 0x658   :  { %12245 = vmatprep.subr.bf16.mxu1 %v15290_v38 }
 0x659   :  { %8981 = vmatmul.mubr.bf16.gmra.mrb[108].mxu1 %v15267_v41 }
 0x65a   :  { %10587 = vmatmul.mubr.bf16.gmra.mrb[44].mxu0 %v15268_v43  ;;  %8988 = vmatprep.mubr.bf16.mxu1 %v15270_v44  ;;  %v15307_v44 = vld [vmem:[%s19535_s0 + $0x2f0] ss:$108 sps:$4 sm:$0xff]  }
 0x65b   :  { %10594 = vmatprep.mubr.bf16.mxu0 %v15272_v47  ;;  %12246 = vmatpush3.bf16.msra.mxu1 %v15290_v38  ;;  %v15306_v47 = vld [vmem:[%s19535_s0 + $0xeb8] ss:$108 sps:$4 sm:$0xff]  }
 0x65c   :  { %v18733_v50 = vpop.f32.mrb[36].mxu1  ;;  %12247 = vmatprep.subr.bf16.mxu1 %v15297_v49 }
 0x65d   :  { %v8551_v51 = vpop.f32.mrb[37].mxu1 }
 0x65e   :  { %v18738_v55 = vpop.f32.mrb[38].mxu1 }
 0x65f   :  { %v8554_v59 = vpop.f32.mrb[39].mxu1  ;;  %12248 = vmatpush3.bf16.msra.mxu1 %v15297_v49  ;;  %v15310_v49 = vld [vmem:[%s19535_s0 + $0x3c8] ss:$108 sps:$4 sm:$0xff]  }
 0x660   :  { %v15312_v59 = vld [vmem:[%s19535_s0 + $0x4a0] ss:$108 sps:$4 sm:$0xff]  }
 0x661   :  { %8989 = vmatmul.mubr.bf16.gmra.mrb[112].mxu1 %v15274_v53  ;;  %v15308_v53 = vld [vmem:[%s19535_s0 + $0xf94] ss:$108 sps:$4 sm:$0xff]  }
 0x662   :  { %10595 = vmatmul.mubr.bf16.gmra.mrb[48].mxu0 %v15275_v56  ;;  %8996 = vmatprep.mubr.bf16.mxu1 %v15277_v58 }
 0x663   :  { %10602 = vmatprep.mubr.bf16.mxu0 %v15279_v60 }
 0x664   :  { %v18749_v61 = vpop.f32.mrb[40].mxu1 }
 0x665   :  { %v8559_v63 = vpop.f32.mrb[41].mxu1 }
 0x666   :  { %v18754_v3 = vpop.f32.mrb[42].mxu1  ;;  %v15311_v63 = vld [vmem:[%s19535_s0 + $0xf90] ss:$108 sps:$4 sm:$0xff]  }
 0x667   :  { %v8562_v6 = vpop.f32.mrb[43].mxu1 }
 0x669   :  { %8997 = vmatmul.mubr.bf16.gmra.mrb[116].mxu1 %v15281_v1  ;;  %v15315_v1 = vld [vmem:[%s19535_s0 + $0x578] ss:$108 sps:$4 sm:$0xff]  }
 0x66a   :  { %10603 = vmatmul.mubr.bf16.gmra.mrb[52].mxu0 %v15282_v4  ;;  %9004 = vmatprep.mubr.bf16.mxu1 %v15284_v5  ;;  %v15313_v5 = vld [vmem:[%s19535_s0 + $0x106c] ss:$108 sps:$4 sm:$0xff]  }
 0x66b   :  { %10610 = vmatprep.mubr.bf16.mxu0 %v15286_v8 }
 0x66c   :  { %v18765_v9 = vpop.f32.mrb[44].mxu1 }
 0x66d   :  { %v8567_v11 = vpop.f32.mrb[45].mxu1 }
 0x66e   :  { %v18770_v13 = vpop.f32.mrb[46].mxu1  ;;  %v15317_v11 = vld [vmem:[%s19535_s0 + $0x650] ss:$108 sps:$4 sm:$0xff]  }
 0x66f   :  { %v8570_v16 = vpop.f32.mrb[47].mxu1 }
 0x671   :  { %9005 = vmatmul.mubr.bf16.gmra.mrb[120].mxu1 %v15288_v12 }
 0x672   :  { %10611 = vmatmul.mubr.bf16.gmra.mrb[56].mxu0 %v15289_v14  ;;  %9012 = vmatprep.mubr.bf16.mxu1 %v15291_v15  ;;  %v15316_v14 = vld [vmem:[%s19535_s0 + $0x1068] ss:$108 sps:$4 sm:$0xff]  }
 0x673   :  { %10618 = vmatprep.mubr.bf16.mxu0 %v15293_v18  ;;  %v15320_v15 = vld [vmem:[%s19535_s0 + $0x728] ss:$108 sps:$4 sm:$0xff]   ;;  %v15318_v18 = vld [vmem:[%s19535_s0 + $0x1144] ss:$108 sps:$4 sm:$0xff]  }
 0x674   :  { %v18781_v19 = vpop.f32.mrb[48].mxu1 }
 0x675   :  { %v8575_v52 = vpop.f32.mrb[49].mxu1 }
 0x676   :  { %v18786_v21 = vpop.f32.mrb[50].mxu1 }
 0x677   :  { %v8578_v25 = vpop.f32.mrb[51].mxu1 }
 0x678   :  { %v15321_v25 = vld [vmem:[%s19535_s0 + $0x1140] ss:$108 sps:$4 sm:$0xff]  }
 0x679   :  { %9013 = vmatmul.mubr.bf16.gmra.mrb[124].mxu1 %v15295_v20 }
 0x67a   :  { %10619 = vmatmul.mubr.bf16.gmra.mrb[60].mxu0 %v15296_v22  ;;  %12249 = vmatprep.mubr.bf16.mxu1 %v15300_v23  ;;  %v15322_v22 = vld [vmem:[%s19535_s0 + $0x800] ss:$108 sps:$4 sm:$0xff]  }
 0x67b   :  { %10626 = vmatprep.mubr.bf16.mxu0 %v15298_v26  ;;  %v15325_v26 = vld [vmem:[%s19535_s0 + $0x8d8] ss:$108 sps:$4 sm:$0xff]  }
 0x67c   :  { %v18797_v27 = vpop.f32.mrb[52].mxu1 }
 0x67d   :  { %v8583_v30 = vpop.f32.mrb[53].mxu1 }
 0x67e   :  { %v18802_v33 = vpop.f32.mrb[54].mxu1 }
 0x67f   :  { %v8586_v38 = vpop.f32.mrb[55].mxu1 }
 0x680   :  { %v15327_v38 = vld [vmem:[%s19535_s0 + $0x9b0] ss:$108 sps:$4 sm:$0xff]  }
 0x681   :  { %12250 = vmatmul.mubr.bf16.vlgmr.msra.gmra.mrb[128].mxu1 %v15302_v31  ;;  %v15323_v31 = vld [vmem:[%s19535_s0 + $0x121c] ss:$108 sps:$4 sm:$0xff]  }
 0x682   :  { %10627 = vmatmul.mubr.bf16.gmra.mrb[64].mxu0 %v15301_v34  ;;  %12253 = vmatprep.mubr.bf16.mxu1 %v15305_v35 }
 0x683   :  { %10634 = vmatprep.mubr.bf16.mxu0 %v15303_v39 }
 0x684   :  { %v18813_v41 = vpop.f32.mrb[56].mxu1 }
 0x685   :  { %v8591_v43 = vpop.f32.mrb[57].mxu1 }
 0x686   :  { %v18818_v46 = vpop.f32.mrb[58].mxu1  ;;  %v15326_v43 = vld [vmem:[%s19535_s0 + $0x1218] ss:$108 sps:$4 sm:$0xff]  }
 0x687   :  { %v8594_v51 = vpop.f32.mrb[59].mxu1 }
 0x689   :  { %12254 = vmatmul.mubr.bf16.gmra.mrb[132].mxu1 %v15307_v44  ;;  %v15330_v44 = vld [vmem:[%s19535_s0 + $0xa88] ss:$108 sps:$4 sm:$0xff]  }
 0x68a   :  { %10635 = vmatmul.mubr.bf16.gmra.mrb[68].mxu0 %v15306_v47  ;;  %12257 = vmatprep.mubr.bf16.mxu1 %v15310_v49  ;;  %v15328_v49 = vld [vmem:[%s19535_s0 + $0x12f4] ss:$108 sps:$4 sm:$0xff]  }
 0x68b   :  { %10642 = vmatprep.mubr.bf16.mxu0 %v15308_v53 }
 0x68c   :  { %v18829_v56 = vpop.f32.mrb[60].mxu1 }
 0x68d   :  { %v8599_v58 = vpop.f32.mrb[61].mxu1 }
 0x68e   :  { %v18834_v60 = vpop.f32.mrb[62].mxu1  ;;  %v15332_v58 = vld [vmem:[%s19535_s0 + $0xb60] ss:$108 sps:$4 sm:$0xff]  }
 0x68f   :  { %v8602_v4 = vpop.f32.mrb[63].mxu1 }
 0x691   :  { %12258 = vmatmul.mubr.bf16.gmra.mrb[136].mxu1 %v15312_v59 }
 0x692   :  { %10643 = vmatmul.mubr.bf16.gmra.mrb[72].mxu0 %v15311_v63  ;;  %12261 = vmatprep.mubr.bf16.mxu1 %v15315_v1  ;;  %v15331_v63 = vld [vmem:[%s19535_s0 + $0x12f0] ss:$108 sps:$4 sm:$0xff]   ;;  %v15335_v1 = vld [vmem:[%s19535_s0 + $0xc38] ss:$108 sps:$4 sm:$0xff]  }
 0x693   :  { %10650 = vmatprep.mubr.bf16.mxu0 %v15313_v5  ;;  %v15333_v5 = vld [vmem:[%s19535_s0 + $0x13cc] ss:$108 sps:$4 sm:$0xff]  }
 0x694   :  { %v18845_v6 = vpop.f32.mrb[64].mxu1 }
 0x695   :  { %v8607_v8 = vpop.f32.mrb[65].mxu1 }
 0x696   :  { %v18850_v12 = vpop.f32.mrb[66].mxu1 }
 0x697   :  { %v8610_v16 = vpop.f32.mrb[67].mxu1 }
 0x698   :  { %v15336_v16 = vld [vmem:[%s19535_s0 + $0x13c8] ss:$108 sps:$4 sm:$0xff]  }
 0x699   :  { %12262 = vmatmul.mubr.bf16.gmra.mrb[140].mxu1 %v15317_v11 }
 0x69a   :  { %10651 = vmatmul.mubr.bf16.gmra.mrb[76].mxu0 %v15316_v14  ;;  %12265 = vmatprep.mubr.bf16.mxu1 %v15320_v15  ;;  %v15337_v14 = vld [vmem:[%s19535_s0 + $0xd10] ss:$108 sps:$4 sm:$0xff]  }
 0x69b   :  { %10658 = vmatprep.mubr.bf16.mxu0 %v15318_v18  ;;  %v15340_v18 = vld [vmem:[%s19535_s0 + $0xde8] ss:$108 sps:$4 sm:$0xff]  }
 0x69c   :  { %v18861_v52 = vpop.f32.mrb[68].mxu1 }
 0x69d   :  { %v8615_v20 = vpop.f32.mrb[69].mxu1 }
 0x69e   :  { %v18866_v23 = vpop.f32.mrb[70].mxu1 }
 0x69f   :  { %v8618_v30 = vpop.f32.mrb[71].mxu1 }
 0x6a0   :  { %v15342_v30 = vld [vmem:[%s19535_s0 + $0xec0] ss:$108 sps:$4 sm:$0xff]  }
 0x6a1   :  { %12266 = vmatmul.mubr.bf16.gmra.mrb[144].mxu1 %v15322_v22  ;;  %v15338_v22 = vld [vmem:[%s19535_s0 + $0x14a4] ss:$108 sps:$4 sm:$0xff]  }
 0x6a2   :  { %10659 = vmatmul.mubr.bf16.gmra.mrb[80].mxu0 %v15321_v25  ;;  %12269 = vmatprep.mubr.bf16.mxu1 %v15325_v26 }
 0x6a3   :  { %10666 = vmatprep.mubr.bf16.mxu0 %v15323_v31 }
 0x6a4   :  { %v18877_v34 = vpop.f32.mrb[72].mxu1 }
 0x6a5   :  { %v8623_v35 = vpop.f32.mrb[73].mxu1 }
 0x6a6   :  { %v18882_v39 = vpop.f32.mrb[74].mxu1  ;;  %v15341_v35 = vld [vmem:[%s19535_s0 + $0x14a0] ss:$108 sps:$4 sm:$0xff]  }
 0x6a7   :  { %v8626_v47 = vpop.f32.mrb[75].mxu1 }
 0x6a9   :  { %12270 = vmatmul.mubr.bf16.gmra.mrb[148].mxu1 %v15327_v38  ;;  %v15345_v38 = vld [vmem:[%s19535_s0 + $0xf98] ss:$108 sps:$4 sm:$0xff]  }
 0x6aa   :  { %10667 = vmatmul.mubr.bf16.gmra.mrb[84].mxu0 %v15326_v43  ;;  %12273 = vmatprep.mubr.bf16.mxu1 %v15330_v44  ;;  %v15343_v44 = vld [vmem:[%s19535_s0 + $0x157c] ss:$108 sps:$4 sm:$0xff]  }
 0x6ab   :  { %10674 = vmatprep.mubr.bf16.mxu0 %v15328_v49 }
 0x6ac   :  { %v18893_v51 = vpop.f32.mrb[76].mxu1 }
 0x6ad   :  { %v8631_v53 = vpop.f32.mrb[77].mxu1 }
 0x6ae   :  { %v18898_v59 = vpop.f32.mrb[78].mxu1  ;;  %v15347_v53 = vld [vmem:[%s19535_s0 + $0x1070] ss:$108 sps:$4 sm:$0xff]  }
 0x6af   :  { %v8634_v4 = vpop.f32.mrb[79].mxu1 }
 0x6b1   :  { %12274 = vmatmul.mubr.bf16.gmra.mrb[152].mxu1 %v15332_v58 }
 0x6b2   :  { %10675 = vmatmul.mubr.bf16.gmra.mrb[88].mxu0 %v15331_v63  ;;  %12277 = vmatprep.mubr.bf16.mxu1 %v15335_v1  ;;  %v15346_v63 = vld [vmem:[%s19535_s0 + $0x1578] ss:$108 sps:$4 sm:$0xff]   ;;  %v15350_v1 = vld [vmem:[%s19535_s0 + $0x1148] ss:$108 sps:$4 sm:$0xff]  }
 0x6b3   :  { %10682 = vmatprep.mubr.bf16.mxu0 %v15333_v5  ;;  %v15348_v5 = vld [vmem:[%s19535_s0 + $0x1654] ss:$108 sps:$4 sm:$0xff]  }
 0x6b4   :  { %v18909_v8 = vpop.f32.mrb[80].mxu1 }
 0x6b5   :  { %v8639_v11 = vpop.f32.mrb[81].mxu1 }
 0x6b6   :  { %v18914_v15 = vpop.f32.mrb[82].mxu1 }
 0x6b7   :  { %v8642_v20 = vpop.f32.mrb[83].mxu1 }
 0x6b8   :  { %v15351_v20 = vld [vmem:[%s19535_s0 + $0x1650] ss:$108 sps:$4 sm:$0xff]  }
 0x6b9   :  { %12278 = vmatmul.mubr.bf16.gmra.mrb[156].mxu1 %v15337_v14 }
 0x6ba   :  { %10683 = vmatmul.mubr.bf16.gmra.mrb[92].mxu0 %v15336_v16  ;;  %12281 = vmatprep.mubr.bf16.mxu1 %v15340_v18  ;;  %v15352_v16 = vld [vmem:[%s19535_s0 + $0x1220] ss:$108 sps:$4 sm:$0xff]  }
 0x6bb   :  { %10690 = vmatprep.mubr.bf16.mxu0 %v15338_v22  ;;  %v15355_v22 = vld [vmem:[%s19535_s0 + $0x12f8] ss:$108 sps:$4 sm:$0xff]  }
 0x6bc   :  { %v18925_v25 = vpop.f32.mrb[84].mxu1 }
 0x6bd   :  { %v8647_v26 = vpop.f32.mrb[85].mxu1 }
 0x6be   :  { %v18930_v31 = vpop.f32.mrb[86].mxu1 }
 0x6bf   :  { %v8650_v43 = vpop.f32.mrb[87].mxu1 }
 0x6c1   :  { %12282 = vmatmul.mubr.bf16.gmra.mrb[160].mxu1 %v15342_v30  ;;  %v15353_v30 = vld [vmem:[%s19535_s0 + $0x172c] ss:$108 sps:$4 sm:$0xff]  }
 0x6c2   :  { %10691 = vmatmul.mubr.bf16.gmra.mrb[96].mxu0 %v15341_v35  ;;  %12285 = vmatprep.mubr.bf16.mxu1 %v15345_v38  ;;  %v18976_v35 = vld [vmem:[%s19536_s2] ss:$0 sm:$0xff] }
 0x6c3   :  { %10698 = vmatprep.mubr.bf16.mxu0 %v15343_v44  ;;  %v12345_v38 = vadd.f32 %v18976_v35, %v18567_v29  ;;  %v15357_v44 = vld [vmem:[%s19535_s0 + $0x13d0] ss:$108 sps:$4 sm:$0xff]  }
 0x6c4   :  { %v18941_v47 = vpop.f32.mrb[88].mxu1 }
 0x6c5   :  { %v8655_v49 = vpop.f32.mrb[89].mxu1 }
 0x6c6   :  { %v18946_v58 = vpop.f32.mrb[90].mxu1  ;;  %v12347_v49 = vadd.f32 %v18976_v35, %v18572_v32  ;;  %v12349_v32 = vadd.f32 %v18976_v35, %v18583_v37 }
 0x6c7   :  { %v8658_v4 = vpop.f32.mrb[91].mxu1 }
 0x6c8   :  { %v15360_v4 = vld [vmem:[%s19535_s0 + $0x14a8] ss:$108 sps:$4 sm:$0xff]  }
 0x6c9   :  { %12286 = vmatmul.mubr.bf16.gmra.mrb[164].mxu1 %v15347_v53 }
 0x6ca   :  { %10699 = vmatmul.mubr.bf16.gmra.mrb[100].mxu0 %v15346_v63  ;;  %12289 = vmatprep.mubr.bf16.mxu1 %v15350_v1  ;;  %v15356_v1 = vld [vmem:[%s19535_s0 + $0x1728] ss:$108 sps:$4 sm:$0xff]  }
 0x6cb   :  { %10706 = vmatprep.mubr.bf16.mxu0 %v15348_v5  ;;  %v15358_v5 = vld [vmem:[%s19535_s0 + $0x1804] ss:$108 sps:$4 sm:$0xff]  }
 0x6cc   :  { %v18957_v11 = vpop.f32.mrb[92].mxu1 }
 0x6cd   :  { %v8663_v14 = vpop.f32.mrb[93].mxu1 }
 0x6ce   :  { %v18962_v18 = vpop.f32.mrb[94].mxu1 }
 0x6cf   :  { %v8666_v26 = vpop.f32.mrb[95].mxu1 }
 0x6d0   :  { %v12351_v26 = vadd.f32 %v18976_v35, %v18588_v40  ;;  %v12353_v40 = vadd.f32 %v18976_v35, %v18599_v45 }
 0x6d1   :  { %12290 = vmatmul.mubr.bf16.gmra.mrb[168].mxu1 %v15352_v16 }
 0x6d2   :  { %10707 = vmatmul.mubr.bf16.gmra.mrb[104].mxu0 %v15351_v20  ;;  %12293 = vmatprep.mubr.bf16.mxu1 %v15355_v22  ;;  %v15362_v22 = vld [vmem:[%s19535_s0 + $0x1580] ss:$108 sps:$4 sm:$0xff]  }
 0x6d3   :  { %10714 = vmatprep.mubr.bf16.mxu0 %v15353_v30 }
 0x6d5   :  { %v10500_v43 = vpop.f32.mrb[0].mxu0 }
 0x6d6   :  { %v18985_v53 = vadd.f32 %v12345_v38, %v10500_v43  ;;  %v10502_v63 = vpop.f32.mrb[1].mxu0  ;;  %v15361_v43 = vld [vmem:[%s19535_s0 + $0x1800] ss:$108 sps:$4 sm:$0xff]  }
 0x6d7   :  { %v10503_v29 = vpop.f32.mrb[2].mxu0 }
 0x6d8   :  { %v18996_v14 = vadd.f32 %v12347_v49, %v10503_v29  ;;  %v10505_v16 = vpop.f32.mrb[3].mxu0  ;;  %v15363_v49 = vld [vmem:[%s19535_s0 + $0x18dc] ss:$108 sps:$4 sm:$0xff]  }
 0x6d9   :  { %12294 = vmatmul.mubr.bf16.gmra.mrb[172].mxu1 %v15357_v44  ;;  %v15365_v44 = vld [vmem:[%s19535_s0 + $0x1658] ss:$108 sps:$4 sm:$0xff]   ;;  %v15367_v29 = vld [vmem:[%s19535_s0 + $0x1730] ss:$108 sps:$4 sm:$0xff]  }
 0x6da   :  { %10715 = vmatmul.mubr.bf16.gmra.mrb[108].mxu0 %v15356_v1  ;;  %12297 = vmatprep.mubr.bf16.mxu1 %v15360_v4 }
 0x6db   :  { %10722 = vmatprep.mubr.bf16.mxu0 %v15358_v5  ;;  %v12355_v5 = vadd.f32 %v18976_v35, %v18604_v48  ;;  %v12357_v48 = vadd.f32 %v18976_v35, %v18615_v54 }
 0x6dd   :  { %v10508_v20 = vpop.f32.mrb[4].mxu0 }
 0x6de   :  { %v19005_v30 = vadd.f32 %v12349_v32, %v10508_v20  ;;  %v10510_v38 = vpop.f32.mrb[5].mxu0  ;;  %v15366_v20 = vld [vmem:[%s19535_s0 + $0x18d8] ss:$108 sps:$4 sm:$0xff]  }
 0x6df   :  { %v10511_v37 = vpop.f32.mrb[6].mxu0 }
 0x6e0   :  { %v19016_v63 = vadd.f32 %v12351_v26, %v10511_v37  ;;  %v10513_v1 = vpop.f32.mrb[7].mxu0  ;;  %v15368_v26 = vld [vmem:[%s19535_s0 + $0x19b4] ss:$108 sps:$4 sm:$0xff]  }
 0x6e1   :  { %12298 = vmatmul.mubr.bf16.gmra.mrb[176].mxu1 %v15362_v22  ;;  %v15370_v22 = vld [vmem:[%s19535_s0 + $0x1808] ss:$108 sps:$4 sm:$0xff]   ;;  %v15372_v37 = vld [vmem:[%s19535_s0 + $0x18e0] ss:$108 sps:$4 sm:$0xff]  }
 0x6e2   :  { %10723 = vmatmul.mubr.bf16.gmra.mrb[112].mxu0 %v15361_v43  ;;  %12301 = vmatprep.mubr.bf16.mxu1 %v15365_v44 }
 0x6e3   :  { %10730 = vmatprep.mubr.bf16.mxu0 %v15363_v49  ;;  %v12359_v49 = vadd.f32 %v18976_v35, %v18620_v57  ;;  %v12361_v57 = vadd.f32 %v18976_v35, %v18631_v62  ;;  %v12365_v62 = vadd.f32 %v18976_v35, %v18647_v7 }
 0x6e5   :  { %v10516_v4 = vpop.f32.mrb[8].mxu0 }
 0x6e6   :  { %v19025_v16 = vadd.f32 %v12353_v40, %v10516_v4  ;;  %v10518_v32 = vpop.f32.mrb[9].mxu0  ;;  %v15371_v4 = vld [vmem:[%s19535_s0 + $0x19b0] ss:$108 sps:$4 sm:$0xff]  }
 0x6e7   :  { %v10519_v45 = vpop.f32.mrb[10].mxu0 }
 0x6e8   :  { %v19036_v38 = vadd.f32 %v12355_v5, %v10519_v45  ;;  %v10521_v43 = vpop.f32.mrb[11].mxu0  ;;  %v15373_v5 = vld [vmem:[%s19535_s0 + $0x1a8c] ss:$108 sps:$4 sm:$0xff]   ;;  %v15377_v45 = vld [vmem:[%s19535_s0 + $0x1a90] ss:$108 sps:$4 sm:$0xff]  }
 0x6e9   :  { %12302 = vmatmul.mubr.bf16.gmra.mrb[180].mxu1 %v15367_v29  ;;  %v15375_v29 = vld [vmem:[%s19535_s0 + $0x19b8] ss:$108 sps:$4 sm:$0xff]  }
 0x6ea   :  { %10731 = vmatmul.mubr.bf16.gmra.mrb[116].mxu0 %v15366_v20  ;;  %12305 = vmatprep.mubr.bf16.mxu1 %v15370_v22 }
 0x6eb   :  { %10738 = vmatprep.mubr.bf16.mxu0 %v15368_v26  ;;  %v12363_v26 = vadd.f32 %v18976_v35, %v18636_v2  ;;  %v12367_v2 = vadd.f32 %v18976_v35, %v18652_v10 }
 0x6ed   :  { %v10524_v44 = vpop.f32.mrb[12].mxu0 }
 0x6ee   :  { %v19045_v1 = vadd.f32 %v12357_v48, %v10524_v44  ;;  %v10526_v40 = vpop.f32.mrb[13].mxu0  ;;  %v15376_v44 = vld [vmem:[%s19535_s0 + $0x1a88] ss:$108 sps:$4 sm:$0xff]  }
 0x6ef   :  { %v10527_v54 = vpop.f32.mrb[14].mxu0 }
 0x6f0   :  { %v19056_v32 = vadd.f32 %v12359_v49, %v10527_v54  ;;  %v10529_v20 = vpop.f32.mrb[15].mxu0 }
 0x6f1   :  { %12306 = vmatmul.mubr.bf16.gmra.mrb[184].mxu1 %v15372_v37 }
 0x6f2   :  { %10739 = vmatmul.mubr.bf16.gmra.mrb[120].mxu0 %v15371_v4  ;;  %12309 = vmatprep.mubr.bf16.mxu1 %v15375_v29 }
 0x6f3   :  { %10746 = vmatprep.mubr.bf16.mxu0 %v15373_v5 }
 0x6f5   :  { %v10532_v22 = vpop.f32.mrb[16].mxu0 }
 0x6f6   :  { %v19065_v43 = vadd.f32 %v12361_v57, %v10532_v22  ;;  %v10534_v48 = vpop.f32.mrb[17].mxu0  ;;  %v12369_v22 = vadd.f32 %v18976_v35, %v18670_v17 }
 0x6f7   :  { %v10535_v37 = vpop.f32.mrb[18].mxu0 }
 0x6f8   :  { %v19070_v49 = vadd.f32 %v12363_v26, %v10535_v37  ;;  %v10537_v40 = vpop.f32.mrb[19].mxu0 }
 0x6f9   :  { %12310 = vmatmul.mubr.bf16.gmra.mrb[188].mxu1 %v15377_v45  ;;  %v12371_v45 = vadd.f32 %v18976_v35, %v18675_v0  ;;  %v12373_v40 = vadd.f32 %v18976_v35, %v18689_v24  ;;  %v12379_v24 = vadd.f32 %v18976_v35, %v18719_v42  ;;  %v12383_v42 = vadd.f32 %v18976_v35, %v18738_v55 }
 0x6fa   :  { %10747 = vmatmul.mubr.bf16.gmra.mrb[124].mxu0 %v15376_v44  ;;  %v12387_v55 = vadd.f32 %v18976_v35, %v18754_v3  ;;  %v12391_v3 = vadd.f32 %v18976_v35, %v18770_v13  ;;  %v12395_v13 = vadd.f32 %v18976_v35, %v18786_v21  ;;  %v12399_v21 = vadd.f32 %v18976_v35, %v18802_v33 }
 0x6fb   :  { %v12403_v33 = vadd.f32 %v18976_v35, %v18818_v46  ;;  %v12407_v46 = vadd.f32 %v18976_v35, %v18834_v60  ;;  %v12411_v60 = vadd.f32 %v18976_v35, %v18850_v12 }
 0x6fd   :  { %v10540_v4 = vpop.f32.mrb[20].mxu0 }
 0x6fe   :  { %v19076_v29 = vadd.f32 %v12365_v62, %v10540_v4  ;;  %v10542_v54 = vpop.f32.mrb[21].mxu0  ;;  %v12375_v4 = vadd.f32 %v18976_v35, %v18697_v28 }
 0x6ff   :  { %v10543_v5 = vpop.f32.mrb[22].mxu0 }
 0x700   :  { %v19078_v20 = vadd.f32 %v12367_v2, %v10543_v5  ;;  %v10545_v57 = vpop.f32.mrb[23].mxu0 }
 0x701   :  { %v12377_v57 = vadd.f32 %v18976_v35, %v18711_v36  ;;  %v12381_v36 = vadd.f32 %v18976_v35, %v18733_v50  ;;  %v12385_v50 = vadd.f32 %v18976_v35, %v18749_v61  ;;  %v12389_v61 = vadd.f32 %v18976_v35, %v18765_v9 }
 0x702   :  { %v12393_v9 = vadd.f32 %v18976_v35, %v18781_v19  ;;  %v12397_v19 = vadd.f32 %v18976_v35, %v18797_v27  ;;  %v12401_v27 = vadd.f32 %v18976_v35, %v18813_v41  ;;  %v12405_v41 = vadd.f32 %v18976_v35, %v18829_v56 }
 0x703   :  { %v12409_v56 = vadd.f32 %v18976_v35, %v18845_v6 }
 0x705   :  { %v10548_v26 = vpop.f32.mrb[24].mxu0 }
 0x706   :  { %v19084_v48 = vadd.f32 %v12369_v22, %v10548_v26  ;;  %v10550_v7 = vpop.f32.mrb[25].mxu0 }
 0x707   :  { %v10551_v44 = vpop.f32.mrb[26].mxu0 }
 0x708   :  { %v19086_v37 = vadd.f32 %v12371_v45, %v10551_v44  ;;  %v10553_v10 = vpop.f32.mrb[27].mxu0 }
 0x70d   :  { %v10556_v62 = vpop.f32.mrb[28].mxu0 }
 0x70e   :  { %v19092_v2 = vadd.f32 %v12373_v40, %v10556_v62  ;;  %v10558_v17 = vpop.f32.mrb[29].mxu0 }
 0x70f   :  { %v10559_v54 = vpop.f32.mrb[30].mxu0 }
 0x710   :  { %v19094_v5 = vadd.f32 %v12375_v4, %v10559_v54  ;;  %v10561_v0 = vpop.f32.mrb[31].mxu0 }
 0x714   :  { %v19098_v22 = vpop.f32.mrb[96].mxu1 }
 0x715   :  { %v10564_v26 = vpop.f32.mrb[32].mxu0  ;;  %v8960_v45 = vpop.f32.mrb[97].mxu1 }
 0x716   :  { %v19102_v7 = vadd.f32 %v12377_v57, %v10564_v26  ;;  %v10566_v28 = vpop.f32.mrb[33].mxu0  ;;  %v19104_v44 = vpop.f32.mrb[98].mxu1 }
 0x717   :  { %19538 = vst [vmem:[#allocation2_spill] sm:$0xff] %v19104_v44  ;;  %v10567_v10 = vpop.f32.mrb[34].mxu0  ;;  %v8963_v40 = vpop.f32.mrb[99].mxu1 }
 0x718   :  { %v19106_v62 = vadd.f32 %v12379_v24, %v10567_v10  ;;  %v10569_v4 = vpop.f32.mrb[35].mxu0 }
 0x71c   :  { %v19110_v17 = vpop.f32.mrb[100].mxu1 }
 0x71d   :  { %19539 = vst [vmem:[#allocation3_spill] sm:$0xff] %v19110_v17  ;;  %v10572_v54 = vpop.f32.mrb[36].mxu0  ;;  %v8968_v0 = vpop.f32.mrb[101].mxu1 }
 0x71e   :  { %v19114_v57 = vadd.f32 %v12381_v36, %v10572_v54  ;;  %v10574_v26 = vpop.f32.mrb[37].mxu0  ;;  %v19116_v45 = vpop.f32.mrb[102].mxu1 }
 0x71f   :  { %19540 = vst [vmem:[#allocation4_spill] sm:$0xff] %v19116_v45  ;;  %v10575_v28 = vpop.f32.mrb[38].mxu0  ;;  %v8971_v40 = vpop.f32.mrb[103].mxu1 }
 0x720   :  { %v19118_v24 = vadd.f32 %v12383_v42, %v10575_v28  ;;  %v10577_v10 = vpop.f32.mrb[39].mxu0 }
 0x724   :  { %v19122_v4 = vpop.f32.mrb[104].mxu1 }
 0x725   :  { %19541 = vst [vmem:[#allocation5_spill] sm:$0xff] %v19122_v4  ;;  %v10580_v17 = vpop.f32.mrb[40].mxu0  ;;  %v8976_v0 = vpop.f32.mrb[105].mxu1 }
 0x726   :  { %v19126_v36 = vadd.f32 %v12385_v50, %v10580_v17  ;;  %v10582_v54 = vpop.f32.mrb[41].mxu0  ;;  %v19128_v26 = vpop.f32.mrb[106].mxu1 }
 0x727   :  { %19542 = vst [vmem:[#allocation6_spill] sm:$0xff] %v19128_v26  ;;  %v10583_v45 = vpop.f32.mrb[42].mxu0  ;;  %v8979_v40 = vpop.f32.mrb[107].mxu1 }
 0x728   :  { %v19130_v42 = vadd.f32 %v12387_v55, %v10583_v45  ;;  %v10585_v28 = vpop.f32.mrb[43].mxu0 }
 0x72c   :  { %v19134_v10 = vpop.f32.mrb[108].mxu1 }
 0x72d   :  { %19543 = vst [vmem:[#allocation7_spill] sm:$0xff] %v19134_v10  ;;  %v10588_v4 = vpop.f32.mrb[44].mxu0  ;;  %v8984_v0 = vpop.f32.mrb[109].mxu1 }
 0x72e   :  { %v19138_v17 = vadd.f32 %v12389_v61, %v10588_v4  ;;  %v10590_v50 = vpop.f32.mrb[45].mxu0  ;;  %v19140_v54 = vpop.f32.mrb[110].mxu1 }
 0x72f   :  { %19544 = vst [vmem:[#allocation8_spill] sm:$0xff] %v19140_v54  ;;  %v10591_v26 = vpop.f32.mrb[46].mxu0  ;;  %v8987_v40 = vpop.f32.mrb[111].mxu1 }
 0x730   :  { %v19142_v45 = vadd.f32 %v12391_v3, %v10591_v26  ;;  %v10593_v55 = vpop.f32.mrb[47].mxu0 }
 0x734   :  { %v19146_v28 = vpop.f32.mrb[112].mxu1 }
 0x735   :  { %19545 = vst [vmem:[#allocation9_spill] sm:$0xff] %v19146_v28  ;;  %v10596_v10 = vpop.f32.mrb[48].mxu0  ;;  %v8992_v0 = vpop.f32.mrb[113].mxu1 }
 0x736   :  { %v19150_v4 = vadd.f32 %v12393_v9, %v10596_v10  ;;  %v10598_v61 = vpop.f32.mrb[49].mxu0  ;;  %v19152_v50 = vpop.f32.mrb[114].mxu1 }
 0x737   :  { %19546 = vst [vmem:[#allocation10_spill] sm:$0xff] %v19152_v50  ;;  %v10599_v54 = vpop.f32.mrb[50].mxu0  ;;  %v8995_v40 = vpop.f32.mrb[115].mxu1 }
 0x738   :  { %v19154_v26 = vadd.f32 %v12395_v13, %v10599_v54  ;;  %v10601_v3 = vpop.f32.mrb[51].mxu0 }
 0x73c   :  { %v19158_v55 = vpop.f32.mrb[116].mxu1 }
 0x73d   :  { %19547 = vst [vmem:[#allocation11_spill] sm:$0xff] %v19158_v55  ;;  %v10604_v28 = vpop.f32.mrb[52].mxu0  ;;  %v9000_v0 = vpop.f32.mrb[117].mxu1 }
 0x73e   :  { %v19162_v10 = vadd.f32 %v12397_v19, %v10604_v28  ;;  %v10606_v9 = vpop.f32.mrb[53].mxu0  ;;  %v19164_v61 = vpop.f32.mrb[118].mxu1 }
 0x73f   :  { %19548 = vst [vmem:[#allocation12_spill] sm:$0xff] %v19164_v61  ;;  %v10607_v50 = vpop.f32.mrb[54].mxu0  ;;  %v9003_v40 = vpop.f32.mrb[119].mxu1 }
 0x740   :  { %v19166_v54 = vadd.f32 %v12399_v21, %v10607_v50  ;;  %v10609_v13 = vpop.f32.mrb[55].mxu0 }
 0x744   :  { %v19170_v3 = vpop.f32.mrb[120].mxu1 }
 0x745   :  { %19549 = vst [vmem:[#allocation13_spill] sm:$0xff] %v19170_v3  ;;  %v10612_v55 = vpop.f32.mrb[56].mxu0  ;;  %v9008_v0 = vpop.f32.mrb[121].mxu1 }
 0x746   :  { %v19174_v28 = vadd.f32 %v12401_v27, %v10612_v55  ;;  %v10614_v19 = vpop.f32.mrb[57].mxu0  ;;  %v19176_v9 = vpop.f32.mrb[122].mxu1 }
 0x747   :  { %19550 = vst [vmem:[#allocation14_spill] sm:$0xff] %v19176_v9  ;;  %v10615_v61 = vpop.f32.mrb[58].mxu0  ;;  %v9011_v40 = vpop.f32.mrb[123].mxu1 }
 0x748   :  { %v19178_v50 = vadd.f32 %v12403_v33, %v10615_v61  ;;  %v10617_v21 = vpop.f32.mrb[59].mxu0 }
 0x74c   :  { %v19182_v13 = vpop.f32.mrb[124].mxu1 }
 0x74d   :  { %19551 = vst [vmem:[#allocation15_spill] sm:$0xff] %v19182_v13  ;;  %v10620_v3 = vpop.f32.mrb[60].mxu0  ;;  %v9016_v0 = vpop.f32.mrb[125].mxu1 }
 0x74e   :  { %v19186_v55 = vadd.f32 %v12405_v41, %v10620_v3  ;;  %v10622_v27 = vpop.f32.mrb[61].mxu0  ;;  %v19188_v19 = vpop.f32.mrb[126].mxu1 }
 0x74f   :  { %v10623_v9 = vpop.f32.mrb[62].mxu0  ;;  %v9019_v40 = vpop.f32.mrb[127].mxu1 }
 0x750   :  { %v19190_v61 = vadd.f32 %v12407_v46, %v10623_v9  ;;  %v10625_v33 = vpop.f32.mrb[63].mxu0 }
 0x754   :  { %v12251_v21 = vpop.f32.mrb[128].mxu1 }
 0x755   :  { %v10628_v13 = vpop.f32.mrb[64].mxu0  ;;  %v10798_v0 = vadd.f32 %v19005_v30, %v12251_v21  ;;  %v10789_v44 = vpop.f32.mrb[129].mxu1  ;;  %v12415_v21 = vadd.f32 %v18976_v35, %v18866_v23 }
 0x756   :  { %v19197_v3 = vadd.f32 %v12409_v56, %v10628_v13  ;;  %v10630_v41 = vpop.f32.mrb[65].mxu0  ;;  %v10790_v27 = vadd.f32 %v18985_v53, %v10789_v44  ;;  %v12252_v40 = vpop.f32.mrb[130].mxu1  ;;  %v12413_v53 = vadd.f32 %v18976_v35, %v18861_v52 }
 0x757   :  { %11046 = vst [vmem:[%s19537_s3 + $0x10] sm:$0xff] %v10798_v0  ;;  %v10631_v9 = vpop.f32.mrb[66].mxu0  ;;  %v10801_v6 = vadd.f32 %v19016_v63, %v12252_v40  ;;  %v10792_v46 = vpop.f32.mrb[131].mxu1 }
 0x758   :  { %11044 = vst [vmem:[%s19537_s3] sm:$0xff] %v10790_v27  ;;  %v19207_v30 = vadd.f32 %v12411_v60, %v10631_v9  ;;  %v10633_v12 = vpop.f32.mrb[67].mxu0  ;;  %v10793_v13 = vadd.f32 %v18996_v14, %v10792_v46 }
 0x759   :  { %11047 = vst [vmem:[%s19537_s3 + $0x18] sm:$0xff] %v10801_v6 }
 0x75a   :  { %11045 = vst [vmem:[%s19537_s3 + $0x8] sm:$0xff] %v10793_v13  ;;  %v12419_v13 = vadd.f32 %v18976_v35, %v18882_v39 }
 0x75c   :  { %v12255_v63 = vpop.f32.mrb[132].mxu1 }
 0x75d   :  { %v10636_v44 = vpop.f32.mrb[68].mxu0  ;;  %v10814_v33 = vadd.f32 %v19045_v1, %v12255_v63  ;;  %v10805_v56 = vpop.f32.mrb[133].mxu1 }
 0x75e   :  { %v19221_v14 = vadd.f32 %v12413_v53, %v10636_v44  ;;  %v10638_v0 = vpop.f32.mrb[69].mxu0  ;;  %v10806_v60 = vadd.f32 %v19025_v16, %v10805_v56  ;;  %v12256_v41 = vpop.f32.mrb[134].mxu1  ;;  %v12417_v16 = vadd.f32 %v18976_v35, %v18877_v34 }
 0x75f   :  { %11050 = vst [vmem:[%s19537_s3 + $0x30] sm:$0xff] %v10814_v33  ;;  %v10639_v27 = vpop.f32.mrb[70].mxu0  ;;  %v10817_v52 = vadd.f32 %v19056_v32, %v12256_v41  ;;  %v10808_v40 = vpop.f32.mrb[135].mxu1 }
 0x760   :  { %11048 = vst [vmem:[%s19537_s3 + $0x20] sm:$0xff] %v10806_v60  ;;  %v19231_v1 = vadd.f32 %v12415_v21, %v10639_v27  ;;  %v10641_v23 = vpop.f32.mrb[71].mxu0  ;;  %v10809_v9 = vadd.f32 %v19036_v38, %v10808_v40  ;;  %v12423_v27 = vadd.f32 %v18976_v35, %v18898_v59 }
 0x761   :  { %11051 = vst [vmem:[%s19537_s3 + $0x38] sm:$0xff] %v10817_v52 }
 0x762   :  { %11049 = vst [vmem:[%s19537_s3 + $0x28] sm:$0xff] %v10809_v9 }
 0x764   :  { %v12259_v32 = vpop.f32.mrb[136].mxu1 }
 0x765   :  { %v10644_v6 = vpop.f32.mrb[72].mxu0  ;;  %v10830_v46 = vadd.f32 %v19076_v29, %v12259_v32  ;;  %v10821_v12 = vpop.f32.mrb[137].mxu1 }
 0x766   :  { %v19245_v38 = vadd.f32 %v12417_v16, %v10644_v6  ;;  %v10646_v53 = vpop.f32.mrb[73].mxu0  ;;  %v10822_v63 = vadd.f32 %v19065_v43, %v10821_v12  ;;  %v12260_v44 = vpop.f32.mrb[138].mxu1  ;;  %v12421_v43 = vadd.f32 %v18976_v35, %v18893_v51 }
 0x767   :  { %11054 = vst [vmem:[%s19537_s3 + $0x50] sm:$0xff] %v10830_v46  ;;  %v10647_v33 = vpop.f32.mrb[74].mxu0  ;;  %v10833_v34 = vadd.f32 %v19078_v20, %v12260_v44  ;;  %v10824_v56 = vpop.f32.mrb[139].mxu1 }
 0x768   :  { %11052 = vst [vmem:[%s19537_s3 + $0x40] sm:$0xff] %v10822_v63  ;;  %v19255_v29 = vadd.f32 %v12419_v13, %v10647_v33  ;;  %v10649_v39 = vpop.f32.mrb[75].mxu0  ;;  %v10825_v21 = vadd.f32 %v19070_v49, %v10824_v56  ;;  %v12427_v13 = vadd.f32 %v18976_v35, %v18914_v15 }
 0x769   :  { %11055 = vst [vmem:[%s19537_s3 + $0x58] sm:$0xff] %v10833_v34 }
 0x76a   :  { %11053 = vst [vmem:[%s19537_s3 + $0x48] sm:$0xff] %v10825_v21 }
 0x76c   :  { %v12263_v20 = vpop.f32.mrb[140].mxu1 }
 0x76d   :  { %v10652_v0 = vpop.f32.mrb[76].mxu0  ;;  %v10846_v60 = vadd.f32 %v19092_v2, %v12263_v20  ;;  %v10837_v41 = vpop.f32.mrb[141].mxu1  ;;  %v12431_v20 = vadd.f32 %v18976_v35, %v18930_v31 }
 0x76e   :  { %v19269_v49 = vadd.f32 %v12421_v43, %v10652_v0  ;;  %v10654_v52 = vpop.f32.mrb[77].mxu0  ;;  %v10838_v40 = vadd.f32 %v19084_v48, %v10837_v41  ;;  %v12264_v23 = vpop.f32.mrb[142].mxu1  ;;  %v12425_v48 = vadd.f32 %v18976_v35, %v18909_v8 }
 0x76f   :  { %11058 = vst [vmem:[%s19537_s3 + $0x70] sm:$0xff] %v10846_v60  ;;  %v10655_v9 = vpop.f32.mrb[78].mxu0  ;;  %v10849_v51 = vadd.f32 %v19094_v5, %v12264_v23  ;;  %v10840_v16 = vpop.f32.mrb[143].mxu1 }
 0x770   :  { %11056 = vst [vmem:[%s19537_s3 + $0x60] sm:$0xff] %v10838_v40  ;;  %v19279_v2 = vadd.f32 %v12423_v27, %v10655_v9  ;;  %v10657_v59 = vpop.f32.mrb[79].mxu0  ;;  %v10841_v32 = vadd.f32 %v19086_v37, %v10840_v16  ;;  %v12435_v16 = vadd.f32 %v18976_v35, %v18946_v58 }
 0x771   :  { %11059 = vst [vmem:[%s19537_s3 + $0x78] sm:$0xff] %v10849_v51 }
 0x772   :  { %11057 = vst [vmem:[%s19537_s3 + $0x68] sm:$0xff] %v10841_v32 }
 0x774   :  { %v12267_v5 = vpop.f32.mrb[144].mxu1 }
 0x775   :  { %v10660_v6 = vpop.f32.mrb[80].mxu0  ;;  %v10862_v46 = vadd.f32 %v19114_v57, %v12267_v5  ;;  %v10853_v12 = vpop.f32.mrb[145].mxu1 }
 0x776   :  { %v19293_v37 = vadd.f32 %v12425_v48, %v10660_v6  ;;  %v10662_v53 = vpop.f32.mrb[81].mxu0  ;;  %v10854_v63 = vadd.f32 %v19102_v7, %v10853_v12  ;;  %v12268_v44 = vpop.f32.mrb[146].mxu1  ;;  %v12429_v7 = vadd.f32 %v18976_v35, %v18925_v25 }
 0x777   :  { %11062 = vst [vmem:[%s19537_s3 + $0x90] sm:$0xff] %v10862_v46  ;;  %v10663_v33 = vpop.f32.mrb[82].mxu0  ;;  %v10865_v8 = vadd.f32 %v19118_v24, %v12268_v44  ;;  %v10856_v34 = vpop.f32.mrb[147].mxu1 }
 0x778   :  { %11060 = vst [vmem:[%s19537_s3 + $0x80] sm:$0xff] %v10854_v63  ;;  %v19303_v57 = vadd.f32 %v12427_v13, %v10663_v33  ;;  %v10665_v15 = vpop.f32.mrb[83].mxu0  ;;  %v10857_v56 = vadd.f32 %v19106_v62, %v10856_v34  ;;  %v12439_v63 = vadd.f32 %v18976_v35, %v18962_v18 }
 0x779   :  { %11063 = vst [vmem:[%s19537_s3 + $0x98] sm:$0xff] %v10865_v8 }
 0x77a   :  { %11061 = vst [vmem:[%s19537_s3 + $0x88] sm:$0xff] %v10857_v56 }
 0x77c   :  { %v12271_v24 = vpop.f32.mrb[148].mxu1 }
 0x77d   :  { %v10668_v39 = vpop.f32.mrb[84].mxu0  ;;  %v10878_v21 = vadd.f32 %v19138_v17, %v12271_v24  ;;  %v10869_v43 = vpop.f32.mrb[149].mxu1 }
 0x77e   :  { %v19317_v62 = vadd.f32 %v12429_v7, %v10668_v39  ;;  %v10670_v0 = vpop.f32.mrb[85].mxu0  ;;  %v10870_v60 = vadd.f32 %v19126_v36, %v10869_v43  ;;  %v12272_v41 = vpop.f32.mrb[150].mxu1  ;;  %v12433_v36 = vadd.f32 %v18976_v35, %v18941_v47 }
 0x77f   :  { %11066 = vst [vmem:[%s19537_s3 + $0xb0] sm:$0xff] %v10878_v21  ;;  %v10671_v27 = vpop.f32.mrb[86].mxu0  ;;  %v10881_v25 = vadd.f32 %v19142_v45, %v12272_v41  ;;  %v10872_v52 = vpop.f32.mrb[151].mxu1  ;;  %v19552_v21 = vld [vmem:[#allocation2_spill] sm:$0xff] }
 0x780   :  { %11064 = vst [vmem:[%s19537_s3 + $0xa0] sm:$0xff] %v10870_v60  ;;  %v19327_v17 = vadd.f32 %v12431_v20, %v10671_v27  ;;  %v10673_v31 = vpop.f32.mrb[87].mxu0  ;;  %v10873_v40 = vadd.f32 %v19130_v42, %v10872_v52  ;;  %v12443_v43 = vadd.f32 %v18976_v35, %v19552_v21 }
 0x781   :  { %11067 = vst [vmem:[%s19537_s3 + $0xb8] sm:$0xff] %v10881_v25 }
 0x782   :  { %11065 = vst [vmem:[%s19537_s3 + $0xa8] sm:$0xff] %v10873_v40 }
 0x784   :  { %v12275_v45 = vpop.f32.mrb[152].mxu1 }
 0x785   :  { %v10676_v23 = vpop.f32.mrb[88].mxu0  ;;  %v10894_v9 = vadd.f32 %v19162_v10, %v12275_v45  ;;  %v10885_v51 = vpop.f32.mrb[153].mxu1 }
 0x786   :  { %v19341_v42 = vadd.f32 %v12433_v36, %v10676_v23  ;;  %v10678_v59 = vpop.f32.mrb[89].mxu0  ;;  %v10886_v32 = vadd.f32 %v19150_v4, %v10885_v51  ;;  %v12276_v48 = vpop.f32.mrb[154].mxu1  ;;  %v12437_v4 = vadd.f32 %v18976_v35, %v18957_v11  ;;  %v19554_v23 = vld [vmem:[#allocation4_spill] sm:$0xff] }
 0x787   :  { %11070 = vst [vmem:[%s19537_s3 + $0xd0] sm:$0xff] %v10894_v9  ;;  %v10679_v5 = vpop.f32.mrb[90].mxu0  ;;  %v10897_v47 = vadd.f32 %v19166_v54, %v12276_v48  ;;  %v10888_v6 = vpop.f32.mrb[155].mxu1  ;;  %v12447_v9 = vadd.f32 %v18976_v35, %v19554_v23 }
 0x788   :  { %11068 = vst [vmem:[%s19537_s3 + $0xc0] sm:$0xff] %v10886_v32  ;;  %v19351_v10 = vadd.f32 %v12435_v16, %v10679_v5  ;;  %v10681_v58 = vpop.f32.mrb[91].mxu0  ;;  %v10889_v46 = vadd.f32 %v19154_v26, %v10888_v6 }
 0x789   :  { %11071 = vst [vmem:[%s19537_s3 + $0xd8] sm:$0xff] %v10897_v47 }
 0x78a   :  { %11069 = vst [vmem:[%s19537_s3 + $0xc8] sm:$0xff] %v10889_v46 }
 0x78c   :  { %v12279_v54 = vpop.f32.mrb[156].mxu1 }
 0x78d   :  { %v10684_v12 = vpop.f32.mrb[92].mxu0  ;;  %v10910_v13 = vadd.f32 %v19186_v55, %v12279_v54  ;;  %v10901_v53 = vpop.f32.mrb[157].mxu1 }
 0x78e   :  { %v19365_v26 = vadd.f32 %v12437_v4, %v10684_v12  ;;  %v10686_v44 = vpop.f32.mrb[93].mxu0  ;;  %v10902_v33 = vadd.f32 %v19174_v28, %v10901_v53  ;;  %v12280_v8 = vpop.f32.mrb[158].mxu1  ;;  %v12441_v28 = vadd.f32 %v18976_v35, %v19098_v22  ;;  %v19556_v12 = vld [vmem:[#allocation6_spill] sm:$0xff] }
 0x78f   :  { %11074 = vst [vmem:[%s19537_s3 + $0xf0] sm:$0xff] %v10910_v13  ;;  %v10687_v34 = vpop.f32.mrb[94].mxu0  ;;  %v10913_v11 = vadd.f32 %v19190_v61, %v12280_v8  ;;  %v10904_v15 = vpop.f32.mrb[159].mxu1  ;;  %v12451_v13 = vadd.f32 %v18976_v35, %v19556_v12 }
 0x790   :  { %11072 = vst [vmem:[%s19537_s3 + $0xe0] sm:$0xff] %v10902_v33  ;;  %v19375_v55 = vadd.f32 %v12439_v63, %v10687_v34  ;;  %v10689_v18 = vpop.f32.mrb[95].mxu0  ;;  %v10905_v56 = vadd.f32 %v19178_v50, %v10904_v15 }
 0x791   :  { %11075 = vst [vmem:[%s19537_s3 + $0xf8] sm:$0xff] %v10913_v11 }
 0x792   :  { %11073 = vst [vmem:[%s19537_s3 + $0xe8] sm:$0xff] %v10905_v56 }
 0x794   :  { %v12283_v61 = vpop.f32.mrb[160].mxu1 }
 0x795   :  { %v10692_v7 = vpop.f32.mrb[96].mxu0  ;;  %v10926_v24 = vadd.f32 %v19221_v14, %v12283_v61  ;;  %v10917_v39 = vpop.f32.mrb[161].mxu1 }
 0x796   :  { %v19389_v50 = vadd.f32 %v12441_v28, %v10692_v7  ;;  %v10694_v20 = vpop.f32.mrb[97].mxu0  ;;  %v10918_v0 = vadd.f32 %v19197_v3, %v10917_v39  ;;  %v12284_v60 = vpop.f32.mrb[162].mxu1  ;;  %v19553_v3 = vld [vmem:[#allocation3_spill] sm:$0xff]  ;;  %v19558_v7 = vld [vmem:[#allocation8_spill] sm:$0xff] }
 0x797   :  { %11078 = vst [vmem:[%s19537_s3 + $0x110] sm:$0xff] %v10926_v24  ;;  %v10695_v41 = vpop.f32.mrb[98].mxu0  ;;  %v10929_v22 = vadd.f32 %v19231_v1, %v12284_v60  ;;  %v10920_v27 = vpop.f32.mrb[163].mxu1  ;;  %v12445_v1 = vadd.f32 %v18976_v35, %v19553_v3  ;;  %v12455_v24 = vadd.f32 %v18976_v35, %v19558_v7 }
 0x798   :  { %11076 = vst [vmem:[%s19537_s3 + $0x100] sm:$0xff] %v10918_v0  ;;  %v19399_v14 = vadd.f32 %v12443_v43, %v10695_v41  ;;  %v10697_v25 = vpop.f32.mrb[99].mxu0  ;;  %v10921_v52 = vadd.f32 %v19207_v30, %v10920_v27 }
 0x799   :  { %11079 = vst [vmem:[%s19537_s3 + $0x118] sm:$0xff] %v10929_v22 }
 0x79a   :  { %11077 = vst [vmem:[%s19537_s3 + $0x108] sm:$0xff] %v10921_v52 }
 0x79c   :  { %v12287_v31 = vpop.f32.mrb[164].mxu1 }
 0x79d   :  { %v10700_v40 = vpop.f32.mrb[100].mxu0  ;;  %v10942_v36 = vadd.f32 %v19269_v49, %v12287_v31  ;;  %v10933_v45 = vpop.f32.mrb[165].mxu1 }
 0x79e   :  { %v12446_v30 = vadd.f32 %v12445_v1, %v10700_v40  ;;  %v10702_v51 = vpop.f32.mrb[101].mxu0  ;;  %v10934_v16 = vadd.f32 %v19245_v38, %v10933_v45  ;;  %v12288_v59 = vpop.f32.mrb[166].mxu1  ;;  %v19555_v38 = vld [vmem:[#allocation5_spill] sm:$0xff]  ;;  %v19560_v1 = vld [vmem:[#allocation10_spill] sm:$0xff] }
 0x79f   :  { %11082 = vst [vmem:[%s19537_s3 + $0x130] sm:$0xff] %v10942_v36  ;;  %v10703_v32 = vpop.f32.mrb[102].mxu0  ;;  %v10945_v48 = vadd.f32 %v19279_v2, %v12288_v59  ;;  %v10936_v5 = vpop.f32.mrb[167].mxu1  ;;  %v12449_v2 = vadd.f32 %v18976_v35, %v19555_v38  ;;  %v12459_v31 = vadd.f32 %v18976_v35, %v19560_v1 }
 0x7a0   :  { %11080 = vst [vmem:[%s19537_s3 + $0x120] sm:$0xff] %v10934_v16  ;;  %v12448_v49 = vadd.f32 %v12447_v9, %v10703_v32  ;;  %v10705_v47 = vpop.f32.mrb[103].mxu0  ;;  %v10937_v6 = vadd.f32 %v19255_v29, %v10936_v5 }
 0x7a1   :  { %11083 = vst [vmem:[%s19537_s3 + $0x138] sm:$0xff] %v10945_v48 }
 0x7a2   :  { %11081 = vst [vmem:[%s19537_s3 + $0x128] sm:$0xff] %v10937_v6  ;;  %v19562_v6 = vld [vmem:[#allocation12_spill] sm:$0xff] }
 0x7a3   :  { %v12463_v38 = vadd.f32 %v18976_v35, %v19562_v6 }
 0x7a4   :  { %v12291_v58 = vpop.f32.mrb[168].mxu1 }
 0x7a5   :  { %v10708_v46 = vpop.f32.mrb[104].mxu0  ;;  %v10958_v4 = vadd.f32 %v19317_v62, %v12291_v58  ;;  %v10949_v54 = vpop.f32.mrb[169].mxu1 }
 0x7a6   :  { %v12450_v29 = vadd.f32 %v12449_v2, %v10708_v46  ;;  %v10710_v53 = vpop.f32.mrb[105].mxu0  ;;  %v10950_v63 = vadd.f32 %v19293_v37, %v10949_v54  ;;  %v12292_v44 = vpop.f32.mrb[170].mxu1  ;;  %v19557_v37 = vld [vmem:[#allocation7_spill] sm:$0xff] }
 0x7a7   :  { %11086 = vst [vmem:[%s19537_s3 + $0x150] sm:$0xff] %v10958_v4  ;;  %v10711_v33 = vpop.f32.mrb[106].mxu0  ;;  %v10961_v8 = vadd.f32 %v19327_v17, %v12292_v44  ;;  %v10952_v34 = vpop.f32.mrb[171].mxu1  ;;  %v12453_v17 = vadd.f32 %v18976_v35, %v19557_v37 }
 0x7a8   :  { %11084 = vst [vmem:[%s19537_s3 + $0x140] sm:$0xff] %v10950_v63  ;;  %v12452_v62 = vadd.f32 %v12451_v13, %v10711_v33  ;;  %v10713_v11 = vpop.f32.mrb[107].mxu0  ;;  %v10953_v15 = vadd.f32 %v19303_v57, %v10952_v34 }
 0x7a9   :  { %11087 = vst [vmem:[%s19537_s3 + $0x158] sm:$0xff] %v10961_v8 }
 0x7aa   :  { %11085 = vst [vmem:[%s19537_s3 + $0x148] sm:$0xff] %v10953_v15  ;;  %v19564_v15 = vld [vmem:[#allocation14_spill] sm:$0xff] }
 0x7ab   :  { %v12467_v37 = vadd.f32 %v18976_v35, %v19564_v15 }
 0x7ac   :  { %v12295_v18 = vpop.f32.mrb[172].mxu1 }
 0x7ad   :  { %v10716_v56 = vpop.f32.mrb[108].mxu0  ;;  %v10974_v28 = vadd.f32 %v19365_v26, %v12295_v18  ;;  %v10965_v61 = vpop.f32.mrb[173].mxu1 }
 0x7ae   :  { %v12454_v57 = vadd.f32 %v12453_v17, %v10716_v56  ;;  %v10718_v39 = vpop.f32.mrb[109].mxu0  ;;  %v10966_v21 = vadd.f32 %v19341_v42, %v10965_v61  ;;  %v12296_v43 = vpop.f32.mrb[174].mxu1  ;;  %v19559_v42 = vld [vmem:[#allocation9_spill] sm:$0xff] }
 0x7af   :  { %11090 = vst [vmem:[%s19537_s3 + $0x170] sm:$0xff] %v10974_v28  ;;  %v10719_v20 = vpop.f32.mrb[110].mxu0  ;;  %v10977_v0 = vadd.f32 %v19375_v55, %v12296_v43  ;;  %v10968_v60 = vpop.f32.mrb[175].mxu1  ;;  %v12457_v55 = vadd.f32 %v18976_v35, %v19559_v42 }
 0x7b0   :  { %11088 = vst [vmem:[%s19537_s3 + $0x160] sm:$0xff] %v10966_v21  ;;  %v12456_v26 = vadd.f32 %v12455_v24, %v10719_v20  ;;  %v10721_v41 = vpop.f32.mrb[111].mxu0  ;;  %v10969_v22 = vadd.f32 %v19351_v10, %v10968_v60  ;;  %v19565_v21 = vld [vmem:[#allocation15_spill] sm:$0xff] }
 0x7b1   :  { %11091 = vst [vmem:[%s19537_s3 + $0x178] sm:$0xff] %v10977_v0  ;;  %v12469_v43 = vadd.f32 %v18976_v35, %v19565_v21 }
 0x7b2   :  { %11089 = vst [vmem:[%s19537_s3 + $0x168] sm:$0xff] %v10969_v22 }
 0x7b4   :  { %v12299_v27 = vpop.f32.mrb[176].mxu1 }
 0x7b5   :  { %v10724_v25 = vpop.f32.mrb[112].mxu0  ;;  %v10990_v52 = vadd.f32 %v12446_v30, %v12299_v27  ;;  %v10981_v3 = vpop.f32.mrb[177].mxu1 }
 0x7b6   :  { %v12458_v40 = vadd.f32 %v12457_v55, %v10724_v25  ;;  %v10726_v10 = vpop.f32.mrb[113].mxu0  ;;  %v10982_v36 = vadd.f32 %v19389_v50, %v10981_v3  ;;  %v12300_v45 = vpop.f32.mrb[178].mxu1  ;;  %v19561_v50 = vld [vmem:[#allocation11_spill] sm:$0xff] }
 0x7b7   :  { %11094 = vst [vmem:[%s19537_s3 + $0x190] sm:$0xff] %v10990_v52  ;;  %v10727_v23 = vpop.f32.mrb[114].mxu0  ;;  %v10993_v9 = vadd.f32 %v12448_v49, %v12300_v45  ;;  %v10984_v51 = vpop.f32.mrb[179].mxu1  ;;  %v12461_v32 = vadd.f32 %v18976_v35, %v19561_v50 }
 0x7b8   :  { %11092 = vst [vmem:[%s19537_s3 + $0x180] sm:$0xff] %v10982_v36  ;;  %v12460_v30 = vadd.f32 %v12459_v31, %v10727_v23  ;;  %v10729_v16 = vpop.f32.mrb[115].mxu0  ;;  %v10985_v59 = vadd.f32 %v19399_v14, %v10984_v51 }
 0x7b9   :  { %11095 = vst [vmem:[%s19537_s3 + $0x198] sm:$0xff] %v10993_v9 }
 0x7ba   :  { %11093 = vst [vmem:[%s19537_s3 + $0x188] sm:$0xff] %v10985_v59 }
 0x7bc   :  { %v12303_v48 = vpop.f32.mrb[180].mxu1 }
 0x7bd   :  { %v10732_v5 = vpop.f32.mrb[116].mxu0  ;;  %v11006_v49 = vadd.f32 %v12454_v57, %v12303_v48  ;;  %v10997_v47 = vpop.f32.mrb[181].mxu1 }
 0x7be   :  { %v12462_v2 = vadd.f32 %v12461_v32, %v10732_v5  ;;  %v10734_v14 = vpop.f32.mrb[117].mxu0  ;;  %v10998_v58 = vadd.f32 %v12450_v29, %v10997_v47  ;;  %v12304_v46 = vpop.f32.mrb[182].mxu1  ;;  %v19563_v29 = vld [vmem:[#allocation13_spill] sm:$0xff] }
 0x7bf   :  { %11098 = vst [vmem:[%s19537_s3 + $0x1b0] sm:$0xff] %v11006_v49  ;;  %v10735_v4 = vpop.f32.mrb[118].mxu0  ;;  %v11009_v54 = vadd.f32 %v12456_v26, %v12304_v46  ;;  %v11000_v12 = vpop.f32.mrb[183].mxu1  ;;  %v12465_v44 = vadd.f32 %v18976_v35, %v19563_v29  ;;  %v12471_v26 = vadd.f32 %v18976_v35, %v19188_v19 }
 0x7c0   :  { %11096 = vst [vmem:[%s19537_s3 + $0x1a0] sm:$0xff] %v10998_v58  ;;  %v12464_v13 = vadd.f32 %v12463_v38, %v10735_v4  ;;  %v10737_v53 = vpop.f32.mrb[119].mxu0  ;;  %v11001_v63 = vadd.f32 %v12452_v62, %v11000_v12 }
 0x7c1   :  { %11099 = vst [vmem:[%s19537_s3 + $0x1b8] sm:$0xff] %v11009_v54 }
 0x7c2   :  { %11097 = vst [vmem:[%s19537_s3 + $0x1a8] sm:$0xff] %v11001_v63 }
 0x7c4   :  { %v12307_v33 = vpop.f32.mrb[184].mxu1 }
 0x7c5   :  { %v10740_v8 = vpop.f32.mrb[120].mxu0  ;;  %v11022_v34 = vadd.f32 %v12462_v2, %v12307_v33  ;;  %v11013_v11 = vpop.f32.mrb[185].mxu1 }
 0x7c6   :  { %v12466_v17 = vadd.f32 %v12465_v44, %v10740_v8  ;;  %v10742_v62 = vpop.f32.mrb[121].mxu0  ;;  %v11014_v18 = vadd.f32 %v12458_v40, %v11013_v11  ;;  %v12308_v56 = vpop.f32.mrb[186].mxu1 }
 0x7c7   :  { %11102 = vst [vmem:[%s19537_s3 + $0x1d0] sm:$0xff] %v11022_v34  ;;  %v10743_v28 = vpop.f32.mrb[122].mxu0  ;;  %v11025_v61 = vadd.f32 %v12464_v13, %v12308_v56  ;;  %v11016_v7 = vpop.f32.mrb[187].mxu1 }
 0x7c8   :  { %11100 = vst [vmem:[%s19537_s3 + $0x1c0] sm:$0xff] %v11014_v18  ;;  %v12468_v24 = vadd.f32 %v12467_v37, %v10743_v28  ;;  %v10745_v57 = vpop.f32.mrb[123].mxu0  ;;  %v11017_v39 = vadd.f32 %v12460_v30, %v11016_v7 }
 0x7c9   :  { %11103 = vst [vmem:[%s19537_s3 + $0x1d8] sm:$0xff] %v11025_v61 }
 0x7ca   :  { %11101 = vst [vmem:[%s19537_s3 + $0x1c8] sm:$0xff] %v11017_v39 }
 0x7cc   :  { %v12311_v20 = vpop.f32.mrb[188].mxu1 }
 0x7cd   :  { %v10748_v0 = vpop.f32.mrb[124].mxu0  ;;  %v11029_v60 = vpop.f32.mrb[189].mxu1 }
 0x7ce   :  { %v12470_v41 = vadd.f32 %v12469_v43, %v10748_v0  ;;  %v10750_v22 = vpop.f32.mrb[125].mxu0  ;;  %v11030_v42 = vadd.f32 %v12466_v17, %v11029_v60  ;;  %v12312_v55 = vpop.f32.mrb[190].mxu1 }
 0x7cf   :  { %v10751_v27 = vpop.f32.mrb[126].mxu0  ;;  %v11032_v25 = vpop.f32.mrb[191].mxu1 }
 0x7d0   :  { %v11038_v52 = vadd.f32 %v12470_v41, %v12311_v20  ;;  %11104 = vst [vmem:[%s19537_s3 + $0x1e0] sm:$0xff] %v11030_v42  ;;  %v12472_v3 = vadd.f32 %v12471_v26, %v10751_v27  ;;  %v10753_v1 = vpop.f32.mrb[127].mxu0  ;;  %v11033_v31 = vadd.f32 %v12468_v24, %v11032_v25 }
 0x7d2   :  { %11106 = vst [vmem:[%s19537_s3 + $0x1f0] sm:$0xff] %v11038_v52  ;;  %v11041_v40 = vadd.f32 %v12472_v3, %v12312_v55  ;;  %11105 = vst [vmem:[%s19537_s3 + $0x1e8] sm:$0xff] %v11033_v31 }
 0x7d4   :  { %11107 = vst [vmem:[%s19537_s3 + $0x1f8] sm:$0xff] %v11041_v40 }

</bundles_post_ra>
